<compile_context>
chip_gen: v7x
topology: tpu7x:2x2x1
jax: 0.10.0
libtpu: 0.0.40
codegen_flags: <defaults>
</compile_context>

<pallas_src>
import functools

import numpy as np
import jax
import jax.numpy as jnp
from jax.experimental import pallas as pl
from jax.experimental.pallas import tpu as pltpu

_VMEM_LIMIT = 32 * 1024 * 1024     # explicit scoped-VMEM budget (fits v5e/v6e/v7x)
_LANE = 128


def _round_up(x, m):
    return ((x + m - 1) // m) * m


# ----------------------------------------------------------------------------
# Trace-time (numpy) 0/1 selection matrices.
#
# Conv outputs are flattened (L, C) values with row stride ws (= the padded
# width of that conv's input); valid output (oh, ow) sits at flat index
# oh*ws + ow.  After the shifted-slice maxes of a 3x3/s2 maxpool, the pooled
# value for (po, pw) sits at flat index 2*po*ws + 2*pw.  A constant 0/1 matrix
# then subsamples those positions and scatters them into the next stage's
# zero-padded flat grid in one small MXU matmul (zero rows == conv zero-pad).
# ----------------------------------------------------------------------------
def _pool_to_pad_matrix(ho, wo, ws, pad_next):
    qh, qw = (ho - 3) // 2 + 1, (wo - 3) // 2 + 1
    hm_len = (ho - 3) * ws + wo - 2
    hn, wn = qh + 2 * pad_next, qw + 2 * pad_next
    t = np.zeros((hn * wn, hm_len), np.float32)
    for i in range(qh):
        for j in range(qw):
            t[(pad_next + i) * wn + (pad_next + j), 2 * i * ws + 2 * j] = 1.0
    return t, (qh, qw)


def _pad_matrix(ho, wo, ws, pad_next):
    length = (ho - 1) * ws + wo
    hn, wn = ho + 2 * pad_next, wo + 2 * pad_next
    t = np.zeros((hn * wn, length), np.float32)
    for i in range(ho):
        for j in range(wo):
            t[(pad_next + i) * wn + (pad_next + j), i * ws + j] = 1.0
    return t


def _pool_to_dense_matrix(ho, wo, ws):
    qh, qw = (ho - 3) // 2 + 1, (wo - 3) // 2 + 1
    hm_len = (ho - 3) * ws + wo - 2
    t = np.zeros((qh * qw, hm_len), np.float32)
    for i in range(qh):
        for j in range(qw):
            t[i * qw + j, 2 * i * ws + 2 * j] = 1.0
    return t, (qh, qw)


# ----------------------------------------------------------------------------
# In-kernel helpers (value-level, fully static shapes, unrolled).
# ----------------------------------------------------------------------------
def _pool3x3s2_hmax(y, row_stride):
    """3x3 window max of a flattened (L, C) map; the pooled (po, pw) value ends
    up at flat index 2*po*row_stride + 2*pw of the returned array."""
    n = y.shape[0]
    wm = jnp.maximum(jnp.maximum(y[0:n - 2], y[1:n - 1]), y[2:n])
    m = wm.shape[0] - 2 * row_stride
    return jnp.maximum(
        jnp.maximum(wm[0:m], wm[row_stride:row_stride + m]),
        wm[2 * row_stride:2 * row_stride + m])


def _conv_relu_flat(p, w_ref, b_ref, kh, kw, wp, ho, wo):
    """Stride-1 conv + bias + relu on a zero-padded flat activation.

    p: (hp*wp, cin) bf16 with row stride wp.  One MXU matmul per tap with
    M = (ho-1)*wp + wo; flat positions whose column is >= wo are don't-care and
    are never selected downstream."""
    length = (ho - 1) * wp + wo
    acc = None
    for di in range(kh):
        for dj in range(kw):
            s = di * wp + dj
            part = jnp.dot(p[s:s + length], w_ref[di * kw + dj],
                           preferred_element_type=jnp.float32)
            acc = part if acc is None else acc + part
    return jnp.maximum(acc + b_ref[...], 0.0)


# ----------------------------------------------------------------------------
# Kernel 1: the whole AlexNet `features` stack, one image per grid step.
# ----------------------------------------------------------------------------
def _features_kernel(cols_ref, w0_ref, b0_ref, t1_ref, w1_ref, b1_ref,
                     t2_ref, w2_ref, b2_ref, t3_ref, w3_ref, b3_ref,
                     w4_ref, b4_ref, s2_ref, out_ref, *, conv0_out_w, q0, q1):
    q0h, q0w = q0
    q1h, q1w = q1
    bf16 = jnp.bfloat16

    # conv0 (11x11/s4 via im2col done in the wrapper) + bias + relu.
    y0 = jnp.dot(cols_ref[...], w0_ref[...], preferred_element_type=jnp.float32)
    y0 = jnp.maximum(y0 + b0_ref[...], 0.0)

    # maxpool0 (3,2) + zero-pad(2) scatter for conv1 (selection matmul).
    h0 = _pool3x3s2_hmax(y0, conv0_out_w).astype(bf16)
    p1 = jnp.dot(t1_ref[...], h0, preferred_element_type=jnp.float32).astype(bf16)

    # conv1 (5x5/s1) + relu.
    a1 = _conv_relu_flat(p1, w1_ref, b1_ref, 5, 5, q0w + 4, q0h, q0w)

    # maxpool1 (3,2) + zero-pad(1) scatter for conv2.
    h1 = _pool3x3s2_hmax(a1, q0w + 4).astype(bf16)
    p2 = jnp.dot(t2_ref[...], h1, preferred_element_type=jnp.float32).astype(bf16)

    # conv2 / conv3 / conv4 (3x3/s1) + relu, re-padding between them.
    a2 = _conv_relu_flat(p2, w2_ref, b2_ref, 3, 3, q1w + 2, q1h, q1w)
    p3 = jnp.dot(t3_ref[...], a2.astype(bf16),
                 preferred_element_type=jnp.float32).astype(bf16)
    a3 = _conv_relu_flat(p3, w3_ref, b3_ref, 3, 3, q1w + 2, q1h, q1w)
    p4 = jnp.dot(t3_ref[...], a3.astype(bf16),
                 preferred_element_type=jnp.float32).astype(bf16)
    a4 = _conv_relu_flat(p4, w4_ref, b4_ref, 3, 3, q1w + 2, q1h, q1w)

    # final maxpool (3,2) -> dense (q2h*q2w, cout) features; single store.
    h4 = _pool3x3s2_hmax(a4, q1w + 2)
    if s2_ref.shape == (1, 1):               # common case: 3x3 -> 1x1
        out_ref[...] = h4
    else:
        out_ref[...] = jnp.dot(s2_ref[...], h4,
                               preferred_element_type=jnp.float32)


def alexnet_features(params, x_nhwc):
    """x_nhwc (N,H,W,3) -> flattened pooled features (N, q2h*q2w, 256) f32."""
    N, H, W, C = x_nhwc.shape
    KH = KW = 11
    stride, pad = 4, 2
    H0 = (H + 2 * pad - KH) // stride + 1
    W0 = (W + 2 * pad - KW) // stride + 1

    # conv0 im2col glue; K padded 363 -> 384 for lane alignment.
    # TODO(synk): drive the patch extraction from a BlockSpec index_map instead
    # of materializing im2col in HBM.
    xp = jnp.pad(x_nhwc.astype(jnp.bfloat16),
                 ((0, 0), (pad, pad), (pad, pad), (0, 0)))
    patches = []
    for i in range(KH):
        for j in range(KW):
            patches.append(xp[:, i:i + stride * (H0 - 1) + 1:stride,
                              j:j + stride * (W0 - 1) + 1:stride, :])
    k_raw = KH * KW * C
    k_pad = _round_up(k_raw, _LANE)
    cols = jnp.stack(patches, axis=3).reshape(N, H0 * W0, k_raw)
    cols = jnp.pad(cols, ((0, 0), (0, 0), (0, k_pad - k_raw)))

    # Weights: zero-pad channel dims to lane multiples (results unchanged).
    co0 = params["conv0_w"].shape[0]
    c0p = _round_up(co0, _LANE)                          # 64 -> 128
    w0 = jnp.pad(params["conv0_w"], ((0, c0p - co0), (0, 0), (0, 0), (0, 0)))
    w0 = jnp.transpose(w0, (2, 3, 1, 0)).reshape(k_raw, c0p)
    w0 = jnp.pad(w0, ((0, k_pad - k_raw), (0, 0))).astype(jnp.bfloat16)
    b0 = jnp.pad(params["conv0_b"], (0, c0p - co0)).reshape(1, c0p).astype(jnp.float32)

    co1 = params["conv1_w"].shape[0]
    c1p = _round_up(co1, _LANE)                          # 192 -> 256
    w1 = jnp.pad(params["conv1_w"], ((0, c1p - co1), (0, c0p - co0), (0, 0), (0, 0)))
    w1 = jnp.transpose(w1, (2, 3, 1, 0)).reshape(25, c0p, c1p).astype(jnp.bfloat16)
    b1 = jnp.pad(params["conv1_b"], (0, c1p - co1)).reshape(1, c1p).astype(jnp.float32)

    co2 = params["conv2_w"].shape[0]                     # 384
    w2 = jnp.pad(params["conv2_w"], ((0, 0), (0, c1p - co1), (0, 0), (0, 0)))
    w2 = jnp.transpose(w2, (2, 3, 1, 0)).reshape(9, c1p, co2).astype(jnp.bfloat16)
    b2 = params["conv2_b"].reshape(1, co2).astype(jnp.float32)

    co3 = params["conv3_w"].shape[0]                     # 256
    w3 = jnp.transpose(params["conv3_w"], (2, 3, 1, 0)).reshape(9, co2, co3).astype(jnp.bfloat16)
    b3 = params["conv3_b"].reshape(1, co3).astype(jnp.float32)

    co4 = params["conv4_w"].shape[0]                     # 256
    w4 = jnp.transpose(params["conv4_w"], (2, 3, 1, 0)).reshape(9, co3, co4).astype(jnp.bfloat16)
    b4 = params["conv4_b"].reshape(1, co4).astype(jnp.float32)

    # Pool-subsample / zero-pad scatter matrices (trace-time constants).
    t1_np, (q0h, q0w) = _pool_to_pad_matrix(H0, W0, W0, pad_next=2)
    t2_np, (q1h, q1w) = _pool_to_pad_matrix(q0h, q0w, q0w + 4, pad_next=1)
    t3_np = _pad_matrix(q1h, q1w, q1w + 2, pad_next=1)
    s2_np, (q2h, q2w) = _pool_to_dense_matrix(q1h, q1w, q1w + 2)
    assert t1_np.shape[1] == H0 * W0 - 2 * W0 - 2
    t1 = jnp.asarray(t1_np, jnp.bfloat16)
    t2 = jnp.asarray(t2_np, jnp.bfloat16)
    t3 = jnp.asarray(t3_np, jnp.bfloat16)
    s2 = jnp.asarray(s2_np, jnp.float32)

    kernel = functools.partial(_features_kernel, conv0_out_w=W0,
                               q0=(q0h, q0w), q1=(q1h, q1w))
    feats = pl.pallas_call(
        kernel,
        out_shape=jax.ShapeDtypeStruct((N, q2h * q2w, co4), jnp.float32),
        grid=(N,),
        in_specs=[
            pl.BlockSpec((None, H0 * W0, k_pad), lambda n: (n, 0, 0)),
            pl.BlockSpec((k_pad, c0p), lambda n: (0, 0)),
            pl.BlockSpec((1, c0p), lambda n: (0, 0)),
            pl.BlockSpec(t1.shape, lambda n: (0, 0)),
            pl.BlockSpec((25, c0p, c1p), lambda n: (0, 0, 0)),
            pl.BlockSpec((1, c1p), lambda n: (0, 0)),
            pl.BlockSpec(t2.shape, lambda n: (0, 0)),
            pl.BlockSpec((9, c1p, co2), lambda n: (0, 0, 0)),
            pl.BlockSpec((1, co2), lambda n: (0, 0)),
            pl.BlockSpec(t3.shape, lambda n: (0, 0)),
            pl.BlockSpec((9, co2, co3), lambda n: (0, 0, 0)),
            pl.BlockSpec((1, co3), lambda n: (0, 0)),
            pl.BlockSpec((9, co3, co4), lambda n: (0, 0, 0)),
            pl.BlockSpec((1, co4), lambda n: (0, 0)),
            pl.BlockSpec(s2.shape, lambda n: (0, 0)),
        ],
        out_specs=pl.BlockSpec((None, q2h * q2w, co4), lambda n: (n, 0, 0)),
        compiler_params=pltpu.CompilerParams(
            dimension_semantics=("parallel",),      # megacore on v7x, N>=2
            vmem_limit_bytes=_VMEM_LIMIT),
    )(cols, w0, b0, t1, w1, b1, t2, w2, b2, t3, w3, b3, w4, b4, s2)
    return feats, (q2h, q2w, co4)


# ----------------------------------------------------------------------------
# Kernel 2: Linear + sigmoid as a VPU row reduction (N=1 MXU matmul would waste
# 127/255 lanes and force masked stores).  Sigmoid via tanh (no inf).
# ----------------------------------------------------------------------------
def _fc_sigmoid_kernel(x_ref, w_ref, b_ref, o_ref):
    logits = jnp.sum(x_ref[...] * w_ref[...], axis=-1, keepdims=True) + b_ref[...]
    o_ref[...] = 0.5 * (jnp.tanh(0.5 * logits) + 1.0)       # == sigmoid, stable


def fc_sigmoid(x, w, b):
    M, K = x.shape
    assert w.shape[-1] == K
    return pl.pallas_call(
        _fc_sigmoid_kernel,
        out_shape=jax.ShapeDtypeStruct((M, 1), jnp.float32),
    )(x.astype(jnp.float32), w.reshape(1, K).astype(jnp.float32),
      b.reshape(1, 1).astype(jnp.float32))


# ----------------------------------------------------------------------------
# AdaptiveAvgPool2d((6,6)) semantics on NHWC (tiny; plain-JAX glue), only used
# on the general path (pooled map larger than 1x1).
# ----------------------------------------------------------------------------
def adaptive_avg_pool_nhwc(x, out_h, out_w):
    N, H, W, C = x.shape
    x = x.astype(jnp.float32)
    if H == 1 and W == 1:
        return jnp.broadcast_to(x, (N, out_h, out_w, C))
    rows = []
    for oi in range(out_h):
        h0 = (oi * H) // out_h
        h1 = -(-((oi + 1) * H) // out_h)
        cols = []
        for oj in range(out_w):
            w0 = (oj * W) // out_w
            w1 = -(-((oj + 1) * W) // out_w)
            cols.append(jnp.mean(x[:, h0:h1, w0:w1, :], axis=(1, 2)))
        rows.append(jnp.stack(cols, axis=1))
    return jnp.stack(rows, axis=1)


# ----------------------------------------------------------------------------
# AlexNet forward
# ----------------------------------------------------------------------------
# torchvision AlexNet conv configs: (Cout, Cin, K, stride, pad)
_CONV_CFGS = [
    (64, 3, 11, 4, 2),
    (192, 64, 5, 1, 2),
    (384, 192, 3, 1, 1),
    (256, 384, 3, 1, 1),
    (256, 256, 3, 1, 1),
]


def init_params(key):
    # TODO(synk): pretrained AlexNet_Weights.DEFAULT not available in-script;
    # deterministic random init with matching shapes instead.
    params = {}
    for idx, (co, ci, k, _, _) in enumerate(_CONV_CFGS):
        key, kw_, kb_ = jax.random.split(key, 3)
        fan_in = ci * k * k
        params[f"conv{idx}_w"] = (
            jax.random.normal(kw_, (co, ci, k, k), jnp.float32)
            * (1.0 / jnp.sqrt(fan_in)))
        params[f"conv{idx}_b"] = (
            jax.random.normal(kb_, (co,), jnp.float32) * 0.01)
    key, kfw, kfb = jax.random.split(key, 3)
    params["fc_w"] = (jax.random.normal(kfw, (1, 9216), jnp.float32)
                      * (1.0 / jnp.sqrt(9216.0)))
    params["fc_b"] = jax.random.normal(kfb, (1,), jnp.float32) * 0.01
    return params


def alexnet_forward(params, x_nchw):
    # NCHW (PyTorch input convention) -> NHWC so channels are lane-dense.
    x = jnp.transpose(x_nchw, (0, 2, 3, 1))
    feats, (q2h, q2w, cf) = alexnet_features(params, x)      # (N, q2h*q2w, 256)
    n = feats.shape[0]

    if q2h == 1 and q2w == 1:
        # AdaptiveAvgPool2d((6,6)) of a 1x1 map replicates the 256-vector 36x in
        # NCHW flatten order; fold that replication into the FC weights.
        w_eff = params["fc_w"].reshape(1, cf, 36).sum(axis=-1)   # (1, 256)
        return fc_sigmoid(feats.reshape(n, cf), w_eff, params["fc_b"])

    # General path: adaptive avg pool to 6x6 + full 9216-wide FC.
    fmap = feats.reshape(n, q2h, q2w, cf)
    pooled = adaptive_avg_pool_nhwc(fmap, 6, 6)               # (N,6,6,256) f32
    flat = jnp.transpose(pooled, (0, 3, 1, 2)).reshape(n, -1)  # NCHW flatten
    return fc_sigmoid(flat, params["fc_w"], params["fc_b"])


if __name__ == "__main__":
    key = jax.random.PRNGKey(0)
    kp, kx = jax.random.split(key)
    params = init_params(kp)

    # Small input consistent with the module: batch=2, 3 channels, 64x64.
    x = jax.random.normal(kx, (2, 3, 64, 64), jnp.float32)

    fwd = jax.jit(alexnet_forward)
    y = jax.block_until_ready(fwd(params, x))

    assert y.shape == (2, 1), y.shape
    assert bool(jnp.all(jnp.isfinite(y)))
    assert bool(jnp.all((y >= 0.0) & (y <= 1.0)))  # sigmoid range
    print("KERNEL_OK")
</pallas_src>

<mosaic_0001>
module attributes {stable_mosaic.version = 11 : i64} {
  func.func @_features_kernel(%arg0: i32, %arg1: memref<1x225x384xbf16, #tpu.memory_space<vmem>>, %arg2: memref<384x128xbf16, #tpu.memory_space<vmem>>, %arg3: memref<1x128xf32, #tpu.memory_space<vmem>>, %arg4: memref<121x193xbf16, #tpu.memory_space<vmem>>, %arg5: memref<25x128x256xbf16, #tpu.memory_space<vmem>>, %arg6: memref<1x256xf32, #tpu.memory_space<vmem>>, %arg7: memref<25x49xbf16, #tpu.memory_space<vmem>>, %arg8: memref<9x256x384xbf16, #tpu.memory_space<vmem>>, %arg9: memref<1x384xf32, #tpu.memory_space<vmem>>, %arg10: memref<25x13xbf16, #tpu.memory_space<vmem>>, %arg11: memref<9x384x256xbf16, #tpu.memory_space<vmem>>, %arg12: memref<1x256xf32, #tpu.memory_space<vmem>>, %arg13: memref<9x256x256xbf16, #tpu.memory_space<vmem>>, %arg14: memref<1x256xf32, #tpu.memory_space<vmem>>, %arg15: memref<1x1xf32, #tpu.memory_space<vmem>>, %arg16: memref<1x1x256xf32, #tpu.memory_space<vmem>>) attributes {dimension_semantics = [#tpu.dimension_semantics<parallel>], iteration_bounds = array<i64: 2>, scalar_prefetch = 0 : i64, scratch_operands = 0 : i64, tpu.core_type = #tpu.core_type<tc>, window_params = [{transform_indices = @transform_0, window_bounds = array<i64: 1, 225, 384>}, {pipeline_mode = #tpu.pipeline_mode<synchronous>, transform_indices = @transform_1, window_bounds = array<i64: 384, 128>}, {pipeline_mode = #tpu.pipeline_mode<synchronous>, transform_indices = @transform_2, window_bounds = array<i64: 1, 128>}, {pipeline_mode = #tpu.pipeline_mode<synchronous>, transform_indices = @transform_3, window_bounds = array<i64: 121, 193>}, {pipeline_mode = #tpu.pipeline_mode<synchronous>, transform_indices = @transform_4, window_bounds = array<i64: 25, 128, 256>}, {pipeline_mode = #tpu.pipeline_mode<synchronous>, transform_indices = @transform_5, window_bounds = array<i64: 1, 256>}, {pipeline_mode = #tpu.pipeline_mode<synchronous>, transform_indices = @transform_6, window_bounds = array<i64: 25, 49>}, {pipeline_mode = #tpu.pipeline_mode<synchronous>, transform_indices = @transform_7, window_bounds = array<i64: 9, 256, 384>}, {pipeline_mode = #tpu.pipeline_mode<synchronous>, transform_indices = @transform_8, window_bounds = array<i64: 1, 384>}, {pipeline_mode = #tpu.pipeline_mode<synchronous>, transform_indices = @transform_9, window_bounds = array<i64: 25, 13>}, {pipeline_mode = #tpu.pipeline_mode<synchronous>, transform_indices = @transform_10, window_bounds = array<i64: 9, 384, 256>}, {pipeline_mode = #tpu.pipeline_mode<synchronous>, transform_indices = @transform_11, window_bounds = array<i64: 1, 256>}, {pipeline_mode = #tpu.pipeline_mode<synchronous>, transform_indices = @transform_12, window_bounds = array<i64: 9, 256, 256>}, {pipeline_mode = #tpu.pipeline_mode<synchronous>, transform_indices = @transform_13, window_bounds = array<i64: 1, 256>}, {pipeline_mode = #tpu.pipeline_mode<synchronous>, transform_indices = @transform_14, window_bounds = array<i64: 1, 1>}, {transform_indices = @transform_15, window_bounds = array<i64: 1, 1, 256>}]} {
    %c0 = arith.constant 0 : index
    %c0_0 = arith.constant 0 : index
    %c0_1 = arith.constant 0 : index
    %0 = vector.load %arg1[%c0, %c0_0, %c0_1] : memref<1x225x384xbf16, #tpu.memory_space<vmem>>, vector<1x225x384xbf16>
    %1 = vector.shape_cast %0 : vector<1x225x384xbf16> to vector<225x384xbf16>
    %c0_2 = arith.constant 0 : index
    %c0_3 = arith.constant 0 : index
    %2 = vector.load %arg2[%c0_2, %c0_3] : memref<384x128xbf16, #tpu.memory_space<vmem>>, vector<384x128xbf16>
    %cst = arith.constant dense<0.000000e+00> : vector<225x128xf32>
    %3 = tpu.matmul %1, %2, %cst {dimension_numbers = #tpu.dot_dimension_numbers<[1], [0], [0], [1], [0, 0, 1, 1], [], []>} : vector<225x384xbf16>, vector<384x128xbf16>, vector<225x128xf32> -> vector<225x128xf32>
    %c0_4 = arith.constant 0 : index
    %c0_5 = arith.constant 0 : index
    %4 = vector.load %arg3[%c0_4, %c0_5] : memref<1x128xf32, #tpu.memory_space<vmem>>, vector<1x128xf32>
    %5 = vector.broadcast %4 : vector<1x128xf32> to vector<225x128xf32>
    %6 = arith.addf %3, %5 : vector<225x128xf32>
    %cst_6 = arith.constant 0.000000e+00 : f32
    %7 = vector.broadcast %cst_6 : f32 to vector<225x128xf32>
    %8 = arith.maximumf %6, %7 : vector<225x128xf32>
    %9 = vector.extract_strided_slice %8 {offsets = [0, 0], sizes = [223, 128], strides = [1, 1]} : vector<225x128xf32> to vector<223x128xf32>
    %10 = vector.extract_strided_slice %8 {offsets = [1, 0], sizes = [223, 128], strides = [1, 1]} : vector<225x128xf32> to vector<223x128xf32>
    %11 = arith.maximumf %9, %10 : vector<223x128xf32>
    %12 = vector.extract_strided_slice %8 {offsets = [2, 0], sizes = [223, 128], strides = [1, 1]} : vector<225x128xf32> to vector<223x128xf32>
    %13 = arith.maximumf %11, %12 : vector<223x128xf32>
    %14 = vector.extract_strided_slice %13 {offsets = [0, 0], sizes = [193, 128], strides = [1, 1]} : vector<223x128xf32> to vector<193x128xf32>
    %15 = vector.extract_strided_slice %13 {offsets = [15, 0], sizes = [193, 128], strides = [1, 1]} : vector<223x128xf32> to vector<193x128xf32>
    %16 = arith.maximumf %14, %15 : vector<193x128xf32>
    %17 = vector.extract_strided_slice %13 {offsets = [30, 0], sizes = [193, 128], strides = [1, 1]} : vector<223x128xf32> to vector<193x128xf32>
    %18 = arith.maximumf %16, %17 : vector<193x128xf32>
    %19 = arith.truncf %18 : vector<193x128xf32> to vector<193x128xbf16>
    %c0_7 = arith.constant 0 : index
    %c0_8 = arith.constant 0 : index
    %20 = vector.load %arg4[%c0_7, %c0_8] : memref<121x193xbf16, #tpu.memory_space<vmem>>, vector<121x193xbf16>
    %cst_9 = arith.constant dense<0.000000e+00> : vector<121x128xf32>
    %21 = tpu.matmul %20, %19, %cst_9 {dimension_numbers = #tpu.dot_dimension_numbers<[1], [0], [0], [1], [0, 0, 1, 1], [], []>} : vector<121x193xbf16>, vector<193x128xbf16>, vector<121x128xf32> -> vector<121x128xf32>
    %22 = arith.truncf %21 : vector<121x128xf32> to vector<121x128xbf16>
    %23 = vector.extract_strided_slice %22 {offsets = [0, 0], sizes = [73, 128], strides = [1, 1]} : vector<121x128xbf16> to vector<73x128xbf16>
    %c0_10 = arith.constant 0 : index
    %c0_11 = arith.constant 0 : index
    %c0_12 = arith.constant 0 : index
    %24 = vector.load %arg5[%c0_10, %c0_11, %c0_12] : memref<25x128x256xbf16, #tpu.memory_space<vmem>>, vector<1x128x256xbf16>
    %25 = vector.shape_cast %24 : vector<1x128x256xbf16> to vector<128x256xbf16>
    %cst_13 = arith.constant dense<0.000000e+00> : vector<73x256xf32>
    %26 = tpu.matmul %23, %25, %cst_13 {dimension_numbers = #tpu.dot_dimension_numbers<[1], [0], [0], [1], [0, 0, 1, 1], [], []>} : vector<73x128xbf16>, vector<128x256xbf16>, vector<73x256xf32> -> vector<73x256xf32>
    %27 = vector.extract_strided_slice %22 {offsets = [1, 0], sizes = [73, 128], strides = [1, 1]} : vector<121x128xbf16> to vector<73x128xbf16>
    %c1 = arith.constant 1 : index
    %c0_14 = arith.constant 0 : index
    %c0_15 = arith.constant 0 : index
    %28 = vector.load %arg5[%c1, %c0_14, %c0_15] : memref<25x128x256xbf16, #tpu.memory_space<vmem>>, vector<1x128x256xbf16>
    %29 = vector.shape_cast %28 : vector<1x128x256xbf16> to vector<128x256xbf16>
    %cst_16 = arith.constant dense<0.000000e+00> : vector<73x256xf32>
    %30 = tpu.matmul %27, %29, %cst_16 {dimension_numbers = #tpu.dot_dimension_numbers<[1], [0], [0], [1], [0, 0, 1, 1], [], []>} : vector<73x128xbf16>, vector<128x256xbf16>, vector<73x256xf32> -> vector<73x256xf32>
    %31 = arith.addf %26, %30 : vector<73x256xf32>
    %32 = vector.extract_strided_slice %22 {offsets = [2, 0], sizes = [73, 128], strides = [1, 1]} : vector<121x128xbf16> to vector<73x128xbf16>
    %c2 = arith.constant 2 : index
    %c0_17 = arith.constant 0 : index
    %c0_18 = arith.constant 0 : index
    %33 = vector.load %arg5[%c2, %c0_17, %c0_18] : memref<25x128x256xbf16, #tpu.memory_space<vmem>>, vector<1x128x256xbf16>
    %34 = vector.shape_cast %33 : vector<1x128x256xbf16> to vector<128x256xbf16>
    %cst_19 = arith.constant dense<0.000000e+00> : vector<73x256xf32>
    %35 = tpu.matmul %32, %34, %cst_19 {dimension_numbers = #tpu.dot_dimension_numbers<[1], [0], [0], [1], [0, 0, 1, 1], [], []>} : vector<73x128xbf16>, vector<128x256xbf16>, vector<73x256xf32> -> vector<73x256xf32>
    %36 = arith.addf %31, %35 : vector<73x256xf32>
    %37 = vector.extract_strided_slice %22 {offsets = [3, 0], sizes = [73, 128], strides = [1, 1]} : vector<121x128xbf16> to vector<73x128xbf16>
    %c3 = arith.constant 3 : index
    %c0_20 = arith.constant 0 : index
    %c0_21 = arith.constant 0 : index
    %38 = vector.load %arg5[%c3, %c0_20, %c0_21] : memref<25x128x256xbf16, #tpu.memory_space<vmem>>, vector<1x128x256xbf16>
    %39 = vector.shape_cast %38 : vector<1x128x256xbf16> to vector<128x256xbf16>
    %cst_22 = arith.constant dense<0.000000e+00> : vector<73x256xf32>
    %40 = tpu.matmul %37, %39, %cst_22 {dimension_numbers = #tpu.dot_dimension_numbers<[1], [0], [0], [1], [0, 0, 1, 1], [], []>} : vector<73x128xbf16>, vector<128x256xbf16>, vector<73x256xf32> -> vector<73x256xf32>
    %41 = arith.addf %36, %40 : vector<73x256xf32>
    %42 = vector.extract_strided_slice %22 {offsets = [4, 0], sizes = [73, 128], strides = [1, 1]} : vector<121x128xbf16> to vector<73x128xbf16>
    %c4 = arith.constant 4 : index
    %c0_23 = arith.constant 0 : index
    %c0_24 = arith.constant 0 : index
    %43 = vector.load %arg5[%c4, %c0_23, %c0_24] : memref<25x128x256xbf16, #tpu.memory_space<vmem>>, vector<1x128x256xbf16>
    %44 = vector.shape_cast %43 : vector<1x128x256xbf16> to vector<128x256xbf16>
    %cst_25 = arith.constant dense<0.000000e+00> : vector<73x256xf32>
    %45 = tpu.matmul %42, %44, %cst_25 {dimension_numbers = #tpu.dot_dimension_numbers<[1], [0], [0], [1], [0, 0, 1, 1], [], []>} : vector<73x128xbf16>, vector<128x256xbf16>, vector<73x256xf32> -> vector<73x256xf32>
    %46 = arith.addf %41, %45 : vector<73x256xf32>
    %47 = vector.extract_strided_slice %22 {offsets = [11, 0], sizes = [73, 128], strides = [1, 1]} : vector<121x128xbf16> to vector<73x128xbf16>
    %c5 = arith.constant 5 : index
    %c0_26 = arith.constant 0 : index
    %c0_27 = arith.constant 0 : index
    %48 = vector.load %arg5[%c5, %c0_26, %c0_27] : memref<25x128x256xbf16, #tpu.memory_space<vmem>>, vector<1x128x256xbf16>
    %49 = vector.shape_cast %48 : vector<1x128x256xbf16> to vector<128x256xbf16>
    %cst_28 = arith.constant dense<0.000000e+00> : vector<73x256xf32>
    %50 = tpu.matmul %47, %49, %cst_28 {dimension_numbers = #tpu.dot_dimension_numbers<[1], [0], [0], [1], [0, 0, 1, 1], [], []>} : vector<73x128xbf16>, vector<128x256xbf16>, vector<73x256xf32> -> vector<73x256xf32>
    %51 = arith.addf %46, %50 : vector<73x256xf32>
    %52 = vector.extract_strided_slice %22 {offsets = [12, 0], sizes = [73, 128], strides = [1, 1]} : vector<121x128xbf16> to vector<73x128xbf16>
    %c6 = arith.constant 6 : index
    %c0_29 = arith.constant 0 : index
    %c0_30 = arith.constant 0 : index
    %53 = vector.load %arg5[%c6, %c0_29, %c0_30] : memref<25x128x256xbf16, #tpu.memory_space<vmem>>, vector<1x128x256xbf16>
    %54 = vector.shape_cast %53 : vector<1x128x256xbf16> to vector<128x256xbf16>
    %cst_31 = arith.constant dense<0.000000e+00> : vector<73x256xf32>
    %55 = tpu.matmul %52, %54, %cst_31 {dimension_numbers = #tpu.dot_dimension_numbers<[1], [0], [0], [1], [0, 0, 1, 1], [], []>} : vector<73x128xbf16>, vector<128x256xbf16>, vector<73x256xf32> -> vector<73x256xf32>
    %56 = arith.addf %51, %55 : vector<73x256xf32>
    %57 = vector.extract_strided_slice %22 {offsets = [13, 0], sizes = [73, 128], strides = [1, 1]} : vector<121x128xbf16> to vector<73x128xbf16>
    %c7 = arith.constant 7 : index
    %c0_32 = arith.constant 0 : index
    %c0_33 = arith.constant 0 : index
    %58 = vector.load %arg5[%c7, %c0_32, %c0_33] : memref<25x128x256xbf16, #tpu.memory_space<vmem>>, vector<1x128x256xbf16>
    %59 = vector.shape_cast %58 : vector<1x128x256xbf16> to vector<128x256xbf16>
    %cst_34 = arith.constant dense<0.000000e+00> : vector<73x256xf32>
    %60 = tpu.matmul %57, %59, %cst_34 {dimension_numbers = #tpu.dot_dimension_numbers<[1], [0], [0], [1], [0, 0, 1, 1], [], []>} : vector<73x128xbf16>, vector<128x256xbf16>, vector<73x256xf32> -> vector<73x256xf32>
    %61 = arith.addf %56, %60 : vector<73x256xf32>
    %62 = vector.extract_strided_slice %22 {offsets = [14, 0], sizes = [73, 128], strides = [1, 1]} : vector<121x128xbf16> to vector<73x128xbf16>
    %c8 = arith.constant 8 : index
    %c0_35 = arith.constant 0 : index
    %c0_36 = arith.constant 0 : index
    %63 = vector.load %arg5[%c8, %c0_35, %c0_36] : memref<25x128x256xbf16, #tpu.memory_space<vmem>>, vector<1x128x256xbf16>
    %64 = vector.shape_cast %63 : vector<1x128x256xbf16> to vector<128x256xbf16>
    %cst_37 = arith.constant dense<0.000000e+00> : vector<73x256xf32>
    %65 = tpu.matmul %62, %64, %cst_37 {dimension_numbers = #tpu.dot_dimension_numbers<[1], [0], [0], [1], [0, 0, 1, 1], [], []>} : vector<73x128xbf16>, vector<128x256xbf16>, vector<73x256xf32> -> vector<73x256xf32>
    %66 = arith.addf %61, %65 : vector<73x256xf32>
    %67 = vector.extract_strided_slice %22 {offsets = [15, 0], sizes = [73, 128], strides = [1, 1]} : vector<121x128xbf16> to vector<73x128xbf16>
    %c9 = arith.constant 9 : index
    %c0_38 = arith.constant 0 : index
    %c0_39 = arith.constant 0 : index
    %68 = vector.load %arg5[%c9, %c0_38, %c0_39] : memref<25x128x256xbf16, #tpu.memory_space<vmem>>, vector<1x128x256xbf16>
    %69 = vector.shape_cast %68 : vector<1x128x256xbf16> to vector<128x256xbf16>
    %cst_40 = arith.constant dense<0.000000e+00> : vector<73x256xf32>
    %70 = tpu.matmul %67, %69, %cst_40 {dimension_numbers = #tpu.dot_dimension_numbers<[1], [0], [0], [1], [0, 0, 1, 1], [], []>} : vector<73x128xbf16>, vector<128x256xbf16>, vector<73x256xf32> -> vector<73x256xf32>
    %71 = arith.addf %66, %70 : vector<73x256xf32>
    %72 = vector.extract_strided_slice %22 {offsets = [22, 0], sizes = [73, 128], strides = [1, 1]} : vector<121x128xbf16> to vector<73x128xbf16>
    %c10 = arith.constant 10 : index
    %c0_41 = arith.constant 0 : index
    %c0_42 = arith.constant 0 : index
    %73 = vector.load %arg5[%c10, %c0_41, %c0_42] : memref<25x128x256xbf16, #tpu.memory_space<vmem>>, vector<1x128x256xbf16>
    %74 = vector.shape_cast %73 : vector<1x128x256xbf16> to vector<128x256xbf16>
    %cst_43 = arith.constant dense<0.000000e+00> : vector<73x256xf32>
    %75 = tpu.matmul %72, %74, %cst_43 {dimension_numbers = #tpu.dot_dimension_numbers<[1], [0], [0], [1], [0, 0, 1, 1], [], []>} : vector<73x128xbf16>, vector<128x256xbf16>, vector<73x256xf32> -> vector<73x256xf32>
    %76 = arith.addf %71, %75 : vector<73x256xf32>
    %77 = vector.extract_strided_slice %22 {offsets = [23, 0], sizes = [73, 128], strides = [1, 1]} : vector<121x128xbf16> to vector<73x128xbf16>
    %c11 = arith.constant 11 : index
    %c0_44 = arith.constant 0 : index
    %c0_45 = arith.constant 0 : index
    %78 = vector.load %arg5[%c11, %c0_44, %c0_45] : memref<25x128x256xbf16, #tpu.memory_space<vmem>>, vector<1x128x256xbf16>
    %79 = vector.shape_cast %78 : vector<1x128x256xbf16> to vector<128x256xbf16>
    %cst_46 = arith.constant dense<0.000000e+00> : vector<73x256xf32>
    %80 = tpu.matmul %77, %79, %cst_46 {dimension_numbers = #tpu.dot_dimension_numbers<[1], [0], [0], [1], [0, 0, 1, 1], [], []>} : vector<73x128xbf16>, vector<128x256xbf16>, vector<73x256xf32> -> vector<73x256xf32>
    %81 = arith.addf %76, %80 : vector<73x256xf32>
    %82 = vector.extract_strided_slice %22 {offsets = [24, 0], sizes = [73, 128], strides = [1, 1]} : vector<121x128xbf16> to vector<73x128xbf16>
    %c12 = arith.constant 12 : index
    %c0_47 = arith.constant 0 : index
    %c0_48 = arith.constant 0 : index
    %83 = vector.load %arg5[%c12, %c0_47, %c0_48] : memref<25x128x256xbf16, #tpu.memory_space<vmem>>, vector<1x128x256xbf16>
    %84 = vector.shape_cast %83 : vector<1x128x256xbf16> to vector<128x256xbf16>
    %cst_49 = arith.constant dense<0.000000e+00> : vector<73x256xf32>
    %85 = tpu.matmul %82, %84, %cst_49 {dimension_numbers = #tpu.dot_dimension_numbers<[1], [0], [0], [1], [0, 0, 1, 1], [], []>} : vector<73x128xbf16>, vector<128x256xbf16>, vector<73x256xf32> -> vector<73x256xf32>
    %86 = arith.addf %81, %85 : vector<73x256xf32>
    %87 = vector.extract_strided_slice %22 {offsets = [25, 0], sizes = [73, 128], strides = [1, 1]} : vector<121x128xbf16> to vector<73x128xbf16>
    %c13 = arith.constant 13 : index
    %c0_50 = arith.constant 0 : index
    %c0_51 = arith.constant 0 : index
    %88 = vector.load %arg5[%c13, %c0_50, %c0_51] : memref<25x128x256xbf16, #tpu.memory_space<vmem>>, vector<1x128x256xbf16>
    %89 = vector.shape_cast %88 : vector<1x128x256xbf16> to vector<128x256xbf16>
    %cst_52 = arith.constant dense<0.000000e+00> : vector<73x256xf32>
    %90 = tpu.matmul %87, %89, %cst_52 {dimension_numbers = #tpu.dot_dimension_numbers<[1], [0], [0], [1], [0, 0, 1, 1], [], []>} : vector<73x128xbf16>, vector<128x256xbf16>, vector<73x256xf32> -> vector<73x256xf32>
    %91 = arith.addf %86, %90 : vector<73x256xf32>
    %92 = vector.extract_strided_slice %22 {offsets = [26, 0], sizes = [73, 128], strides = [1, 1]} : vector<121x128xbf16> to vector<73x128xbf16>
    %c14 = arith.constant 14 : index
    %c0_53 = arith.constant 0 : index
    %c0_54 = arith.constant 0 : index
    %93 = vector.load %arg5[%c14, %c0_53, %c0_54] : memref<25x128x256xbf16, #tpu.memory_space<vmem>>, vector<1x128x256xbf16>
    %94 = vector.shape_cast %93 : vector<1x128x256xbf16> to vector<128x256xbf16>
    %cst_55 = arith.constant dense<0.000000e+00> : vector<73x256xf32>
    %95 = tpu.matmul %92, %94, %cst_55 {dimension_numbers = #tpu.dot_dimension_numbers<[1], [0], [0], [1], [0, 0, 1, 1], [], []>} : vector<73x128xbf16>, vector<128x256xbf16>, vector<73x256xf32> -> vector<73x256xf32>
    %96 = arith.addf %91, %95 : vector<73x256xf32>
    %97 = vector.extract_strided_slice %22 {offsets = [33, 0], sizes = [73, 128], strides = [1, 1]} : vector<121x128xbf16> to vector<73x128xbf16>
    %c15 = arith.constant 15 : index
    %c0_56 = arith.constant 0 : index
    %c0_57 = arith.constant 0 : index
    %98 = vector.load %arg5[%c15, %c0_56, %c0_57] : memref<25x128x256xbf16, #tpu.memory_space<vmem>>, vector<1x128x256xbf16>
    %99 = vector.shape_cast %98 : vector<1x128x256xbf16> to vector<128x256xbf16>
    %cst_58 = arith.constant dense<0.000000e+00> : vector<73x256xf32>
    %100 = tpu.matmul %97, %99, %cst_58 {dimension_numbers = #tpu.dot_dimension_numbers<[1], [0], [0], [1], [0, 0, 1, 1], [], []>} : vector<73x128xbf16>, vector<128x256xbf16>, vector<73x256xf32> -> vector<73x256xf32>
    %101 = arith.addf %96, %100 : vector<73x256xf32>
    %102 = vector.extract_strided_slice %22 {offsets = [34, 0], sizes = [73, 128], strides = [1, 1]} : vector<121x128xbf16> to vector<73x128xbf16>
    %c16 = arith.constant 16 : index
    %c0_59 = arith.constant 0 : index
    %c0_60 = arith.constant 0 : index
    %103 = vector.load %arg5[%c16, %c0_59, %c0_60] : memref<25x128x256xbf16, #tpu.memory_space<vmem>>, vector<1x128x256xbf16>
    %104 = vector.shape_cast %103 : vector<1x128x256xbf16> to vector<128x256xbf16>
    %cst_61 = arith.constant dense<0.000000e+00> : vector<73x256xf32>
    %105 = tpu.matmul %102, %104, %cst_61 {dimension_numbers = #tpu.dot_dimension_numbers<[1], [0], [0], [1], [0, 0, 1, 1], [], []>} : vector<73x128xbf16>, vector<128x256xbf16>, vector<73x256xf32> -> vector<73x256xf32>
    %106 = arith.addf %101, %105 : vector<73x256xf32>
    %107 = vector.extract_strided_slice %22 {offsets = [35, 0], sizes = [73, 128], strides = [1, 1]} : vector<121x128xbf16> to vector<73x128xbf16>
    %c17 = arith.constant 17 : index
    %c0_62 = arith.constant 0 : index
    %c0_63 = arith.constant 0 : index
    %108 = vector.load %arg5[%c17, %c0_62, %c0_63] : memref<25x128x256xbf16, #tpu.memory_space<vmem>>, vector<1x128x256xbf16>
    %109 = vector.shape_cast %108 : vector<1x128x256xbf16> to vector<128x256xbf16>
    %cst_64 = arith.constant dense<0.000000e+00> : vector<73x256xf32>
    %110 = tpu.matmul %107, %109, %cst_64 {dimension_numbers = #tpu.dot_dimension_numbers<[1], [0], [0], [1], [0, 0, 1, 1], [], []>} : vector<73x128xbf16>, vector<128x256xbf16>, vector<73x256xf32> -> vector<73x256xf32>
    %111 = arith.addf %106, %110 : vector<73x256xf32>
    %112 = vector.extract_strided_slice %22 {offsets = [36, 0], sizes = [73, 128], strides = [1, 1]} : vector<121x128xbf16> to vector<73x128xbf16>
    %c18 = arith.constant 18 : index
    %c0_65 = arith.constant 0 : index
    %c0_66 = arith.constant 0 : index
    %113 = vector.load %arg5[%c18, %c0_65, %c0_66] : memref<25x128x256xbf16, #tpu.memory_space<vmem>>, vector<1x128x256xbf16>
    %114 = vector.shape_cast %113 : vector<1x128x256xbf16> to vector<128x256xbf16>
    %cst_67 = arith.constant dense<0.000000e+00> : vector<73x256xf32>
    %115 = tpu.matmul %112, %114, %cst_67 {dimension_numbers = #tpu.dot_dimension_numbers<[1], [0], [0], [1], [0, 0, 1, 1], [], []>} : vector<73x128xbf16>, vector<128x256xbf16>, vector<73x256xf32> -> vector<73x256xf32>
    %116 = arith.addf %111, %115 : vector<73x256xf32>
    %117 = vector.extract_strided_slice %22 {offsets = [37, 0], sizes = [73, 128], strides = [1, 1]} : vector<121x128xbf16> to vector<73x128xbf16>
    %c19 = arith.constant 19 : index
    %c0_68 = arith.constant 0 : index
    %c0_69 = arith.constant 0 : index
    %118 = vector.load %arg5[%c19, %c0_68, %c0_69] : memref<25x128x256xbf16, #tpu.memory_space<vmem>>, vector<1x128x256xbf16>
    %119 = vector.shape_cast %118 : vector<1x128x256xbf16> to vector<128x256xbf16>
    %cst_70 = arith.constant dense<0.000000e+00> : vector<73x256xf32>
    %120 = tpu.matmul %117, %119, %cst_70 {dimension_numbers = #tpu.dot_dimension_numbers<[1], [0], [0], [1], [0, 0, 1, 1], [], []>} : vector<73x128xbf16>, vector<128x256xbf16>, vector<73x256xf32> -> vector<73x256xf32>
    %121 = arith.addf %116, %120 : vector<73x256xf32>
    %122 = vector.extract_strided_slice %22 {offsets = [44, 0], sizes = [73, 128], strides = [1, 1]} : vector<121x128xbf16> to vector<73x128xbf16>
    %c20 = arith.constant 20 : index
    %c0_71 = arith.constant 0 : index
    %c0_72 = arith.constant 0 : index
    %123 = vector.load %arg5[%c20, %c0_71, %c0_72] : memref<25x128x256xbf16, #tpu.memory_space<vmem>>, vector<1x128x256xbf16>
    %124 = vector.shape_cast %123 : vector<1x128x256xbf16> to vector<128x256xbf16>
    %cst_73 = arith.constant dense<0.000000e+00> : vector<73x256xf32>
    %125 = tpu.matmul %122, %124, %cst_73 {dimension_numbers = #tpu.dot_dimension_numbers<[1], [0], [0], [1], [0, 0, 1, 1], [], []>} : vector<73x128xbf16>, vector<128x256xbf16>, vector<73x256xf32> -> vector<73x256xf32>
    %126 = arith.addf %121, %125 : vector<73x256xf32>
    %127 = vector.extract_strided_slice %22 {offsets = [45, 0], sizes = [73, 128], strides = [1, 1]} : vector<121x128xbf16> to vector<73x128xbf16>
    %c21 = arith.constant 21 : index
    %c0_74 = arith.constant 0 : index
    %c0_75 = arith.constant 0 : index
    %128 = vector.load %arg5[%c21, %c0_74, %c0_75] : memref<25x128x256xbf16, #tpu.memory_space<vmem>>, vector<1x128x256xbf16>
    %129 = vector.shape_cast %128 : vector<1x128x256xbf16> to vector<128x256xbf16>
    %cst_76 = arith.constant dense<0.000000e+00> : vector<73x256xf32>
    %130 = tpu.matmul %127, %129, %cst_76 {dimension_numbers = #tpu.dot_dimension_numbers<[1], [0], [0], [1], [0, 0, 1, 1], [], []>} : vector<73x128xbf16>, vector<128x256xbf16>, vector<73x256xf32> -> vector<73x256xf32>
    %131 = arith.addf %126, %130 : vector<73x256xf32>
    %132 = vector.extract_strided_slice %22 {offsets = [46, 0], sizes = [73, 128], strides = [1, 1]} : vector<121x128xbf16> to vector<73x128xbf16>
    %c22 = arith.constant 22 : index
    %c0_77 = arith.constant 0 : index
    %c0_78 = arith.constant 0 : index
    %133 = vector.load %arg5[%c22, %c0_77, %c0_78] : memref<25x128x256xbf16, #tpu.memory_space<vmem>>, vector<1x128x256xbf16>
    %134 = vector.shape_cast %133 : vector<1x128x256xbf16> to vector<128x256xbf16>
    %cst_79 = arith.constant dense<0.000000e+00> : vector<73x256xf32>
    %135 = tpu.matmul %132, %134, %cst_79 {dimension_numbers = #tpu.dot_dimension_numbers<[1], [0], [0], [1], [0, 0, 1, 1], [], []>} : vector<73x128xbf16>, vector<128x256xbf16>, vector<73x256xf32> -> vector<73x256xf32>
    %136 = arith.addf %131, %135 : vector<73x256xf32>
    %137 = vector.extract_strided_slice %22 {offsets = [47, 0], sizes = [73, 128], strides = [1, 1]} : vector<121x128xbf16> to vector<73x128xbf16>
    %c23 = arith.constant 23 : index
    %c0_80 = arith.constant 0 : index
    %c0_81 = arith.constant 0 : index
    %138 = vector.load %arg5[%c23, %c0_80, %c0_81] : memref<25x128x256xbf16, #tpu.memory_space<vmem>>, vector<1x128x256xbf16>
    %139 = vector.shape_cast %138 : vector<1x128x256xbf16> to vector<128x256xbf16>
    %cst_82 = arith.constant dense<0.000000e+00> : vector<73x256xf32>
    %140 = tpu.matmul %137, %139, %cst_82 {dimension_numbers = #tpu.dot_dimension_numbers<[1], [0], [0], [1], [0, 0, 1, 1], [], []>} : vector<73x128xbf16>, vector<128x256xbf16>, vector<73x256xf32> -> vector<73x256xf32>
    %141 = arith.addf %136, %140 : vector<73x256xf32>
    %142 = vector.extract_strided_slice %22 {offsets = [48, 0], sizes = [73, 128], strides = [1, 1]} : vector<121x128xbf16> to vector<73x128xbf16>
    %c24 = arith.constant 24 : index
    %c0_83 = arith.constant 0 : index
    %c0_84 = arith.constant 0 : index
    %143 = vector.load %arg5[%c24, %c0_83, %c0_84] : memref<25x128x256xbf16, #tpu.memory_space<vmem>>, vector<1x128x256xbf16>
    %144 = vector.shape_cast %143 : vector<1x128x256xbf16> to vector<128x256xbf16>
    %cst_85 = arith.constant dense<0.000000e+00> : vector<73x256xf32>
    %145 = tpu.matmul %142, %144, %cst_85 {dimension_numbers = #tpu.dot_dimension_numbers<[1], [0], [0], [1], [0, 0, 1, 1], [], []>} : vector<73x128xbf16>, vector<128x256xbf16>, vector<73x256xf32> -> vector<73x256xf32>
    %146 = arith.addf %141, %145 : vector<73x256xf32>
    %c0_86 = arith.constant 0 : index
    %c0_87 = arith.constant 0 : index
    %147 = vector.load %arg6[%c0_86, %c0_87] : memref<1x256xf32, #tpu.memory_space<vmem>>, vector<1x256xf32>
    %148 = vector.broadcast %147 : vector<1x256xf32> to vector<73x256xf32>
    %149 = arith.addf %146, %148 : vector<73x256xf32>
    %cst_88 = arith.constant 0.000000e+00 : f32
    %150 = vector.broadcast %cst_88 : f32 to vector<73x256xf32>
    %151 = arith.maximumf %149, %150 : vector<73x256xf32>
    %152 = vector.extract_strided_slice %151 {offsets = [0, 0], sizes = [71, 256], strides = [1, 1]} : vector<73x256xf32> to vector<71x256xf32>
    %153 = vector.extract_strided_slice %151 {offsets = [1, 0], sizes = [71, 256], strides = [1, 1]} : vector<73x256xf32> to vector<71x256xf32>
    %154 = arith.maximumf %152, %153 : vector<71x256xf32>
    %155 = vector.extract_strided_slice %151 {offsets = [2, 0], sizes = [71, 256], strides = [1, 1]} : vector<73x256xf32> to vector<71x256xf32>
    %156 = arith.maximumf %154, %155 : vector<71x256xf32>
    %157 = vector.extract_strided_slice %156 {offsets = [0, 0], sizes = [49, 256], strides = [1, 1]} : vector<71x256xf32> to vector<49x256xf32>
    %158 = vector.extract_strided_slice %156 {offsets = [11, 0], sizes = [49, 256], strides = [1, 1]} : vector<71x256xf32> to vector<49x256xf32>
    %159 = arith.maximumf %157, %158 : vector<49x256xf32>
    %160 = vector.extract_strided_slice %156 {offsets = [22, 0], sizes = [49, 256], strides = [1, 1]} : vector<71x256xf32> to vector<49x256xf32>
    %161 = arith.maximumf %159, %160 : vector<49x256xf32>
    %162 = arith.truncf %161 : vector<49x256xf32> to vector<49x256xbf16>
    %c0_89 = arith.constant 0 : index
    %c0_90 = arith.constant 0 : index
    %163 = vector.load %arg7[%c0_89, %c0_90] : memref<25x49xbf16, #tpu.memory_space<vmem>>, vector<25x49xbf16>
    %cst_91 = arith.constant dense<0.000000e+00> : vector<25x256xf32>
    %164 = tpu.matmul %163, %162, %cst_91 {dimension_numbers = #tpu.dot_dimension_numbers<[1], [0], [0], [1], [0, 0, 1, 1], [], []>} : vector<25x49xbf16>, vector<49x256xbf16>, vector<25x256xf32> -> vector<25x256xf32>
    %165 = arith.truncf %164 : vector<25x256xf32> to vector<25x256xbf16>
    %166 = vector.extract_strided_slice %165 {offsets = [0, 0], sizes = [13, 256], strides = [1, 1]} : vector<25x256xbf16> to vector<13x256xbf16>
    %c0_92 = arith.constant 0 : index
    %c0_93 = arith.constant 0 : index
    %c0_94 = arith.constant 0 : index
    %167 = vector.load %arg8[%c0_92, %c0_93, %c0_94] : memref<9x256x384xbf16, #tpu.memory_space<vmem>>, vector<1x256x384xbf16>
    %168 = vector.shape_cast %167 : vector<1x256x384xbf16> to vector<256x384xbf16>
    %cst_95 = arith.constant dense<0.000000e+00> : vector<13x384xf32>
    %169 = tpu.matmul %166, %168, %cst_95 {dimension_numbers = #tpu.dot_dimension_numbers<[1], [0], [0], [1], [0, 0, 1, 1], [], []>} : vector<13x256xbf16>, vector<256x384xbf16>, vector<13x384xf32> -> vector<13x384xf32>
    %170 = vector.extract_strided_slice %165 {offsets = [1, 0], sizes = [13, 256], strides = [1, 1]} : vector<25x256xbf16> to vector<13x256xbf16>
    %c1_96 = arith.constant 1 : index
    %c0_97 = arith.constant 0 : index
    %c0_98 = arith.constant 0 : index
    %171 = vector.load %arg8[%c1_96, %c0_97, %c0_98] : memref<9x256x384xbf16, #tpu.memory_space<vmem>>, vector<1x256x384xbf16>
    %172 = vector.shape_cast %171 : vector<1x256x384xbf16> to vector<256x384xbf16>
    %cst_99 = arith.constant dense<0.000000e+00> : vector<13x384xf32>
    %173 = tpu.matmul %170, %172, %cst_99 {dimension_numbers = #tpu.dot_dimension_numbers<[1], [0], [0], [1], [0, 0, 1, 1], [], []>} : vector<13x256xbf16>, vector<256x384xbf16>, vector<13x384xf32> -> vector<13x384xf32>
    %174 = arith.addf %169, %173 : vector<13x384xf32>
    %175 = vector.extract_strided_slice %165 {offsets = [2, 0], sizes = [13, 256], strides = [1, 1]} : vector<25x256xbf16> to vector<13x256xbf16>
    %c2_100 = arith.constant 2 : index
    %c0_101 = arith.constant 0 : index
    %c0_102 = arith.constant 0 : index
    %176 = vector.load %arg8[%c2_100, %c0_101, %c0_102] : memref<9x256x384xbf16, #tpu.memory_space<vmem>>, vector<1x256x384xbf16>
    %177 = vector.shape_cast %176 : vector<1x256x384xbf16> to vector<256x384xbf16>
    %cst_103 = arith.constant dense<0.000000e+00> : vector<13x384xf32>
    %178 = tpu.matmul %175, %177, %cst_103 {dimension_numbers = #tpu.dot_dimension_numbers<[1], [0], [0], [1], [0, 0, 1, 1], [], []>} : vector<13x256xbf16>, vector<256x384xbf16>, vector<13x384xf32> -> vector<13x384xf32>
    %179 = arith.addf %174, %178 : vector<13x384xf32>
    %180 = vector.extract_strided_slice %165 {offsets = [5, 0], sizes = [13, 256], strides = [1, 1]} : vector<25x256xbf16> to vector<13x256xbf16>
    %c3_104 = arith.constant 3 : index
    %c0_105 = arith.constant 0 : index
    %c0_106 = arith.constant 0 : index
    %181 = vector.load %arg8[%c3_104, %c0_105, %c0_106] : memref<9x256x384xbf16, #tpu.memory_space<vmem>>, vector<1x256x384xbf16>
    %182 = vector.shape_cast %181 : vector<1x256x384xbf16> to vector<256x384xbf16>
    %cst_107 = arith.constant dense<0.000000e+00> : vector<13x384xf32>
    %183 = tpu.matmul %180, %182, %cst_107 {dimension_numbers = #tpu.dot_dimension_numbers<[1], [0], [0], [1], [0, 0, 1, 1], [], []>} : vector<13x256xbf16>, vector<256x384xbf16>, vector<13x384xf32> -> vector<13x384xf32>
    %184 = arith.addf %179, %183 : vector<13x384xf32>
    %185 = vector.extract_strided_slice %165 {offsets = [6, 0], sizes = [13, 256], strides = [1, 1]} : vector<25x256xbf16> to vector<13x256xbf16>
    %c4_108 = arith.constant 4 : index
    %c0_109 = arith.constant 0 : index
    %c0_110 = arith.constant 0 : index
    %186 = vector.load %arg8[%c4_108, %c0_109, %c0_110] : memref<9x256x384xbf16, #tpu.memory_space<vmem>>, vector<1x256x384xbf16>
    %187 = vector.shape_cast %186 : vector<1x256x384xbf16> to vector<256x384xbf16>
    %cst_111 = arith.constant dense<0.000000e+00> : vector<13x384xf32>
    %188 = tpu.matmul %185, %187, %cst_111 {dimension_numbers = #tpu.dot_dimension_numbers<[1], [0], [0], [1], [0, 0, 1, 1], [], []>} : vector<13x256xbf16>, vector<256x384xbf16>, vector<13x384xf32> -> vector<13x384xf32>
    %189 = arith.addf %184, %188 : vector<13x384xf32>
    %190 = vector.extract_strided_slice %165 {offsets = [7, 0], sizes = [13, 256], strides = [1, 1]} : vector<25x256xbf16> to vector<13x256xbf16>
    %c5_112 = arith.constant 5 : index
    %c0_113 = arith.constant 0 : index
    %c0_114 = arith.constant 0 : index
    %191 = vector.load %arg8[%c5_112, %c0_113, %c0_114] : memref<9x256x384xbf16, #tpu.memory_space<vmem>>, vector<1x256x384xbf16>
    %192 = vector.shape_cast %191 : vector<1x256x384xbf16> to vector<256x384xbf16>
    %cst_115 = arith.constant dense<0.000000e+00> : vector<13x384xf32>
    %193 = tpu.matmul %190, %192, %cst_115 {dimension_numbers = #tpu.dot_dimension_numbers<[1], [0], [0], [1], [0, 0, 1, 1], [], []>} : vector<13x256xbf16>, vector<256x384xbf16>, vector<13x384xf32> -> vector<13x384xf32>
    %194 = arith.addf %189, %193 : vector<13x384xf32>
    %195 = vector.extract_strided_slice %165 {offsets = [10, 0], sizes = [13, 256], strides = [1, 1]} : vector<25x256xbf16> to vector<13x256xbf16>
    %c6_116 = arith.constant 6 : index
    %c0_117 = arith.constant 0 : index
    %c0_118 = arith.constant 0 : index
    %196 = vector.load %arg8[%c6_116, %c0_117, %c0_118] : memref<9x256x384xbf16, #tpu.memory_space<vmem>>, vector<1x256x384xbf16>
    %197 = vector.shape_cast %196 : vector<1x256x384xbf16> to vector<256x384xbf16>
    %cst_119 = arith.constant dense<0.000000e+00> : vector<13x384xf32>
    %198 = tpu.matmul %195, %197, %cst_119 {dimension_numbers = #tpu.dot_dimension_numbers<[1], [0], [0], [1], [0, 0, 1, 1], [], []>} : vector<13x256xbf16>, vector<256x384xbf16>, vector<13x384xf32> -> vector<13x384xf32>
    %199 = arith.addf %194, %198 : vector<13x384xf32>
    %200 = vector.extract_strided_slice %165 {offsets = [11, 0], sizes = [13, 256], strides = [1, 1]} : vector<25x256xbf16> to vector<13x256xbf16>
    %c7_120 = arith.constant 7 : index
    %c0_121 = arith.constant 0 : index
    %c0_122 = arith.constant 0 : index
    %201 = vector.load %arg8[%c7_120, %c0_121, %c0_122] : memref<9x256x384xbf16, #tpu.memory_space<vmem>>, vector<1x256x384xbf16>
    %202 = vector.shape_cast %201 : vector<1x256x384xbf16> to vector<256x384xbf16>
    %cst_123 = arith.constant dense<0.000000e+00> : vector<13x384xf32>
    %203 = tpu.matmul %200, %202, %cst_123 {dimension_numbers = #tpu.dot_dimension_numbers<[1], [0], [0], [1], [0, 0, 1, 1], [], []>} : vector<13x256xbf16>, vector<256x384xbf16>, vector<13x384xf32> -> vector<13x384xf32>
    %204 = arith.addf %199, %203 : vector<13x384xf32>
    %205 = vector.extract_strided_slice %165 {offsets = [12, 0], sizes = [13, 256], strides = [1, 1]} : vector<25x256xbf16> to vector<13x256xbf16>
    %c8_124 = arith.constant 8 : index
    %c0_125 = arith.constant 0 : index
    %c0_126 = arith.constant 0 : index
    %206 = vector.load %arg8[%c8_124, %c0_125, %c0_126] : memref<9x256x384xbf16, #tpu.memory_space<vmem>>, vector<1x256x384xbf16>
    %207 = vector.shape_cast %206 : vector<1x256x384xbf16> to vector<256x384xbf16>
    %cst_127 = arith.constant dense<0.000000e+00> : vector<13x384xf32>
    %208 = tpu.matmul %205, %207, %cst_127 {dimension_numbers = #tpu.dot_dimension_numbers<[1], [0], [0], [1], [0, 0, 1, 1], [], []>} : vector<13x256xbf16>, vector<256x384xbf16>, vector<13x384xf32> -> vector<13x384xf32>
    %209 = arith.addf %204, %208 : vector<13x384xf32>
    %c0_128 = arith.constant 0 : index
    %c0_129 = arith.constant 0 : index
    %210 = vector.load %arg9[%c0_128, %c0_129] : memref<1x384xf32, #tpu.memory_space<vmem>>, vector<1x384xf32>
    %211 = vector.broadcast %210 : vector<1x384xf32> to vector<13x384xf32>
    %212 = arith.addf %209, %211 : vector<13x384xf32>
    %cst_130 = arith.constant 0.000000e+00 : f32
    %213 = vector.broadcast %cst_130 : f32 to vector<13x384xf32>
    %214 = arith.maximumf %212, %213 : vector<13x384xf32>
    %c0_131 = arith.constant 0 : index
    %c0_132 = arith.constant 0 : index
    %215 = vector.load %arg10[%c0_131, %c0_132] : memref<25x13xbf16, #tpu.memory_space<vmem>>, vector<25x13xbf16>
    %216 = arith.truncf %214 : vector<13x384xf32> to vector<13x384xbf16>
    %cst_133 = arith.constant dense<0.000000e+00> : vector<25x384xf32>
    %217 = tpu.matmul %215, %216, %cst_133 {dimension_numbers = #tpu.dot_dimension_numbers<[1], [0], [0], [1], [0, 0, 1, 1], [], []>} : vector<25x13xbf16>, vector<13x384xbf16>, vector<25x384xf32> -> vector<25x384xf32>
    %218 = arith.truncf %217 : vector<25x384xf32> to vector<25x384xbf16>
    %219 = vector.extract_strided_slice %218 {offsets = [0, 0], sizes = [13, 384], strides = [1, 1]} : vector<25x384xbf16> to vector<13x384xbf16>
    %c0_134 = arith.constant 0 : index
    %c0_135 = arith.constant 0 : index
    %c0_136 = arith.constant 0 : index
    %220 = vector.load %arg11[%c0_134, %c0_135, %c0_136] : memref<9x384x256xbf16, #tpu.memory_space<vmem>>, vector<1x384x256xbf16>
    %221 = vector.shape_cast %220 : vector<1x384x256xbf16> to vector<384x256xbf16>
    %cst_137 = arith.constant dense<0.000000e+00> : vector<13x256xf32>
    %222 = tpu.matmul %219, %221, %cst_137 {dimension_numbers = #tpu.dot_dimension_numbers<[1], [0], [0], [1], [0, 0, 1, 1], [], []>} : vector<13x384xbf16>, vector<384x256xbf16>, vector<13x256xf32> -> vector<13x256xf32>
    %223 = vector.extract_strided_slice %218 {offsets = [1, 0], sizes = [13, 384], strides = [1, 1]} : vector<25x384xbf16> to vector<13x384xbf16>
    %c1_138 = arith.constant 1 : index
    %c0_139 = arith.constant 0 : index
    %c0_140 = arith.constant 0 : index
    %224 = vector.load %arg11[%c1_138, %c0_139, %c0_140] : memref<9x384x256xbf16, #tpu.memory_space<vmem>>, vector<1x384x256xbf16>
    %225 = vector.shape_cast %224 : vector<1x384x256xbf16> to vector<384x256xbf16>
    %cst_141 = arith.constant dense<0.000000e+00> : vector<13x256xf32>
    %226 = tpu.matmul %223, %225, %cst_141 {dimension_numbers = #tpu.dot_dimension_numbers<[1], [0], [0], [1], [0, 0, 1, 1], [], []>} : vector<13x384xbf16>, vector<384x256xbf16>, vector<13x256xf32> -> vector<13x256xf32>
    %227 = arith.addf %222, %226 : vector<13x256xf32>
    %228 = vector.extract_strided_slice %218 {offsets = [2, 0], sizes = [13, 384], strides = [1, 1]} : vector<25x384xbf16> to vector<13x384xbf16>
    %c2_142 = arith.constant 2 : index
    %c0_143 = arith.constant 0 : index
    %c0_144 = arith.constant 0 : index
    %229 = vector.load %arg11[%c2_142, %c0_143, %c0_144] : memref<9x384x256xbf16, #tpu.memory_space<vmem>>, vector<1x384x256xbf16>
    %230 = vector.shape_cast %229 : vector<1x384x256xbf16> to vector<384x256xbf16>
    %cst_145 = arith.constant dense<0.000000e+00> : vector<13x256xf32>
    %231 = tpu.matmul %228, %230, %cst_145 {dimension_numbers = #tpu.dot_dimension_numbers<[1], [0], [0], [1], [0, 0, 1, 1], [], []>} : vector<13x384xbf16>, vector<384x256xbf16>, vector<13x256xf32> -> vector<13x256xf32>
    %232 = arith.addf %227, %231 : vector<13x256xf32>
    %233 = vector.extract_strided_slice %218 {offsets = [5, 0], sizes = [13, 384], strides = [1, 1]} : vector<25x384xbf16> to vector<13x384xbf16>
    %c3_146 = arith.constant 3 : index
    %c0_147 = arith.constant 0 : index
    %c0_148 = arith.constant 0 : index
    %234 = vector.load %arg11[%c3_146, %c0_147, %c0_148] : memref<9x384x256xbf16, #tpu.memory_space<vmem>>, vector<1x384x256xbf16>
    %235 = vector.shape_cast %234 : vector<1x384x256xbf16> to vector<384x256xbf16>
    %cst_149 = arith.constant dense<0.000000e+00> : vector<13x256xf32>
    %236 = tpu.matmul %233, %235, %cst_149 {dimension_numbers = #tpu.dot_dimension_numbers<[1], [0], [0], [1], [0, 0, 1, 1], [], []>} : vector<13x384xbf16>, vector<384x256xbf16>, vector<13x256xf32> -> vector<13x256xf32>
    %237 = arith.addf %232, %236 : vector<13x256xf32>
    %238 = vector.extract_strided_slice %218 {offsets = [6, 0], sizes = [13, 384], strides = [1, 1]} : vector<25x384xbf16> to vector<13x384xbf16>
    %c4_150 = arith.constant 4 : index
    %c0_151 = arith.constant 0 : index
    %c0_152 = arith.constant 0 : index
    %239 = vector.load %arg11[%c4_150, %c0_151, %c0_152] : memref<9x384x256xbf16, #tpu.memory_space<vmem>>, vector<1x384x256xbf16>
    %240 = vector.shape_cast %239 : vector<1x384x256xbf16> to vector<384x256xbf16>
    %cst_153 = arith.constant dense<0.000000e+00> : vector<13x256xf32>
    %241 = tpu.matmul %238, %240, %cst_153 {dimension_numbers = #tpu.dot_dimension_numbers<[1], [0], [0], [1], [0, 0, 1, 1], [], []>} : vector<13x384xbf16>, vector<384x256xbf16>, vector<13x256xf32> -> vector<13x256xf32>
    %242 = arith.addf %237, %241 : vector<13x256xf32>
    %243 = vector.extract_strided_slice %218 {offsets = [7, 0], sizes = [13, 384], strides = [1, 1]} : vector<25x384xbf16> to vector<13x384xbf16>
    %c5_154 = arith.constant 5 : index
    %c0_155 = arith.constant 0 : index
    %c0_156 = arith.constant 0 : index
    %244 = vector.load %arg11[%c5_154, %c0_155, %c0_156] : memref<9x384x256xbf16, #tpu.memory_space<vmem>>, vector<1x384x256xbf16>
    %245 = vector.shape_cast %244 : vector<1x384x256xbf16> to vector<384x256xbf16>
    %cst_157 = arith.constant dense<0.000000e+00> : vector<13x256xf32>
    %246 = tpu.matmul %243, %245, %cst_157 {dimension_numbers = #tpu.dot_dimension_numbers<[1], [0], [0], [1], [0, 0, 1, 1], [], []>} : vector<13x384xbf16>, vector<384x256xbf16>, vector<13x256xf32> -> vector<13x256xf32>
    %247 = arith.addf %242, %246 : vector<13x256xf32>
    %248 = vector.extract_strided_slice %218 {offsets = [10, 0], sizes = [13, 384], strides = [1, 1]} : vector<25x384xbf16> to vector<13x384xbf16>
    %c6_158 = arith.constant 6 : index
    %c0_159 = arith.constant 0 : index
    %c0_160 = arith.constant 0 : index
    %249 = vector.load %arg11[%c6_158, %c0_159, %c0_160] : memref<9x384x256xbf16, #tpu.memory_space<vmem>>, vector<1x384x256xbf16>
    %250 = vector.shape_cast %249 : vector<1x384x256xbf16> to vector<384x256xbf16>
    %cst_161 = arith.constant dense<0.000000e+00> : vector<13x256xf32>
    %251 = tpu.matmul %248, %250, %cst_161 {dimension_numbers = #tpu.dot_dimension_numbers<[1], [0], [0], [1], [0, 0, 1, 1], [], []>} : vector<13x384xbf16>, vector<384x256xbf16>, vector<13x256xf32> -> vector<13x256xf32>
    %252 = arith.addf %247, %251 : vector<13x256xf32>
    %253 = vector.extract_strided_slice %218 {offsets = [11, 0], sizes = [13, 384], strides = [1, 1]} : vector<25x384xbf16> to vector<13x384xbf16>
    %c7_162 = arith.constant 7 : index
    %c0_163 = arith.constant 0 : index
    %c0_164 = arith.constant 0 : index
    %254 = vector.load %arg11[%c7_162, %c0_163, %c0_164] : memref<9x384x256xbf16, #tpu.memory_space<vmem>>, vector<1x384x256xbf16>
    %255 = vector.shape_cast %254 : vector<1x384x256xbf16> to vector<384x256xbf16>
    %cst_165 = arith.constant dense<0.000000e+00> : vector<13x256xf32>
    %256 = tpu.matmul %253, %255, %cst_165 {dimension_numbers = #tpu.dot_dimension_numbers<[1], [0], [0], [1], [0, 0, 1, 1], [], []>} : vector<13x384xbf16>, vector<384x256xbf16>, vector<13x256xf32> -> vector<13x256xf32>
    %257 = arith.addf %252, %256 : vector<13x256xf32>
    %258 = vector.extract_strided_slice %218 {offsets = [12, 0], sizes = [13, 384], strides = [1, 1]} : vector<25x384xbf16> to vector<13x384xbf16>
    %c8_166 = arith.constant 8 : index
    %c0_167 = arith.constant 0 : index
    %c0_168 = arith.constant 0 : index
    %259 = vector.load %arg11[%c8_166, %c0_167, %c0_168] : memref<9x384x256xbf16, #tpu.memory_space<vmem>>, vector<1x384x256xbf16>
    %260 = vector.shape_cast %259 : vector<1x384x256xbf16> to vector<384x256xbf16>
    %cst_169 = arith.constant dense<0.000000e+00> : vector<13x256xf32>
    %261 = tpu.matmul %258, %260, %cst_169 {dimension_numbers = #tpu.dot_dimension_numbers<[1], [0], [0], [1], [0, 0, 1, 1], [], []>} : vector<13x384xbf16>, vector<384x256xbf16>, vector<13x256xf32> -> vector<13x256xf32>
    %262 = arith.addf %257, %261 : vector<13x256xf32>
    %c0_170 = arith.constant 0 : index
    %c0_171 = arith.constant 0 : index
    %263 = vector.load %arg12[%c0_170, %c0_171] : memref<1x256xf32, #tpu.memory_space<vmem>>, vector<1x256xf32>
    %264 = vector.broadcast %263 : vector<1x256xf32> to vector<13x256xf32>
    %265 = arith.addf %262, %264 : vector<13x256xf32>
    %cst_172 = arith.constant 0.000000e+00 : f32
    %266 = vector.broadcast %cst_172 : f32 to vector<13x256xf32>
    %267 = arith.maximumf %265, %266 : vector<13x256xf32>
    %c0_173 = arith.constant 0 : index
    %c0_174 = arith.constant 0 : index
    %268 = vector.load %arg10[%c0_173, %c0_174] : memref<25x13xbf16, #tpu.memory_space<vmem>>, vector<25x13xbf16>
    %269 = arith.truncf %267 : vector<13x256xf32> to vector<13x256xbf16>
    %cst_175 = arith.constant dense<0.000000e+00> : vector<25x256xf32>
    %270 = tpu.matmul %268, %269, %cst_175 {dimension_numbers = #tpu.dot_dimension_numbers<[1], [0], [0], [1], [0, 0, 1, 1], [], []>} : vector<25x13xbf16>, vector<13x256xbf16>, vector<25x256xf32> -> vector<25x256xf32>
    %271 = arith.truncf %270 : vector<25x256xf32> to vector<25x256xbf16>
    %272 = vector.extract_strided_slice %271 {offsets = [0, 0], sizes = [13, 256], strides = [1, 1]} : vector<25x256xbf16> to vector<13x256xbf16>
    %c0_176 = arith.constant 0 : index
    %c0_177 = arith.constant 0 : index
    %c0_178 = arith.constant 0 : index
    %273 = vector.load %arg13[%c0_176, %c0_177, %c0_178] : memref<9x256x256xbf16, #tpu.memory_space<vmem>>, vector<1x256x256xbf16>
    %274 = vector.shape_cast %273 : vector<1x256x256xbf16> to vector<256x256xbf16>
    %cst_179 = arith.constant dense<0.000000e+00> : vector<13x256xf32>
    %275 = tpu.matmul %272, %274, %cst_179 {dimension_numbers = #tpu.dot_dimension_numbers<[1], [0], [0], [1], [0, 0, 1, 1], [], []>} : vector<13x256xbf16>, vector<256x256xbf16>, vector<13x256xf32> -> vector<13x256xf32>
    %276 = vector.extract_strided_slice %271 {offsets = [1, 0], sizes = [13, 256], strides = [1, 1]} : vector<25x256xbf16> to vector<13x256xbf16>
    %c1_180 = arith.constant 1 : index
    %c0_181 = arith.constant 0 : index
    %c0_182 = arith.constant 0 : index
    %277 = vector.load %arg13[%c1_180, %c0_181, %c0_182] : memref<9x256x256xbf16, #tpu.memory_space<vmem>>, vector<1x256x256xbf16>
    %278 = vector.shape_cast %277 : vector<1x256x256xbf16> to vector<256x256xbf16>
    %cst_183 = arith.constant dense<0.000000e+00> : vector<13x256xf32>
    %279 = tpu.matmul %276, %278, %cst_183 {dimension_numbers = #tpu.dot_dimension_numbers<[1], [0], [0], [1], [0, 0, 1, 1], [], []>} : vector<13x256xbf16>, vector<256x256xbf16>, vector<13x256xf32> -> vector<13x256xf32>
    %280 = arith.addf %275, %279 : vector<13x256xf32>
    %281 = vector.extract_strided_slice %271 {offsets = [2, 0], sizes = [13, 256], strides = [1, 1]} : vector<25x256xbf16> to vector<13x256xbf16>
    %c2_184 = arith.constant 2 : index
    %c0_185 = arith.constant 0 : index
    %c0_186 = arith.constant 0 : index
    %282 = vector.load %arg13[%c2_184, %c0_185, %c0_186] : memref<9x256x256xbf16, #tpu.memory_space<vmem>>, vector<1x256x256xbf16>
    %283 = vector.shape_cast %282 : vector<1x256x256xbf16> to vector<256x256xbf16>
    %cst_187 = arith.constant dense<0.000000e+00> : vector<13x256xf32>
    %284 = tpu.matmul %281, %283, %cst_187 {dimension_numbers = #tpu.dot_dimension_numbers<[1], [0], [0], [1], [0, 0, 1, 1], [], []>} : vector<13x256xbf16>, vector<256x256xbf16>, vector<13x256xf32> -> vector<13x256xf32>
    %285 = arith.addf %280, %284 : vector<13x256xf32>
    %286 = vector.extract_strided_slice %271 {offsets = [5, 0], sizes = [13, 256], strides = [1, 1]} : vector<25x256xbf16> to vector<13x256xbf16>
    %c3_188 = arith.constant 3 : index
    %c0_189 = arith.constant 0 : index
    %c0_190 = arith.constant 0 : index
    %287 = vector.load %arg13[%c3_188, %c0_189, %c0_190] : memref<9x256x256xbf16, #tpu.memory_space<vmem>>, vector<1x256x256xbf16>
    %288 = vector.shape_cast %287 : vector<1x256x256xbf16> to vector<256x256xbf16>
    %cst_191 = arith.constant dense<0.000000e+00> : vector<13x256xf32>
    %289 = tpu.matmul %286, %288, %cst_191 {dimension_numbers = #tpu.dot_dimension_numbers<[1], [0], [0], [1], [0, 0, 1, 1], [], []>} : vector<13x256xbf16>, vector<256x256xbf16>, vector<13x256xf32> -> vector<13x256xf32>
    %290 = arith.addf %285, %289 : vector<13x256xf32>
    %291 = vector.extract_strided_slice %271 {offsets = [6, 0], sizes = [13, 256], strides = [1, 1]} : vector<25x256xbf16> to vector<13x256xbf16>
    %c4_192 = arith.constant 4 : index
    %c0_193 = arith.constant 0 : index
    %c0_194 = arith.constant 0 : index
    %292 = vector.load %arg13[%c4_192, %c0_193, %c0_194] : memref<9x256x256xbf16, #tpu.memory_space<vmem>>, vector<1x256x256xbf16>
    %293 = vector.shape_cast %292 : vector<1x256x256xbf16> to vector<256x256xbf16>
    %cst_195 = arith.constant dense<0.000000e+00> : vector<13x256xf32>
    %294 = tpu.matmul %291, %293, %cst_195 {dimension_numbers = #tpu.dot_dimension_numbers<[1], [0], [0], [1], [0, 0, 1, 1], [], []>} : vector<13x256xbf16>, vector<256x256xbf16>, vector<13x256xf32> -> vector<13x256xf32>
    %295 = arith.addf %290, %294 : vector<13x256xf32>
    %296 = vector.extract_strided_slice %271 {offsets = [7, 0], sizes = [13, 256], strides = [1, 1]} : vector<25x256xbf16> to vector<13x256xbf16>
    %c5_196 = arith.constant 5 : index
    %c0_197 = arith.constant 0 : index
    %c0_198 = arith.constant 0 : index
    %297 = vector.load %arg13[%c5_196, %c0_197, %c0_198] : memref<9x256x256xbf16, #tpu.memory_space<vmem>>, vector<1x256x256xbf16>
    %298 = vector.shape_cast %297 : vector<1x256x256xbf16> to vector<256x256xbf16>
    %cst_199 = arith.constant dense<0.000000e+00> : vector<13x256xf32>
    %299 = tpu.matmul %296, %298, %cst_199 {dimension_numbers = #tpu.dot_dimension_numbers<[1], [0], [0], [1], [0, 0, 1, 1], [], []>} : vector<13x256xbf16>, vector<256x256xbf16>, vector<13x256xf32> -> vector<13x256xf32>
    %300 = arith.addf %295, %299 : vector<13x256xf32>
    %301 = vector.extract_strided_slice %271 {offsets = [10, 0], sizes = [13, 256], strides = [1, 1]} : vector<25x256xbf16> to vector<13x256xbf16>
    %c6_200 = arith.constant 6 : index
    %c0_201 = arith.constant 0 : index
    %c0_202 = arith.constant 0 : index
    %302 = vector.load %arg13[%c6_200, %c0_201, %c0_202] : memref<9x256x256xbf16, #tpu.memory_space<vmem>>, vector<1x256x256xbf16>
    %303 = vector.shape_cast %302 : vector<1x256x256xbf16> to vector<256x256xbf16>
    %cst_203 = arith.constant dense<0.000000e+00> : vector<13x256xf32>
    %304 = tpu.matmul %301, %303, %cst_203 {dimension_numbers = #tpu.dot_dimension_numbers<[1], [0], [0], [1], [0, 0, 1, 1], [], []>} : vector<13x256xbf16>, vector<256x256xbf16>, vector<13x256xf32> -> vector<13x256xf32>
    %305 = arith.addf %300, %304 : vector<13x256xf32>
    %306 = vector.extract_strided_slice %271 {offsets = [11, 0], sizes = [13, 256], strides = [1, 1]} : vector<25x256xbf16> to vector<13x256xbf16>
    %c7_204 = arith.constant 7 : index
    %c0_205 = arith.constant 0 : index
    %c0_206 = arith.constant 0 : index
    %307 = vector.load %arg13[%c7_204, %c0_205, %c0_206] : memref<9x256x256xbf16, #tpu.memory_space<vmem>>, vector<1x256x256xbf16>
    %308 = vector.shape_cast %307 : vector<1x256x256xbf16> to vector<256x256xbf16>
    %cst_207 = arith.constant dense<0.000000e+00> : vector<13x256xf32>
    %309 = tpu.matmul %306, %308, %cst_207 {dimension_numbers = #tpu.dot_dimension_numbers<[1], [0], [0], [1], [0, 0, 1, 1], [], []>} : vector<13x256xbf16>, vector<256x256xbf16>, vector<13x256xf32> -> vector<13x256xf32>
    %310 = arith.addf %305, %309 : vector<13x256xf32>
    %311 = vector.extract_strided_slice %271 {offsets = [12, 0], sizes = [13, 256], strides = [1, 1]} : vector<25x256xbf16> to vector<13x256xbf16>
    %c8_208 = arith.constant 8 : index
    %c0_209 = arith.constant 0 : index
    %c0_210 = arith.constant 0 : index
    %312 = vector.load %arg13[%c8_208, %c0_209, %c0_210] : memref<9x256x256xbf16, #tpu.memory_space<vmem>>, vector<1x256x256xbf16>
    %313 = vector.shape_cast %312 : vector<1x256x256xbf16> to vector<256x256xbf16>
    %cst_211 = arith.constant dense<0.000000e+00> : vector<13x256xf32>
    %314 = tpu.matmul %311, %313, %cst_211 {dimension_numbers = #tpu.dot_dimension_numbers<[1], [0], [0], [1], [0, 0, 1, 1], [], []>} : vector<13x256xbf16>, vector<256x256xbf16>, vector<13x256xf32> -> vector<13x256xf32>
    %315 = arith.addf %310, %314 : vector<13x256xf32>
    %c0_212 = arith.constant 0 : index
    %c0_213 = arith.constant 0 : index
    %316 = vector.load %arg14[%c0_212, %c0_213] : memref<1x256xf32, #tpu.memory_space<vmem>>, vector<1x256xf32>
    %317 = vector.broadcast %316 : vector<1x256xf32> to vector<13x256xf32>
    %318 = arith.addf %315, %317 : vector<13x256xf32>
    %cst_214 = arith.constant 0.000000e+00 : f32
    %319 = vector.broadcast %cst_214 : f32 to vector<13x256xf32>
    %320 = arith.maximumf %318, %319 : vector<13x256xf32>
    %321 = vector.extract_strided_slice %320 {offsets = [0, 0], sizes = [11, 256], strides = [1, 1]} : vector<13x256xf32> to vector<11x256xf32>
    %322 = vector.extract_strided_slice %320 {offsets = [1, 0], sizes = [11, 256], strides = [1, 1]} : vector<13x256xf32> to vector<11x256xf32>
    %323 = arith.maximumf %321, %322 : vector<11x256xf32>
    %324 = vector.extract_strided_slice %320 {offsets = [2, 0], sizes = [11, 256], strides = [1, 1]} : vector<13x256xf32> to vector<11x256xf32>
    %325 = arith.maximumf %323, %324 : vector<11x256xf32>
    %326 = vector.extract_strided_slice %325 {offsets = [0, 0], sizes = [1, 256], strides = [1, 1]} : vector<11x256xf32> to vector<1x256xf32>
    %327 = vector.extract_strided_slice %325 {offsets = [5, 0], sizes = [1, 256], strides = [1, 1]} : vector<11x256xf32> to vector<1x256xf32>
    %328 = arith.maximumf %326, %327 : vector<1x256xf32>
    %329 = vector.extract_strided_slice %325 {offsets = [10, 0], sizes = [1, 256], strides = [1, 1]} : vector<11x256xf32> to vector<1x256xf32>
    %330 = arith.maximumf %328, %329 : vector<1x256xf32>
    %c0_215 = arith.constant 0 : index
    %c0_216 = arith.constant 0 : index
    %c0_217 = arith.constant 0 : index
    %331 = vector.load %arg16[%c0_215, %c0_216, %c0_217] : memref<1x1x256xf32, #tpu.memory_space<vmem>>, vector<1x1x256xf32>
    %332 = vector.shape_cast %331 : vector<1x1x256xf32> to vector<1x256xf32>
    %333 = vector.shape_cast %330 : vector<1x256xf32> to vector<1x1x256xf32>
    tpu.vector_store %arg16[%c0_215, %c0_216, %c0_217], %333 {strides = array<i32>} : memref<1x1x256xf32, #tpu.memory_space<vmem>>, vector<1x1x256xf32>,
    return
  }
  func.func @transform_0(%arg0: i32) -> (i32, i32, i32) {
    %c0_i32 = arith.constant 0 : i32
    %c0_i32_0 = arith.constant 0 : i32
    %c0_i32_1 = arith.constant 0 : i32
    return %arg0, %c0_i32, %c0_i32_0 : i32, i32, i32
  }
  func.func @transform_1(%arg0: i32) -> (i32, i32) {
    %c0_i32 = arith.constant 0 : i32
    %c0_i32_0 = arith.constant 0 : i32
    %c0_i32_1 = arith.constant 0 : i32
    return %c0_i32, %c0_i32_0 : i32, i32
  }
  func.func @transform_2(%arg0: i32) -> (i32, i32) {
    %c0_i32 = arith.constant 0 : i32
    %c0_i32_0 = arith.constant 0 : i32
    %c0_i32_1 = arith.constant 0 : i32
    return %c0_i32, %c0_i32_0 : i32, i32
  }
  func.func @transform_3(%arg0: i32) -> (i32, i32) {
    %c0_i32 = arith.constant 0 : i32
    %c0_i32_0 = arith.constant 0 : i32
    %c0_i32_1 = arith.constant 0 : i32
    return %c0_i32, %c0_i32_0 : i32, i32
  }
  func.func @transform_4(%arg0: i32) -> (i32, i32, i32) {
    %c0_i32 = arith.constant 0 : i32
    %c0_i32_0 = arith.constant 0 : i32
    %c0_i32_1 = arith.constant 0 : i32
    %c0_i32_2 = arith.constant 0 : i32
    return %c0_i32, %c0_i32_0, %c0_i32_1 : i32, i32, i32
  }
  func.func @transform_5(%arg0: i32) -> (i32, i32) {
    %c0_i32 = arith.constant 0 : i32
    %c0_i32_0 = arith.constant 0 : i32
    %c0_i32_1 = arith.constant 0 : i32
    return %c0_i32, %c0_i32_0 : i32, i32
  }
  func.func @transform_6(%arg0: i32) -> (i32, i32) {
    %c0_i32 = arith.constant 0 : i32
    %c0_i32_0 = arith.constant 0 : i32
    %c0_i32_1 = arith.constant 0 : i32
    return %c0_i32, %c0_i32_0 : i32, i32
  }
  func.func @transform_7(%arg0: i32) -> (i32, i32, i32) {
    %c0_i32 = arith.constant 0 : i32
    %c0_i32_0 = arith.constant 0 : i32
    %c0_i32_1 = arith.constant 0 : i32
    %c0_i32_2 = arith.constant 0 : i32
    return %c0_i32, %c0_i32_0, %c0_i32_1 : i32, i32, i32
  }
  func.func @transform_8(%arg0: i32) -> (i32, i32) {
    %c0_i32 = arith.constant 0 : i32
    %c0_i32_0 = arith.constant 0 : i32
    %c0_i32_1 = arith.constant 0 : i32
    return %c0_i32, %c0_i32_0 : i32, i32
  }
  func.func @transform_9(%arg0: i32) -> (i32, i32) {
    %c0_i32 = arith.constant 0 : i32
    %c0_i32_0 = arith.constant 0 : i32
    %c0_i32_1 = arith.constant 0 : i32
    return %c0_i32, %c0_i32_0 : i32, i32
  }
  func.func @transform_10(%arg0: i32) -> (i32, i32, i32) {
    %c0_i32 = arith.constant 0 : i32
    %c0_i32_0 = arith.constant 0 : i32
    %c0_i32_1 = arith.constant 0 : i32
    %c0_i32_2 = arith.constant 0 : i32
    return %c0_i32, %c0_i32_0, %c0_i32_1 : i32, i32, i32
  }
  func.func @transform_11(%arg0: i32) -> (i32, i32) {
    %c0_i32 = arith.constant 0 : i32
    %c0_i32_0 = arith.constant 0 : i32
    %c0_i32_1 = arith.constant 0 : i32
    return %c0_i32, %c0_i32_0 : i32, i32
  }
  func.func @transform_12(%arg0: i32) -> (i32, i32, i32) {
    %c0_i32 = arith.constant 0 : i32
    %c0_i32_0 = arith.constant 0 : i32
    %c0_i32_1 = arith.constant 0 : i32
    %c0_i32_2 = arith.constant 0 : i32
    return %c0_i32, %c0_i32_0, %c0_i32_1 : i32, i32, i32
  }
  func.func @transform_13(%arg0: i32) -> (i32, i32) {
    %c0_i32 = arith.constant 0 : i32
    %c0_i32_0 = arith.constant 0 : i32
    %c0_i32_1 = arith.constant 0 : i32
    return %c0_i32, %c0_i32_0 : i32, i32
  }
  func.func @transform_14(%arg0: i32) -> (i32, i32) {
    %c0_i32 = arith.constant 0 : i32
    %c0_i32_0 = arith.constant 0 : i32
    %c0_i32_1 = arith.constant 0 : i32
    return %c0_i32, %c0_i32_0 : i32, i32
  }
  func.func @transform_15(%arg0: i32) -> (i32, i32, i32) {
    %c0_i32 = arith.constant 0 : i32
    %c0_i32_0 = arith.constant 0 : i32
    %c0_i32_1 = arith.constant 0 : i32
    return %arg0, %c0_i32, %c0_i32_0 : i32, i32, i32
  }
}

module attributes {stable_mosaic.version = 11 : i64} {
  func.func @_fc_sigmoid_kernel(%arg0: memref<2x256xf32, #tpu.memory_space<vmem>>, %arg1: memref<1x256xf32, #tpu.memory_space<vmem>>, %arg2: memref<1x1xf32, #tpu.memory_space<vmem>>, %arg3: memref<2x1xf32, #tpu.memory_space<vmem>>) attributes {dimension_semantics = [], scalar_prefetch = 0 : i64, scratch_operands = 0 : i64, tpu.core_type = #tpu.core_type<tc>} {
    %c0 = arith.constant 0 : index
    %c0_0 = arith.constant 0 : index
    %0 = vector.load %arg0[%c0, %c0_0] : memref<2x256xf32, #tpu.memory_space<vmem>>, vector<2x256xf32>
    %c0_1 = arith.constant 0 : index
    %c0_2 = arith.constant 0 : index
    %1 = vector.load %arg1[%c0_1, %c0_2] : memref<1x256xf32, #tpu.memory_space<vmem>>, vector<1x256xf32>
    %2 = vector.broadcast %1 : vector<1x256xf32> to vector<2x256xf32>
    %3 = arith.mulf %0, %2 : vector<2x256xf32>
    %cst = arith.constant dense<0.000000e+00> : vector<2xf32>
    %4 = vector.multi_reduction <add>, %3, %cst [1] : vector<2x256xf32> to vector<2xf32>
    %5 = vector.shape_cast %4 : vector<2xf32> to vector<2x1xf32>
    %c0_3 = arith.constant 0 : index
    %c0_4 = arith.constant 0 : index
    %6 = vector.load %arg2[%c0_3, %c0_4] : memref<1x1xf32, #tpu.memory_space<vmem>>, vector<1x1xf32>
    %7 = vector.broadcast %6 : vector<1x1xf32> to vector<2x1xf32>
    %8 = arith.addf %5, %7 : vector<2x1xf32>
    %cst_5 = arith.constant 5.000000e-01 : f32
    %9 = vector.broadcast %cst_5 : f32 to vector<2x1xf32>
    %10 = arith.mulf %9, %8 : vector<2x1xf32>
    %11 = math.tanh %10 : vector<2x1xf32>
    %cst_6 = arith.constant 1.000000e+00 : f32
    %12 = vector.broadcast %cst_6 : f32 to vector<2x1xf32>
    %13 = arith.addf %11, %12 : vector<2x1xf32>
    %cst_7 = arith.constant 5.000000e-01 : f32
    %14 = vector.broadcast %cst_7 : f32 to vector<2x1xf32>
    %15 = arith.mulf %14, %13 : vector<2x1xf32>
    %c0_8 = arith.constant 0 : index
    %c0_9 = arith.constant 0 : index
    %16 = vector.load %arg3[%c0_8, %c0_9] : memref<2x1xf32, #tpu.memory_space<vmem>>, vector<2x1xf32>
    tpu.vector_store %arg3[%c0_8, %c0_9], %15 {strides = array<i32>} : memref<2x1xf32, #tpu.memory_space<vmem>>, vector<2x1xf32>,
    return
  }
}

</mosaic_0001>

<bundles_post_ra>
// kernel: alexnet_forward.3
= control target key start
LH: loop header
LB: loop body
LE: loop exit
PB: predicated region body
PF: predicated region fallthrough
CT: control target
= control target key end

     0   :  { %v19_v0 = vlaneseq  ;;  %v76_v1 = vmov 1983009808   ;;  %vm48_vm0 = vcmask 1041408   ;;  %vm66_vm1 = vcmask 1024   ;;  %s109_s1 = inlined_call_operand.vmem [shape: f32[1,256], index: 1, kind: input, shape index: {}]   ;;  %s110_s2 = inlined_call_operand.<no memory space> [shape: f32[1,1], index: 2, kind: input, shape index: {}]   ;;  %s111_s0 = inlined_call_operand.vmem [shape: f32[2,256], index: 0, kind: input, shape index: {}]   ;;  %s112_s3 = inlined_call_operand.vmem [shape: f32[2,1], index: 3, kind: output, shape index: {}]  }
   0x1   :  { %v29_v2 = vunpack.c.l.s4 %v76_v1  ;;  %v8_v3 = vstv %s110_s2  ;;  %v17_v5 = vld [vmem:[%s109_s1] sm:$0x3] }
   0x2   :  { %v20_v4 = vshrl.u32 %v19_v0, 7  ;;  %9 = vst [vmem:[#allocation2] sm:$0x1] %v8_v3  ;;  %v16_v13 = vld [vmem:[%s111_s0] sm:$0xf] }
   0x3   :  { %v30_v6 = vunpack.c.0.s8 %v29_v2 }
   0x4   :  { %v21_v7 = vsub.s32 0, %v20_v4  ;;  %v25_v8 = vsub.s32 1, %v20_v4 }
   0x5   :  { %v33_v11 = vsub.s32 %v30_v6, %v20_v4 }
   0x6   :  { %v22_v9 = vrot.slane %v17_v5, %v21_v7  ;;  %v26_v10 = vrot.slane %v17_v5, %v25_v8 }
   0x8   :  { %v27_v12 = vcombine.low %v22_v9, %v26_v10 }
   0x9   :  { %v72_v21 = vld [vmem:[#allocation2] ss:$0 sm:$0xff] }
   0xa   :  { %v34_v14 = vrot.slane %v27_v12, %v33_v11 }
   0xc   :  { %v36_v15 = vmul.f32 %v34_v14, %v16_v13 }
   0xe   :  { %v44_v16 = vrot.slane %v36_v15, %v33_v11 }
  0x10   :  { %v45_v17 = vcombine.high %v44_v16, %v44_v16  ;;  %v49_v18 = vsel %vm48_vm0, %v44_v16, 0.0 }
  0x12   :  { %v50_v19 = vsel %vm48_vm0, %v45_v17, 0.0 }
  0x13   :  { %v51_v20 = vadd.f32 %v50_v19, %v49_v18 }
  0x15   :  { %52 = vadd.xlane.f32.xlu0 %v51_v20 }
  0xa2   :  { %v53_v22 = vpop.xlane.xlu0 %52 }
  0xa3   :  { %v61_v23 = vadd.f32 %v72_v21, %v53_v22 }
  0xa5   :  { %v62_v24 = vmul.f32 0.5, %v61_v23 }
  0xa7   :  { %74 = vtanh.f32 %v62_v24 }
  0xb1   :  { %v75_v25 = vpop.eup %74 }
  0xb2   :  { %v64_v26 = vadd.f32 1.0, %v75_v25 }
  0xb4   :  { %v65_v27 = vmul.f32 0.5, %v64_v26 }
  0xb6   :  { %67 = vst.msk [vmem:[%s112_s3] sm:$0x3] %vm66_vm1, %v65_v27 }

// kernel: alexnet_forward.2
= control target key start
LH: loop header
LB: loop body
LE: loop exit
PB: predicated region body
PF: predicated region fallthrough
CT: control target
= control target key end

     0   :  { %s24603_s18 = smov 0   ;;  %s31286_s0 = inlined_call_operand.vmem [shape: bf16[2,225,384], index: 0, kind: input, shape index: {}]   ;;  %s31287_s1 = inlined_call_operand.vmem [shape: bf16[384,128], index: 1, kind: input, shape index: {}]   ;;  %s31288_s2 = inlined_call_operand.vmem [shape: f32[1,128], index: 2, kind: input, shape index: {}]   ;;  %s31289_s3 = inlined_call_operand.vmem [shape: bf16[121,193], index: 3, kind: input, shape index: {}]   ;;  %s31290_s4 = inlined_call_operand.vmem [shape: bf16[25,128,256], index: 4, kind: input, shape index: {}]   ;;  %s31291_s5 = inlined_call_operand.vmem [shape: f32[1,256], index: 5, kind: input, shape index: {}]   ;;  %s31292_s6 = inlined_call_operand.vmem [shape: bf16[25,49], index: 6, kind: input, shape index: {}]   ;;  %s31293_s7 = inlined_call_operand.vmem [shape: bf16[9,256,384], index: 7, kind: input, shape index: {}]   ;;  %s31294_s8 = inlined_call_operand.vmem [shape: f32[1,384], index: 8, kind: input, shape index: {}]   ;;  %s31295_s9 = inlined_call_operand.vmem [shape: bf16[25,13], index: 9, kind: input, shape index: {}]   ;;  %s31296_s10 = inlined_call_operand.vmem [shape: bf16[9,384,256], index: 10, kind: input, shape index: {}]   ;;  %s31297_s11 = inlined_call_operand.vmem [shape: f32[1,256], index: 11, kind: input, shape index: {}]   ;;  %s31298_s12 = inlined_call_operand.vmem [shape: bf16[9,256,256], index: 12, kind: input, shape index: {}]   ;;  %s31299_s13 = inlined_call_operand.vmem [shape: f32[1,256], index: 13, kind: input, shape index: {}]   ;;  %s31300_s14 = inlined_call_operand.<no memory space> [shape: f32[1,1], index: 14, kind: input, shape index: {}]   ;;  %s31301_s15 = inlined_call_operand.vmem [shape: f32[2,1,256], index: 15, kind: output, shape index: {}]  }
   0x1 LB: > { %s17871_s19 = sadd.s32 4294967295, %s24516_s18   ;;  %p17875_p0 = scmp.ge.s32.totalorder %s24516_s18, 1  ;;  %s24516_s18 = sphi %s24603_s18, %s27_s18  }
   0x2   : > { %p439_p1 = scmp.lt.s32.totalorder %s24516_s18, 3 }
   0x4   : > { %p440_p2 = pnand %p17875_p0, %p439_p1 }
   0x6   : > { %443 = sbr.rel (%p440_p2) target bundleno = 5404 (0x151c), region = 80 }
   0xd   : > { %v22128_v0 = vld [vmem:[%s31287_s1 + $0x40] sm:$0xff]   ;;  %v22130_v2 = vld [vmem:[%s31287_s1 + $0x48] sm:$0xff]   ;;  %p486_p3 = scmp.lt.s32.totalorder %s17871_s19, 1  ;;  %v22132_v4 = vld [vmem:[%s31287_s1 + $0x50] sm:$0xff]   ;;  %v24518_v20 = vmov 0.0   ;;  %vm24519_vm0 = vmmov 0  }
   0xe   : > { %v22129_v1 = vld [vmem:[%s31287_s1] sm:$0xff]   ;;  %21074 = vmatprep.subr.bf16.mxu1 %v22128_v0  ;;  %v22131_v3 = vld [vmem:[%s31287_s1 + $0x8] sm:$0xff]   ;;  %v22133_v5 = vld [vmem:[%s31287_s1 + $0x10] sm:$0xff]   ;;  %vm1349_vm1 = vcmask 1046528   ;;  %vm1462_vm2 = vcmask 1045504   ;;  %vm1904_vm3 = vcmask 531456  }
   0xf   : > { %21075 = vmatpush3.bf16.msra.mxu1 %v22129_v1  ;;  %s31350_s19 = smov (!%p486_p3, %s17871_s19), 1  ;;  %v22134_v6 = vld [vmem:[%s31287_s1 + $0x58] sm:$0xff]   ;;  %v22136_v8 = vld [vmem:[%s31287_s1 + $0x60] sm:$0xff]   ;;  %v22138_v10 = vld [vmem:[%s31287_s1 + $0x68] sm:$0xff]   ;;  %vm1601_vm4 = vcmask 1040384   ;;  %vm1703_vm5 = vcmask 1041408  }
  0x10   : > { %21076 = vmatprep.subr.bf16.mxu1 %v22130_v2  ;;  %s22114_s20 = smul.u32 348, %s31350_s19  ;;  %v22135_v7 = vld [vmem:[%s31287_s1 + $0x18] sm:$0xff]   ;;  %v22137_v9 = vld [vmem:[%s31287_s1 + $0x20] sm:$0xff]   ;;  %v22139_v12 = vld [vmem:[%s31287_s1 + $0x28] sm:$0xff]   ;;  %vm2072_vm6 = vsmask.f32 7424 }
  0x11   : > { %v22140_v13 = vld [vmem:[%s31287_s1 + $0x70] sm:$0xff]   ;;  %v22142_v15 = vld [vmem:[%s31287_s1 + $0x78] sm:$0xff]   ;;  %v22150_v19 = vld [vmem:[%s31287_s1 + $0x80] sm:$0xff]   ;;  %vm2680_vm7 = vsmask.f32 6400  ;;  %vm4240_vm11 = vcmask 1044480  }
  0x12   : > { %s24644_s26 = scalar_lea.vmem %s31286_s0, %s22114_s20  ;;  %v22141_v14 = vld [vmem:[%s31287_s1 + $0x30] sm:$0xff]   ;;  %v22143_v16 = vld [vmem:[%s31287_s1 + $0x38] sm:$0xff]   ;;  %v22157_v21 = vld [vmem:[%s31287_s1 + $0x88] sm:$0xff]   ;;  %vm3120_vm8 = vsmask.f32 2304  ;;  %vm4681_vm13 = vcmask 1043456  }
  0x13   : > { %21077 = vmatpush3.bf16.msra.mxu1 %v22131_v3  ;;  %v22146_v11 = vld [vmem:[%s24644_s26 + $0x4] ss:$12 sps:$4 sm:$0xff]   ;;  %v22144_v17 = vld [vmem:[%s24644_s26] ss:$12 sps:$4 sm:$0xff]   ;;  %v22147_v18 = vld [vmem:[%s24644_s26 + $0x1c] ss:$12 sps:$4 sm:$0xff]  }
  0x14   : > { %21078 = vmatprep.subr.bf16.mxu1 %v22132_v4  ;;  %1020 = vmatprep.mubr.bf16.mxu1 %v22146_v11  ;;  %v22149_v22 = vld [vmem:[%s24644_s26 + $0x18] ss:$12 sps:$4 sm:$0xff]   ;;  %v22151_v23 = vld [vmem:[%s24644_s26 + $0x34] ss:$12 sps:$4 sm:$0xff]   ;;  %v22153_v26 = vld [vmem:[%s24644_s26 + $0x30] ss:$12 sps:$4 sm:$0xff]  }
  0x15   : > { %v22164_v24 = vld [vmem:[%s31287_s1 + $0x90] sm:$0xff]   ;;  %v22171_v25 = vld [vmem:[%s31287_s1 + $0x98] sm:$0xff]   ;;  %v22178_v28 = vld [vmem:[%s31287_s1 + $0xa0] sm:$0xff]   ;;  %vm3572_vm9 = vsmask.f32 1280  ;;  %vm5132_vm15 = vcmask 1042432  }
  0x16   : > { %v22154_v27 = vld [vmem:[%s24644_s26 + $0x4c] ss:$12 sps:$4 sm:$0xff]   ;;  %v22156_v30 = vld [vmem:[%s24644_s26 + $0x48] ss:$12 sps:$4 sm:$0xff]   ;;  %v22158_v31 = vld [vmem:[%s24644_s26 + $0x64] ss:$12 sps:$4 sm:$0xff]  }
  0x17   : > { %21079 = vmatpush3.bf16.msra.mxu1 %v22133_v5  ;;  %v22185_v29 = vld [vmem:[%s31287_s1 + $0xa8] sm:$0xff]   ;;  %v22191_v32 = vld [vmem:[%s31287_s1 + $0xb0] sm:$0xff]   ;;  %v22195_v33 = vld [vmem:[%s31287_s1 + $0xb8] sm:$0xff]   ;;  %vm4018_vm10 = vsmask.f32 256  ;;  %s17877_s22 = sshll.u32 %s31350_s19, 1 }
  0x18   : > { %21080 = vmatprep.subr.bf16.mxu1 %v22134_v6  ;;  %v22160_v34 = vld [vmem:[%s24644_s26 + $0x60] ss:$12 sps:$4 sm:$0xff]   ;;  %v22161_v35 = vld [vmem:[%s24644_s26 + $0x7c] ss:$12 sps:$4 sm:$0xff]   ;;  %v22163_v36 = vld [vmem:[%s24644_s26 + $0x78] ss:$12 sps:$4 sm:$0xff]   ;;  %s494_s25 = scalar_lea.vmem %s31301_s15, %s17877_s22 }
  0x19   : > { %v22165_v37 = vld [vmem:[%s24644_s26 + $0x94] ss:$12 sps:$4 sm:$0xff]   ;;  %v22167_v38 = vld [vmem:[%s24644_s26 + $0x90] ss:$12 sps:$4 sm:$0xff]   ;;  %v22168_v39 = vld [vmem:[%s24644_s26 + $0xac] ss:$12 sps:$4 sm:$0xff]  }
  0x1a   : > { %v22170_v40 = vld [vmem:[%s24644_s26 + $0xa8] ss:$12 sps:$4 sm:$0xff]   ;;  %v22172_v41 = vld [vmem:[%s24644_s26 + $0xc4] ss:$12 sps:$4 sm:$0xff]   ;;  %v22174_v42 = vld [vmem:[%s24644_s26 + $0xc0] ss:$12 sps:$4 sm:$0xff]  }
  0x1b   : > { %21081 = vmatpush3.bf16.msra.mxu1 %v22135_v7  ;;  %v22175_v43 = vld [vmem:[%s24644_s26 + $0xdc] ss:$12 sps:$4 sm:$0xff]   ;;  %v22177_v44 = vld [vmem:[%s24644_s26 + $0xd8] ss:$12 sps:$4 sm:$0xff]   ;;  %v22179_v45 = vld [vmem:[%s24644_s26 + $0xf4] ss:$12 sps:$4 sm:$0xff]  }
  0x1c   : > { %21082 = vmatprep.subr.bf16.mxu1 %v22136_v8  ;;  %v22181_v46 = vld [vmem:[%s24644_s26 + $0xf0] ss:$12 sps:$4 sm:$0xff]   ;;  %v22182_v47 = vld [vmem:[%s24644_s26 + $0x10c] ss:$12 sps:$4 sm:$0xff]   ;;  %v22184_v48 = vld [vmem:[%s24644_s26 + $0x108] ss:$12 sps:$4 sm:$0xff]  }
  0x1d   : > { %v22186_v49 = vld [vmem:[%s24644_s26 + $0x124] ss:$12 sps:$4 sm:$0xff]   ;;  %v22188_v50 = vld [vmem:[%s24644_s26 + $0x120] ss:$12 sps:$4 sm:$0xff]   ;;  %v22189_v51 = vld [vmem:[%s24644_s26 + $0x13c] ss:$12 sps:$4 sm:$0xff]  }
  0x1e   : > { %v552_v52 = vld [vmem:[%s24644_s26 + $0x150] sm:$0x11]  ;;  %v22192_v53 = vld [vmem:[%s24644_s26 + $0x138] ss:$12 sps:$4 sm:$0xff]   ;;  %v22197_v57 = vld [vmem:[%s24644_s26 + $0x20] ss:$12 sps:$4 sm:$0xff]  }
  0x1f   : > { %21083 = vmatpush3.bf16.msra.mxu1 %v22137_v9  ;;  %v17922_v54 = vcombine.high %v552_v52, %v552_v52  ;;  %v17921_v55 = vcombine.low %v552_v52, %v552_v52  ;;  %v22196_v56 = vld [vmem:[%s24644_s26 + $0x8] ss:$12 sps:$4 sm:$0xff]   ;;  %v22198_v58 = vld [vmem:[%s24644_s26 + $0x38] ss:$12 sps:$4 sm:$0xff]   ;;  %v22199_v59 = vld [vmem:[%s24644_s26 + $0x50] ss:$12 sps:$4 sm:$0xff]  }
  0x20   : > { %21084 = vmatprep.subr.bf16.mxu1 %v22138_v10  ;;  %v22200_v60 = vld [vmem:[%s24644_s26 + $0x68] ss:$12 sps:$4 sm:$0xff]   ;;  %v22201_v61 = vld [vmem:[%s24644_s26 + $0x80] ss:$12 sps:$4 sm:$0xff]   ;;  %v22202_v62 = vld [vmem:[%s24644_s26 + $0x98] ss:$12 sps:$4 sm:$0xff]  }
  0x21   : > { %v22203_v63 = vld [vmem:[%s24644_s26 + $0xb0] ss:$12 sps:$4 sm:$0xff]   ;;  %v22204_v0 = vld [vmem:[%s24644_s26 + $0xc8] ss:$12 sps:$4 sm:$0xff]   ;;  %v22205_v1 = vld [vmem:[%s24644_s26 + $0xe0] ss:$12 sps:$4 sm:$0xff]  }
  0x22   : > { %v22206_v2 = vld [vmem:[%s24644_s26 + $0xf8] ss:$12 sps:$4 sm:$0xff]   ;;  %v22207_v3 = vld [vmem:[%s24644_s26 + $0x110] ss:$12 sps:$4 sm:$0xff]   ;;  %v22208_v4 = vld [vmem:[%s24644_s26 + $0x128] ss:$12 sps:$4 sm:$0xff]  }
  0x23   : > { %21085 = vmatpush3.bf16.msra.mxu1 %v22139_v12  ;;  %v22209_v11 = vld [vmem:[%s24644_s26 + $0x140] ss:$12 sps:$4 sm:$0xff]   ;;  %vm4455_vm12 = vsmask.f32 4352  ;;  %vm4898_vm14 = vsmask.f32 3328 }
  0x24   : > { %21086 = vmatprep.subr.bf16.mxu1 %v22140_v13 }
  0x27   : > { %21087 = vmatpush3.bf16.msra.mxu1 %v22141_v14 }
  0x28   : > { %21088 = vmatprep.subr.bf16.mxu1 %v22142_v15 }
  0x2b   : > { %21089 = vmatpush3.bf16.msra.mxu1 %v22143_v16 }
  0x2c   : > { %21404 = vmatprep.subr.bf16.mxu1 %v24518_v20 }
  0x2e   : > { %1021 = vmatmul.mubr.bf16.vlgmr.msra.gmra.mrb[0].mxu1 %v22144_v17 }
  0x2f   : > { %1028 = vmatprep.mubr.bf16.mxu1 %v22147_v18  ;;  %21405 = vmatpush3.bf16.msra.mxu1 %v22150_v19  ;;  %v22210_v18 = vld [vmem:[%s24644_s26 + $0x158] ss:$0 sps:$4 sm:$0x11]  }
  0x30   : > { %21406 = vmatprep.subr.bf16.mxu1 %v24518_v20 }
  0x33   : > { %21407 = vmatpush3.bf16.msra.mxu1 %v22157_v21 }
  0x34   : > { %21408 = vmatprep.subr.bf16.mxu1 %v24518_v20 }
  0x36   : > { %1029 = vmatmul.mubr.bf16.gmra.mrb[4].mxu1 %v22149_v22 }
  0x37   : > { %1036 = vmatprep.mubr.bf16.mxu1 %v22151_v23  ;;  %21409 = vmatpush3.bf16.msra.mxu1 %v22164_v24 }
  0x38   : > { %21410 = vmatprep.subr.bf16.mxu1 %v24518_v20 }
  0x3b   : > { %21411 = vmatpush3.bf16.msra.mxu1 %v22171_v25 }
  0x3c   : > { %21412 = vmatprep.subr.bf16.mxu1 %v24518_v20 }
  0x3e   : > { %1037 = vmatmul.mubr.bf16.gmra.mrb[8].mxu1 %v22153_v26 }
  0x3f   : > { %1044 = vmatprep.mubr.bf16.mxu1 %v22154_v27  ;;  %21413 = vmatpush3.bf16.msra.mxu1 %v22178_v28 }
  0x40   : > { %21414 = vmatprep.subr.bf16.mxu1 %v24518_v20 }
  0x43   : > { %21415 = vmatpush3.bf16.msra.mxu1 %v22185_v29 }
  0x44   : > { %21416 = vmatprep.subr.bf16.mxu1 %v24518_v20 }
  0x46   : > { %1045 = vmatmul.mubr.bf16.gmra.mrb[12].mxu1 %v22156_v30 }
  0x47   : > { %1052 = vmatprep.mubr.bf16.mxu1 %v22158_v31  ;;  %21417 = vmatpush3.bf16.msra.mxu1 %v22191_v32 }
  0x48   : > { %21418 = vmatprep.subr.bf16.mxu1 %v24518_v20 }
  0x4b   : > { %21419 = vmatpush3.bf16.msra.mxu1 %v22195_v33 }
  0x4e   : > { %1053 = vmatmul.mubr.bf16.gmra.mrb[16].mxu1 %v22160_v34 }
  0x4f   : > { %1060 = vmatprep.mubr.bf16.mxu1 %v22161_v35  ;;  %v31310_v35 = vmov 0  }
  0x50   : > { %1934 = vmatprep.subr.bf16.mxu0 %v31310_v35 }
  0x56   : > { %1061 = vmatmul.mubr.bf16.gmra.mrb[20].mxu1 %v22163_v36 }
  0x57   : > { %1068 = vmatprep.mubr.bf16.mxu1 %v22165_v37 }
  0x5e   : > { %1069 = vmatmul.mubr.bf16.gmra.mrb[24].mxu1 %v22167_v38 }
  0x5f   : > { %1076 = vmatprep.mubr.bf16.mxu1 %v22168_v39 }
  0x66   : > { %1077 = vmatmul.mubr.bf16.gmra.mrb[28].mxu1 %v22170_v40 }
  0x67   : > { %1084 = vmatprep.mubr.bf16.mxu1 %v22172_v41 }
  0x6e   : > { %1085 = vmatmul.mubr.bf16.gmra.mrb[32].mxu1 %v22174_v42 }
  0x6f   : > { %1092 = vmatprep.mubr.bf16.mxu1 %v22175_v43 }
  0x76   : > { %1093 = vmatmul.mubr.bf16.gmra.mrb[36].mxu1 %v22177_v44 }
  0x77   : > { %1100 = vmatprep.mubr.bf16.mxu1 %v22179_v45 }
  0x7e   : > { %1101 = vmatmul.mubr.bf16.gmra.mrb[40].mxu1 %v22181_v46 }
  0x7f   : > { %1108 = vmatprep.mubr.bf16.mxu1 %v22182_v47 }
  0x86   : > { %1109 = vmatmul.mubr.bf16.gmra.mrb[44].mxu1 %v22184_v48 }
  0x87   : > { %1116 = vmatprep.mubr.bf16.mxu1 %v22186_v49 }
  0x8e   : > { %1117 = vmatmul.mubr.bf16.gmra.mrb[48].mxu1 %v22188_v50 }
  0x8f   : > { %1124 = vmatprep.mubr.bf16.mxu1 %v22189_v51 }
  0x96   : > { %1125 = vmatmul.mubr.bf16.gmra.mrb[52].mxu1 %v22192_v53 }
  0x97   : > { %1132 = vmatprep.mubr.bf16.mxu1 %v17922_v54 }
  0x9e   : > { %1133 = vmatmul.mubr.bf16.gmra.mrb[56].mxu1 %v17921_v55 }
  0x9f   : > { %21420 = vmatprep.mubr.msk.bf16.mxu1 %vm24519_vm0, %v24518_v20 }
  0xa6   : > { %21421 = vmatmul.mubr.bf16.vlgmr.msra.gmra.mrb[60].mxu1 %v22196_v56 }
  0xa7   : > { %21424 = vmatprep.mubr.msk.bf16.mxu1 %vm24519_vm0, %v24518_v20 }
  0xae   : > { %21425 = vmatmul.mubr.bf16.gmra.mrb[64].mxu1 %v22197_v57 }
  0xaf   : > { %21428 = vmatprep.mubr.msk.bf16.mxu1 %vm24519_vm0, %v24518_v20 }
  0xb6   : > { %21429 = vmatmul.mubr.bf16.gmra.mrb[68].mxu1 %v22198_v58 }
  0xb7   : > { %21432 = vmatprep.mubr.msk.bf16.mxu1 %vm24519_vm0, %v24518_v20 }
  0xbe   : > { %21433 = vmatmul.mubr.bf16.gmra.mrb[72].mxu1 %v22199_v59 }
  0xbf   : > { %21436 = vmatprep.mubr.msk.bf16.mxu1 %vm24519_vm0, %v24518_v20 }
  0xc6   : > { %21437 = vmatmul.mubr.bf16.gmra.mrb[76].mxu1 %v22200_v60 }
  0xc7   : > { %21440 = vmatprep.mubr.msk.bf16.mxu1 %vm24519_vm0, %v24518_v20 }
  0xce   : > { %21441 = vmatmul.mubr.bf16.gmra.mrb[80].mxu1 %v22201_v61 }
  0xcf   : > { %21444 = vmatprep.mubr.msk.bf16.mxu1 %vm24519_vm0, %v24518_v20 }
  0xd6   : > { %21445 = vmatmul.mubr.bf16.gmra.mrb[84].mxu1 %v22202_v62 }
  0xd7   : > { %21448 = vmatprep.mubr.msk.bf16.mxu1 %vm24519_vm0, %v24518_v20 }
  0xde   : > { %21449 = vmatmul.mubr.bf16.gmra.mrb[88].mxu1 %v22203_v63 }
  0xdf   : > { %21452 = vmatprep.mubr.msk.bf16.mxu1 %vm24519_vm0, %v24518_v20 }
  0xe6   : > { %21453 = vmatmul.mubr.bf16.gmra.mrb[92].mxu1 %v22204_v0 }
  0xe7   : > { %21456 = vmatprep.mubr.msk.bf16.mxu1 %vm24519_vm0, %v24518_v20 }
  0xee   : > { %21457 = vmatmul.mubr.bf16.gmra.mrb[96].mxu1 %v22205_v1 }
  0xef   : > { %21460 = vmatprep.mubr.msk.bf16.mxu1 %vm24519_vm0, %v24518_v20 }
  0xf6   : > { %21461 = vmatmul.mubr.bf16.gmra.mrb[100].mxu1 %v22206_v2 }
  0xf7   : > { %21464 = vmatprep.mubr.msk.bf16.mxu1 %vm24519_vm0, %v24518_v20 }
  0xfe   : > { %21465 = vmatmul.mubr.bf16.gmra.mrb[104].mxu1 %v22207_v3 }
  0xff   : > { %21468 = vmatprep.mubr.msk.bf16.mxu1 %vm24519_vm0, %v24518_v20 }
 0x101   : > { %v21090_v5 = vpop.f32.mrb[0].mxu1 }
 0x102   : > { %v21091_v6 = vpop.f32.mrb[1].mxu1 }
 0x103   : > { %v24767_v7 = vadd.f32 %v21091_v6, %v21090_v5  ;;  %v21093_v8 = vpop.f32.mrb[2].mxu1 }
 0x104   : > { %v21094_v9 = vpop.f32.mrb[3].mxu1 }
 0x105   : > { %v24769_v10 = vadd.f32 %v21094_v9, %v21093_v8 }
 0x106   : > { %21469 = vmatmul.mubr.bf16.gmra.mrb[108].mxu1 %v22208_v4 }
 0x107   : > { %21472 = vmatprep.mubr.msk.bf16.mxu1 %vm24519_vm0, %v24518_v20 }
 0x109   : > { %v21096_v12 = vpop.f32.mrb[4].mxu1 }
 0x10a   : > { %v21097_v13 = vpop.f32.mrb[5].mxu1 }
 0x10b   : > { %v24774_v14 = vadd.f32 %v21097_v13, %v21096_v12  ;;  %v21099_v15 = vpop.f32.mrb[6].mxu1 }
 0x10c   : > { %v21100_v16 = vpop.f32.mrb[7].mxu1 }
 0x10d   : > { %v24776_v17 = vadd.f32 %v21100_v16, %v21099_v15 }
 0x10e   : > { %21473 = vmatmul.mubr.bf16.gmra.mrb[112].mxu1 %v22209_v11 }
 0x10f   : > { %21476 = vmatprep.mubr.msk.bf16.mxu1 %vm24519_vm0, %v24518_v20  ;;  %vm6183_vm0 = vsmask.f32 5376 }
 0x111   : > { %v21102_v19 = vpop.f32.mrb[8].mxu1 }
 0x112   : > { %v21103_v21 = vpop.f32.mrb[9].mxu1 }
 0x113   : > { %v24781_v22 = vadd.f32 %v21103_v21, %v21102_v19  ;;  %v21105_v23 = vpop.f32.mrb[10].mxu1 }
 0x114   : > { %v21106_v24 = vpop.f32.mrb[11].mxu1 }
 0x115   : > { %v24783_v25 = vadd.f32 %v21106_v24, %v21105_v23 }
 0x116   : > { %21477 = vmatmul.mubr.bf16.gmra.mrb[116].mxu1 %v22210_v18 }
 0x117   : > { %2239 = vmatprep.mubr.bf16.mxu1 %v31310_v35 }
 0x119   : > { %v21108_v26 = vpop.f32.mrb[12].mxu1 }
 0x11a   : > { %v21109_v27 = vpop.f32.mrb[13].mxu1 }
 0x11b   : > { %v24785_v28 = vadd.f32 %v21109_v27, %v21108_v26  ;;  %v21111_v29 = vpop.f32.mrb[14].mxu1 }
 0x11c   : > { %v21112_v30 = vpop.f32.mrb[15].mxu1 }
 0x11d   : > { %v24787_v31 = vadd.f32 %v21112_v30, %v21111_v29 }
 0x121   : > { %v21114_v32 = vpop.f32.mrb[16].mxu1 }
 0x122   : > { %v21115_v20 = vpop.f32.mrb[17].mxu1 }
 0x123   : > { %v24789_v33 = vadd.f32 %v21115_v20, %v21114_v32  ;;  %v21117_v34 = vpop.f32.mrb[18].mxu1 }
 0x124   : > { %v21118_v36 = vpop.f32.mrb[19].mxu1 }
 0x125   : > { %v24793_v37 = vadd.f32 %v21118_v36, %v21117_v34 }
 0x129   : > { %v21120_v38 = vpop.f32.mrb[20].mxu1 }
 0x12a   : > { %v21121_v39 = vpop.f32.mrb[21].mxu1 }
 0x12b   : > { %v24795_v40 = vadd.f32 %v21121_v39, %v21120_v38  ;;  %v21123_v41 = vpop.f32.mrb[22].mxu1 }
 0x12c   : > { %v21124_v42 = vpop.f32.mrb[23].mxu1 }
 0x12d   : > { %v24797_v43 = vadd.f32 %v21124_v42, %v21123_v41 }
 0x131   : > { %v21126_v44 = vpop.f32.mrb[24].mxu1 }
 0x132   : > { %v21127_v45 = vpop.f32.mrb[25].mxu1 }
 0x133   : > { %v24799_v46 = vadd.f32 %v21127_v45, %v21126_v44  ;;  %v21129_v47 = vpop.f32.mrb[26].mxu1  ;;  %v24836_v45 = vld [vmem:[%s31288_s2] ss:$0 sm:$0xff] }
 0x134   : > { %v21130_v48 = vpop.f32.mrb[27].mxu1 }
 0x135   : > { %v24801_v49 = vadd.f32 %v21130_v48, %v21129_v47  ;;  %v1023_v48 = vadd.f32 %v24767_v7, %v24836_v45 }
 0x139   : > { %v21132_v50 = vpop.f32.mrb[28].mxu1 }
 0x13a   : > { %v21133_v51 = vpop.f32.mrb[29].mxu1 }
 0x13b   : > { %v24803_v52 = vadd.f32 %v21133_v51, %v21132_v50  ;;  %v21135_v53 = vpop.f32.mrb[30].mxu1 }
 0x13c   : > { %v21136_v54 = vpop.f32.mrb[31].mxu1 }
 0x13d   : > { %v24805_v55 = vadd.f32 %v21136_v54, %v21135_v53  ;;  %v1026_v54 = vadd.f32 %v24769_v10, %v24836_v45 }
 0x141   : > { %v21138_v56 = vpop.f32.mrb[32].mxu1 }
 0x142   : > { %v21139_v57 = vpop.f32.mrb[33].mxu1 }
 0x143   : > { %v24807_v58 = vadd.f32 %v21139_v57, %v21138_v56  ;;  %v21141_v59 = vpop.f32.mrb[34].mxu1 }
 0x144   : > { %v21142_v60 = vpop.f32.mrb[35].mxu1 }
 0x145   : > { %v24809_v61 = vadd.f32 %v21142_v60, %v21141_v59 }
 0x149   : > { %v21144_v62 = vpop.f32.mrb[36].mxu1 }
 0x14a   : > { %v21145_v63 = vpop.f32.mrb[37].mxu1 }
 0x14b   : > { %v24811_v0 = vadd.f32 %v21145_v63, %v21144_v62  ;;  %v21147_v1 = vpop.f32.mrb[38].mxu1 }
 0x14c   : > { %v21148_v2 = vpop.f32.mrb[39].mxu1 }
 0x14d   : > { %v24813_v3 = vadd.f32 %v21148_v2, %v21147_v1  ;;  %v22213_v2 = vld [vmem:[%s31289_s3 + $0x4] ss:$8 sps:$4 sm:$0xff]  }
 0x14e   : > { %17964 = vmatprep.mubr.msk.bf16.mxu0 %vm1904_vm3, %v22213_v2 }
 0x151   : > { %v21150_v4 = vpop.f32.mrb[40].mxu1 }
 0x152   : > { %v21151_v5 = vpop.f32.mrb[41].mxu1 }
 0x153   : > { %v24815_v6 = vadd.f32 %v21151_v5, %v21150_v4  ;;  %v21153_v8 = vpop.f32.mrb[42].mxu1  ;;  %v1031_v5 = vadd.f32 %v24774_v14, %v24836_v45 }
 0x154   : > { %v21154_v9 = vpop.f32.mrb[43].mxu1 }
 0x155   : > { %v24817_v11 = vadd.f32 %v21154_v9, %v21153_v8 }
 0x159   : > { %v21156_v12 = vpop.f32.mrb[44].mxu1 }
 0x15a   : > { %v21157_v13 = vpop.f32.mrb[45].mxu1 }
 0x15b   : > { %v24819_v15 = vadd.f32 %v21157_v13, %v21156_v12  ;;  %v21159_v16 = vpop.f32.mrb[46].mxu1  ;;  %v1034_v13 = vadd.f32 %v24776_v17, %v24836_v45 }
 0x15c   : > { %v21160_v18 = vpop.f32.mrb[47].mxu1 }
 0x15d   : > { %v24821_v19 = vadd.f32 %v21160_v18, %v21159_v16 }
 0x161   : > { %v21162_v21 = vpop.f32.mrb[48].mxu1 }
 0x162   : > { %v21163_v23 = vpop.f32.mrb[49].mxu1 }
 0x163   : > { %v24823_v24 = vadd.f32 %v21163_v23, %v21162_v21  ;;  %v21165_v26 = vpop.f32.mrb[50].mxu1 }
 0x164   : > { %v21166_v27 = vpop.f32.mrb[51].mxu1 }
 0x165   : > { %v24825_v29 = vadd.f32 %v21166_v27, %v21165_v26 }
 0x169   : > { %v21168_v30 = vpop.f32.mrb[52].mxu1 }
 0x16a   : > { %v21169_v32 = vpop.f32.mrb[53].mxu1 }
 0x16b   : > { %v24827_v20 = vadd.f32 %v21169_v32, %v21168_v30  ;;  %v21171_v34 = vpop.f32.mrb[54].mxu1 }
 0x16c   : > { %v21172_v36 = vpop.f32.mrb[55].mxu1 }
 0x16d   : > { %v24829_v38 = vadd.f32 %v21172_v36, %v21171_v34  ;;  %v1039_v36 = vadd.f32 %v24781_v22, %v24836_v45 }
 0x171   : > { %v21174_v39 = vpop.f32.mrb[56].mxu1 }
 0x172   : > { %v21175_v41 = vpop.f32.mrb[57].mxu1 }
 0x173   : > { %v24831_v42 = vadd.f32 %v21175_v41, %v21174_v39  ;;  %v21177_v44 = vpop.f32.mrb[58].mxu1 }
 0x174   : > { %v21178_v47 = vpop.f32.mrb[59].mxu1 }
 0x179   : > { %v1174_v50 = vpop.f32.mrb[60].mxu1 }
 0x17a   : > { %v1175_v51 = vadd.f32 %v1174_v50, %v1023_v48  ;;  %v21422_v53 = vpop.f32.mrb[61].mxu1 }
 0x17b   : > { %v1177_v56 = vpop.f32.mrb[62].mxu1 }
 0x17c   : > { %v1292_v57 = vmax.f32 %v1175_v51, 0.0  ;;  %v1178_v59 = vadd.f32 %v1177_v56, %v1026_v54  ;;  %v21423_v60 = vpop.f32.mrb[63].mxu1  ;;  %v1042_v56 = vadd.f32 %v24783_v25, %v24836_v45 }
 0x17e   : > { %v1350_v62 = vrot.slane %v1292_v57, 1  ;;  %v1463_v63 = vrot.slane %v1292_v57, 2  ;;  %v1293_v1 = vmax.f32 %v1178_v59, 0.0 }
 0x180   : > { %v1351_v7 = vrot.slane %v1293_v1, 1  ;;  %v1464_v4 = vrot.slane %v1293_v1, 2 }
 0x181   : > { %v1182_v8 = vpop.f32.mrb[64].mxu1 }
 0x182   : > { %v1352_v10 = vsel %vm1349_vm1, %v1350_v62, %v1351_v7  ;;  %v1183_v9 = vadd.f32 %v1182_v8, %v1031_v5  ;;  %v21426_v12 = vpop.f32.mrb[65].mxu1  ;;  %v1465_v16 = vsel %vm1462_vm2, %v1463_v63, %v1464_v4  ;;  %v1047_v8 = vadd.f32 %v24785_v28, %v24836_v45 }
 0x183   : > { %v1185_v18 = vpop.f32.mrb[66].mxu1  ;;  %v1433_v21 = vmax.f32 %v1292_v57, %v1352_v10 }
 0x184   : > { %v1294_v23 = vmax.f32 %v1183_v9, 0.0  ;;  %v1186_v26 = vadd.f32 %v1185_v18, %v1034_v13  ;;  %v21427_v27 = vpop.f32.mrb[67].mxu1 }
 0x185   : > { %v24852_v30 = vmax.f32 %v1433_v21, %v1465_v16  ;;  %v1050_v21 = vadd.f32 %v24787_v31, %v24836_v45 }
 0x186   : > { %v1353_v14 = vrot.slane %v1294_v23, 1  ;;  %v1466_v32 = vrot.slane %v1294_v23, 2  ;;  %v1295_v34 = vmax.f32 %v1186_v26, 0.0 }
 0x188   : > { %v1354_v39 = vsel %vm1349_vm1, %v1351_v7, %v1353_v14  ;;  %v1355_v41 = vrot.slane %v1295_v34, 1  ;;  %v1468_v44 = vrot.slane %v1295_v34, 2  ;;  %v1467_v17 = vsel %vm1462_vm2, %v1464_v4, %v1466_v32 }
 0x189   : > { %v1190_v47 = vpop.f32.mrb[68].mxu1  ;;  %v1434_v48 = vmax.f32 %v1293_v1, %v1354_v39 }
 0x18a   : > { %v1356_v50 = vsel %vm1349_vm1, %v1353_v14, %v1355_v41  ;;  %v1469_v51 = vsel %vm1462_vm2, %v1466_v32, %v1468_v44  ;;  %v1191_v53 = vadd.f32 %v1190_v47, %v1039_v36  ;;  %v21430_v54 = vpop.f32.mrb[69].mxu1 }
 0x18b   : > { %v1435_v57 = vmax.f32 %v1294_v23, %v1356_v50  ;;  %v1193_v22 = vpop.f32.mrb[70].mxu1  ;;  %v24862_v59 = vmax.f32 %v1434_v48, %v1467_v17  ;;  %v1055_v54 = vadd.f32 %v24789_v33, %v24836_v45 }
 0x18c   : > { %v1296_v60 = vmax.f32 %v1191_v53, 0.0  ;;  %v1194_v62 = vadd.f32 %v1193_v22, %v1042_v56  ;;  %v21431_v63 = vpop.f32.mrb[71].mxu1 }
 0x18d   : > { %v24864_v2 = vmax.f32 %v1435_v57, %v1469_v51  ;;  %v1602_v1 = vrot.slane %v24862_v59, 7 }
 0x18e   : > { %v1357_v7 = vrot.slane %v1296_v60, 1  ;;  %v1470_v4 = vrot.slane %v1296_v60, 2  ;;  %v1297_v5 = vmax.f32 %v1194_v62, 0.0 }
 0x18f   : > { %v1603_v10 = vrot.slane %v24864_v2, 7 }
 0x190   : > { %v1358_v25 = vsel %vm1349_vm1, %v1355_v41, %v1357_v7  ;;  %v1471_v9 = vsel %vm1462_vm2, %v1468_v44, %v1470_v4  ;;  %v1359_v12 = vrot.slane %v1297_v5, 1  ;;  %v1472_v13 = vrot.slane %v1297_v5, 2 }
 0x191   : > { %v1436_v16 = vmax.f32 %v1295_v34, %v1358_v25  ;;  %v1198_v18 = vpop.f32.mrb[72].mxu1  ;;  %v1604_v23 = vsel %vm1601_vm4, %v1602_v1, %v1603_v10 }
 0x192   : > { %v1360_v26 = vsel %vm1349_vm1, %v1357_v7, %v1359_v12  ;;  %v1473_v28 = vsel %vm1462_vm2, %v1470_v4, %v1472_v13  ;;  %v1199_v27 = vadd.f32 %v1198_v18, %v1047_v8  ;;  %v21434_v14 = vpop.f32.mrb[73].mxu1  ;;  %v1676_v32 = vmax.f32 %v24852_v30, %v1604_v23 }
 0x193   : > { %v24878_v36 = vmax.f32 %v1436_v16, %v1471_v9  ;;  %v1437_v39 = vmax.f32 %v1296_v60, %v1360_v26  ;;  %v1201_v41 = vpop.f32.mrb[74].mxu1  ;;  %v1058_v30 = vadd.f32 %v24793_v37, %v24836_v45 }
 0x194   : > { %v1298_v34 = vmax.f32 %v1199_v27, 0.0  ;;  %v1202_v44 = vadd.f32 %v1201_v41, %v1050_v21  ;;  %v21435_v17 = vpop.f32.mrb[75].mxu1  ;;  %v1063_v27 = vadd.f32 %v24795_v40, %v24836_v45 }
 0x195   : > { %v24880_v47 = vmax.f32 %v1437_v39, %v1473_v28  ;;  %v1605_v31 = vrot.slane %v24878_v36, 7  ;;  %v1704_v48 = vrot.slane %v24878_v36, 6 }
 0x196   : > { %v1361_v50 = vrot.slane %v1298_v34, 1  ;;  %v1474_v51 = vrot.slane %v1298_v34, 2  ;;  %v1299_v53 = vmax.f32 %v1202_v44, 0.0 }
 0x197   : > { %v1606_v56 = vsel %vm1601_vm4, %v1603_v10, %v1605_v31  ;;  %v1705_v57 = vrot.slane %v24880_v47, 6  ;;  %v1607_v22 = vrot.slane %v24880_v47, 7 }
 0x198   : > { %v1362_v60 = vsel %vm1349_vm1, %v1359_v12, %v1361_v50  ;;  %v1475_v62 = vsel %vm1462_vm2, %v1472_v13, %v1474_v51  ;;  %v1363_v63 = vrot.slane %v1299_v53, 1  ;;  %v1476_v1 = vrot.slane %v1299_v53, 2 }
 0x199   : > { %v1438_v7 = vmax.f32 %v1297_v5, %v1362_v60  ;;  %v1206_v4 = vpop.f32.mrb[76].mxu1  ;;  %v1677_v8 = vmax.f32 %v24862_v59, %v1606_v56  ;;  %v1706_v33 = vsel %vm1703_vm5, %v1704_v48, %v1705_v57  ;;  %v1608_v37 = vsel %vm1601_vm4, %v1605_v31, %v1607_v22 }
 0x19a   : > { %v1364_v10 = vsel %vm1349_vm1, %v1361_v50, %v1363_v63  ;;  %v1477_v25 = vsel %vm1462_vm2, %v1474_v51, %v1476_v1  ;;  %v1207_v9 = vadd.f32 %v1206_v4, %v1055_v54  ;;  %v21438_v16 = vpop.f32.mrb[77].mxu1  ;;  %v1778_v18 = vmax.f32 %v1676_v32, %v1706_v33 }
 0x19b   : > { %v24898_v12 = vmax.f32 %v1438_v7, %v1475_v62  ;;  %v1439_v13 = vmax.f32 %v1298_v34, %v1364_v10  ;;  %v1209_v21 = vpop.f32.mrb[78].mxu1  ;;  %v1678_v5 = vmax.f32 %v24864_v2, %v1608_v37  ;;  %v1066_v34 = vadd.f32 %v24797_v43, %v24836_v45 }
 0x19c   : > { %v1300_v23 = vmax.f32 %v1207_v9, 0.0  ;;  %v1210_v26 = vadd.f32 %v1209_v21, %v1058_v30  ;;  %v21439_v59 = vpop.f32.mrb[79].mxu1 }
 0x19d   : > { %v24901_v28 = vmax.f32 %v1439_v13, %v1477_v25  ;;  %v1707_v14 = vrot.slane %v24898_v12, 6  ;;  %v1609_v39 = vrot.slane %v24898_v12, 7  ;;  %v1071_v13 = vadd.f32 %v24799_v46, %v24836_v45 }
 0x19e   : > { %v1365_v41 = vrot.slane %v1300_v23, 1  ;;  %v1478_v32 = vrot.slane %v1300_v23, 2  ;;  %v1301_v44 = vmax.f32 %v1210_v26, 0.0  ;;  %v1074_v59 = vadd.f32 %v24801_v49, %v24836_v45 }
 0x19f   : > { %v1708_v2 = vsel %vm1703_vm5, %v1705_v57, %v1707_v14  ;;  %v1610_v17 = vsel %vm1601_vm4, %v1607_v22, %v1609_v39  ;;  %v1709_v31 = vrot.slane %v24901_v28, 6  ;;  %v1611_v48 = vrot.slane %v24901_v28, 7 }
 0x1a0   : > { %v1366_v40 = vsel %vm1349_vm1, %v1363_v63, %v1365_v41  ;;  %v1479_v50 = vsel %vm1462_vm2, %v1476_v1, %v1478_v32  ;;  %v1367_v51 = vrot.slane %v1301_v44, 1  ;;  %v1480_v54 = vrot.slane %v1301_v44, 2 }
 0x1a1   : > { %v1440_v30 = vmax.f32 %v1299_v53, %v1366_v40  ;;  %v1214_v56 = vpop.f32.mrb[80].mxu1  ;;  %v1779_v60 = vmax.f32 %v1677_v8, %v1708_v2  ;;  %v1679_v62 = vmax.f32 %v24878_v36, %v1610_v17  ;;  %v1710_v43 = vsel %vm1703_vm5, %v1707_v14, %v1709_v31 }
 0x1a2   : > { %v1368_v57 = vsel %vm1349_vm1, %v1365_v41, %v1367_v51  ;;  %v1481_v22 = vsel %vm1462_vm2, %v1478_v32, %v1480_v54  ;;  %v1215_v7 = vadd.f32 %v1214_v56, %v1063_v27  ;;  %v21442_v4 = vpop.f32.mrb[81].mxu1  ;;  %v1780_v33 = vmax.f32 %v1678_v5, %v1710_v43 }
 0x1a3   : > { %v24919_v37 = vmax.f32 %v1440_v30, %v1479_v50  ;;  %v1441_v63 = vmax.f32 %v1300_v23, %v1368_v57  ;;  %v1217_v1 = vpop.f32.mrb[82].mxu1  ;;  %v1803_v10 = vpack.c.bf16 %v1779_v60, %v1778_v18  ;;  %v1612_v53 = vsel %vm1601_vm4, %v1609_v39, %v1611_v48 }
 0x1a4   : > { %v1302_v25 = vmax.f32 %v1215_v7, 0.0  ;;  %v1218_v8 = vadd.f32 %v1217_v1, %v1066_v34  ;;  %v21443_v9 = vpop.f32.mrb[83].mxu1  ;;  %v1680_v36 = vmax.f32 %v24880_v47, %v1612_v53  ;;  %v1079_v53 = vadd.f32 %v24803_v52, %v24836_v45 }
 0x1a5   : > { %v24923_v16 = vmax.f32 %v1441_v63, %v1481_v22  ;;  %1935 = vmatpush1.bf16.msra.mxu0 %v1803_v10  ;;  %v1711_v21 = vrot.slane %v24919_v37, 6  ;;  %v1613_v5 = vrot.slane %v24919_v37, 7  ;;  %v22234_v22 = vld [vmem:[%s31290_s4 + $0x94] ss:$8 sps:$4 sm:$0xff]  }
 0x1a6   : > { %v1369_v23 = vrot.slane %v1302_v25, 1  ;;  %v1482_v26 = vrot.slane %v1302_v25, 2  ;;  %v24929_v18 = vmax.f32 %v1218_v8, 0.0  ;;  %1936 = vmatprep.subr.bf16.mxu0 %v31310_v35 }
 0x1a7   : > { %v1712_v47 = vsel %vm1703_vm5, %v1709_v31, %v1711_v21  ;;  %v1614_v27 = vsel %vm1601_vm4, %v1611_v48, %v1613_v5  ;;  %v1713_v14 = vrot.slane %v24923_v16, 6  ;;  %v1615_v46 = vrot.slane %v24923_v16, 7  ;;  %v22231_v48 = vld [vmem:[%s31290_s4 + $0x84] ss:$8 sps:$4 sm:$0xff]  }
 0x1a8   : > { %v1370_v39 = vsel %vm1349_vm1, %v1367_v51, %v1369_v23  ;;  %v1483_v41 = vsel %vm1462_vm2, %v1480_v54, %v1482_v26  ;;  %v1371_v32 = vrot.slane %v24929_v18, 1  ;;  %v1484_v34 = vrot.slane %v24929_v18, 2  ;;  %21486 = vmatprep.subr.bf16.mxu1 %v22231_v48 }
 0x1a9   : > { %v1442_v2 = vmax.f32 %v1301_v44, %v1370_v39  ;;  %v1222_v49 = vpop.f32.mrb[84].mxu1  ;;  %v1781_v17 = vmax.f32 %v1679_v62, %v1712_v47  ;;  %v1681_v40 = vmax.f32 %v24898_v12, %v1614_v27  ;;  %v1714_v31 = vsel %vm1703_vm5, %v1711_v21, %v1713_v14  ;;  %v22229_v44 = vld [vmem:[%s31290_s4 + $0x80] ss:$8 sps:$4 sm:$0xff]  }
 0x1aa   : > { %v1372_v50 = vsel %vm1349_vm1, %v1369_v23, %v1371_v32  ;;  %v1485_v51 = vsel %vm1462_vm2, %v1482_v26, %v1484_v34  ;;  %v1223_v54 = vadd.f32 %v1222_v49, %v1071_v13  ;;  %v21446_v30 = vpop.f32.mrb[85].mxu1  ;;  %v1782_v56 = vmax.f32 %v1680_v36, %v1714_v31  ;;  %21494 = vmatpush1.bf16.msra.mxu1 %v22229_v44  ;;  %v22237_v26 = vld [vmem:[%s31290_s4 + $0xa4] ss:$8 sps:$4 sm:$0xff]  }
 0x1ab   : > { %v24952_v60 = vmax.f32 %v1442_v2, %v1483_v41  ;;  %v1443_v12 = vmax.f32 %v1302_v25, %v1372_v50  ;;  %v1225_v62 = vpop.f32.mrb[86].mxu1  ;;  %v1804_v43 = vpack.c.bf16 %v1781_v17, %v1780_v33  ;;  %v1616_v57 = vsel %vm1601_vm4, %v1613_v5, %v1615_v46  ;;  %21487 = vmatprep.subr.bf16.mxu1 %v22234_v22 }
 0x1ac   : > { %v1304_v7 = vmax.f32 %v1223_v54, 0.0  ;;  %v1226_v4 = vadd.f32 %v1225_v62, %v1074_v59  ;;  %v21447_v63 = vpop.f32.mrb[87].mxu1  ;;  %v1682_v1 = vmax.f32 %v24901_v28, %v1616_v57  ;;  %v1082_v13 = vadd.f32 %v24805_v55, %v24836_v45  ;;  %v22232_v28 = vld [vmem:[%s31290_s4 + $0x90] ss:$8 sps:$4 sm:$0xff]  }
 0x1ad   : > { %v24959_v10 = vmax.f32 %v1443_v12, %v1485_v51  ;;  %1937 = vmatpush1.bf16.msra.mxu0 %v1804_v43  ;;  %v1715_v33 = vrot.slane %v24952_v60, 6  ;;  %v1617_v25 = vrot.slane %v24952_v60, 7  ;;  %v22238_v43 = vld [vmem:[%s31290_s4 + $0xb0] ss:$8 sps:$4 sm:$0xff]   ;;  %v1087_v22 = vadd.f32 %v24807_v58, %v24836_v45 }
 0x1ae   : > { %v1373_v8 = vrot.slane %v1304_v7, 1  ;;  %v1486_v9 = vrot.slane %v1304_v7, 2  ;;  %v24965_v36 = vmax.f32 %v1226_v4, 0.0  ;;  %1938 = vmatprep.subr.bf16.mxu0 %v31310_v35  ;;  %21495 = vmatpush1.bf16.msra.mxu1 %v22232_v28 }
 0x1af   : > { %v1716_v52 = vsel %vm1703_vm5, %v1713_v14, %v1715_v33  ;;  %v1618_v21 = vsel %vm1601_vm4, %v1615_v46, %v1617_v25  ;;  %v1717_v5 = vrot.slane %v24959_v10, 6  ;;  %v1619_v23 = vrot.slane %v24959_v10, 7  ;;  %v22235_v14 = vld [vmem:[%s31290_s4 + $0xa0] ss:$8 sps:$4 sm:$0xff]   ;;  %21488 = vmatprep.subr.bf16.mxu1 %v22237_v26 }
 0x1b0   : > { %v1374_v55 = vsel %vm1349_vm1, %v1371_v32, %v1373_v8  ;;  %v1487_v59 = vsel %vm1462_vm2, %v1484_v34, %v1486_v9  ;;  %v1375_v47 = vrot.slane %v24965_v36, 1  ;;  %v1488_v27 = vrot.slane %v24965_v36, 2  ;;  %v22240_v32 = vld [vmem:[%s31290_s4 + $0xb4] ss:$8 sps:$4 sm:$0xff]  }
 0x1b1   : > { %v1444_v46 = vmax.f32 %v24929_v18, %v1374_v55  ;;  %v1230_v39 = vpop.f32.mrb[88].mxu1  ;;  %v1783_v41 = vmax.f32 %v1681_v40, %v1716_v52  ;;  %v1683_v2 = vmax.f32 %v24919_v37, %v1618_v21  ;;  %v1718_v49 = vsel %vm1703_vm5, %v1715_v33, %v1717_v5 }
 0x1b2   : > { %v1376_v34 = vsel %vm1349_vm1, %v1373_v8, %v1375_v47  ;;  %v1489_v17 = vsel %vm1462_vm2, %v1486_v9, %v1488_v27  ;;  %v1231_v31 = vadd.f32 %v1230_v39, %v1079_v53  ;;  %v21450_v48 = vpop.f32.mrb[89].mxu1  ;;  %v1784_v50 = vmax.f32 %v1682_v1, %v1718_v49  ;;  %21496 = vmatpush1.bf16.msra.mxu1 %v22235_v14 }
 0x1b3   : > { %v24995_v51 = vmax.f32 %v1444_v46, %v1487_v59  ;;  %v1445_v18 = vmax.f32 %v1304_v7, %v1376_v34  ;;  %v1233_v40 = vpop.f32.mrb[90].mxu1  ;;  %v1805_v54 = vpack.c.bf16 %v1783_v41, %v1782_v56  ;;  %v1620_v37 = vsel %vm1601_vm4, %v1617_v25, %v1619_v23  ;;  %21489 = vmatprep.subr.bf16.mxu1 %v22240_v32  ;;  %v22246_v59 = vld [vmem:[%s31290_s4 + $0xd4] ss:$8 sps:$4 sm:$0xff]   ;;  %v22244_v48 = vld [vmem:[%s31290_s4 + $0xd0] ss:$8 sps:$4 sm:$0xff]  }
 0x1b4   : > { %v1306_v30 = vmax.f32 %v1231_v31, 0.0  ;;  %v1234_v44 = vadd.f32 %v1233_v40, %v1082_v13  ;;  %v21451_v12 = vpop.f32.mrb[91].mxu1  ;;  %v1684_v62 = vmax.f32 %v24923_v16, %v1620_v37  ;;  %v22243_v16 = vld [vmem:[%s31290_s4 + $0xc4] ss:$8 sps:$4 sm:$0xff]   ;;  %v1090_v53 = vadd.f32 %v24809_v61, %v24836_v45  ;;  %v22241_v61 = vld [vmem:[%s31290_s4 + $0xc0] ss:$8 sps:$4 sm:$0xff]  }
 0x1b5   : > { %v25002_v57 = vmax.f32 %v1445_v18, %v1489_v17  ;;  %1939 = vmatpush1.bf16.msra.mxu0 %v1805_v54  ;;  %v1719_v56 = vrot.slane %v24995_v51, 6  ;;  %v1621_v7 = vrot.slane %v24995_v51, 7  ;;  %v1095_v40 = vadd.f32 %v24811_v0, %v24836_v45 }
 0x1b6   : > { %v1377_v4 = vrot.slane %v1306_v30, 1  ;;  %v1490_v63 = vrot.slane %v1306_v30, 2  ;;  %v25011_v1 = vmax.f32 %v1234_v44, 0.0  ;;  %1940 = vmatprep.subr.bf16.mxu0 %v31310_v35  ;;  %21497 = vmatpush1.bf16.msra.mxu1 %v22238_v43 }
 0x1b7   : > { %v1720_v58 = vsel %vm1703_vm5, %v1717_v5, %v1719_v56  ;;  %v1622_v33 = vsel %vm1601_vm4, %v1619_v23, %v1621_v7  ;;  %v1721_v25 = vrot.slane %v25002_v57, 6  ;;  %v1623_v8 = vrot.slane %v25002_v57, 7  ;;  %21490 = vmatprep.subr.bf16.mxu1 %v22243_v16 }
 0x1b8   : > { %v1378_v9 = vsel %vm1349_vm1, %v1375_v47, %v1377_v4  ;;  %v1491_v13 = vsel %vm1462_vm2, %v1488_v27, %v1490_v63  ;;  %v1379_v28 = vrot.slane %v25011_v1, 1  ;;  %v1492_v52 = vrot.slane %v25011_v1, 2 }
 0x1b9   : > { %v1446_v21 = vmax.f32 %v24965_v36, %v1378_v9  ;;  %v1238_v5 = vpop.f32.mrb[92].mxu1  ;;  %v1785_v23 = vmax.f32 %v1683_v2, %v1720_v58  ;;  %v1685_v26 = vmax.f32 %v24952_v60, %v1622_v33  ;;  %v1722_v55 = vsel %vm1703_vm5, %v1719_v56, %v1721_v25 }
 0x1ba   : > { %v1380_v47 = vsel %vm1349_vm1, %v1377_v4, %v1379_v28  ;;  %v1493_v27 = vsel %vm1462_vm2, %v1490_v63, %v1492_v52  ;;  %v1239_v14 = vadd.f32 %v1238_v5, %v1087_v22  ;;  %v21454_v46 = vpop.f32.mrb[93].mxu1  ;;  %v1786_v39 = vmax.f32 %v1684_v62, %v1722_v55  ;;  %21498 = vmatpush1.bf16.msra.mxu1 %v22241_v61  ;;  %v25071_v55 = vld [vmem:[%s31288_s2] ss:$0 sm:$0xff] }
 0x1bb   : > { %v25035_v41 = vmax.f32 %v1446_v21, %v1491_v13  ;;  %v1447_v36 = vmax.f32 %v1306_v30, %v1380_v47  ;;  %v1241_v2 = vpop.f32.mrb[94].mxu1  ;;  %v1806_v49 = vpack.c.bf16 %v1785_v23, %v1784_v50  ;;  %v1624_v60 = vsel %vm1601_vm4, %v1621_v7, %v1623_v8  ;;  %21491 = vmatprep.subr.bf16.mxu1 %v22246_v59 }
 0x1bc   : > { %v1308_v32 = vmax.f32 %v1239_v14, 0.0  ;;  %v1242_v34 = vadd.f32 %v1241_v2, %v1090_v53  ;;  %v21455_v17 = vpop.f32.mrb[95].mxu1  ;;  %v1686_v31 = vmax.f32 %v24959_v10, %v1624_v60  ;;  %v1098_v10 = vadd.f32 %v24813_v3, %v24836_v45 }
 0x1bd   : > { %v25042_v18 = vmax.f32 %v1447_v36, %v1493_v27  ;;  %1941 = vmatpush1.bf16.msra.mxu0 %v1806_v49  ;;  %v1723_v50 = vrot.slane %v25035_v41, 6  ;;  %v1625_v54 = vrot.slane %v25035_v41, 7  ;;  %v1103_v59 = vadd.f32 %v25071_v55, %v24815_v6 }
 0x1be   : > { %v1381_v37 = vrot.slane %v1308_v32, 1  ;;  %v1494_v30 = vrot.slane %v1308_v32, 2  ;;  %v1309_v44 = vmax.f32 %v1242_v34, 0.0  ;;  %1942 = vmatprep.subr.bf16.mxu0 %v31310_v35  ;;  %21499 = vmatpush1.bf16.msra.mxu1 %v22244_v48 }
 0x1bf   : > { %v1724_v12 = vsel %vm1703_vm5, %v1721_v25, %v1723_v50  ;;  %v1626_v62 = vsel %vm1601_vm4, %v1623_v8, %v1625_v54  ;;  %v1725_v43 = vrot.slane %v25042_v18, 6  ;;  %v1627_v0 = vrot.slane %v25042_v18, 7 }
 0x1c0   : > { %v1382_v22 = vsel %vm1349_vm1, %v1379_v28, %v1381_v37  ;;  %v1495_v56 = vsel %vm1462_vm2, %v1492_v52, %v1494_v30  ;;  %v1383_v7 = vrot.slane %v1309_v44, 1  ;;  %v1496_v16 = vrot.slane %v1309_v44, 2 }
 0x1c1   : > { %v1448_v4 = vmax.f32 %v25011_v1, %v1382_v22  ;;  %v1246_v3 = vpop.f32.mrb[96].mxu1  ;;  %v1787_v45 = vmax.f32 %v1685_v26, %v1724_v12  ;;  %v1687_v63 = vmax.f32 %v24995_v51, %v1626_v62  ;;  %v1726_v53 = vsel %vm1703_vm5, %v1723_v50, %v1725_v43 }
 0x1c2   : > { %v1384_v58 = vsel %vm1349_vm1, %v1381_v37, %v1383_v7  ;;  %v1497_v33 = vsel %vm1462_vm2, %v1494_v30, %v1496_v16  ;;  %v1247_v25 = vadd.f32 %v1246_v3, %v1095_v40  ;;  %v21458_v8 = vpop.f32.mrb[97].mxu1  ;;  %v1788_v9 = vmax.f32 %v1686_v31, %v1726_v53 }
 0x1c3   : > { %v25062_v13 = vmax.f32 %v1448_v4, %v1495_v56  ;;  %v1449_v28 = vmax.f32 %v1308_v32, %v1384_v58  ;;  %v1249_v52 = vpop.f32.mrb[98].mxu1  ;;  %v1807_v61 = vpack.c.bf16 %v1787_v45, %v1786_v39  ;;  %v1628_v1 = vsel %vm1601_vm4, %v1625_v54, %v1627_v0 }
 0x1c4   : > { %v1310_v21 = vmax.f32 %v1247_v25, 0.0  ;;  %v1250_v5 = vadd.f32 %v1249_v52, %v1098_v10  ;;  %v21459_v23 = vpop.f32.mrb[99].mxu1  ;;  %v1688_v51 = vmax.f32 %v25002_v57, %v1628_v1  ;;  %v1106_v57 = vadd.f32 %v25071_v55, %v24817_v11 }
 0x1c5   : > { %v25066_v26 = vmax.f32 %v1449_v28, %v1497_v33  ;;  %1943 = vmatpush1.bf16.msra.mxu0 %v1807_v61  ;;  %v1727_v47 = vrot.slane %v25062_v13, 6  ;;  %v1629_v27 = vrot.slane %v25062_v13, 7  ;;  %v1111_v3 = vadd.f32 %v25071_v55, %v24819_v15 }
 0x1c6   : > { %v1385_v14 = vrot.slane %v1310_v21, 1  ;;  %v1498_v46 = vrot.slane %v1310_v21, 2  ;;  %v1311_v39 = vmax.f32 %v1250_v5, 0.0  ;;  %1944 = vmatprep.subr.bf16.mxu0 %v31310_v35  ;;  %v1114_v25 = vadd.f32 %v25071_v55, %v24821_v19 }
 0x1c7   : > { %v1728_v36 = vsel %vm1703_vm5, %v1725_v43, %v1727_v47  ;;  %v1630_v2 = vsel %vm1601_vm4, %v1627_v0, %v1629_v27  ;;  %v1729_v49 = vrot.slane %v25066_v26, 6  ;;  %v1631_v6 = vrot.slane %v25066_v26, 7 }
 0x1c8   : > { %v1386_v60 = vsel %vm1349_vm1, %v1383_v7, %v1385_v14  ;;  %v1499_v32 = vsel %vm1462_vm2, %v1496_v16, %v1498_v46  ;;  %v1387_v34 = vrot.slane %v1311_v39, 1  ;;  %v1500_v17 = vrot.slane %v1311_v39, 2 }
 0x1c9   : > { %v1450_v31 = vmax.f32 %v1309_v44, %v1386_v60  ;;  %v1254_v48 = vpop.f32.mrb[100].mxu1  ;;  %v1789_v40 = vmax.f32 %v1687_v63, %v1728_v36  ;;  %v1689_v11 = vmax.f32 %v25035_v41, %v1630_v2  ;;  %v1730_v50 = vsel %vm1703_vm5, %v1727_v47, %v1729_v49 }
 0x1ca   : > { %v1388_v54 = vsel %vm1349_vm1, %v1385_v14, %v1387_v34  ;;  %v1501_v37 = vsel %vm1462_vm2, %v1498_v46, %v1500_v17  ;;  %v1255_v30 = vadd.f32 %v1254_v48, %v1103_v59  ;;  %v21462_v10 = vpop.f32.mrb[101].mxu1  ;;  %v1790_v12 = vmax.f32 %v1688_v51, %v1730_v50 }
 0x1cb   : > { %v25090_v62 = vmax.f32 %v1450_v31, %v1499_v32  ;;  %v1451_v43 = vmax.f32 %v1310_v21, %v1388_v54  ;;  %v1257_v0 = vpop.f32.mrb[102].mxu1  ;;  %v1808_v22 = vpack.c.bf16 %v1789_v40, %v1788_v9  ;;  %v1632_v44 = vsel %vm1601_vm4, %v1629_v27, %v1631_v6 }
 0x1cc   : > { %v1312_v56 = vmax.f32 %v1255_v30, 0.0  ;;  %v1258_v7 = vadd.f32 %v1257_v0, %v1106_v57  ;;  %v21463_v16 = vpop.f32.mrb[103].mxu1  ;;  %v1690_v41 = vmax.f32 %v25042_v18, %v1632_v44  ;;  %v1122_v54 = vadd.f32 %v25071_v55, %v24825_v29 }
 0x1cd   : > { %v25094_v4 = vmax.f32 %v1451_v43, %v1501_v37  ;;  %1945 = vmatpush1.bf16.msra.mxu0 %v1808_v22  ;;  %v1731_v45 = vrot.slane %v25090_v62, 6  ;;  %v1633_v63 = vrot.slane %v25090_v62, 7 }
 0x1ce   : > { %v1389_v53 = vrot.slane %v1312_v56, 1  ;;  %v1502_v58 = vrot.slane %v1312_v56, 2  ;;  %v1313_v33 = vmax.f32 %v1258_v7, 0.0  ;;  %1946 = vmatprep.subr.bf16.mxu0 %v31310_v35 }
 0x1cf   : > { %v1732_v18 = vsel %vm1703_vm5, %v1729_v49, %v1731_v45  ;;  %v1634_v8 = vsel %vm1601_vm4, %v1631_v6, %v1633_v63  ;;  %v1733_v9 = vrot.slane %v25094_v4, 6  ;;  %v1635_v15 = vrot.slane %v25094_v4, 7 }
 0x1d0   : > { %v1390_v28 = vsel %vm1349_vm1, %v1387_v34, %v1389_v53  ;;  %v1503_v52 = vsel %vm1462_vm2, %v1500_v17, %v1502_v58  ;;  %v1391_v61 = vrot.slane %v1313_v33, 1  ;;  %v1504_v1 = vrot.slane %v1313_v33, 2 }
 0x1d1   : > { %v1452_v21 = vmax.f32 %v1311_v39, %v1390_v28  ;;  %v1262_v5 = vpop.f32.mrb[104].mxu1  ;;  %v1791_v23 = vmax.f32 %v1689_v11, %v1732_v18  ;;  %v1691_v19 = vmax.f32 %v25062_v13, %v1634_v8  ;;  %v1734_v51 = vsel %vm1703_vm5, %v1731_v45, %v1733_v9 }
 0x1d2   : > { %v1392_v59 = vsel %vm1349_vm1, %v1389_v53, %v1391_v61  ;;  %v1505_v47 = vsel %vm1462_vm2, %v1502_v58, %v1504_v1  ;;  %v1263_v27 = vadd.f32 %v1262_v5, %v1111_v3  ;;  %v21466_v14 = vpop.f32.mrb[105].mxu1  ;;  %v1792_v46 = vmax.f32 %v1690_v41, %v1734_v51 }
 0x1d3   : > { %v25113_v57 = vmax.f32 %v1452_v21, %v1503_v52  ;;  %v1453_v36 = vmax.f32 %v1312_v56, %v1392_v59  ;;  %v1265_v2 = vpop.f32.mrb[106].mxu1  ;;  %v1809_v49 = vpack.c.bf16 %v1791_v23, %v1790_v12  ;;  %v1636_v39 = vsel %vm1601_vm4, %v1633_v63, %v1635_v15 }
 0x1d4   : > { %v1314_v6 = vmax.f32 %v1263_v27, 0.0  ;;  %v1266_v60 = vadd.f32 %v1265_v2, %v1114_v25  ;;  %v21467_v32 = vpop.f32.mrb[107].mxu1  ;;  %v1692_v13 = vmax.f32 %v25066_v26, %v1636_v39  ;;  %v1119_v17 = vadd.f32 %v25071_v55, %v24823_v24 }
 0x1d5   : > { %v25117_v34 = vmax.f32 %v1453_v36, %v1505_v47  ;;  %1947 = vmatpush1.bf16.msra.mxu0 %v1809_v49  ;;  %v1735_v31 = vrot.slane %v25113_v57, 6  ;;  %v1637_v48 = vrot.slane %v25113_v57, 7  ;;  %v1127_v52 = vadd.f32 %v25071_v55, %v24827_v20 }
 0x1d6   : > { %v1393_v40 = vrot.slane %v1314_v6, 1  ;;  %v1506_v11 = vrot.slane %v1314_v6, 2  ;;  %v1315_v50 = vmax.f32 %v1266_v60, 0.0  ;;  %1948 = vmatprep.subr.bf16.mxu0 %v31310_v35 }
 0x1d7   : > { %v1736_v26 = vsel %vm1703_vm5, %v1733_v9, %v1735_v31  ;;  %v1638_v37 = vsel %vm1601_vm4, %v1635_v15, %v1637_v48  ;;  %v1737_v30 = vrot.slane %v25117_v34, 6  ;;  %v1639_v24 = vrot.slane %v25117_v34, 7 }
 0x1d8   : > { %v1394_v10 = vsel %vm1349_vm1, %v1391_v61, %v1393_v40  ;;  %v1507_v12 = vsel %vm1462_vm2, %v1504_v1, %v1506_v11  ;;  %v1395_v43 = vrot.slane %v1315_v50, 1  ;;  %v1508_v0 = vrot.slane %v1315_v50, 2 }
 0x1d9   : > { %v1454_v22 = vmax.f32 %v1313_v33, %v1394_v10  ;;  %v1270_v44 = vpop.f32.mrb[108].mxu1  ;;  %v1793_v56 = vmax.f32 %v1691_v19, %v1736_v26  ;;  %v1693_v29 = vmax.f32 %v25090_v62, %v1638_v37  ;;  %v1738_v7 = vsel %vm1703_vm5, %v1735_v31, %v1737_v30 }
 0x1da   : > { %v1396_v16 = vsel %vm1349_vm1, %v1393_v40, %v1395_v43  ;;  %v1509_v41 = vsel %vm1462_vm2, %v1506_v11, %v1508_v0  ;;  %v1271_v3 = vadd.f32 %v1270_v44, %v1119_v17  ;;  %v21470_v45 = vpop.f32.mrb[109].mxu1  ;;  %v1794_v63 = vmax.f32 %v1692_v13, %v1738_v7 }
 0x1db   : > { %v25136_v53 = vmax.f32 %v1454_v22, %v1507_v12  ;;  %v1455_v58 = vmax.f32 %v1314_v6, %v1396_v16  ;;  %v1273_v25 = vpop.f32.mrb[110].mxu1  ;;  %v1810_v18 = vpack.c.bf16 %v1793_v56, %v1792_v46  ;;  %v1640_v33 = vsel %vm1601_vm4, %v1637_v48, %v1639_v24 }
 0x1dc   : > { %v1316_v8 = vmax.f32 %v1271_v3, 0.0  ;;  %v1274_v9 = vadd.f32 %v1273_v25, %v1122_v54  ;;  %v21471_v15 = vpop.f32.mrb[111].mxu1  ;;  %v1694_v62 = vmax.f32 %v25094_v4, %v1640_v33  ;;  %v1130_v19 = vadd.f32 %v25071_v55, %v24829_v38 }
 0x1dd   : > { %v25140_v28 = vmax.f32 %v1455_v58, %v1509_v41  ;;  %1949 = vmatpush1.bf16.msra.mxu0 %v1810_v18  ;;  %v1739_v61 = vrot.slane %v25136_v53, 6  ;;  %v1641_v1 = vrot.slane %v25136_v53, 7  ;;  %v1135_v22 = vadd.f32 %v25071_v55, %v24831_v42 }
 0x1de   : > { %v1397_v21 = vrot.slane %v1316_v8, 1  ;;  %v1510_v5 = vrot.slane %v1316_v8, 2  ;;  %v1317_v23 = vmax.f32 %v1274_v9, 0.0  ;;  %1950 = vmatprep.subr.bf16.mxu0 %v31310_v35 }
 0x1df   : > { %v1740_v4 = vsel %vm1703_vm5, %v1737_v30, %v1739_v61  ;;  %v1642_v51 = vsel %vm1601_vm4, %v1639_v24, %v1641_v1  ;;  %v1741_v59 = vrot.slane %v25140_v28, 6  ;;  %v1643_v20 = vrot.slane %v25140_v28, 7 }
 0x1e0   : > { %v1398_v47 = vsel %vm1349_vm1, %v1395_v43, %v1397_v21  ;;  %v1511_v27 = vsel %vm1462_vm2, %v1508_v0, %v1510_v5  ;;  %v1399_v14 = vrot.slane %v1317_v23, 1  ;;  %v1512_v46 = vrot.slane %v1317_v23, 2 }
 0x1e1   : > { %v1456_v36 = vmax.f32 %v1315_v50, %v1398_v47  ;;  %v1278_v2 = vpop.f32.mrb[112].mxu1  ;;  %v1795_v49 = vmax.f32 %v1693_v29, %v1740_v4  ;;  %v1695_v38 = vmax.f32 %v25113_v57, %v1642_v51  ;;  %v1742_v39 = vsel %vm1703_vm5, %v1739_v61, %v1741_v59 }
 0x1e2   : > { %v1400_v6 = vsel %vm1349_vm1, %v1397_v21, %v1399_v14  ;;  %v1513_v60 = vsel %vm1462_vm2, %v1510_v5, %v1512_v46  ;;  %v1279_v32 = vadd.f32 %v1278_v2, %v1127_v52  ;;  %v21474_v13 = vpop.f32.mrb[113].mxu1  ;;  %v1796_v17 = vmax.f32 %v1694_v62, %v1742_v39 }
 0x1e3   : > { %v25159_v31 = vmax.f32 %v1456_v36, %v1511_v27  ;;  %v1457_v48 = vmax.f32 %v1316_v8, %v1400_v6  ;;  %v1281_v40 = vpop.f32.mrb[114].mxu1  ;;  %v1811_v11 = vpack.c.bf16 %v1795_v49, %v1794_v63  ;;  %v1644_v50 = vsel %vm1601_vm4, %v1641_v1, %v1643_v20 }
 0x1e4   : > { %v1318_v54 = vmax.f32 %v1279_v32, 0.0  ;;  %v1282_v26 = vadd.f32 %v1281_v40, %v1130_v19  ;;  %v21475_v37 = vpop.f32.mrb[115].mxu1  ;;  %v1696_v57 = vmax.f32 %v25117_v34, %v1644_v50  ;;  %v25188_v40 = vsel %vm1601_vm4, 65535, %v31310_v35  ;;  %v22214_v50 = vld [vmem:[%s31289_s3 + $0x14] ss:$8 sps:$4 sm:$0xff]  }
 0x1e5   : > { %v1572_v30 = vmax.f32 %v1457_v48, %v1513_v60  ;;  %1951 = vmatpush1.bf16.msra.mxu0 %v1811_v11  ;;  %v1743_v24 = vrot.slane %v25159_v31, 6  ;;  %v1645_v10 = vrot.slane %v25159_v31, 7  ;;  %31318 = vst [vmem:[#allocation3_spill] sm:$0xff] %v25188_v40  ;;  %v22216_v37 = vld [vmem:[%s31289_s3 + $0x10] ss:$8 sps:$4 sm:$0xff]  }
 0x1e6   : > { %v1401_v12 = vrot.slane %v1318_v54, 1  ;;  %v1514_v43 = vrot.slane %v1318_v54, 2  ;;  %v1319_v0 = vmax.f32 %v1282_v26, 0.0  ;;  %1952 = vmatprep.subr.bf16.mxu0 %v31310_v35  ;;  %v24497_v26 = vld [vmem:[%s31290_s4 + $0x80] ss:$8 sps:$4 sm:$0xff]  }
 0x1e7   : > { %v1744_v44 = vsel %vm1703_vm5, %v1741_v59, %v1743_v24  ;;  %v1646_v56 = vsel %vm1601_vm4, %v1643_v20, %v1645_v10  ;;  %v1745_v29 = vrot.slane %v1572_v30, 6  ;;  %v1647_v34 = vrot.slane %v1572_v30, 7 }
 0x1e8   : > { %v1402_v7 = vsel %vm1349_vm1, %v1399_v14, %v1401_v12  ;;  %v1515_v16 = vsel %vm1462_vm2, %v1512_v46, %v1514_v43  ;;  %v1403_v41 = vrot.slane %v1319_v0, 1  ;;  %v1516_v3 = vrot.slane %v1319_v0, 2 }
 0x1e9   : > { %v1458_v45 = vmax.f32 %v1317_v23, %v1402_v7  ;;  %v1286_v63 = vpop.f32.mrb[116].mxu1  ;;  %v1797_v58 = vmax.f32 %v1695_v38, %v1744_v44  ;;  %v1697_v25 = vmax.f32 %v25136_v53, %v1646_v56  ;;  %v1746_v42 = vsel %vm1703_vm5, %v1743_v24, %v1745_v29  ;;  %v24499_v24 = vld [vmem:[%s31290_s4 + $0x90] ss:$8 sps:$4 sm:$0xff]   ;;  %v24504_v56 = vld [vmem:[%s31290_s4 + $0xc4] ss:$8 sps:$4 sm:$0xff]  }
 0x1ea   : > { %v1404_v55 = vsel %vm1349_vm1, %v1401_v12, %v1403_v41  ;;  %v1517_v18 = vsel %vm1462_vm2, %v1514_v43, %v1516_v3  ;;  %v1287_v33 = vadd.f32 %v1286_v63, %v1135_v22  ;;  %v21478_v8 = vpop.f32.mrb[117].mxu1  ;;  %v1798_v61 = vmax.f32 %v1696_v57, %v1746_v42  ;;  %v24498_v57 = vld [vmem:[%s31290_s4 + $0x94] ss:$8 sps:$4 sm:$0xff]   ;;  %v24501_v12 = vld [vmem:[%s31290_s4 + $0xa0] ss:$8 sps:$4 sm:$0xff]  }
 0x1eb   : > { %v1573_v9 = vmax.f32 %v1458_v45, %v1515_v16  ;;  %v1459_v15 = vmax.f32 %v1318_v54, %v1404_v55  ;;  %v1289_v62 = vpop.f32.mrb[118].mxu1  ;;  %v1812_v52 = vpack.c.bf16 %v1797_v58, %v1796_v17  ;;  %v1648_v5 = vsel %vm1601_vm4, %v1645_v10, %v1647_v34  ;;  %v24496_v54 = vld [vmem:[%s31290_s4 + $0x84] ss:$8 sps:$4 sm:$0xff]   ;;  %v22219_v43 = vld [vmem:[%s31289_s3 + $0x20] ss:$8 sps:$4 sm:$0xff]  }
 0x1ec   : > { %v1320_v1 = vmax.f32 %v1287_v33, 0.0  ;;  %v21479_v21 = vpop.f32.mrb[119].mxu1  ;;  %v1698_v4 = vmax.f32 %v25140_v28, %v1648_v5  ;;  %v1460_v51 = vmax.f32 %v1319_v0, %v1403_v41  ;;  %v24500_v10 = vld [vmem:[%s31290_s4 + $0xa4] ss:$8 sps:$4 sm:$0xff]   ;;  %v24502_v0 = vld [vmem:[%s31290_s4 + $0xb4] ss:$8 sps:$4 sm:$0xff]  }
 0x1ed   : > { %v1649_v23 = vrot.slane %v1573_v9, 7  ;;  %v1574_v19 = vmax.f32 %v1459_v15, %v1517_v18  ;;  %1953 = vmatpush1.bf16.msra.mxu0 %v1812_v52  ;;  %v1747_v53 = vrot.slane %v1573_v9, 6  ;;  %v22220_v22 = vld [vmem:[%s31289_s3 + $0x34] ss:$8 sps:$4 sm:$0xff]   ;;  %v24503_v44 = vld [vmem:[%s31290_s4 + $0xb0] ss:$8 sps:$4 sm:$0xff]  }
 0x1ee   : > { %v1518_v59 = vrot.slane %v1320_v1, 2  ;;  %1954 = vmatprep.subr.bf16.mxu0 %v31310_v35  ;;  %v24506_v7 = vld [vmem:[%s31290_s4 + $0xd4] ss:$8 sps:$4 sm:$0xff]   ;;  %v22223_v16 = vld [vmem:[%s31289_s3 + $0x44] ss:$8 sps:$4 sm:$0xff]  }
 0x1ef   : > { %v1748_v20 = vsel %vm1703_vm5, %v1745_v29, %v1747_v53  ;;  %v1650_v47 = vsel %vm1601_vm4, %v1647_v34, %v1649_v23  ;;  %v1749_v27 = vrot.slane %v1574_v19, 6  ;;  %v1700_v14 = vmax.f32 %v1572_v30, %v1649_v23  ;;  %v22217_v30 = vld [vmem:[%s31289_s3 + $0x24] ss:$8 sps:$4 sm:$0xff]   ;;  %v24505_v29 = vld [vmem:[%s31290_s4 + $0xc0] ss:$8 sps:$4 sm:$0xff]  }
 0x1f0   : > { %v1519_v46 = vsel %vm1462_vm2, %v1516_v3, %v1518_v59  ;;  %v1799_v36 = vmax.f32 %v1697_v25, %v1748_v20  ;;  %v1699_v2 = vmax.f32 %v25159_v31, %v1650_v47  ;;  %v22211_v31 = vld [vmem:[%s31289_s3] ss:$8 sps:$4 sm:$0xff]   ;;  %v22222_v34 = vld [vmem:[%s31289_s3 + $0x30] ss:$8 sps:$4 sm:$0xff]   ;;  %v22226_v45 = vld [vmem:[%s31289_s3 + $0x54] ss:$8 sps:$4 sm:$0xff]  }
 0x1f1   : > { %v1575_v49 = vmax.f32 %v1460_v51, %v1519_v46  ;;  %v1750_v38 = vsel %vm1703_vm5, %v1747_v53, %v1749_v27  ;;  %v24507_v41 = vld [vmem:[%s31290_s4 + $0xd0] ss:$8 sps:$4 sm:$0xff]   ;;  %v22225_v3 = vld [vmem:[%s31289_s3 + $0x40] ss:$8 sps:$4 sm:$0xff]   ;;  %v22247_v58 = vld [vmem:[%s31289_s3 + $0x64] ss:$8 sps:$4 sm:$0xff]  }
 0x1f2   : > { %v1813_v39 = vpack.c.bf16 %v1799_v36, %v1798_v61  ;;  %v1800_v28 = vmax.f32 %v1698_v4, %v1750_v38  ;;  %v22228_v63 = vld [vmem:[%s31289_s3 + $0x50] ss:$8 sps:$4 sm:$0xff]   ;;  %v22249_v25 = vld [vmem:[%s31289_s3 + $0x60] ss:$8 sps:$4 sm:$0xff]   ;;  %v22252_v55 = vld [vmem:[%s31290_s4 + $0xe4] ss:$8 sps:$4 sm:$0xff]  }
 0x1f3   : > { %v1751_v6 = vrot.slane %v1575_v49, 6  ;;  %v22250_v42 = vld [vmem:[%s31290_s4 + $0xe0] ss:$8 sps:$4 sm:$0xff]   ;;  %v22253_v18 = vld [vmem:[%s31289_s3 + $0x74] ss:$8 sps:$4 sm:$0x1f]   ;;  %21492 = vmatprep.subr.bf16.mxu1 %v22252_v55 }
 0x1f4   : > { %1955 = vmatpush1.bf16.msra.mxu0 %v1813_v39  ;;  %21500 = vmatpush1.bf16.msra.mxu1 %v22250_v42  ;;  %v22255_v33 = vld [vmem:[%s31289_s3 + $0x70] ss:$8 sps:$4 sm:$0x1f]   ;;  %v22258_v9 = vld [vmem:[%s31290_s4 + $0xf4] ss:$8 sps:$4 sm:$0xff]  }
 0x1f5   : > { %1956 = vmatprep.subr.bf16.mxu0 %v31310_v35  ;;  %v1752_v60 = vsel %vm1703_vm5, %v1749_v27, %v1751_v6  ;;  %v1802_v32 = vmax.f32 %v1700_v14, %v1751_v6  ;;  %v22256_v8 = vld [vmem:[%s31290_s4 + $0xf0] ss:$8 sps:$4 sm:$0xff]   ;;  %21493 = vmatprep.subr.bf16.mxu1 %v22258_v9  ;;  %v22261_v15 = vld [vmem:[%s31290_s4 + $0x4] ss:$8 sps:$4 sm:$0xff]  }
 0x1f6   : > { %v1801_v13 = vmax.f32 %v1699_v2, %v1752_v60 }
 0x1f7   : > { %v1815_v48 = vpack.c.bf16 %v1802_v32, %v1802_v32 }
 0x1f8   : > { %v1814_v17 = vpack.c.bf16 %v1801_v13, %v1800_v28  ;;  %21501 = vmatpush1.bf16.msra.mxu1 %v22256_v8 }
 0x1f9   : > { %v1932_v11 = vand.u32 %v25188_v40, %v1815_v48  ;;  %2360 = vmatprep.subr.bf16.mxu1 %v22261_v15 }
 0x1fa   : > { %1957 = vmatpush1.bf16.msra.mxu0 %v1814_v17 }
 0x1fb   : > { %1958 = vmatprep.subr.bf16.mxu0 %v31310_v35 }
 0x1fe   : > { %1959 = vmatpush1.bf16.msra.mxu0 %v1932_v11 }
 0x1ff   : > { %2197 = vmatprep.subr.bf16.mxu0 %v24496_v54 }
 0x201   : > { %1967 = vmatmul.mubr.bf16.vlgmr.msra.gmra.mrb[0].mxu0 %v22211_v31 }
 0x202   : > { %17965 = vmatprep.mubr.msk.bf16.mxu0 %vm1904_vm3, %v22214_v50  ;;  %2198 = vmatpush1.bf16.msra.mxu0 %v24497_v26 }
 0x203   : > { %2199 = vmatprep.subr.bf16.mxu0 %v24498_v57 }
 0x206   : > { %2200 = vmatpush1.bf16.msra.mxu0 %v24499_v24 }
 0x207   : > { %2201 = vmatprep.subr.bf16.mxu0 %v24500_v10 }
 0x209   : > { %1975 = vmatmul.mubr.bf16.gmra.mrb[4].mxu0 %v22216_v37 }
 0x20a   : > { %17966 = vmatprep.mubr.msk.bf16.mxu0 %vm1904_vm3, %v22217_v30  ;;  %2202 = vmatpush1.bf16.msra.mxu0 %v24501_v12 }
 0x20b   : > { %2203 = vmatprep.subr.bf16.mxu0 %v24502_v0 }
 0x20e   : > { %2204 = vmatpush1.bf16.msra.mxu0 %v24503_v44 }
 0x20f   : > { %2205 = vmatprep.subr.bf16.mxu0 %v24504_v56 }
 0x211   : > { %1983 = vmatmul.mubr.bf16.gmra.mrb[8].mxu0 %v22219_v43 }
 0x212   : > { %17967 = vmatprep.mubr.msk.bf16.mxu0 %vm1904_vm3, %v22220_v22  ;;  %2206 = vmatpush1.bf16.msra.mxu0 %v24505_v29 }
 0x213   : > { %2207 = vmatprep.subr.bf16.mxu0 %v24506_v7 }
 0x216   : > { %2208 = vmatpush1.bf16.msra.mxu0 %v24507_v41 }
 0x217   : > { %2209 = vmatprep.subr.bf16.mxu0 %v22252_v55 }
 0x219   : > { %1991 = vmatmul.mubr.bf16.gmra.mrb[12].mxu0 %v22222_v34 }
 0x21a   : > { %17968 = vmatprep.mubr.msk.bf16.mxu0 %vm1904_vm3, %v22223_v16  ;;  %2210 = vmatpush1.bf16.msra.mxu0 %v22250_v42 }
 0x21b   : > { %2211 = vmatprep.subr.bf16.mxu0 %v22258_v9 }
 0x21e   : > { %2212 = vmatpush1.bf16.msra.mxu0 %v22256_v8 }
 0x221   : > { %1999 = vmatmul.mubr.bf16.gmra.mrb[16].mxu0 %v22225_v3 }
 0x222   : > { %17969 = vmatprep.mubr.msk.bf16.mxu0 %vm1904_vm3, %v22226_v45 }
 0x229   : > { %2007 = vmatmul.mubr.bf16.gmra.mrb[20].mxu0 %v22228_v63 }
 0x22a   : > { %17970 = vmatprep.mubr.msk.bf16.mxu0 %vm1904_vm3, %v22247_v58 }
 0x231   : > { %2015 = vmatmul.mubr.bf16.gmra.mrb[24].mxu0 %v22249_v25 }
 0x232   : > { %17971 = vmatprep.mubr.msk.bf16.mxu0 %vm1904_vm3, %v22253_v18  ;;  %vm7790_vm3 = vcmask 400384  }
 0x239   : > { %2023 = vmatmul.mubr.bf16.gmra.mrb[28].mxu0 %v22255_v33 }
 0x23a   : > { %2229 = vmatprep.mubr.bf16.mxu0 %v31310_v35 }
 0x2d4   : > { %v1968_v62 = vpop.f32.mrb[0].mxu0 }
 0x2d5   : > { %v1970_v52 = vpop.f32.mrb[1].mxu0 }
 0x2d6   : > { %v1971_v61 = vpop.f32.mrb[2].mxu0 }
 0x2d7   : > { %v25296_v1 = vpack.c.bf16 %v1971_v61, %v1968_v62  ;;  %v1973_v21 = vpop.f32.mrb[3].mxu0 }
 0x2d9   : > { %v25299_v5 = vshrl.u32 %v25296_v1, 16  ;;  %v2076_v23 = vshll.u32 %v25296_v1, 16  ;;  %v2466_v28 = vrot.slane %v25296_v1, 1  ;;  %v2906_v6 = vrot.slane %v25296_v1, 2 }
 0x2da   : > { %v3356_v60 = vrot.slane %v25296_v1, 6  ;;  %v3802_v50 = vrot.slane %v25296_v1, 7 }
 0x2db   : > { %v2681_v19 = vrot.slane %v25299_v5, 1  ;;  %v2682_v53 = vrot.slane %v2076_v23, 2  ;;  %v3121_v4 = vrot.slane %v25299_v5, 5  ;;  %v3122_v59 = vrot.slane %v2076_v23, 6 }
 0x2dc   : > { %v1976_v51 = vpop.f32.mrb[4].mxu0  ;;  %v3573_v20 = vrot.slane %v25299_v5, 6  ;;  %v3574_v47 = vrot.slane %v2076_v23, 7  ;;  %v2078_v36 = vrot.slane %v2076_v23, 1  ;;  %v4019_v3 = vrot.slane %v25299_v5, 7 }
 0x2dd   : > { %v1978_v27 = vpop.f32.mrb[5].mxu0  ;;  %v2683_v14 = vor.u32 %v2682_v53, %v2681_v19  ;;  %v3123_v2 = vor.u32 %v3122_v59, %v3121_v4  ;;  %v22259_v53 = vld [vmem:[%s31290_s4] ss:$8 sps:$4 sm:$0xff]  }
 0x2de   : > { %v1979_v46 = vpop.f32.mrb[6].mxu0  ;;  %v3575_v49 = vor.u32 %v3574_v47, %v3573_v20  ;;  %v2079_v31 = vor.u32 %v2078_v36, %v25299_v5  ;;  %v22264_v47 = vld [vmem:[%s31290_s4 + $0x14] ss:$8 sps:$4 sm:$0xff]  }
 0x2df   : > { %v25305_v38 = vpack.c.bf16 %v1979_v46, %v1976_v51  ;;  %v1981_v39 = vpop.f32.mrb[7].mxu0 }
 0x2e1   : > { %v25311_v32 = vshll.u32 %v25305_v38, 16  ;;  %v25314_v13 = vshrl.u32 %v25305_v38, 16  ;;  %v2467_v17 = vrot.slane %v25305_v38, 1  ;;  %v2907_v48 = vrot.slane %v25305_v38, 2 }
 0x2e2   : > { %v3357_v11 = vrot.slane %v25305_v38, 6  ;;  %v3803_v54 = vrot.slane %v25305_v38, 7  ;;  %v4682_v40 = vrot.slane %v25305_v38, 4 }
 0x2e3   : > { %v2083_v26 = vrot.slane %v25311_v32, 1  ;;  %v25324_v37 = vsel %vm1349_vm1, %v2466_v28, %v2467_v17  ;;  %v2684_v57 = vrot.slane %v25314_v13, 1  ;;  %v2685_v30 = vrot.slane %v25311_v32, 2 }
 0x2e4   : > { %v1984_v24 = vpop.f32.mrb[8].mxu0  ;;  %v25329_v10 = vsel %vm1462_vm2, %v2906_v6, %v2907_v48  ;;  %v3124_v12 = vrot.slane %v25314_v13, 5  ;;  %v3125_v43 = vrot.slane %v25311_v32, 6  ;;  %v25334_v0 = vsel %vm1703_vm5, %v3356_v60, %v3357_v11 }
 0x2e5   : > { %v1986_v22 = vpop.f32.mrb[9].mxu0  ;;  %v2084_v44 = vsel %vm2072_vm6, %v2079_v31, %v2083_v26  ;;  %v2686_v56 = vor.u32 %v2685_v30, %v2684_v57  ;;  %v3576_v29 = vrot.slane %v25314_v13, 6  ;;  %v3577_v16 = vrot.slane %v25311_v32, 7 }
 0x2e6   : > { %v1987_v34 = vpop.f32.mrb[10].mxu0  ;;  %2230 = vmatmul.mubr.bf16.vlgmr.msra.gmra.mrb[32].mxu0 %v2084_v44  ;;  %v3126_v7 = vor.u32 %v3125_v43, %v3124_v12  ;;  %v25340_v41 = vsel %vm1601_vm4, %v3802_v50, %v3803_v54  ;;  %v2087_v58 = vor.u32 %v25314_v13, %v2083_v26  ;;  %v4020_v42 = vrot.slane %v25314_v13, 7  ;;  %v22262_v26 = vld [vmem:[%s31290_s4 + $0x10] ss:$8 sps:$4 sm:$0xff]  }
 0x2e7   : > { %v25343_v45 = vpack.c.bf16 %v1987_v34, %v1984_v24  ;;  %v1989_v63 = vpop.f32.mrb[11].mxu0  ;;  %v25347_v25 = vsel %vm2680_vm7, %v2683_v14, %v2686_v56  ;;  %7835 = vmatprep.mubr.bf16.mxu0 %v31310_v35  ;;  %v3578_v18 = vor.u32 %v3577_v16, %v3576_v29  ;;  %v4456_v33 = vrot.slane %v25314_v13, 3  ;;  %v22267_v24 = vld [vmem:[%s31290_s4 + $0x24] ss:$8 sps:$4 sm:$0xff]   ;;  %v22265_v16 = vld [vmem:[%s31290_s4 + $0x20] ss:$8 sps:$4 sm:$0xff]  }
 0x2e8   : > { %v25352_v55 = vsel %vm3120_vm8, %v3123_v2, %v3126_v7  ;;  %v4457_v8 = vrot.slane %v25311_v32, 4  ;;  %v4021_v23 = vor.u32 %v4020_v42, %v25311_v32 }
 0x2e9   : > { %v25357_v9 = vshll.u32 %v25343_v45, 16  ;;  %v25360_v15 = vshrl.u32 %v25343_v45, 16  ;;  %v31307_v62 = vrot.slane %v25343_v45, 1  ;;  %v31305_v52 = vrot.slane %v25343_v45, 2 }
 0x2ea   : > { %v31304_v61 = vrot.slane %v25343_v45, 6  ;;  %v25366_v21 = vsel %vm3572_vm9, %v3575_v49, %v3578_v18  ;;  %v31303_v5 = vrot.slane %v25343_v45, 7  ;;  %v25407_v31 = vsel %vm4018_vm10, %v4019_v3, %v4021_v23 }
 0x2eb   : > { %v2091_v19 = vrot.slane %v25357_v9, 1  ;;  %v25379_v4 = vsel %vm1349_vm1, %v2467_v17, %v31307_v62  ;;  %v2688_v51 = vrot.slane %v25360_v15, 1  ;;  %v2689_v59 = vrot.slane %v25357_v9, 2 }
 0x2ec   : > { %v1992_v20 = vpop.f32.mrb[12].mxu0  ;;  %v25389_v27 = vsel %vm1462_vm2, %v2907_v48, %v31305_v52  ;;  %v3128_v14 = vrot.slane %v25360_v15, 5  ;;  %v3129_v46 = vrot.slane %v25357_v9, 6  ;;  %v25396_v36 = vsel %vm1703_vm5, %v3357_v11, %v31304_v61 }
 0x2ed   : > { %v1994_v2 = vpop.f32.mrb[13].mxu0  ;;  %v2092_v49 = vsel %vm2072_vm6, %v2087_v58, %v2091_v19  ;;  %v2690_v39 = vor.u32 %v2689_v59, %v2688_v51  ;;  %v3580_v28 = vrot.slane %v25360_v15, 6  ;;  %v3581_v17 = vrot.slane %v25357_v9, 7 }
 0x2ee   : > { %v1995_v6 = vpop.f32.mrb[14].mxu0  ;;  %2240 = vmatmul.mubr.bf16.vlgmr.msra.gmra.mrb[120].mxu1 %v2092_v49  ;;  %v3130_v60 = vor.u32 %v3129_v46, %v3128_v14  ;;  %v25404_v48 = vsel %vm1601_vm4, %v3803_v54, %v31303_v5  ;;  %v4023_v30 = vrot.slane %v25360_v15, 7  ;;  %v25419_v54 = vor.u32 %v4457_v8, %v4456_v33 }
 0x2ef   : > { %v25409_v11 = vpack.c.bf16 %v1995_v6, %v1992_v20  ;;  %v1997_v50 = vpop.f32.mrb[15].mxu0  ;;  %2361 = vmatpush1.bf16.msra.mxu1 %v22259_v53  ;;  %2249 = vmatprep.mubr.bf16.mxu1 %v31310_v35  ;;  %v25416_v57 = vsel %vm2680_vm7, %v2686_v56, %v2690_v39  ;;  %v3582_v43 = vor.u32 %v3581_v17, %v3580_v28  ;;  %v31302_v58 = vrot.slane %v25343_v45, 3  ;;  %v22268_v6 = vld [vmem:[%s31290_s4 + $0x30] ss:$8 sps:$4 sm:$0xff]  }
 0x2f0   : > { %2362 = vmatprep.subr.bf16.mxu1 %v22264_v47  ;;  %v25425_v12 = vsel %vm3120_vm8, %v3126_v7, %v3130_v60  ;;  %v2095_v56 = vor.u32 %v25360_v15, %v2091_v19  ;;  %v4024_v34 = vor.u32 %v4023_v30, %v25357_v9  ;;  %v4241_v20 = vrot.slane %v25305_v38, 3 }
 0x2f1   : > { %v25428_v22 = vshll.u32 %v25409_v11, 16  ;;  %v25431_v44 = vshrl.u32 %v25409_v11, 16  ;;  %v25435_v29 = vsel %vm3572_vm9, %v3578_v18, %v3582_v43  ;;  %v22270_v18 = vld [vmem:[%s31290_s4 + $0x34] ss:$8 sps:$4 sm:$0xff]  }
 0x2f2   : > { %v25464_v2 = vsel %vm4018_vm10, %v4020_v42, %v4024_v34  ;;  %v25480_v42 = vsel %vm4240_vm11, %v4241_v20, %v31302_v58  ;;  %v4459_v20 = vrot.slane %v25360_v15, 3 }
 0x2f3   : > { %2363 = vmatpush1.bf16.msra.mxu1 %v22262_v26  ;;  %v2099_v7 = vrot.slane %v25428_v22, 1  ;;  %v2692_v3 = vrot.slane %v25431_v44, 1  ;;  %v2693_v63 = vrot.slane %v25428_v22, 2  ;;  %v3132_v8 = vrot.slane %v25431_v44, 5  ;;  %31320 = vst [vmem:[#allocation5_spill] sm:$0xff] %v25480_v42 }
 0x2f4   : > { %v2000_v33 = vpop.f32.mrb[16].mxu0  ;;  %2364 = vmatprep.subr.bf16.mxu1 %v22267_v24  ;;  %v3133_v23 = vrot.slane %v25428_v22, 6  ;;  %v3584_v59 = vrot.slane %v25431_v44, 6  ;;  %v3585_v46 = vrot.slane %v25428_v22, 7  ;;  %v4026_v50 = vrot.slane %v25431_v44, 7 }
 0x2f5   : > { %v2002_v19 = vpop.f32.mrb[17].mxu0  ;;  %v25453_v53 = vsel %vm2072_vm6, %v2095_v56, %v2099_v7  ;;  %v25455_v51 = vor.u32 %v2693_v63, %v2692_v3  ;;  %v22273_v26 = vld [vmem:[%s31290_s4 + $0x44] ss:$8 sps:$4 sm:$0xff]   ;;  %v4899_v42 = vrot.slane %v25314_v13, 4  ;;  %v4900_v13 = vrot.slane %v25311_v32, 5 }
 0x2f6   : > { %31319 = vst [vmem:[#allocation4_spill] sm:$0xff] %v25453_v53  ;;  %v2003_v47 = vpop.f32.mrb[18].mxu0  ;;  %2250 = vmatmul.mubr.bf16.gmra.mrb[124].mxu1 %v25453_v53  ;;  %v3134_v14 = vor.u32 %v3133_v23, %v3132_v8  ;;  %v3586_v56 = vor.u32 %v3585_v46, %v3584_v59  ;;  %v4027_v63 = vor.u32 %v4026_v50, %v25428_v22  ;;  %v22286_v32 = vld [vmem:[%s31290_s4 + $0x110] ss:$8 sps:$4 sm:$0xff]  }
 0x2f7   : > { %v25466_v49 = vpack.c.bf16 %v2003_v47, %v2000_v33  ;;  %v2005_v28 = vpop.f32.mrb[19].mxu0  ;;  %2365 = vmatpush1.bf16.msra.mxu1 %v22265_v16  ;;  %2259 = vmatprep.mubr.bf16.mxu1 %v31310_v35  ;;  %v25474_v17 = vsel %vm2680_vm7, %v2690_v39, %v25455_v51  ;;  %v22271_v16 = vld [vmem:[%s31290_s4 + $0x40] ss:$8 sps:$4 sm:$0xff]  }
 0x2f8   : > { %2366 = vmatprep.subr.bf16.mxu1 %v22270_v18  ;;  %v25486_v24 = vsel %vm3120_vm8, %v3130_v60, %v3134_v14  ;;  %v25498_v3 = vsel %vm3572_vm9, %v3582_v43, %v3586_v56  ;;  %v2103_v60 = vor.u32 %v25431_v44, %v2099_v7  ;;  %v22276_v18 = vld [vmem:[%s31290_s4 + $0x54] ss:$8 sps:$4 sm:$0xff]   ;;  %v4460_v7 = vrot.slane %v25357_v9, 4 }
 0x2f9   : > { %v25489_v34 = vshll.u32 %v25466_v49, 16  ;;  %v25492_v39 = vshrl.u32 %v25466_v49, 16  ;;  %v25525_v61 = vsel %vm4018_vm10, %v4023_v30, %v4027_v63 }
 0x2fb   : > { %2367 = vmatpush1.bf16.msra.mxu1 %v22268_v6  ;;  %v2107_v33 = vrot.slane %v25489_v34, 1  ;;  %v2696_v8 = vrot.slane %v25492_v39, 1  ;;  %v2697_v23 = vrot.slane %v25489_v34, 2  ;;  %v3136_v43 = vrot.slane %v25492_v39, 5 }
 0x2fc   : > { %v2008_v19 = vpop.f32.mrb[20].mxu0  ;;  %2368 = vmatprep.subr.bf16.mxu1 %v22273_v26  ;;  %v3137_v59 = vrot.slane %v25489_v34, 6  ;;  %v3588_v6 = vrot.slane %v25492_v39, 6  ;;  %v3589_v5 = vrot.slane %v25489_v34, 7 }
 0x2fd   : > { %v2010_v47 = vpop.f32.mrb[21].mxu0  ;;  %v25513_v46 = vsel %vm2072_vm6, %v2103_v60, %v2107_v33  ;;  %v25515_v28 = vor.u32 %v2697_v23, %v2696_v8  ;;  %v22274_v60 = vld [vmem:[%s31290_s4 + $0x50] ss:$8 sps:$4 sm:$0xff]   ;;  %v4029_v23 = vrot.slane %v25492_v39, 7 }
 0x2fe   : > { %31321 = vst [vmem:[#allocation6_spill] sm:$0xff] %v25513_v46  ;;  %v2011_v58 = vpop.f32.mrb[22].mxu0  ;;  %2260 = vmatmul.mubr.bf16.gmra.mrb[128].mxu1 %v25513_v46  ;;  %v25519_v26 = vor.u32 %v3137_v59, %v3136_v43  ;;  %v22279_v43 = vld [vmem:[%s31290_s4 + $0x64] ss:$8 sps:$4 sm:$0xff]   ;;  %v22277_v59 = vld [vmem:[%s31290_s4 + $0x60] ss:$8 sps:$4 sm:$0xff]  }
 0x2ff   : > { %v25527_v47 = vpack.c.bf16 %v2011_v58, %v2008_v19  ;;  %2369 = vmatpush1.bf16.msra.mxu1 %v22271_v16  ;;  %2269 = vmatprep.mubr.bf16.mxu1 %v31310_v35  ;;  %v2013_v8 = vpop.f32.mrb[23].mxu0  ;;  %v25541_v58 = vor.u32 %v3589_v5, %v3588_v6  ;;  %v4461_v16 = vor.u32 %v4460_v7, %v4459_v20 }
 0x300   : > { %2370 = vmatprep.subr.bf16.mxu1 %v22276_v18  ;;  %v25539_v30 = vsel %vm3120_vm8, %v3134_v14, %v25519_v26  ;;  %v4030_v18 = vor.u32 %v4029_v23, %v25489_v34  ;;  %v25558_v5 = vor.u32 %v25492_v39, %v2107_v33  ;;  %v4464_v8 = vrot.slane %v25428_v22, 4 }
 0x301   : > { %v25544_v63 = vshrl.u32 %v25527_v47, 16  ;;  %v25548_v19 = vsel %vm3572_vm9, %v3586_v56, %v25541_v58  ;;  %v25555_v14 = vshll.u32 %v25527_v47, 16  ;;  %v22282_v56 = vld [vmem:[%s31290_s4 + $0x74] ss:$8 sps:$4 sm:$0xff]   ;;  %v25569_v6 = vsel %vm4455_vm12, %v25419_v54, %v4461_v16 }
 0x302   : > { %v25564_v20 = vsel %vm4018_vm10, %v4026_v50, %v4030_v18  ;;  %31322 = vst [vmem:[#allocation7_spill] sm:$0xff] %v25569_v6  ;;  %v22280_v50 = vld [vmem:[%s31290_s4 + $0x70] ss:$8 sps:$4 sm:$0xff]   ;;  %v4468_v54 = vrot.slane %v25489_v34, 4 }
 0x303   : > { %2371 = vmatpush1.bf16.msra.mxu1 %v22274_v60  ;;  %v31306_v7 = vrot.slane %v25544_v63, 7  ;;  %v4463_v60 = vrot.slane %v25431_v44, 3  ;;  %v4471_v18 = vrot.slane %v25544_v63, 3  ;;  %v4472_v52 = vrot.slane %v25555_v14, 4 }
 0x304   : > { %2372 = vmatprep.subr.bf16.mxu1 %v22279_v43  ;;  %v4467_v43 = vrot.slane %v25492_v39, 3 }
 0x305   : > { %v4033_v33 = vor.u32 %v31306_v7, %v25555_v14  ;;  %v22285_v7 = vld [vmem:[%s31290_s4 + $0x104] ss:$8 sps:$4 sm:$0xff]   ;;  %v4465_v62 = vor.u32 %v4464_v8, %v4463_v60  ;;  %v25593_v53 = vor.u32 %v4472_v52, %v4471_v18  ;;  %v4906_v8 = vrot.slane %v25431_v44, 4 }
 0x306   : > { %2270 = vmatmul.mubr.bf16.gmra.mrb[132].mxu1 %v25558_v5  ;;  %v4469_v46 = vor.u32 %v4468_v54, %v4467_v43  ;;  %v4910_v43 = vrot.slane %v25492_v39, 4  ;;  %v31325_v54 = vmov 0  }
 0x307   : > { %2373 = vmatpush1.bf16.msra.mxu1 %v22277_v59  ;;  %2392 = vmatprep.mubr.bf16.mxu1 %v31310_v35  ;;  %v25589_v59 = vsel %vm4018_vm10, %v4029_v23, %v4033_v33  ;;  %v31314_v35 = vrot.slane %v25343_v45, 4  ;;  %31323 = vst [vmem:[#allocation8_spill] sm:$0xff] %v25593_v53  ;;  %v25596_v6 = vsel %vm4455_vm12, %v4461_v16, %v4465_v62  ;;  %v22283_v23 = vld [vmem:[%s31290_s4 + $0x100] ss:$8 sps:$4 sm:$0xff]   ;;  %v4902_v16 = vrot.slane %v25360_v15, 4 }
 0x308   : > { %2374 = vmatprep.subr.bf16.mxu1 %v22282_v56  ;;  %v25608_v60 = vsel %vm4455_vm12, %v4465_v62, %v4469_v46  ;;  %v25612_v52 = vsel %vm4455_vm12, %v4469_v46, %v25593_v53  ;;  %v4903_v33 = vrot.slane %v25357_v9, 5  ;;  %v4907_v62 = vrot.slane %v25428_v22, 5 }
 0x309   : > { %v25601_v56 = vsel %vm4681_vm13, %v4682_v40, %v31314_v35  ;;  %v22288_v40 = vld [vmem:[%s31290_s4 + $0x114] ss:$8 sps:$4 sm:$0xff]   ;;  %v4911_v46 = vrot.slane %v25489_v34, 5  ;;  %v4915_v53 = vrot.slane %v25555_v14, 5 }
 0x30a   : > { %31324 = vst [vmem:[#allocation9_spill] sm:$0xff] %v25601_v56  ;;  %v4908_v18 = vor.u32 %v4907_v62, %v4906_v8  ;;  %v4914_v56 = vrot.slane %v25544_v63, 4  ;;  %v5349_v62 = vrot.slane %v25555_v14, 1 }
 0x30b   : > { %2375 = vmatpush1.bf16.msra.mxu1 %v22280_v50  ;;  %v4904_v50 = vor.u32 %v4903_v33, %v4902_v16  ;;  %v4912_v35 = vor.u32 %v4911_v46, %v4910_v43  ;;  %v22289_v43 = vld [vmem:[%s31290_s4 + $0x120] ss:$8 sps:$4 sm:$0xff]  }
 0x30c   : > { %2560 = vmatprep.subr.bf16.mxu1 %v22285_v7  ;;  %v4901_v7 = vor.u32 %v4900_v13, %v4899_v42  ;;  %v31316_v13 = vrot.slane %v25343_v45, 5  ;;  %v25645_v8 = vor.u32 %v4915_v53, %v4914_v56  ;;  %v22294_v53 = vld [vmem:[%s31290_s4 + $0x134] ss:$8 sps:$4 sm:$0xff]   ;;  %v25667_v56 = vsel %vm2072_vm6, %v25558_v5, %v5349_v62 }
 0x30d   : > { %v25640_v16 = vsel %vm4898_vm14, %v4904_v50, %v4908_v18  ;;  %v25643_v33 = vsel %vm4898_vm14, %v4908_v18, %v4912_v35  ;;  %v6191_v5 = vrot.slane %v25492_v39, 2 }
 0x30e   : > { %2393 = vmatmul.mubr.bf16.vlgmr.msra.gmra.mrb[136].mxu1 %v25296_v1  ;;  %v22291_v1 = vld [vmem:[%s31290_s4 + $0x124] ss:$8 sps:$4 sm:$0xff]   ;;  %v25635_v42 = vsel %vm4898_vm14, %v4901_v7, %v4904_v50  ;;  %v25658_v46 = vsel %vm4898_vm14, %v4912_v35, %v25645_v8  ;;  %v6184_v7 = vrot.slane %v25360_v15, 2  ;;  %v6185_v50 = vrot.slane %v25357_v9, 3  ;;  %v22292_v35 = vld [vmem:[%s31290_s4 + $0x130] ss:$8 sps:$4 sm:$0xff]  }
 0x30f   : > { %2402 = vmatprep.mubr.bf16.mxu1 %v31325_v54  ;;  %2561 = vmatpush1.bf16.msra.mxu1 %v22283_v23  ;;  %v5133_v23 = vrot.slane %v25305_v38, 5  ;;  %v6192_v15 = vrot.slane %v25489_v34, 3  ;;  %v22297_v9 = vld [vmem:[%s31290_s4 + $0x144] ss:$8 sps:$4 sm:$0xff]  }
 0x310   : > { %2562 = vmatprep.subr.bf16.mxu1 %v22288_v40  ;;  %v6186_v18 = vor.u32 %v6185_v50, %v6184_v7  ;;  %v22298_v50 = vld [vmem:[%s31290_s4 + $0x150] ss:$8 sps:$4 sm:$0xff]  }
 0x311   : > { %v25650_v40 = vsel %vm5132_vm15, %v5133_v23, %v31316_v13 }
 0x313   : > { %2563 = vmatpush1.bf16.msra.mxu1 %v22286_v32  ;;  %v6187_v32 = vrot.slane %v25431_v44, 2  ;;  %v6196_v44 = vrot.slane %v25555_v14, 3 }
 0x314   : > { %2564 = vmatprep.subr.bf16.mxu1 %v22291_v1  ;;  %v6188_v1 = vrot.slane %v25428_v22, 3  ;;  %v22295_v22 = vld [vmem:[%s31290_s4 + $0x140] ss:$8 sps:$4 sm:$0xff]  }
 0x316   : > { %2403 = vmatmul.mubr.bf16.gmra.mrb[120].mxu1 %v25305_v38  ;;  %v6195_v38 = vrot.slane %v25544_v63, 2  ;;  %v6189_v23 = vor.u32 %v6188_v1, %v6187_v32  ;;  %v22303_v32 = vld [vmem:[%s31290_s4 + $0x164] ss:$8 sps:$4 sm:$0xff]   ;;  %v22304_v1 = vld [vmem:[%s31290_s4 + $0x170] ss:$8 sps:$4 sm:$0xff]  }
 0x317   : > { %2412 = vmatprep.mubr.bf16.mxu1 %v31325_v54  ;;  %2565 = vmatpush1.bf16.msra.mxu1 %v22289_v43  ;;  %v6193_v43 = vor.u32 %v6192_v15, %v6191_v5  ;;  %v22309_v5 = vld [vmem:[%s31290_s4 + $0x184] ss:$8 sps:$4 sm:$0xff]   ;;  %v2016_v15 = vpop.f32.mrb[24].mxu0 }
 0x318   : > { %2566 = vmatprep.subr.bf16.mxu1 %v22294_v53  ;;  %v25685_v13 = vor.u32 %v6196_v44, %v6195_v38  ;;  %v25691_v34 = vsel %vm6183_vm0, %v6186_v18, %v6189_v23  ;;  %v22300_v53 = vld [vmem:[%s31290_s4 + $0x154] ss:$8 sps:$4 sm:$0xff]  }
 0x319   : > { %31326 = vst [vmem:[#allocation10_spill] sm:$0xff] %v25691_v34  ;;  %v25694_v39 = vsel %vm6183_vm0, %v6189_v23, %v6193_v43  ;;  %v22306_v18 = vld [vmem:[%s31290_s4 + $0x174] ss:$8 sps:$4 sm:$0xff]  }
 0x31a   : > { %31327 = vst [vmem:[#allocation11_spill] sm:$0xff] %v25694_v39  ;;  %v25701_v7 = vsel %vm6183_vm0, %v6193_v43, %v25685_v13  ;;  %v22307_v43 = vld [vmem:[%s31290_s4 + $0x180] ss:$8 sps:$4 sm:$0xff]  }
 0x31b   : > { %2567 = vmatpush1.bf16.msra.mxu1 %v22292_v35  ;;  %31328 = vst [vmem:[#allocation12_spill] sm:$0xff] %v25701_v7  ;;  %v22301_v35 = vld [vmem:[%s31290_s4 + $0x160] ss:$8 sps:$4 sm:$0xff]  }
 0x31c   : > { %2568 = vmatprep.subr.bf16.mxu1 %v22297_v9  ;;  %v2018_v9 = vpop.f32.mrb[25].mxu0 }
 0x31d   : > { %v2019_v38 = vpop.f32.mrb[26].mxu0  ;;  %v22316_v9 = vld [vmem:[%s31290_s4 + $0x1b0] ss:$8 sps:$4 sm:$0xff]  }
 0x31e   : > { %2413 = vmatmul.mubr.bf16.gmra.mrb[124].mxu1 %v25343_v45  ;;  %v25727_v44 = vpack.c.bf16 %v2019_v38, %v2016_v15  ;;  %v2021_v23 = vpop.f32.mrb[27].mxu0  ;;  %v22318_v15 = vld [vmem:[%s31290_s4 + $0x1b4] ss:$8 sps:$4 sm:$0xff]   ;;  %v22321_v38 = vld [vmem:[%s31290_s4 + $0x1c4] ss:$8 sps:$4 sm:$0xff]  }
 0x31f   : > { %2422 = vmatprep.mubr.bf16.mxu1 %v31325_v54  ;;  %2569 = vmatpush1.bf16.msra.mxu1 %v22295_v22  ;;  %v22312_v22 = vld [vmem:[%s31290_s4 + $0x194] ss:$8 sps:$4 sm:$0xff]   ;;  %v2471_v23 = vrot.slane %v25409_v11, 1 }
 0x320   : > { %2570 = vmatprep.subr.bf16.mxu1 %v22300_v53  ;;  %v2024_v53 = vpop.f32.mrb[28].mxu0 }
 0x323   : > { %2571 = vmatpush1.bf16.msra.mxu1 %v22298_v50  ;;  %v2026_v50 = vpop.f32.mrb[29].mxu0 }
 0x324   : > { %2572 = vmatprep.subr.bf16.mxu1 %v22303_v32  ;;  %v2027_v32 = vpop.f32.mrb[30].mxu0  ;;  %v22322_v50 = vld [vmem:[%s31290_s4 + $0x1d0] ss:$8 sps:$4 sm:$0xff]  }
 0x326   : > { %2423 = vmatmul.mubr.bf16.gmra.mrb[128].mxu1 %v25409_v11 }
 0x327   : > { %2432 = vmatprep.mubr.bf16.mxu1 %v31325_v54  ;;  %2573 = vmatpush1.bf16.msra.mxu1 %v22301_v35  ;;  %v22310_v35 = vld [vmem:[%s31290_s4 + $0x190] ss:$8 sps:$4 sm:$0xff]  }
 0x328   : > { %2574 = vmatprep.subr.bf16.mxu1 %v22306_v18  ;;  %v25740_v18 = vpack.c.bf16 %v2027_v32, %v2024_v53  ;;  %v22327_v32 = vld [vmem:[%s31290_s4 + $0x1e4] ss:$8 sps:$4 sm:$0xff]  }
 0x32b   : > { %2575 = vmatpush1.bf16.msra.mxu1 %v22304_v1  ;;  %v2029_v1 = vpop.f32.mrb[31].mxu0 }
 0x32c   : > { %2785 = vmatprep.subr.bf16.mxu1 %v22309_v5  ;;  %v22315_v5 = vld [vmem:[%s31290_s4 + $0x1a4] ss:$8 sps:$4 sm:$0xff]   ;;  %v22325_v1 = vld [vmem:[%s31290_s4 + $0x1e0] ss:$8 sps:$4 sm:$0xff]  }
 0x32e   : > { %2433 = vmatmul.mubr.bf16.gmra.mrb[132].mxu1 %v25466_v49 }
 0x32f   : > { %2592 = vmatprep.mubr.bf16.mxu1 %v31325_v54 }
 0x336   : > { %2593 = vmatmul.mubr.bf16.vlgmr.msra.gmra.mrb[136].mxu1 %v25324_v37  ;;  %v22313_v37 = vld [vmem:[%s31290_s4 + $0x1a0] ss:$8 sps:$4 sm:$0xff]  }
 0x337   : > { %2602 = vmatprep.mubr.bf16.mxu1 %v31325_v54  ;;  %2786 = vmatpush1.bf16.msra.mxu1 %v22307_v43  ;;  %v22319_v43 = vld [vmem:[%s31290_s4 + $0x1c0] ss:$8 sps:$4 sm:$0xff]  }
 0x338   : > { %2787 = vmatprep.subr.bf16.mxu1 %v22312_v22  ;;  %v31329_v22 = vrot.slane %v25343_v45, 1 }
 0x33a   : > { %v25769_v53 = vsel %vm1349_vm1, %v31329_v22, %v2471_v23  ;;  %v22337_v22 = vld [vmem:[%s31290_s4 + $0x220] ss:$8 sps:$4 sm:$0xff]  }
 0x33b   : > { %2788 = vmatpush1.bf16.msra.mxu1 %v22310_v35  ;;  %v25780_v35 = vrot.slane %v25466_v49, 1 }
 0x33c   : > { %2789 = vmatprep.subr.bf16.mxu1 %v22315_v5  ;;  %v22330_v5 = vld [vmem:[%s31290_s4 + $0x1f4] ss:$8 sps:$4 sm:$0xff]  }
 0x33e   : > { %2603 = vmatmul.mubr.bf16.gmra.mrb[120].mxu1 %v25379_v4  ;;  %v22324_v4 = vld [vmem:[%s31290_s4 + $0x1d4] ss:$8 sps:$4 sm:$0xff]  }
 0x33f   : > { %2612 = vmatprep.mubr.bf16.mxu1 %v31325_v54  ;;  %2790 = vmatpush1.bf16.msra.mxu1 %v22313_v37  ;;  %v25790_v37 = vsel %vm1349_vm1, %v2471_v23, %v25780_v35  ;;  %v22336_v23 = vld [vmem:[%s31290_s4 + $0x214] ss:$8 sps:$4 sm:$0xff]  }
 0x340   : > { %2791 = vmatprep.subr.bf16.mxu1 %v22318_v15  ;;  %v22328_v15 = vld [vmem:[%s31290_s4 + $0x1f0] ss:$8 sps:$4 sm:$0xff]  }
 0x343   : > { %2792 = vmatpush1.bf16.msra.mxu1 %v22316_v9  ;;  %v22333_v9 = vld [vmem:[%s31290_s4 + $0x204] ss:$8 sps:$4 sm:$0xff]  }
 0x344   : > { %2793 = vmatprep.subr.bf16.mxu1 %v22321_v38  ;;  %v22331_v38 = vld [vmem:[%s31290_s4 + $0x200] ss:$8 sps:$4 sm:$0xff]  }
 0x346   : > { %2613 = vmatmul.mubr.bf16.gmra.mrb[124].mxu1 %v25769_v53 }
 0x347   : > { %2622 = vmatprep.mubr.bf16.mxu1 %v31325_v54  ;;  %2794 = vmatpush1.bf16.msra.mxu1 %v22319_v43  ;;  %v22334_v43 = vld [vmem:[%s31290_s4 + $0x210] ss:$8 sps:$4 sm:$0xff]  }
 0x348   : > { %2795 = vmatprep.subr.bf16.mxu1 %v22324_v4  ;;  %v22339_v4 = vld [vmem:[%s31290_s4 + $0x224] ss:$8 sps:$4 sm:$0xff]  }
 0x34b   : > { %2796 = vmatpush1.bf16.msra.mxu1 %v22322_v50  ;;  %v22340_v50 = vld [vmem:[%s31290_s4 + $0x230] ss:$8 sps:$4 sm:$0xff]  }
 0x34c   : > { %2797 = vmatprep.subr.bf16.mxu1 %v22327_v32  ;;  %v22345_v32 = vld [vmem:[%s31290_s4 + $0x244] ss:$8 sps:$4 sm:$0xff]  }
 0x34e   : > { %2623 = vmatmul.mubr.bf16.gmra.mrb[128].mxu1 %v25790_v37 }
 0x34f   : > { %2632 = vmatprep.mubr.bf16.mxu1 %v31325_v54  ;;  %2798 = vmatpush1.bf16.msra.mxu1 %v22325_v1  ;;  %v22343_v1 = vld [vmem:[%s31290_s4 + $0x240] ss:$8 sps:$4 sm:$0xff]  }
 0x350   : > { %2799 = vmatprep.subr.bf16.mxu1 %v22330_v5  ;;  %v22346_v5 = vld [vmem:[%s31290_s4 + $0x250] ss:$8 sps:$4 sm:$0xff]  }
 0x353   : > { %2800 = vmatpush1.bf16.msra.mxu1 %v22328_v15  ;;  %v22351_v15 = vld [vmem:[%s31290_s4 + $0x264] ss:$8 sps:$4 sm:$0xff]  }
 0x354   : > { %3000 = vmatprep.subr.bf16.mxu1 %v22333_v9  ;;  %v22349_v9 = vld [vmem:[%s31290_s4 + $0x260] ss:$8 sps:$4 sm:$0xff]  }
 0x356   : > { %2633 = vmatmul.mubr.bf16.gmra.mrb[132].mxu1 %v25780_v35 }
 0x357   : > { %2817 = vmatprep.mubr.bf16.mxu1 %v31325_v54 }
 0x35e   : > { %2818 = vmatmul.mubr.bf16.vlgmr.msra.gmra.mrb[136].mxu1 %v25347_v25  ;;  %v22342_v25 = vld [vmem:[%s31290_s4 + $0x234] ss:$8 sps:$4 sm:$0xff]  }
 0x35f   : > { %2827 = vmatprep.mubr.bf16.mxu1 %v31325_v54  ;;  %3001 = vmatpush1.bf16.msra.mxu1 %v22331_v38  ;;  %v25848_v38 = vshll.u32 %v25727_v44, 16 }
 0x360   : > { %3002 = vmatprep.subr.bf16.mxu1 %v22336_v23  ;;  %v22354_v23 = vld [vmem:[%s31290_s4 + $0x274] ss:$8 sps:$4 sm:$0xff]  }
 0x363   : > { %3003 = vmatpush1.bf16.msra.mxu1 %v22334_v43  ;;  %v25856_v43 = vsel %vm2680_vm7, %v25455_v51, %v25515_v28  ;;  %v22352_v51 = vld [vmem:[%s31290_s4 + $0x270] ss:$8 sps:$4 sm:$0xff]  }
 0x364   : > { %3004 = vmatprep.subr.bf16.mxu1 %v22339_v4  ;;  %31330 = vst [vmem:[#allocation13_spill] sm:$0xff] %v25856_v43  ;;  %v25859_v4 = vshrl.u32 %v25727_v44, 16 }
 0x366   : > { %2828 = vmatmul.mubr.bf16.gmra.mrb[120].mxu1 %v25416_v57  ;;  %v22348_v57 = vld [vmem:[%s31290_s4 + $0x254] ss:$8 sps:$4 sm:$0xff]  }
 0x367   : > { %2837 = vmatprep.mubr.bf16.mxu1 %v31325_v54  ;;  %3005 = vmatpush1.bf16.msra.mxu1 %v22337_v22  ;;  %v5765_v22 = vrot.slane %v25544_v63, 1 }
 0x368   : > { %3006 = vmatprep.subr.bf16.mxu1 %v22342_v25  ;;  %v5766_v25 = vrot.slane %v25555_v14, 2 }
 0x36a   : > { %v25884_v7 = vor.u32 %v5766_v25, %v5765_v22  ;;  %v22355_v22 = vld [vmem:[%s31290_s4 + $0x280] ss:$8 sps:$4 sm:$0xff]   ;;  %v22360_v25 = vld [vmem:[%s31290_s4 + $0x294] ss:$8 sps:$4 sm:$0xff]  }
 0x36b   : > { %3007 = vmatpush1.bf16.msra.mxu1 %v22340_v50  ;;  %v5351_v50 = vor.u32 %v5349_v62, %v25544_v63  ;;  %v22357_v62 = vld [vmem:[%s31290_s4 + $0x284] ss:$8 sps:$4 sm:$0xff]  }
 0x36c   : > { %3008 = vmatprep.subr.bf16.mxu1 %v22345_v32  ;;  %v5352_v32 = vrot.slane %v25848_v38, 1 }
 0x36e   : > { %2838 = vmatmul.mubr.bf16.gmra.mrb[124].mxu1 %v25474_v17 }
 0x36f   : > { %2847 = vmatprep.mubr.bf16.mxu1 %v31325_v54  ;;  %3009 = vmatpush1.bf16.msra.mxu1 %v22343_v1  ;;  %v5769_v1 = vrot.slane %v25859_v4, 1 }
 0x370   : > { %3010 = vmatprep.subr.bf16.mxu1 %v22348_v57  ;;  %v5770_v57 = vrot.slane %v25848_v38, 2 }
 0x372   : > { %v25886_v39 = vor.u32 %v5770_v57, %v5769_v1  ;;  %v22364_v1 = vld [vmem:[%s31290_s4 + $0x2b0] ss:$8 sps:$4 sm:$0xff]   ;;  %v22369_v57 = vld [vmem:[%s31290_s4 + $0x2c4] ss:$8 sps:$4 sm:$0xff]  }
 0x373   : > { %3011 = vmatpush1.bf16.msra.mxu1 %v22346_v5  ;;  %v6199_v5 = vrot.slane %v25859_v4, 2 }
 0x374   : > { %3012 = vmatprep.subr.bf16.mxu1 %v22351_v15  ;;  %v6200_v15 = vrot.slane %v25848_v38, 3 }
 0x376   : > { %2848 = vmatmul.mubr.bf16.gmra.mrb[128].mxu1 %v25856_v43  ;;  %v25888_v34 = vor.u32 %v6200_v15, %v6199_v5  ;;  %v2911_v5 = vrot.slane %v25409_v11, 2  ;;  %v31331_v15 = vrot.slane %v25343_v45, 2 }
 0x377   : > { %2857 = vmatprep.mubr.bf16.mxu1 %v31325_v54  ;;  %3013 = vmatpush1.bf16.msra.mxu1 %v22349_v9  ;;  %v25882_v9 = vsel %vm2072_vm6, %v5351_v50, %v5352_v32  ;;  %v22363_v50 = vld [vmem:[%s31290_s4 + $0x2a4] ss:$8 sps:$4 sm:$0xff]  }
 0x378   : > { %3014 = vmatprep.subr.bf16.mxu1 %v22354_v23  ;;  %v25893_v23 = vsel %vm2680_vm7, %v25884_v7, %v25886_v39  ;;  %v25898_v43 = vsel %vm6183_vm0, %v25685_v13, %v25888_v34  ;;  %v22358_v13 = vld [vmem:[%s31290_s4 + $0x290] ss:$8 sps:$4 sm:$0xff]  }
 0x37b   : > { %3015 = vmatpush1.bf16.msra.mxu1 %v22352_v51  ;;  %v22361_v51 = vld [vmem:[%s31290_s4 + $0x2a0] ss:$8 sps:$4 sm:$0xff]  }
 0x37c   : > { %3234 = vmatprep.subr.bf16.mxu1 %v22357_v62  ;;  %v22367_v62 = vld [vmem:[%s31290_s4 + $0x2c0] ss:$8 sps:$4 sm:$0xff]  }
 0x37e   : > { %2858 = vmatmul.mubr.bf16.gmra.mrb[132].mxu1 %v25515_v28 }
 0x37f   : > { %3032 = vmatprep.mubr.bf16.mxu1 %v31325_v54 }
 0x386   : > { %3033 = vmatmul.mubr.bf16.vlgmr.msra.gmra.mrb[136].mxu1 %v25329_v10  ;;  %v22366_v10 = vld [vmem:[%s31290_s4 + $0x2b4] ss:$8 sps:$4 sm:$0xff]  }
 0x387   : > { %3042 = vmatprep.mubr.bf16.mxu1 %v31325_v54  ;;  %3235 = vmatpush1.bf16.msra.mxu1 %v22355_v22  ;;  %v25940_v22 = vsel %vm1462_vm2, %v31331_v15, %v2911_v5  ;;  %v22382_v15 = vld [vmem:[%s31290_s4 + $0x310] ss:$8 sps:$4 sm:$0xff]  }
 0x388   : > { %3236 = vmatprep.subr.bf16.mxu1 %v22360_v25  ;;  %v22370_v25 = vld [vmem:[%s31290_s4 + $0x2d0] ss:$8 sps:$4 sm:$0xff]  }
 0x38b   : > { %3237 = vmatpush1.bf16.msra.mxu1 %v22358_v13  ;;  %v22375_v13 = vld [vmem:[%s31290_s4 + $0x2e4] ss:$8 sps:$4 sm:$0xff]  }
 0x38c   : > { %3238 = vmatprep.subr.bf16.mxu1 %v22363_v50  ;;  %v25951_v50 = vrot.slane %v25466_v49, 2 }
 0x38e   : > { %3043 = vmatmul.mubr.bf16.gmra.mrb[120].mxu1 %v25389_v27  ;;  %v22372_v27 = vld [vmem:[%s31290_s4 + $0x2d4] ss:$8 sps:$4 sm:$0xff]  }
 0x38f   : > { %3052 = vmatprep.mubr.bf16.mxu1 %v31325_v54  ;;  %3239 = vmatpush1.bf16.msra.mxu1 %v22361_v51  ;;  %v22373_v51 = vld [vmem:[%s31290_s4 + $0x2e0] ss:$8 sps:$4 sm:$0xff]  }
 0x390   : > { %3240 = vmatprep.subr.bf16.mxu1 %v22366_v10  ;;  %v22378_v10 = vld [vmem:[%s31290_s4 + $0x2f4] ss:$8 sps:$4 sm:$0xff]  }
 0x393   : > { %3241 = vmatpush1.bf16.msra.mxu1 %v22364_v1  ;;  %v25961_v1 = vsel %vm1462_vm2, %v2911_v5, %v25951_v50  ;;  %v22379_v5 = vld [vmem:[%s31290_s4 + $0x300] ss:$8 sps:$4 sm:$0xff]  }
 0x394   : > { %3242 = vmatprep.subr.bf16.mxu1 %v22369_v57  ;;  %v22376_v57 = vld [vmem:[%s31290_s4 + $0x2f0] ss:$8 sps:$4 sm:$0xff]  }
 0x396   : > { %3053 = vmatmul.mubr.bf16.gmra.mrb[124].mxu1 %v25940_v22 }
 0x397   : > { %3062 = vmatprep.mubr.bf16.mxu1 %v31325_v54  ;;  %3243 = vmatpush1.bf16.msra.mxu1 %v22367_v62  ;;  %v22381_v62 = vld [vmem:[%s31290_s4 + $0x304] ss:$8 sps:$4 sm:$0xff]  }
 0x398   : > { %3244 = vmatprep.subr.bf16.mxu1 %v22372_v27  ;;  %v22384_v27 = vld [vmem:[%s31290_s4 + $0x314] ss:$8 sps:$4 sm:$0xff]  }
 0x39b   : > { %3245 = vmatpush1.bf16.msra.mxu1 %v22370_v25  ;;  %v22387_v25 = vld [vmem:[%s31290_s4 + $0x324] ss:$8 sps:$4 sm:$0xff]  }
 0x39c   : > { %3246 = vmatprep.subr.bf16.mxu1 %v22375_v13  ;;  %v22385_v13 = vld [vmem:[%s31290_s4 + $0x320] ss:$8 sps:$4 sm:$0xff]  }
 0x39e   : > { %3063 = vmatmul.mubr.bf16.gmra.mrb[128].mxu1 %v25961_v1 }
 0x39f   : > { %3072 = vmatprep.mubr.bf16.mxu1 %v31325_v54  ;;  %3247 = vmatpush1.bf16.msra.mxu1 %v22373_v51  ;;  %v22388_v51 = vld [vmem:[%s31290_s4 + $0x330] ss:$8 sps:$4 sm:$0xff]  }
 0x3a0   : > { %3248 = vmatprep.subr.bf16.mxu1 %v22378_v10  ;;  %v22393_v10 = vld [vmem:[%s31290_s4 + $0x344] ss:$8 sps:$4 sm:$0xff]  }
 0x3a3   : > { %3249 = vmatpush1.bf16.msra.mxu1 %v22376_v57 }
 0x3a4   : > { %3452 = vmatprep.subr.bf16.mxu1 %v22381_v62 }
 0x3a6   : > { %3073 = vmatmul.mubr.bf16.gmra.mrb[132].mxu1 %v25951_v50 }
 0x3a7   : > { %3266 = vmatprep.mubr.bf16.mxu1 %v31325_v54 }
 0x3ae   : > { %3267 = vmatmul.mubr.bf16.vlgmr.msra.gmra.mrb[136].mxu1 %v25352_v55  ;;  %v22390_v55 = vld [vmem:[%s31290_s4 + $0x334] ss:$8 sps:$4 sm:$0xff]  }
 0x3af   : > { %3276 = vmatprep.mubr.bf16.mxu1 %v31325_v54  ;;  %3453 = vmatpush1.bf16.msra.mxu1 %v22379_v5 }
 0x3b0   : > { %3454 = vmatprep.subr.bf16.mxu1 %v22384_v27 }
 0x3b3   : > { %3455 = vmatpush1.bf16.msra.mxu1 %v22382_v15  ;;  %v22396_v15 = vld [vmem:[%s31290_s4 + $0x354] ss:$8 sps:$4 sm:$0xff]  }
 0x3b4   : > { %3456 = vmatprep.subr.bf16.mxu1 %v22387_v25  ;;  %v22394_v25 = vld [vmem:[%s31290_s4 + $0x350] ss:$8 sps:$4 sm:$0xff]  }
 0x3b6   : > { %3277 = vmatmul.mubr.bf16.gmra.mrb[120].mxu1 %v25425_v12  ;;  %v22391_v12 = vld [vmem:[%s31290_s4 + $0x340] ss:$8 sps:$4 sm:$0xff]  }
 0x3b7   : > { %3286 = vmatprep.mubr.bf16.mxu1 %v31325_v54  ;;  %3457 = vmatpush1.bf16.msra.mxu1 %v22385_v13  ;;  %v22399_v13 = vld [vmem:[%s31290_s4 + $0x364] ss:$8 sps:$4 sm:$0xff]  }
 0x3b8   : > { %3458 = vmatprep.subr.bf16.mxu1 %v22390_v55  ;;  %v22397_v55 = vld [vmem:[%s31290_s4 + $0x360] ss:$8 sps:$4 sm:$0xff]  }
 0x3b9   : > { %v26001_v57 = vpop.f32.mrb[32].mxu0 }
 0x3ba   : > { %v26003_v62 = vpop.f32.mrb[33].mxu0 }
 0x3bb   : > { %v26005_v5 = vpop.f32.mrb[34].mxu0  ;;  %3459 = vmatpush1.bf16.msra.mxu1 %v22388_v51  ;;  %v3143_v51 = vrot.slane %v25544_v63, 5 }
 0x3bc   : > { %v26010_v27 = vpop.f32.mrb[35].mxu0  ;;  %3460 = vmatprep.subr.bf16.mxu1 %v22393_v10  ;;  %v3146_v10 = vrot.slane %v25555_v14, 6 }
 0x3be   : > { %3287 = vmatmul.mubr.bf16.gmra.mrb[124].mxu1 %v25486_v24  ;;  %v22402_v24 = vld [vmem:[%s31290_s4 + $0x374] ss:$8 sps:$4 sm:$0xff]  }
 0x3bf   : > { %3296 = vmatprep.mubr.bf16.mxu1 %v31325_v54  ;;  %3461 = vmatpush1.bf16.msra.mxu1 %v22391_v12  ;;  %v22400_v12 = vld [vmem:[%s31290_s4 + $0x370] ss:$8 sps:$4 sm:$0xff]  }
 0x3c0   : > { %3462 = vmatprep.subr.bf16.mxu1 %v22396_v15  ;;  %v22405_v15 = vld [vmem:[%s31290_s4 + $0x384] ss:$8 sps:$4 sm:$0xff]  }
 0x3c3   : > { %3463 = vmatpush1.bf16.msra.mxu1 %v22394_v25  ;;  %v3147_v25 = vor.u32 %v3146_v10, %v3143_v51  ;;  %v22409_v51 = vld [vmem:[%s31290_s4 + $0x3a0] ss:$8 sps:$4 sm:$0xff]   ;;  %v22412_v10 = vld [vmem:[%s31290_s4 + $0x3b0] ss:$8 sps:$4 sm:$0xff]  }
 0x3c4   : > { %3464 = vmatprep.subr.bf16.mxu1 %v22399_v13 }
 0x3c5   : > { %v3148_v13 = vsel %vm3120_vm8, %v25519_v26, %v3147_v25  ;;  %v22406_v26 = vld [vmem:[%s31290_s4 + $0x390] ss:$8 sps:$4 sm:$0xff]   ;;  %v22415_v25 = vld [vmem:[%s31290_s4 + $0x3c0] ss:$8 sps:$4 sm:$0xff]  }
 0x3c6   : > { %3297 = vmatmul.mubr.bf16.gmra.mrb[128].mxu1 %v25539_v30  ;;  %v22403_v30 = vld [vmem:[%s31290_s4 + $0x380] ss:$8 sps:$4 sm:$0xff]  }
 0x3c7   : > { %3306 = vmatprep.mubr.bf16.mxu1 %v31325_v54  ;;  %3465 = vmatpush1.bf16.msra.mxu1 %v22397_v55  ;;  %v22408_v55 = vld [vmem:[%s31290_s4 + $0x394] ss:$8 sps:$4 sm:$0xff]  }
 0x3c8   : > { %3466 = vmatprep.subr.bf16.mxu1 %v22402_v24  ;;  %v22411_v24 = vld [vmem:[%s31290_s4 + $0x3a4] ss:$8 sps:$4 sm:$0xff]  }
 0x3cb   : > { %3467 = vmatpush1.bf16.msra.mxu1 %v22400_v12  ;;  %v22417_v12 = vld [vmem:[%s31290_s4 + $0x3c4] ss:$8 sps:$4 sm:$0xff]  }
 0x3cc   : > { %3681 = vmatprep.subr.bf16.mxu1 %v22405_v15  ;;  %v3361_v15 = vrot.slane %v25409_v11, 6 }
 0x3ce   : > { %3307 = vmatmul.mubr.bf16.gmra.mrb[132].mxu1 %v3148_v13  ;;  %v31332_v13 = vrot.slane %v25343_v45, 6 }
 0x3cf   : > { %3484 = vmatprep.mubr.bf16.mxu1 %v31325_v54 }
 0x3d6   : > { %3485 = vmatmul.mubr.bf16.vlgmr.msra.gmra.mrb[136].mxu1 %v25334_v0  ;;  %v22414_v0 = vld [vmem:[%s31290_s4 + $0x3b4] ss:$8 sps:$4 sm:$0xff]  }
 0x3d7   : > { %3494 = vmatprep.mubr.bf16.mxu1 %v31325_v54  ;;  %3682 = vmatpush1.bf16.msra.mxu1 %v22403_v30  ;;  %v26080_v30 = vsel %vm1703_vm5, %v31332_v13, %v3361_v15  ;;  %v22427_v13 = vld [vmem:[%s31290_s4 + $0x400] ss:$8 sps:$4 sm:$0xff]  }
 0x3d8   : > { %3683 = vmatprep.subr.bf16.mxu1 %v22408_v55  ;;  %v22418_v55 = vld [vmem:[%s31290_s4 + $0x3d0] ss:$8 sps:$4 sm:$0xff]  }
 0x3db   : > { %3684 = vmatpush1.bf16.msra.mxu1 %v22406_v26  ;;  %v22423_v26 = vld [vmem:[%s31290_s4 + $0x3e4] ss:$8 sps:$4 sm:$0xff]  }
 0x3dc   : > { %3685 = vmatprep.subr.bf16.mxu1 %v22411_v24  ;;  %v3363_v24 = vrot.slane %v25466_v49, 6 }
 0x3de   : > { %3495 = vmatmul.mubr.bf16.gmra.mrb[120].mxu1 %v25396_v36  ;;  %v22420_v36 = vld [vmem:[%s31290_s4 + $0x3d4] ss:$8 sps:$4 sm:$0xff]  }
 0x3df   : > { %3504 = vmatprep.mubr.bf16.mxu1 %v31325_v54  ;;  %3686 = vmatpush1.bf16.msra.mxu1 %v22409_v51  ;;  %v22421_v51 = vld [vmem:[%s31290_s4 + $0x3e0] ss:$8 sps:$4 sm:$0xff]  }
 0x3e0   : > { %3687 = vmatprep.subr.bf16.mxu1 %v22414_v0  ;;  %v22426_v0 = vld [vmem:[%s31290_s4 + $0x3f4] ss:$8 sps:$4 sm:$0xff]  }
 0x3e3   : > { %3688 = vmatpush1.bf16.msra.mxu1 %v22412_v10  ;;  %v26098_v10 = vsel %vm1703_vm5, %v3361_v15, %v3363_v24 }
 0x3e4   : > { %3689 = vmatprep.subr.bf16.mxu1 %v22417_v12  ;;  %v22424_v12 = vld [vmem:[%s31290_s4 + $0x3f0] ss:$8 sps:$4 sm:$0xff]  }
 0x3e6   : > { %3505 = vmatmul.mubr.bf16.gmra.mrb[124].mxu1 %v26080_v30 }
 0x3e7   : > { %3514 = vmatprep.mubr.bf16.mxu1 %v31325_v54  ;;  %3690 = vmatpush1.bf16.msra.mxu1 %v22415_v25  ;;  %v22429_v25 = vld [vmem:[%s31290_s4 + $0x404] ss:$8 sps:$4 sm:$0xff]  }
 0x3e8   : > { %3691 = vmatprep.subr.bf16.mxu1 %v22420_v36  ;;  %v3365_v36 = vrot.slane %v25527_v47, 6 }
 0x3ea   : > { %v26112_v15 = vsel %vm1703_vm5, %v3363_v24, %v3365_v36  ;;  %v22435_v24 = vld [vmem:[%s31290_s4 + $0x424] ss:$8 sps:$4 sm:$0xff]  }
 0x3eb   : > { %3692 = vmatpush1.bf16.msra.mxu1 %v22418_v55  ;;  %v22432_v55 = vld [vmem:[%s31290_s4 + $0x414] ss:$8 sps:$4 sm:$0xff]  }
 0x3ec   : > { %3693 = vmatprep.subr.bf16.mxu1 %v22423_v26  ;;  %v22430_v26 = vld [vmem:[%s31290_s4 + $0x410] ss:$8 sps:$4 sm:$0xff]  }
 0x3ee   : > { %3515 = vmatmul.mubr.bf16.gmra.mrb[128].mxu1 %v26098_v10 }
 0x3ef   : > { %3524 = vmatprep.mubr.bf16.mxu1 %v31325_v54  ;;  %3694 = vmatpush1.bf16.msra.mxu1 %v22421_v51  ;;  %v22433_v51 = vld [vmem:[%s31290_s4 + $0x420] ss:$8 sps:$4 sm:$0xff]  }
 0x3f0   : > { %3695 = vmatprep.subr.bf16.mxu1 %v22426_v0  ;;  %v22436_v0 = vld [vmem:[%s31290_s4 + $0x430] ss:$8 sps:$4 sm:$0xff]  }
 0x3f3   : > { %3696 = vmatpush1.bf16.msra.mxu1 %v22424_v12  ;;  %v22441_v12 = vld [vmem:[%s31290_s4 + $0x444] ss:$8 sps:$4 sm:$0xff]  }
 0x3f4   : > { %3898 = vmatprep.subr.bf16.mxu1 %v22429_v25  ;;  %v22439_v25 = vld [vmem:[%s31290_s4 + $0x440] ss:$8 sps:$4 sm:$0xff]  }
 0x3f6   : > { %3525 = vmatmul.mubr.bf16.gmra.mrb[132].mxu1 %v26112_v15 }
 0x3f7   : > { %3713 = vmatprep.mubr.bf16.mxu1 %v31325_v54 }
 0x3fe   : > { %3714 = vmatmul.mubr.bf16.vlgmr.msra.gmra.mrb[136].mxu1 %v25366_v21  ;;  %v22438_v21 = vld [vmem:[%s31290_s4 + $0x434] ss:$8 sps:$4 sm:$0xff]  }
 0x3ff   : > { %3723 = vmatprep.mubr.bf16.mxu1 %v31325_v54  ;;  %3899 = vmatpush1.bf16.msra.mxu1 %v22427_v13  ;;  %v22442_v13 = vld [vmem:[%s31290_s4 + $0x450] ss:$8 sps:$4 sm:$0xff]  }
 0x400   : > { %3900 = vmatprep.subr.bf16.mxu1 %v22432_v55  ;;  %v22447_v55 = vld [vmem:[%s31290_s4 + $0x464] ss:$8 sps:$4 sm:$0xff]  }
 0x403   : > { %3901 = vmatpush1.bf16.msra.mxu1 %v22430_v26  ;;  %v22445_v26 = vld [vmem:[%s31290_s4 + $0x460] ss:$8 sps:$4 sm:$0xff]  }
 0x404   : > { %3902 = vmatprep.subr.bf16.mxu1 %v22435_v24  ;;  %v22450_v24 = vld [vmem:[%s31290_s4 + $0x474] ss:$8 sps:$4 sm:$0xff]  }
 0x406   : > { %3724 = vmatmul.mubr.bf16.gmra.mrb[120].mxu1 %v25435_v29  ;;  %v22444_v29 = vld [vmem:[%s31290_s4 + $0x454] ss:$8 sps:$4 sm:$0xff]  }
 0x407   : > { %3733 = vmatprep.mubr.bf16.mxu1 %v31325_v54  ;;  %3903 = vmatpush1.bf16.msra.mxu1 %v22433_v51  ;;  %v3592_v51 = vrot.slane %v25544_v63, 6 }
 0x408   : > { %3904 = vmatprep.subr.bf16.mxu1 %v22438_v21  ;;  %v3593_v21 = vrot.slane %v25555_v14, 7 }
 0x40b   : > { %3905 = vmatpush1.bf16.msra.mxu1 %v22436_v0  ;;  %v22448_v0 = vld [vmem:[%s31290_s4 + $0x470] ss:$8 sps:$4 sm:$0xff]  }
 0x40c   : > { %3906 = vmatprep.subr.bf16.mxu1 %v22441_v12  ;;  %v22453_v12 = vld [vmem:[%s31290_s4 + $0x484] ss:$8 sps:$4 sm:$0xff]  }
 0x40e   : > { %3734 = vmatmul.mubr.bf16.gmra.mrb[124].mxu1 %v25498_v3 }
 0x40f   : > { %3743 = vmatprep.mubr.bf16.mxu1 %v31325_v54  ;;  %3907 = vmatpush1.bf16.msra.mxu1 %v22439_v25  ;;  %v26174_v25 = vor.u32 %v3593_v21, %v3592_v51  ;;  %v22465_v51 = vld [vmem:[%s31290_s4 + $0x4c4] ss:$8 sps:$4 sm:$0xff]   ;;  %v3807_v21 = vrot.slane %v25409_v11, 7 }
 0x410   : > { %3908 = vmatprep.subr.bf16.mxu1 %v22444_v29  ;;  %v22451_v29 = vld [vmem:[%s31290_s4 + $0x480] ss:$8 sps:$4 sm:$0xff]  }
 0x411   : > { %v26179_v14 = vsel %vm3572_vm9, %v25541_v58, %v26174_v25  ;;  %v22454_v58 = vld [vmem:[%s31290_s4 + $0x490] ss:$8 sps:$4 sm:$0xff]  }
 0x413   : > { %3909 = vmatpush1.bf16.msra.mxu1 %v22442_v13  ;;  %v22456_v13 = vld [vmem:[%s31290_s4 + $0x494] ss:$8 sps:$4 sm:$0xff]  }
 0x414   : > { %3910 = vmatprep.subr.bf16.mxu1 %v22447_v55  ;;  %v22459_v55 = vld [vmem:[%s31290_s4 + $0x4a4] ss:$8 sps:$4 sm:$0xff]  }
 0x416   : > { %3744 = vmatmul.mubr.bf16.gmra.mrb[128].mxu1 %v25548_v19 }
 0x417   : > { %3753 = vmatprep.mubr.bf16.mxu1 %v31325_v54  ;;  %3911 = vmatpush1.bf16.msra.mxu1 %v22445_v26  ;;  %v22457_v26 = vld [vmem:[%s31290_s4 + $0x4a0] ss:$8 sps:$4 sm:$0xff]  }
 0x418   : > { %3912 = vmatprep.subr.bf16.mxu1 %v22450_v24  ;;  %v22460_v24 = vld [vmem:[%s31290_s4 + $0x4b0] ss:$8 sps:$4 sm:$0xff]  }
 0x41b   : > { %3913 = vmatpush1.bf16.msra.mxu1 %v22448_v0  ;;  %v22463_v0 = vld [vmem:[%s31290_s4 + $0x4c0] ss:$8 sps:$4 sm:$0xff]  }
 0x41c   : > { %4120 = vmatprep.subr.bf16.mxu1 %v22453_v12  ;;  %v31333_v12 = vrot.slane %v25343_v45, 7 }
 0x41e   : > { %3754 = vmatmul.mubr.bf16.gmra.mrb[132].mxu1 %v26179_v14 }
 0x41f   : > { %3930 = vmatprep.mubr.bf16.mxu1 %v31325_v54 }
 0x426   : > { %3931 = vmatmul.mubr.bf16.vlgmr.msra.gmra.mrb[136].mxu1 %v25340_v41  ;;  %v22462_v41 = vld [vmem:[%s31290_s4 + $0x4b4] ss:$8 sps:$4 sm:$0xff]  }
 0x427   : > { %3940 = vmatprep.mubr.bf16.mxu1 %v31325_v54  ;;  %4121 = vmatpush1.bf16.msra.mxu1 %v22451_v29  ;;  %v26221_v29 = vsel %vm1601_vm4, %v31333_v12, %v3807_v21  ;;  %v22475_v12 = vld [vmem:[%s31290_s4 + $0x500] ss:$8 sps:$4 sm:$0xff]  }
 0x428   : > { %4122 = vmatprep.subr.bf16.mxu1 %v22456_v13  ;;  %v22466_v13 = vld [vmem:[%s31290_s4 + $0x4d0] ss:$8 sps:$4 sm:$0xff]  }
 0x42b   : > { %4123 = vmatpush1.bf16.msra.mxu1 %v22454_v58  ;;  %v22471_v58 = vld [vmem:[%s31290_s4 + $0x4e4] ss:$8 sps:$4 sm:$0xff]  }
 0x42c   : > { %4124 = vmatprep.subr.bf16.mxu1 %v22459_v55  ;;  %v3809_v55 = vrot.slane %v25466_v49, 7 }
 0x42e   : > { %3941 = vmatmul.mubr.bf16.gmra.mrb[120].mxu1 %v25404_v48  ;;  %v22468_v48 = vld [vmem:[%s31290_s4 + $0x4d4] ss:$8 sps:$4 sm:$0xff]  }
 0x42f   : > { %3950 = vmatprep.mubr.bf16.mxu1 %v31325_v54  ;;  %4125 = vmatpush1.bf16.msra.mxu1 %v22457_v26  ;;  %v22469_v26 = vld [vmem:[%s31290_s4 + $0x4e0] ss:$8 sps:$4 sm:$0xff]  }
 0x430   : > { %4126 = vmatprep.subr.bf16.mxu1 %v22462_v41  ;;  %v22474_v41 = vld [vmem:[%s31290_s4 + $0x4f4] ss:$8 sps:$4 sm:$0xff]  }
 0x433   : > { %4127 = vmatpush1.bf16.msra.mxu1 %v22460_v24  ;;  %v26239_v24 = vsel %vm1601_vm4, %v3807_v21, %v3809_v55 }
 0x434   : > { %4128 = vmatprep.subr.bf16.mxu1 %v22465_v51  ;;  %v22472_v51 = vld [vmem:[%s31290_s4 + $0x4f0] ss:$8 sps:$4 sm:$0xff]  }
 0x436   : > { %3951 = vmatmul.mubr.bf16.gmra.mrb[124].mxu1 %v26221_v29 }
 0x437   : > { %3960 = vmatprep.mubr.bf16.mxu1 %v31325_v54  ;;  %4129 = vmatpush1.bf16.msra.mxu1 %v22463_v0  ;;  %v22477_v0 = vld [vmem:[%s31290_s4 + $0x504] ss:$8 sps:$4 sm:$0xff]  }
 0x438   : > { %4130 = vmatprep.subr.bf16.mxu1 %v22468_v48  ;;  %v3811_v48 = vrot.slane %v25527_v47, 7 }
 0x43a   : > { %v26253_v21 = vsel %vm1601_vm4, %v3809_v55, %v3811_v48  ;;  %v22483_v55 = vld [vmem:[%s31290_s4 + $0x524] ss:$8 sps:$4 sm:$0xff]  }
 0x43b   : > { %4131 = vmatpush1.bf16.msra.mxu1 %v22466_v13  ;;  %v22480_v13 = vld [vmem:[%s31290_s4 + $0x514] ss:$8 sps:$4 sm:$0xff]  }
 0x43c   : > { %4132 = vmatprep.subr.bf16.mxu1 %v22471_v58  ;;  %v22478_v58 = vld [vmem:[%s31290_s4 + $0x510] ss:$8 sps:$4 sm:$0xff]  }
 0x43e   : > { %3961 = vmatmul.mubr.bf16.gmra.mrb[128].mxu1 %v26239_v24 }
 0x43f   : > { %3970 = vmatprep.mubr.bf16.mxu1 %v31325_v54  ;;  %4133 = vmatpush1.bf16.msra.mxu1 %v22469_v26  ;;  %v22481_v26 = vld [vmem:[%s31290_s4 + $0x520] ss:$8 sps:$4 sm:$0xff]  }
 0x440   : > { %4134 = vmatprep.subr.bf16.mxu1 %v22474_v41  ;;  %v22484_v41 = vld [vmem:[%s31290_s4 + $0x530] ss:$8 sps:$4 sm:$0xff]  }
 0x443   : > { %4135 = vmatpush1.bf16.msra.mxu1 %v22472_v51  ;;  %v22489_v51 = vld [vmem:[%s31290_s4 + $0x544] ss:$8 sps:$4 sm:$0xff]  }
 0x444   : > { %4335 = vmatprep.subr.bf16.mxu1 %v22477_v0  ;;  %v22487_v0 = vld [vmem:[%s31290_s4 + $0x540] ss:$8 sps:$4 sm:$0xff]  }
 0x446   : > { %3971 = vmatmul.mubr.bf16.gmra.mrb[132].mxu1 %v26253_v21 }
 0x447   : > { %4152 = vmatprep.mubr.bf16.mxu1 %v31325_v54 }
 0x44e   : > { %4153 = vmatmul.mubr.bf16.vlgmr.msra.gmra.mrb[136].mxu1 %v25407_v31  ;;  %v22486_v31 = vld [vmem:[%s31290_s4 + $0x534] ss:$8 sps:$4 sm:$0xff]  }
 0x44f   : > { %4162 = vmatprep.mubr.bf16.mxu1 %v31325_v54  ;;  %4336 = vmatpush1.bf16.msra.mxu1 %v22475_v12  ;;  %v22490_v12 = vld [vmem:[%s31290_s4 + $0x550] ss:$8 sps:$4 sm:$0xff]  }
 0x450   : > { %4337 = vmatprep.subr.bf16.mxu1 %v22480_v13  ;;  %v22495_v13 = vld [vmem:[%s31290_s4 + $0x564] ss:$8 sps:$4 sm:$0xff]  }
 0x453   : > { %4338 = vmatpush1.bf16.msra.mxu1 %v22478_v58  ;;  %v22493_v58 = vld [vmem:[%s31290_s4 + $0x560] ss:$8 sps:$4 sm:$0xff]  }
 0x454   : > { %4339 = vmatprep.subr.bf16.mxu1 %v22483_v55  ;;  %v22498_v55 = vld [vmem:[%s31290_s4 + $0x574] ss:$8 sps:$4 sm:$0xff]  }
 0x456   : > { %4163 = vmatmul.mubr.bf16.gmra.mrb[120].mxu1 %v25464_v2  ;;  %v22492_v2 = vld [vmem:[%s31290_s4 + $0x554] ss:$8 sps:$4 sm:$0xff]  }
 0x457   : > { %4172 = vmatprep.mubr.bf16.mxu1 %v31325_v54  ;;  %4340 = vmatpush1.bf16.msra.mxu1 %v22481_v26  ;;  %v22496_v26 = vld [vmem:[%s31290_s4 + $0x570] ss:$8 sps:$4 sm:$0xff]  }
 0x458   : > { %4341 = vmatprep.subr.bf16.mxu1 %v22486_v31  ;;  %v22501_v31 = vld [vmem:[%s31290_s4 + $0x584] ss:$8 sps:$4 sm:$0xff]  }
 0x45b   : > { %4342 = vmatpush1.bf16.msra.mxu1 %v22484_v41  ;;  %v22499_v41 = vld [vmem:[%s31290_s4 + $0x580] ss:$8 sps:$4 sm:$0xff]  }
 0x45c   : > { %4343 = vmatprep.subr.bf16.mxu1 %v22489_v51  ;;  %v22504_v51 = vld [vmem:[%s31290_s4 + $0x594] ss:$8 sps:$4 sm:$0xff]  }
 0x45e   : > { %4173 = vmatmul.mubr.bf16.gmra.mrb[124].mxu1 %v25525_v61 }
 0x45f   : > { %4182 = vmatprep.mubr.bf16.mxu1 %v31325_v54  ;;  %4344 = vmatpush1.bf16.msra.mxu1 %v22487_v0  ;;  %v31334_v0 = vld [vmem:[#allocation5_spill] sm:$0xff] }
 0x460   : > { %4345 = vmatprep.subr.bf16.mxu1 %v22492_v2  ;;  %v22502_v2 = vld [vmem:[%s31290_s4 + $0x590] ss:$8 sps:$4 sm:$0xff]  }
 0x463   : > { %4346 = vmatpush1.bf16.msra.mxu1 %v22490_v12  ;;  %v22507_v12 = vld [vmem:[%s31290_s4 + $0x5a4] ss:$8 sps:$4 sm:$0xff]  }
 0x464   : > { %4347 = vmatprep.subr.bf16.mxu1 %v22495_v13  ;;  %v4244_v13 = vrot.slane %v25409_v11, 3 }
 0x466   : > { %4183 = vmatmul.mubr.bf16.gmra.mrb[128].mxu1 %v25564_v20 }
 0x467   : > { %4192 = vmatprep.mubr.bf16.mxu1 %v31325_v54  ;;  %4348 = vmatpush1.bf16.msra.mxu1 %v22493_v58  ;;  %v22505_v58 = vld [vmem:[%s31290_s4 + $0x5a0] ss:$8 sps:$4 sm:$0xff]  }
 0x468   : > { %4349 = vmatprep.subr.bf16.mxu1 %v22498_v55  ;;  %v22510_v55 = vld [vmem:[%s31290_s4 + $0x5b4] ss:$8 sps:$4 sm:$0xff]  }
 0x46b   : > { %4350 = vmatpush1.bf16.msra.mxu1 %v22496_v26  ;;  %v31335_v26 = vrot.slane %v25343_v45, 3 }
 0x46c   : > { %4560 = vmatprep.subr.bf16.mxu1 %v22501_v31 }
 0x46d   : > { %v4245_v31 = vsel %vm4240_vm11, %v31335_v26, %v4244_v13  ;;  %v22519_v26 = vld [vmem:[%s31290_s4 + $0x5e4] ss:$8 sps:$4 sm:$0xff]  }
 0x46e   : > { %4193 = vmatmul.mubr.bf16.gmra.mrb[132].mxu1 %v25589_v59 }
 0x46f   : > { %4367 = vmatprep.mubr.bf16.mxu1 %v31325_v54 }
 0x476   : > { %4368 = vmatmul.mubr.bf16.vlgmr.msra.gmra.mrb[136].mxu1 %v31334_v0  ;;  %v4246_v0 = vrot.slane %v25466_v49, 3 }
 0x477   : > { %4377 = vmatprep.mubr.bf16.mxu1 %v31325_v54  ;;  %4561 = vmatpush1.bf16.msra.mxu1 %v22499_v41  ;;  %v22508_v41 = vld [vmem:[%s31290_s4 + $0x5b0] ss:$8 sps:$4 sm:$0xff]  }
 0x478   : > { %4562 = vmatprep.subr.bf16.mxu1 %v22504_v51  ;;  %v22513_v51 = vld [vmem:[%s31290_s4 + $0x5c4] ss:$8 sps:$4 sm:$0xff]  }
 0x47b   : > { %4563 = vmatpush1.bf16.msra.mxu1 %v22502_v2  ;;  %v22511_v2 = vld [vmem:[%s31290_s4 + $0x5c0] ss:$8 sps:$4 sm:$0xff]  }
 0x47c   : > { %4564 = vmatprep.subr.bf16.mxu1 %v22507_v12  ;;  %v22516_v12 = vld [vmem:[%s31290_s4 + $0x5d4] ss:$8 sps:$4 sm:$0xff]  }
 0x47e   : > { %4378 = vmatmul.mubr.bf16.gmra.mrb[120].mxu1 %v4245_v31  ;;  %v4248_v31 = vrot.slane %v25527_v47, 3 }
 0x47f   : > { %4387 = vmatprep.mubr.bf16.mxu1 %v31325_v54  ;;  %4565 = vmatpush1.bf16.msra.mxu1 %v22505_v58  ;;  %v4247_v58 = vsel %vm4240_vm11, %v4244_v13, %v4246_v0  ;;  %v22517_v13 = vld [vmem:[%s31290_s4 + $0x5e0] ss:$8 sps:$4 sm:$0xff]  }
 0x480   : > { %4566 = vmatprep.subr.bf16.mxu1 %v22510_v55  ;;  %v22514_v55 = vld [vmem:[%s31290_s4 + $0x5d0] ss:$8 sps:$4 sm:$0xff]  }
 0x483   : > { %4567 = vmatpush1.bf16.msra.mxu1 %v22508_v41  ;;  %v22522_v41 = vld [vmem:[%s31290_s4 + $0x5f4] ss:$8 sps:$4 sm:$0xff]  }
 0x484   : > { %4568 = vmatprep.subr.bf16.mxu1 %v22513_v51  ;;  %v4249_v51 = vsel %vm4240_vm11, %v4246_v0, %v4248_v31 }
 0x486   : > { %4388 = vmatmul.mubr.bf16.gmra.mrb[124].mxu1 %v4247_v58  ;;  %v22525_v58 = vld [vmem:[%s31290_s4 + $0x604] ss:$8 sps:$4 sm:$0xff]  }
 0x487   : > { %4397 = vmatprep.mubr.bf16.mxu1 %v31325_v54  ;;  %4569 = vmatpush1.bf16.msra.mxu1 %v22511_v2  ;;  %v22520_v2 = vld [vmem:[%s31290_s4 + $0x5f0] ss:$8 sps:$4 sm:$0xff]  }
 0x488   : > { %4570 = vmatprep.subr.bf16.mxu1 %v22516_v12  ;;  %v6620_v12 = vshrl.u32 %v25740_v18, 16 }
 0x48a   : > { %v7039_v0 = vrot.slane %v6620_v12, 7 }
 0x48b   : > { %4571 = vmatpush1.bf16.msra.mxu1 %v22514_v55  ;;  %v6623_v55 = vshll.u32 %v25740_v18, 16 }
 0x48c   : > { %4572 = vmatprep.subr.bf16.mxu1 %v22519_v26 }
 0x48d   : > { %v26382_v26 = vor.u32 %v7039_v0, %v6623_v55  ;;  %v22534_v0 = vld [vmem:[%s31290_s4 + $0x634] ss:$8 sps:$4 sm:$0xff]  }
 0x48e   : > { %4398 = vmatmul.mubr.bf16.gmra.mrb[128].mxu1 %v4249_v51  ;;  %v31336_v51 = vld [vmem:[#allocation7_spill] sm:$0xff] }
 0x48f   : > { %4407 = vmatprep.mubr.bf16.mxu1 %v31325_v54  ;;  %4573 = vmatpush1.bf16.msra.mxu1 %v22517_v13  ;;  %v22523_v13 = vld [vmem:[%s31290_s4 + $0x600] ss:$8 sps:$4 sm:$0xff]  }
 0x490   : > { %4574 = vmatprep.subr.bf16.mxu1 %v22522_v41  ;;  %v22528_v41 = vld [vmem:[%s31290_s4 + $0x614] ss:$8 sps:$4 sm:$0xff]  }
 0x493   : > { %4575 = vmatpush1.bf16.msra.mxu1 %v22520_v2  ;;  %v22526_v2 = vld [vmem:[%s31290_s4 + $0x610] ss:$8 sps:$4 sm:$0xff]  }
 0x494   : > { %4778 = vmatprep.subr.bf16.mxu1 %v22525_v58  ;;  %v22529_v58 = vld [vmem:[%s31290_s4 + $0x620] ss:$8 sps:$4 sm:$0xff]  }
 0x496   : > { %4408 = vmatmul.mubr.bf16.gmra.mrb[132].mxu1 %v4248_v31  ;;  %v22531_v31 = vld [vmem:[%s31290_s4 + $0x624] ss:$8 sps:$4 sm:$0xff]  }
 0x497   : > { %4592 = vmatprep.mubr.bf16.mxu1 %v31325_v54 }
 0x49e   : > { %4593 = vmatmul.mubr.bf16.vlgmr.msra.gmra.mrb[136].mxu1 %v31336_v51  ;;  %v22535_v51 = vld [vmem:[%s31290_s4 + $0x640] ss:$8 sps:$4 sm:$0xff]  }
 0x49f   : > { %4602 = vmatprep.mubr.bf16.mxu1 %v31325_v54  ;;  %4779 = vmatpush1.bf16.msra.mxu1 %v22523_v13  ;;  %v22532_v13 = vld [vmem:[%s31290_s4 + $0x630] ss:$8 sps:$4 sm:$0xff]  }
 0x4a0   : > { %4780 = vmatprep.subr.bf16.mxu1 %v22528_v41  ;;  %v22537_v41 = vld [vmem:[%s31290_s4 + $0x644] ss:$8 sps:$4 sm:$0xff]  }
 0x4a3   : > { %4781 = vmatpush1.bf16.msra.mxu1 %v22526_v2  ;;  %v22538_v2 = vld [vmem:[%s31290_s4 + $0x650] ss:$8 sps:$4 sm:$0xff]  }
 0x4a4   : > { %4782 = vmatprep.subr.bf16.mxu1 %v22531_v31  ;;  %v22543_v31 = vld [vmem:[%s31290_s4 + $0x664] ss:$8 sps:$4 sm:$0xff]  }
 0x4a6   : > { %4603 = vmatmul.mubr.bf16.gmra.mrb[120].mxu1 %v25596_v6  ;;  %v22540_v6 = vld [vmem:[%s31290_s4 + $0x654] ss:$8 sps:$4 sm:$0xff]  }
 0x4a7   : > { %4612 = vmatprep.mubr.bf16.mxu1 %v31325_v54  ;;  %4783 = vmatpush1.bf16.msra.mxu1 %v22529_v58  ;;  %v22541_v58 = vld [vmem:[%s31290_s4 + $0x660] ss:$8 sps:$4 sm:$0xff]  }
 0x4a8   : > { %4784 = vmatprep.subr.bf16.mxu1 %v22534_v0  ;;  %v22544_v0 = vld [vmem:[%s31290_s4 + $0x670] ss:$8 sps:$4 sm:$0xff]  }
 0x4ab   : > { %4785 = vmatpush1.bf16.msra.mxu1 %v22532_v13  ;;  %v22549_v13 = vld [vmem:[%s31290_s4 + $0x684] ss:$8 sps:$4 sm:$0xff]  }
 0x4ac   : > { %4786 = vmatprep.subr.bf16.mxu1 %v22537_v41  ;;  %v31337_v41 = vld [vmem:[#allocation8_spill] sm:$0xff] }
 0x4ae   : > { %4613 = vmatmul.mubr.bf16.gmra.mrb[124].mxu1 %v25608_v60  ;;  %v22546_v60 = vld [vmem:[%s31290_s4 + $0x674] ss:$8 sps:$4 sm:$0xff]  }
 0x4af   : > { %4622 = vmatprep.mubr.bf16.mxu1 %v31325_v54  ;;  %4787 = vmatpush1.bf16.msra.mxu1 %v22535_v51  ;;  %v22552_v51 = vld [vmem:[%s31290_s4 + $0x694] ss:$8 sps:$4 sm:$0xff]  }
 0x4b0   : > { %4788 = vmatprep.subr.bf16.mxu1 %v22540_v6  ;;  %v31338_v6 = vld [vmem:[#allocation9_spill] sm:$0xff] }
 0x4b3   : > { %4789 = vmatpush1.bf16.msra.mxu1 %v22538_v2  ;;  %v22550_v2 = vld [vmem:[%s31290_s4 + $0x690] ss:$8 sps:$4 sm:$0xff]  }
 0x4b4   : > { %4790 = vmatprep.subr.bf16.mxu1 %v22543_v31  ;;  %v22555_v31 = vld [vmem:[%s31290_s4 + $0x6a4] ss:$8 sps:$4 sm:$0xff]  }
 0x4b6   : > { %4623 = vmatmul.mubr.bf16.gmra.mrb[128].mxu1 %v25612_v52  ;;  %v22547_v52 = vld [vmem:[%s31290_s4 + $0x680] ss:$8 sps:$4 sm:$0xff]  }
 0x4b7   : > { %4632 = vmatprep.mubr.bf16.mxu1 %v31325_v54  ;;  %4791 = vmatpush1.bf16.msra.mxu1 %v22541_v58  ;;  %v4685_v58 = vrot.slane %v25409_v11, 4 }
 0x4b8   : > { %4792 = vmatprep.subr.bf16.mxu1 %v22546_v60  ;;  %v22553_v60 = vld [vmem:[%s31290_s4 + $0x6a0] ss:$8 sps:$4 sm:$0xff]  }
 0x4bb   : > { %4793 = vmatpush1.bf16.msra.mxu1 %v22544_v0  ;;  %v22558_v0 = vld [vmem:[%s31290_s4 + $0x6b4] ss:$8 sps:$4 sm:$0xff]  }
 0x4bc   : > { %5012 = vmatprep.subr.bf16.mxu1 %v22549_v13  ;;  %v31339_v13 = vrot.slane %v25343_v45, 4 }
 0x4be   : > { %4633 = vmatmul.mubr.bf16.gmra.mrb[132].mxu1 %v31337_v41  ;;  %v4686_v41 = vsel %vm4681_vm13, %v31339_v13, %v4685_v58  ;;  %v22567_v13 = vld [vmem:[%s31290_s4 + $0x6e4] ss:$8 sps:$4 sm:$0xff]  }
 0x4bf   : > { %4810 = vmatprep.mubr.bf16.mxu1 %v31325_v54 }
 0x4c6   : > { %4811 = vmatmul.mubr.bf16.vlgmr.msra.gmra.mrb[136].mxu1 %v31338_v6  ;;  %v4687_v6 = vrot.slane %v25466_v49, 4 }
 0x4c7   : > { %4820 = vmatprep.mubr.bf16.mxu1 %v31325_v54  ;;  %5013 = vmatpush1.bf16.msra.mxu1 %v22547_v52  ;;  %v22556_v52 = vld [vmem:[%s31290_s4 + $0x6b0] ss:$8 sps:$4 sm:$0xff]  }
 0x4c8   : > { %5014 = vmatprep.subr.bf16.mxu1 %v22552_v51  ;;  %v22561_v51 = vld [vmem:[%s31290_s4 + $0x6c4] ss:$8 sps:$4 sm:$0xff]  }
 0x4cb   : > { %5015 = vmatpush1.bf16.msra.mxu1 %v22550_v2  ;;  %v22559_v2 = vld [vmem:[%s31290_s4 + $0x6c0] ss:$8 sps:$4 sm:$0xff]  }
 0x4cc   : > { %5016 = vmatprep.subr.bf16.mxu1 %v22555_v31  ;;  %v22564_v31 = vld [vmem:[%s31290_s4 + $0x6d4] ss:$8 sps:$4 sm:$0xff]  }
 0x4ce   : > { %4821 = vmatmul.mubr.bf16.gmra.mrb[120].mxu1 %v4686_v41  ;;  %v4689_v41 = vrot.slane %v25527_v47, 4 }
 0x4cf   : > { %4830 = vmatprep.mubr.bf16.mxu1 %v31325_v54  ;;  %5017 = vmatpush1.bf16.msra.mxu1 %v22553_v60  ;;  %v4688_v60 = vsel %vm4681_vm13, %v4685_v58, %v4687_v6  ;;  %v22565_v58 = vld [vmem:[%s31290_s4 + $0x6e0] ss:$8 sps:$4 sm:$0xff]  }
 0x4d0   : > { %5018 = vmatprep.subr.bf16.mxu1 %v22558_v0  ;;  %v22562_v0 = vld [vmem:[%s31290_s4 + $0x6d0] ss:$8 sps:$4 sm:$0xff]  }
 0x4d3   : > { %5019 = vmatpush1.bf16.msra.mxu1 %v22556_v52  ;;  %v22570_v52 = vld [vmem:[%s31290_s4 + $0x6f4] ss:$8 sps:$4 sm:$0xff]  }
 0x4d4   : > { %5020 = vmatprep.subr.bf16.mxu1 %v22561_v51  ;;  %v4690_v51 = vsel %vm4681_vm13, %v4687_v6, %v4689_v41  ;;  %v22571_v6 = vld [vmem:[%s31290_s4 + $0x700] ss:$8 sps:$4 sm:$0xff]  }
 0x4d6   : > { %4831 = vmatmul.mubr.bf16.gmra.mrb[124].mxu1 %v4688_v60  ;;  %v4691_v60 = vrot.slane %v25727_v44, 4 }
 0x4d7   : > { %4840 = vmatprep.mubr.bf16.mxu1 %v31325_v54  ;;  %5021 = vmatpush1.bf16.msra.mxu1 %v22559_v2  ;;  %v22568_v2 = vld [vmem:[%s31290_s4 + $0x6f0] ss:$8 sps:$4 sm:$0xff]  }
 0x4d8   : > { %5022 = vmatprep.subr.bf16.mxu1 %v22564_v31  ;;  %v22573_v31 = vld [vmem:[%s31290_s4 + $0x704] ss:$8 sps:$4 sm:$0xff]  }
 0x4db   : > { %5023 = vmatpush1.bf16.msra.mxu1 %v22562_v0  ;;  %v4692_v0 = vsel %vm4681_vm13, %v4689_v41, %v4691_v60  ;;  %v22574_v41 = vld [vmem:[%s31290_s4 + $0x710] ss:$8 sps:$4 sm:$0xff]  }
 0x4dc   : > { %5024 = vmatprep.subr.bf16.mxu1 %v22567_v13  ;;  %v22576_v13 = vld [vmem:[%s31290_s4 + $0x714] ss:$8 sps:$4 sm:$0xff]   ;;  %v22586_v60 = vld [vmem:[%s31290_s4 + $0x750] ss:$8 sps:$4 sm:$0xff]  }
 0x4de   : > { %4841 = vmatmul.mubr.bf16.gmra.mrb[128].mxu1 %v4690_v51  ;;  %v22580_v51 = vld [vmem:[%s31290_s4 + $0x730] ss:$8 sps:$4 sm:$0xff]  }
 0x4df   : > { %4850 = vmatprep.mubr.bf16.mxu1 %v31325_v54  ;;  %5025 = vmatpush1.bf16.msra.mxu1 %v22565_v58  ;;  %v22579_v58 = vld [vmem:[%s31290_s4 + $0x724] ss:$8 sps:$4 sm:$0xff]  }
 0x4e0   : > { %5026 = vmatprep.subr.bf16.mxu1 %v22570_v52  ;;  %v22577_v52 = vld [vmem:[%s31290_s4 + $0x720] ss:$8 sps:$4 sm:$0xff]  }
 0x4e3   : > { %5027 = vmatpush1.bf16.msra.mxu1 %v22568_v2  ;;  %v22585_v2 = vld [vmem:[%s31290_s4 + $0x744] ss:$8 sps:$4 sm:$0xff]  }
 0x4e4   : > { %5229 = vmatprep.subr.bf16.mxu1 %v22573_v31  ;;  %v22583_v31 = vld [vmem:[%s31290_s4 + $0x740] ss:$8 sps:$4 sm:$0xff]  }
 0x4e6   : > { %4851 = vmatmul.mubr.bf16.gmra.mrb[132].mxu1 %v4692_v0  ;;  %v22591_v0 = vld [vmem:[%s31290_s4 + $0x764] ss:$8 sps:$4 sm:$0xff]  }
 0x4e7   : > { %5044 = vmatprep.mubr.bf16.mxu1 %v31325_v54 }
 0x4ee   : > { %5045 = vmatmul.mubr.bf16.vlgmr.msra.gmra.mrb[136].mxu1 %v25635_v42  ;;  %v22582_v42 = vld [vmem:[%s31290_s4 + $0x734] ss:$8 sps:$4 sm:$0xff]  }
 0x4ef   : > { %5054 = vmatprep.mubr.bf16.mxu1 %v31325_v54  ;;  %5230 = vmatpush1.bf16.msra.mxu1 %v22571_v6  ;;  %v22589_v6 = vld [vmem:[%s31290_s4 + $0x760] ss:$8 sps:$4 sm:$0xff]  }
 0x4f0   : > { %5231 = vmatprep.subr.bf16.mxu1 %v22576_v13  ;;  %v4921_v13 = vrot.slane %v25859_v4, 4 }
 0x4f3   : > { %5232 = vmatpush1.bf16.msra.mxu1 %v22574_v41  ;;  %v4924_v41 = vrot.slane %v25848_v38, 5 }
 0x4f4   : > { %5233 = vmatprep.subr.bf16.mxu1 %v22579_v58  ;;  %v22592_v58 = vld [vmem:[%s31290_s4 + $0x770] ss:$8 sps:$4 sm:$0xff]  }
 0x4f6   : > { %5055 = vmatmul.mubr.bf16.gmra.mrb[120].mxu1 %v25640_v16  ;;  %v22588_v16 = vld [vmem:[%s31290_s4 + $0x754] ss:$8 sps:$4 sm:$0xff]  }
 0x4f7   : > { %5064 = vmatprep.mubr.bf16.mxu1 %v31325_v54  ;;  %5234 = vmatpush1.bf16.msra.mxu1 %v22577_v52  ;;  %v22597_v52 = vld [vmem:[%s31290_s4 + $0x784] ss:$8 sps:$4 sm:$0xff]  }
 0x4f8   : > { %5235 = vmatprep.subr.bf16.mxu1 %v22582_v42  ;;  %v4925_v42 = vor.u32 %v4924_v41, %v4921_v13  ;;  %v22609_v13 = vld [vmem:[%s31290_s4 + $0x7c4] ss:$8 sps:$4 sm:$0xff]   ;;  %v5138_v41 = vrot.slane %v25466_v49, 5 }
 0x4fb   : > { %5236 = vmatpush1.bf16.msra.mxu1 %v22580_v51  ;;  %v4926_v51 = vsel %vm4898_vm14, %v25645_v8, %v4925_v42  ;;  %v22598_v8 = vld [vmem:[%s31290_s4 + $0x790] ss:$8 sps:$4 sm:$0xff]  }
 0x4fc   : > { %5237 = vmatprep.subr.bf16.mxu1 %v22585_v2  ;;  %v22600_v2 = vld [vmem:[%s31290_s4 + $0x794] ss:$8 sps:$4 sm:$0xff]   ;;  %v22610_v42 = vld [vmem:[%s31290_s4 + $0x7d0] ss:$8 sps:$4 sm:$0xff]  }
 0x4fe   : > { %5065 = vmatmul.mubr.bf16.gmra.mrb[124].mxu1 %v25643_v33  ;;  %v22594_v33 = vld [vmem:[%s31290_s4 + $0x774] ss:$8 sps:$4 sm:$0xff]  }
 0x4ff   : > { %5074 = vmatprep.mubr.bf16.mxu1 %v31325_v54  ;;  %5238 = vmatpush1.bf16.msra.mxu1 %v22583_v31  ;;  %v22603_v31 = vld [vmem:[%s31290_s4 + $0x7a4] ss:$8 sps:$4 sm:$0xff]  }
 0x500   : > { %5239 = vmatprep.subr.bf16.mxu1 %v22588_v16  ;;  %v5136_v16 = vrot.slane %v25409_v11, 5 }
 0x503   : > { %5240 = vmatpush1.bf16.msra.mxu1 %v22586_v60  ;;  %v22601_v60 = vld [vmem:[%s31290_s4 + $0x7a0] ss:$8 sps:$4 sm:$0xff]  }
 0x504   : > { %5241 = vmatprep.subr.bf16.mxu1 %v22591_v0  ;;  %v31340_v0 = vrot.slane %v25343_v45, 5  ;;  %v22607_v45 = vld [vmem:[%s31290_s4 + $0x7c0] ss:$8 sps:$4 sm:$0xff]  }
 0x506   : > { %5075 = vmatmul.mubr.bf16.gmra.mrb[128].mxu1 %v25658_v46  ;;  %v22595_v46 = vld [vmem:[%s31290_s4 + $0x780] ss:$8 sps:$4 sm:$0xff]  }
 0x507   : > { %5084 = vmatprep.mubr.bf16.mxu1 %v31325_v54  ;;  %5242 = vmatpush1.bf16.msra.mxu1 %v22589_v6  ;;  %v5137_v6 = vsel %vm5132_vm15, %v31340_v0, %v5136_v16 }
 0x508   : > { %5243 = vmatprep.subr.bf16.mxu1 %v22594_v33  ;;  %v22604_v33 = vld [vmem:[%s31290_s4 + $0x7b0] ss:$8 sps:$4 sm:$0xff]  }
 0x50b   : > { %5244 = vmatpush1.bf16.msra.mxu1 %v22592_v58  ;;  %v22612_v58 = vld [vmem:[%s31290_s4 + $0x7d4] ss:$8 sps:$4 sm:$0xff]  }
 0x50c   : > { %5438 = vmatprep.subr.bf16.mxu1 %v22597_v52  ;;  %v5139_v52 = vsel %vm5132_vm15, %v5136_v16, %v5138_v41  ;;  %v22616_v16 = vld [vmem:[%s31290_s4 + $0x7f0] ss:$8 sps:$4 sm:$0xff]  }
 0x50e   : > { %5085 = vmatmul.mubr.bf16.gmra.mrb[132].mxu1 %v4926_v51  ;;  %v22615_v51 = vld [vmem:[%s31290_s4 + $0x7e4] ss:$8 sps:$4 sm:$0xff]  }
 0x50f   : > { %5261 = vmatprep.mubr.bf16.mxu1 %v31325_v54 }
 0x516   : > { %5262 = vmatmul.mubr.bf16.vlgmr.msra.gmra.mrb[136].mxu1 %v25650_v40  ;;  %v22606_v40 = vld [vmem:[%s31290_s4 + $0x7b4] ss:$8 sps:$4 sm:$0xff]  }
 0x517   : > { %5271 = vmatprep.mubr.bf16.mxu1 %v31325_v54  ;;  %5439 = vmatpush1.bf16.msra.mxu1 %v22595_v46  ;;  %v5140_v46 = vrot.slane %v25527_v47, 5 }
 0x518   : > { %5440 = vmatprep.subr.bf16.mxu1 %v22600_v2  ;;  %v22613_v2 = vld [vmem:[%s31290_s4 + $0x7e0] ss:$8 sps:$4 sm:$0xff]  }
 0x51b   : > { %5441 = vmatpush1.bf16.msra.mxu1 %v22598_v8  ;;  %v22618_v8 = vld [vmem:[%s31290_s4 + $0x7f4] ss:$8 sps:$4 sm:$0xff]  }
 0x51c   : > { %5442 = vmatprep.subr.bf16.mxu1 %v22603_v31  ;;  %v5141_v31 = vsel %vm5132_vm15, %v5138_v41, %v5140_v46  ;;  %v22622_v41 = vld [vmem:[%s31290_s4 + $0x810] ss:$8 sps:$4 sm:$0xff]  }
 0x51e   : > { %5272 = vmatmul.mubr.bf16.gmra.mrb[120].mxu1 %v5137_v6  ;;  %v22619_v6 = vld [vmem:[%s31290_s4 + $0x800] ss:$8 sps:$4 sm:$0xff]  }
 0x51f   : > { %5281 = vmatprep.mubr.bf16.mxu1 %v31325_v54  ;;  %5443 = vmatpush1.bf16.msra.mxu1 %v22601_v60  ;;  %v22621_v60 = vld [vmem:[%s31290_s4 + $0x804] ss:$8 sps:$4 sm:$0xff]  }
 0x520   : > { %5444 = vmatprep.subr.bf16.mxu1 %v22606_v40  ;;  %v5142_v40 = vrot.slane %v25727_v44, 5 }
 0x522   : > { %v5143_v0 = vsel %vm5132_vm15, %v5140_v46, %v5142_v40  ;;  %v22633_v46 = vld [vmem:[%s31290_s4 + $0x844] ss:$8 sps:$4 sm:$0xff]   ;;  %v22640_v40 = vld [vmem:[%s31290_s4 + $0x870] ss:$8 sps:$4 sm:$0xff]  }
 0x523   : > { %5445 = vmatpush1.bf16.msra.mxu1 %v22604_v33  ;;  %v22624_v33 = vld [vmem:[%s31290_s4 + $0x814] ss:$8 sps:$4 sm:$0xff]  }
 0x524   : > { %5446 = vmatprep.subr.bf16.mxu1 %v22609_v13  ;;  %v31341_v13 = vld [vmem:[#allocation4_spill] sm:$0xff] }
 0x526   : > { %5282 = vmatmul.mubr.bf16.gmra.mrb[124].mxu1 %v5139_v52  ;;  %v22630_v52 = vld [vmem:[%s31290_s4 + $0x834] ss:$8 sps:$4 sm:$0xff]  }
 0x527   : > { %5291 = vmatprep.mubr.bf16.mxu1 %v31325_v54  ;;  %5447 = vmatpush1.bf16.msra.mxu1 %v22607_v45  ;;  %v22627_v45 = vld [vmem:[%s31290_s4 + $0x824] ss:$8 sps:$4 sm:$0xff]  }
 0x528   : > { %5448 = vmatprep.subr.bf16.mxu1 %v22612_v58  ;;  %v22625_v58 = vld [vmem:[%s31290_s4 + $0x820] ss:$8 sps:$4 sm:$0xff]  }
 0x52b   : > { %5449 = vmatpush1.bf16.msra.mxu1 %v22610_v42  ;;  %v31342_v42 = vld [vmem:[#allocation6_spill] sm:$0xff] }
 0x52c   : > { %5450 = vmatprep.subr.bf16.mxu1 %v22615_v51  ;;  %v22628_v51 = vld [vmem:[%s31290_s4 + $0x830] ss:$8 sps:$4 sm:$0xff]  }
 0x52e   : > { %5292 = vmatmul.mubr.bf16.gmra.mrb[128].mxu1 %v5141_v31  ;;  %v22634_v31 = vld [vmem:[%s31290_s4 + $0x850] ss:$8 sps:$4 sm:$0xff]  }
 0x52f   : > { %5301 = vmatprep.mubr.bf16.mxu1 %v31325_v54  ;;  %5451 = vmatpush1.bf16.msra.mxu1 %v22613_v2  ;;  %v22631_v2 = vld [vmem:[%s31290_s4 + $0x840] ss:$8 sps:$4 sm:$0xff]  }
 0x530   : > { %5452 = vmatprep.subr.bf16.mxu1 %v22618_v8  ;;  %v22636_v8 = vld [vmem:[%s31290_s4 + $0x854] ss:$8 sps:$4 sm:$0xff]  }
 0x533   : > { %5453 = vmatpush1.bf16.msra.mxu1 %v22616_v16  ;;  %v22639_v16 = vld [vmem:[%s31290_s4 + $0x864] ss:$8 sps:$4 sm:$0xff]  }
 0x534   : > { %5645 = vmatprep.subr.bf16.mxu1 %v22621_v60  ;;  %v22637_v60 = vld [vmem:[%s31290_s4 + $0x860] ss:$8 sps:$4 sm:$0xff]  }
 0x536   : > { %5302 = vmatmul.mubr.bf16.gmra.mrb[132].mxu1 %v5143_v0  ;;  %v22645_v0 = vld [vmem:[%s31290_s4 + $0x884] ss:$8 sps:$4 sm:$0xff]  }
 0x537   : > { %5470 = vmatprep.mubr.bf16.mxu1 %v31325_v54 }
 0x53e   : > { %5471 = vmatmul.mubr.bf16.vlgmr.msra.gmra.mrb[136].mxu1 %v31341_v13  ;;  %v22651_v13 = vld [vmem:[%s31290_s4 + $0x8a4] ss:$8 sps:$4 sm:$0xff]  }
 0x53f   : > { %5480 = vmatprep.mubr.bf16.mxu1 %v31325_v54  ;;  %5646 = vmatpush1.bf16.msra.mxu1 %v22619_v6  ;;  %v5354_v6 = vor.u32 %v5352_v32, %v25859_v4  ;;  %v22646_v32 = vld [vmem:[%s31290_s4 + $0x890] ss:$8 sps:$4 sm:$0xff]  }
 0x540   : > { %5647 = vmatprep.subr.bf16.mxu1 %v22624_v33  ;;  %v22648_v33 = vld [vmem:[%s31290_s4 + $0x894] ss:$8 sps:$4 sm:$0xff]  }
 0x543   : > { %5648 = vmatpush1.bf16.msra.mxu1 %v22622_v41  ;;  %v22649_v41 = vld [vmem:[%s31290_s4 + $0x8a0] ss:$8 sps:$4 sm:$0xff]  }
 0x544   : > { %5649 = vmatprep.subr.bf16.mxu1 %v22627_v45  ;;  %v22652_v45 = vld [vmem:[%s31290_s4 + $0x8b0] ss:$8 sps:$4 sm:$0xff]  }
 0x546   : > { %5481 = vmatmul.mubr.bf16.gmra.mrb[120].mxu1 %v31342_v42  ;;  %v22655_v42 = vld [vmem:[%s31290_s4 + $0x8c0] ss:$8 sps:$4 sm:$0xff]  }
 0x547   : > { %5490 = vmatprep.mubr.bf16.mxu1 %v31325_v54  ;;  %5650 = vmatpush1.bf16.msra.mxu1 %v22625_v58  ;;  %v22657_v58 = vld [vmem:[%s31290_s4 + $0x8c4] ss:$8 sps:$4 sm:$0xff]  }
 0x548   : > { %5651 = vmatprep.subr.bf16.mxu1 %v22630_v52  ;;  %v5558_v52 = vrot.slane %v25527_v47, 1 }
 0x54b   : > { %5652 = vmatpush1.bf16.msra.mxu1 %v22628_v51  ;;  %v5559_v51 = vsel %vm1349_vm1, %v25780_v35, %v5558_v52  ;;  %v22661_v35 = vld [vmem:[%s31290_s4 + $0x8e0] ss:$8 sps:$4 sm:$0xff]  }
 0x54c   : > { %5653 = vmatprep.subr.bf16.mxu1 %v22633_v46  ;;  %v22658_v46 = vld [vmem:[%s31290_s4 + $0x8d0] ss:$8 sps:$4 sm:$0xff]  }
 0x54e   : > { %5491 = vmatmul.mubr.bf16.gmra.mrb[124].mxu1 %v25667_v56  ;;  %v22642_v56 = vld [vmem:[%s31290_s4 + $0x874] ss:$8 sps:$4 sm:$0xff]  }
 0x54f   : > { %5500 = vmatprep.mubr.bf16.mxu1 %v31325_v54  ;;  %5654 = vmatpush1.bf16.msra.mxu1 %v22631_v2  ;;  %v22663_v2 = vld [vmem:[%s31290_s4 + $0x8e4] ss:$8 sps:$4 sm:$0xff]  }
 0x550   : > { %5655 = vmatprep.subr.bf16.mxu1 %v22636_v8  ;;  %v5560_v8 = vrot.slane %v25727_v44, 1 }
 0x553   : > { %5656 = vmatpush1.bf16.msra.mxu1 %v22634_v31  ;;  %v22666_v31 = vld [vmem:[%s31290_s4 + $0x8f4] ss:$8 sps:$4 sm:$0xff]  }
 0x554   : > { %5657 = vmatprep.subr.bf16.mxu1 %v22639_v16  ;;  %v5561_v16 = vsel %vm1349_vm1, %v5558_v52, %v5560_v8  ;;  %v22682_v52 = vld [vmem:[%s31290_s4 + $0x950] ss:$8 sps:$4 sm:$0xff]  }
 0x556   : > { %5501 = vmatmul.mubr.bf16.gmra.mrb[128].mxu1 %v25882_v9  ;;  %v22643_v9 = vld [vmem:[%s31290_s4 + $0x880] ss:$8 sps:$4 sm:$0xff]  }
 0x557   : > { %5510 = vmatprep.mubr.bf16.mxu1 %v31325_v54  ;;  %5658 = vmatpush1.bf16.msra.mxu1 %v22637_v60  ;;  %v22664_v60 = vld [vmem:[%s31290_s4 + $0x8f0] ss:$8 sps:$4 sm:$0xff]  }
 0x558   : > { %5659 = vmatprep.subr.bf16.mxu1 %v22642_v56  ;;  %v22669_v56 = vld [vmem:[%s31290_s4 + $0x904] ss:$8 sps:$4 sm:$0xff]  }
 0x55b   : > { %5660 = vmatpush1.bf16.msra.mxu1 %v22640_v40  ;;  %v22667_v40 = vld [vmem:[%s31290_s4 + $0x900] ss:$8 sps:$4 sm:$0xff]  }
 0x55c   : > { %5856 = vmatprep.subr.bf16.mxu1 %v22645_v0  ;;  %v22672_v0 = vld [vmem:[%s31290_s4 + $0x914] ss:$8 sps:$4 sm:$0xff]  }
 0x55e   : > { %5511 = vmatmul.mubr.bf16.gmra.mrb[132].mxu1 %v5354_v6  ;;  %v22670_v6 = vld [vmem:[%s31290_s4 + $0x910] ss:$8 sps:$4 sm:$0xff]  }
 0x55f   : > { %5677 = vmatprep.mubr.bf16.mxu1 %v31325_v54 }
 0x566   : > { %5678 = vmatmul.mubr.bf16.vlgmr.msra.gmra.mrb[136].mxu1 %v25769_v53  ;;  %v22654_v53 = vld [vmem:[%s31290_s4 + $0x8b4] ss:$8 sps:$4 sm:$0xff]  }
 0x567   : > { %5687 = vmatprep.mubr.bf16.mxu1 %v31325_v54  ;;  %5857 = vmatpush1.bf16.msra.mxu1 %v22643_v9  ;;  %v22675_v9 = vld [vmem:[%s31290_s4 + $0x924] ss:$8 sps:$4 sm:$0xff]  }
 0x568   : > { %5858 = vmatprep.subr.bf16.mxu1 %v22648_v33  ;;  %v22673_v33 = vld [vmem:[%s31290_s4 + $0x920] ss:$8 sps:$4 sm:$0xff]  }
 0x56b   : > { %5859 = vmatpush1.bf16.msra.mxu1 %v22646_v32  ;;  %v31343_v32 = vld [vmem:[#allocation13_spill] sm:$0xff] }
 0x56c   : > { %5860 = vmatprep.subr.bf16.mxu1 %v22651_v13  ;;  %v22676_v13 = vld [vmem:[%s31290_s4 + $0x930] ss:$8 sps:$4 sm:$0xff]  }
 0x56e   : > { %5688 = vmatmul.mubr.bf16.gmra.mrb[120].mxu1 %v25790_v37  ;;  %v22660_v37 = vld [vmem:[%s31290_s4 + $0x8d4] ss:$8 sps:$4 sm:$0xff]  }
 0x56f   : > { %5697 = vmatprep.mubr.bf16.mxu1 %v31325_v54  ;;  %5861 = vmatpush1.bf16.msra.mxu1 %v22649_v41  ;;  %v22681_v41 = vld [vmem:[%s31290_s4 + $0x944] ss:$8 sps:$4 sm:$0xff]  }
 0x570   : > { %5862 = vmatprep.subr.bf16.mxu1 %v22654_v53  ;;  %v22679_v53 = vld [vmem:[%s31290_s4 + $0x940] ss:$8 sps:$4 sm:$0xff]  }
 0x573   : > { %5863 = vmatpush1.bf16.msra.mxu1 %v22652_v45  ;;  %v22684_v45 = vld [vmem:[%s31290_s4 + $0x954] ss:$8 sps:$4 sm:$0xff]  }
 0x574   : > { %5864 = vmatprep.subr.bf16.mxu1 %v22657_v58  ;;  %v5768_v58 = vsel %vm2680_vm7, %v25515_v28, %v25884_v7  ;;  %v22690_v28 = vld [vmem:[%s31290_s4 + $0x974] ss:$8 sps:$4 sm:$0xff]   ;;  %v22688_v7 = vld [vmem:[%s31290_s4 + $0x970] ss:$8 sps:$4 sm:$0xff]  }
 0x576   : > { %5698 = vmatmul.mubr.bf16.gmra.mrb[124].mxu1 %v5559_v51  ;;  %v22693_v51 = vld [vmem:[%s31290_s4 + $0x984] ss:$8 sps:$4 sm:$0xff]  }
 0x577   : > { %5707 = vmatprep.mubr.bf16.mxu1 %v31325_v54  ;;  %5865 = vmatpush1.bf16.msra.mxu1 %v22655_v42  ;;  %v22687_v42 = vld [vmem:[%s31290_s4 + $0x964] ss:$8 sps:$4 sm:$0xff]  }
 0x578   : > { %5866 = vmatprep.subr.bf16.mxu1 %v22660_v37  ;;  %v22685_v37 = vld [vmem:[%s31290_s4 + $0x960] ss:$8 sps:$4 sm:$0xff]  }
 0x57b   : > { %5867 = vmatpush1.bf16.msra.mxu1 %v22658_v46  ;;  %v22696_v46 = vld [vmem:[%s31290_s4 + $0x994] ss:$8 sps:$4 sm:$0xff]  }
 0x57c   : > { %5868 = vmatprep.subr.bf16.mxu1 %v22663_v2  ;;  %v22694_v2 = vld [vmem:[%s31290_s4 + $0x990] ss:$8 sps:$4 sm:$0xff]  }
 0x57e   : > { %5708 = vmatmul.mubr.bf16.gmra.mrb[128].mxu1 %v5561_v16  ;;  %v5976_v16 = vrot.slane %v25527_v47, 2 }
 0x57f   : > { %5717 = vmatprep.mubr.bf16.mxu1 %v31325_v54  ;;  %5869 = vmatpush1.bf16.msra.mxu1 %v22661_v35  ;;  %v22700_v35 = vld [vmem:[%s31290_s4 + $0x9b0] ss:$8 sps:$4 sm:$0xff]  }
 0x580   : > { %5870 = vmatprep.subr.bf16.mxu1 %v22666_v31  ;;  %v22705_v31 = vld [vmem:[%s31290_s4 + $0x9c4] ss:$8 sps:$4 sm:$0xff]  }
 0x583   : > { %5871 = vmatpush1.bf16.msra.mxu1 %v22664_v60  ;;  %v22703_v60 = vld [vmem:[%s31290_s4 + $0x9c0] ss:$8 sps:$4 sm:$0xff]  }
 0x584   : > { %6063 = vmatprep.subr.bf16.mxu1 %v22669_v56  ;;  %v5977_v56 = vsel %vm1462_vm2, %v25951_v50, %v5976_v16  ;;  %v22709_v50 = vld [vmem:[%s31290_s4 + $0x9e0] ss:$8 sps:$4 sm:$0xff]  }
 0x586   : > { %5718 = vmatmul.mubr.bf16.gmra.mrb[132].mxu1 %v5560_v8  ;;  %v22697_v8 = vld [vmem:[%s31290_s4 + $0x9a0] ss:$8 sps:$4 sm:$0xff]  }
 0x587   : > { %5888 = vmatprep.mubr.bf16.mxu1 %v31325_v54 }
 0x58e   : > { %5889 = vmatmul.mubr.bf16.vlgmr.msra.gmra.mrb[136].mxu1 %v25474_v17  ;;  %v22678_v17 = vld [vmem:[%s31290_s4 + $0x934] ss:$8 sps:$4 sm:$0xff]  }
 0x58f   : > { %5898 = vmatprep.mubr.bf16.mxu1 %v31325_v54  ;;  %6064 = vmatpush1.bf16.msra.mxu1 %v22667_v40  ;;  %v22706_v40 = vld [vmem:[%s31290_s4 + $0x9d0] ss:$8 sps:$4 sm:$0xff]  }
 0x590   : > { %6065 = vmatprep.subr.bf16.mxu1 %v22672_v0  ;;  %v22711_v0 = vld [vmem:[%s31290_s4 + $0x9e4] ss:$8 sps:$4 sm:$0xff]  }
 0x593   : > { %6066 = vmatpush1.bf16.msra.mxu1 %v22670_v6  ;;  %v5978_v6 = vrot.slane %v25727_v44, 2 }
 0x594   : > { %6067 = vmatprep.subr.bf16.mxu1 %v22675_v9  ;;  %v22714_v9 = vld [vmem:[%s31290_s4 + $0x9f4] ss:$8 sps:$4 sm:$0xff]  }
 0x596   : > { %5899 = vmatmul.mubr.bf16.gmra.mrb[120].mxu1 %v31343_v32  ;;  %v22717_v32 = vld [vmem:[%s31290_s4 + $0xa04] ss:$8 sps:$4 sm:$0xff]  }
 0x597   : > { %5908 = vmatprep.mubr.bf16.mxu1 %v31325_v54  ;;  %6068 = vmatpush1.bf16.msra.mxu1 %v22673_v33  ;;  %v5979_v33 = vsel %vm1462_vm2, %v5976_v16, %v5978_v6  ;;  %v22744_v16 = vld [vmem:[%s31290_s4 + $0xa94] ss:$8 sps:$4 sm:$0xff]  }
 0x598   : > { %6069 = vmatprep.subr.bf16.mxu1 %v22678_v17  ;;  %v22712_v17 = vld [vmem:[%s31290_s4 + $0x9f0] ss:$8 sps:$4 sm:$0xff]  }
 0x59b   : > { %6070 = vmatpush1.bf16.msra.mxu1 %v22676_v13  ;;  %v22715_v13 = vld [vmem:[%s31290_s4 + $0xa00] ss:$8 sps:$4 sm:$0xff]  }
 0x59c   : > { %6071 = vmatprep.subr.bf16.mxu1 %v22681_v41  ;;  %v22720_v41 = vld [vmem:[%s31290_s4 + $0xa14] ss:$8 sps:$4 sm:$0xff]  }
 0x59e   : > { %5909 = vmatmul.mubr.bf16.gmra.mrb[124].mxu1 %v5768_v58  ;;  %v22723_v58 = vld [vmem:[%s31290_s4 + $0xa24] ss:$8 sps:$4 sm:$0xff]  }
 0x59f   : > { %5918 = vmatprep.mubr.bf16.mxu1 %v31325_v54  ;;  %6072 = vmatpush1.bf16.msra.mxu1 %v22679_v53  ;;  %v31344_v53 = vld [vmem:[#allocation10_spill] sm:$0xff] }
 0x5a0   : > { %6073 = vmatprep.subr.bf16.mxu1 %v22684_v45  ;;  %v22718_v45 = vld [vmem:[%s31290_s4 + $0xa10] ss:$8 sps:$4 sm:$0xff]  }
 0x5a3   : > { %6074 = vmatpush1.bf16.msra.mxu1 %v22682_v52  ;;  %v22721_v52 = vld [vmem:[%s31290_s4 + $0xa20] ss:$8 sps:$4 sm:$0xff]  }
 0x5a4   : > { %6075 = vmatprep.subr.bf16.mxu1 %v22687_v42  ;;  %v22726_v42 = vld [vmem:[%s31290_s4 + $0xa34] ss:$8 sps:$4 sm:$0xff]  }
 0x5a6   : > { %5919 = vmatmul.mubr.bf16.gmra.mrb[128].mxu1 %v25893_v23  ;;  %v22691_v23 = vld [vmem:[%s31290_s4 + $0x980] ss:$8 sps:$4 sm:$0xff]  }
 0x5a7   : > { %5928 = vmatprep.mubr.bf16.mxu1 %v31325_v54  ;;  %6076 = vmatpush1.bf16.msra.mxu1 %v22685_v37  ;;  %v31345_v37 = vld [vmem:[#allocation11_spill] sm:$0xff] }
 0x5a8   : > { %6077 = vmatprep.subr.bf16.mxu1 %v22690_v28  ;;  %v22724_v28 = vld [vmem:[%s31290_s4 + $0xa30] ss:$8 sps:$4 sm:$0xff]  }
 0x5ab   : > { %6078 = vmatpush1.bf16.msra.mxu1 %v22688_v7  ;;  %v22729_v7 = vld [vmem:[%s31290_s4 + $0xa44] ss:$8 sps:$4 sm:$0xff]  }
 0x5ac   : > { %6288 = vmatprep.subr.bf16.mxu1 %v22693_v51  ;;  %v22727_v51 = vld [vmem:[%s31290_s4 + $0xa40] ss:$8 sps:$4 sm:$0xff]  }
 0x5ae   : > { %5929 = vmatmul.mubr.bf16.gmra.mrb[132].mxu1 %v25886_v39  ;;  %v22699_v39 = vld [vmem:[%s31290_s4 + $0x9a4] ss:$8 sps:$4 sm:$0xff]  }
 0x5af   : > { %6095 = vmatprep.mubr.bf16.mxu1 %v31325_v54 }
 0x5b6   : > { %6096 = vmatmul.mubr.bf16.vlgmr.msra.gmra.mrb[136].mxu1 %v25940_v22  ;;  %v22702_v22 = vld [vmem:[%s31290_s4 + $0x9b4] ss:$8 sps:$4 sm:$0xff]  }
 0x5b7   : > { %6105 = vmatprep.mubr.bf16.mxu1 %v31325_v54  ;;  %6289 = vmatpush1.bf16.msra.mxu1 %v22691_v23  ;;  %v22732_v23 = vld [vmem:[%s31290_s4 + $0xa54] ss:$8 sps:$4 sm:$0xff]  }
 0x5b8   : > { %6290 = vmatprep.subr.bf16.mxu1 %v22696_v46  ;;  %v31346_v46 = vld [vmem:[#allocation12_spill] sm:$0xff] }
 0x5bb   : > { %6291 = vmatpush1.bf16.msra.mxu1 %v22694_v2  ;;  %v22730_v2 = vld [vmem:[%s31290_s4 + $0xa50] ss:$8 sps:$4 sm:$0xff]  }
 0x5bc   : > { %6292 = vmatprep.subr.bf16.mxu1 %v22699_v39  ;;  %v22735_v39 = vld [vmem:[%s31290_s4 + $0xa64] ss:$8 sps:$4 sm:$0xff]  }
 0x5be   : > { %6106 = vmatmul.mubr.bf16.gmra.mrb[120].mxu1 %v25961_v1  ;;  %v22708_v1 = vld [vmem:[%s31290_s4 + $0x9d4] ss:$8 sps:$4 sm:$0xff]  }
 0x5bf   : > { %6115 = vmatprep.mubr.bf16.mxu1 %v31325_v54  ;;  %6293 = vmatpush1.bf16.msra.mxu1 %v22697_v8  ;;  %v22733_v8 = vld [vmem:[%s31290_s4 + $0xa60] ss:$8 sps:$4 sm:$0xff]  }
 0x5c0   : > { %6294 = vmatprep.subr.bf16.mxu1 %v22702_v22  ;;  %v22738_v22 = vld [vmem:[%s31290_s4 + $0xa74] ss:$8 sps:$4 sm:$0xff]  }
 0x5c3   : > { %6295 = vmatpush1.bf16.msra.mxu1 %v22700_v35  ;;  %v22736_v35 = vld [vmem:[%s31290_s4 + $0xa70] ss:$8 sps:$4 sm:$0xff]  }
 0x5c4   : > { %6296 = vmatprep.subr.bf16.mxu1 %v22705_v31  ;;  %v22741_v31 = vld [vmem:[%s31290_s4 + $0xa84] ss:$8 sps:$4 sm:$0xff]  }
 0x5c6   : > { %6116 = vmatmul.mubr.bf16.gmra.mrb[124].mxu1 %v5977_v56  ;;  %v22748_v56 = vld [vmem:[%s31290_s4 + $0xab0] ss:$8 sps:$4 sm:$0xff]  }
 0x5c7   : > { %6125 = vmatprep.mubr.bf16.mxu1 %v31325_v54  ;;  %6297 = vmatpush1.bf16.msra.mxu1 %v22703_v60  ;;  %v22742_v60 = vld [vmem:[%s31290_s4 + $0xa90] ss:$8 sps:$4 sm:$0xff]  }
 0x5c8   : > { %6298 = vmatprep.subr.bf16.mxu1 %v22708_v1  ;;  %v22745_v1 = vld [vmem:[%s31290_s4 + $0xaa0] ss:$8 sps:$4 sm:$0xff]  }
 0x5cb   : > { %6299 = vmatpush1.bf16.msra.mxu1 %v22706_v40  ;;  %v22753_v40 = vld [vmem:[%s31290_s4 + $0xac4] ss:$8 sps:$4 sm:$0xff]  }
 0x5cc   : > { %6300 = vmatprep.subr.bf16.mxu1 %v22711_v0  ;;  %v22751_v0 = vld [vmem:[%s31290_s4 + $0xac0] ss:$8 sps:$4 sm:$0xff]  }
 0x5ce   : > { %6126 = vmatmul.mubr.bf16.gmra.mrb[128].mxu1 %v5979_v33  ;;  %v22757_v33 = vld [vmem:[%s31290_s4 + $0xae0] ss:$8 sps:$4 sm:$0xff]  }
 0x5cf   : > { %6135 = vmatprep.mubr.bf16.mxu1 %v31325_v54  ;;  %6301 = vmatpush1.bf16.msra.mxu1 %v22709_v50  ;;  %v22759_v50 = vld [vmem:[%s31290_s4 + $0xae4] ss:$8 sps:$4 sm:$0xff]  }
 0x5d0   : > { %6302 = vmatprep.subr.bf16.mxu1 %v22714_v9  ;;  %v6409_v9 = vrot.slane %v25727_v44, 6 }
 0x5d3   : > { %6303 = vmatpush1.bf16.msra.mxu1 %v22712_v17  ;;  %v6410_v17 = vsel %vm1703_vm5, %v3365_v36, %v6409_v9  ;;  %v22763_v36 = vld [vmem:[%s31290_s4 + $0xb00] ss:$8 sps:$4 sm:$0xff]  }
 0x5d4   : > { %6495 = vmatprep.subr.bf16.mxu1 %v22717_v32  ;;  %v22760_v32 = vld [vmem:[%s31290_s4 + $0xaf0] ss:$8 sps:$4 sm:$0xff]  }
 0x5d6   : > { %6136 = vmatmul.mubr.bf16.gmra.mrb[132].mxu1 %v5978_v6  ;;  %v22754_v6 = vld [vmem:[%s31290_s4 + $0xad0] ss:$8 sps:$4 sm:$0xff]  }
 0x5d7   : > { %6320 = vmatprep.mubr.bf16.mxu1 %v31325_v54 }
 0x5de   : > { %6321 = vmatmul.mubr.bf16.vlgmr.msra.gmra.mrb[136].mxu1 %v31344_v53 }
 0x5df   : > { %6330 = vmatprep.mubr.bf16.mxu1 %v31325_v54  ;;  %6496 = vmatpush1.bf16.msra.mxu1 %v22715_v13  ;;  %v22765_v13 = vld [vmem:[%s31290_s4 + $0xb04] ss:$8 sps:$4 sm:$0xff]  }
 0x5e0   : > { %6497 = vmatprep.subr.bf16.mxu1 %v22720_v41  ;;  %v6411_v41 = vrot.slane %v25740_v18, 6 }
 0x5e2   : > { %v6412_v53 = vsel %vm1703_vm5, %v6409_v9, %v6411_v41  ;;  %v22805_v9 = vld [vmem:[%s31290_s4 + $0xbe0] ss:$8 sps:$4 sm:$0xff]   ;;  %v22816_v41 = vld [vmem:[%s31290_s4 + $0xc14] ss:$8 sps:$4 sm:$0xff]  }
 0x5e3   : > { %6498 = vmatpush1.bf16.msra.mxu1 %v22718_v45  ;;  %v22768_v45 = vld [vmem:[%s31290_s4 + $0xb14] ss:$8 sps:$4 sm:$0xff]  }
 0x5e4   : > { %6499 = vmatprep.subr.bf16.mxu1 %v22723_v58  ;;  %v22766_v58 = vld [vmem:[%s31290_s4 + $0xb10] ss:$8 sps:$4 sm:$0xff]  }
 0x5e6   : > { %6331 = vmatmul.mubr.bf16.gmra.mrb[120].mxu1 %v31345_v37  ;;  %v22772_v37 = vld [vmem:[%s31290_s4 + $0xb30] ss:$8 sps:$4 sm:$0xff]  }
 0x5e7   : > { %6340 = vmatprep.mubr.bf16.mxu1 %v31325_v54  ;;  %6500 = vmatpush1.bf16.msra.mxu1 %v22721_v52  ;;  %v22771_v52 = vld [vmem:[%s31290_s4 + $0xb24] ss:$8 sps:$4 sm:$0xff]  }
 0x5e8   : > { %6501 = vmatprep.subr.bf16.mxu1 %v22726_v42  ;;  %v22769_v42 = vld [vmem:[%s31290_s4 + $0xb20] ss:$8 sps:$4 sm:$0xff]  }
 0x5eb   : > { %6502 = vmatpush1.bf16.msra.mxu1 %v22724_v28  ;;  %v22777_v28 = vld [vmem:[%s31290_s4 + $0xb44] ss:$8 sps:$4 sm:$0xff]  }
 0x5ec   : > { %6503 = vmatprep.subr.bf16.mxu1 %v22729_v7  ;;  %v22775_v7 = vld [vmem:[%s31290_s4 + $0xb40] ss:$8 sps:$4 sm:$0xff]  }
 0x5ee   : > { %6341 = vmatmul.mubr.bf16.gmra.mrb[124].mxu1 %v31346_v46  ;;  %v22778_v46 = vld [vmem:[%s31290_s4 + $0xb50] ss:$8 sps:$4 sm:$0xff]  }
 0x5ef   : > { %6350 = vmatprep.mubr.bf16.mxu1 %v31325_v54  ;;  %6504 = vmatpush1.bf16.msra.mxu1 %v22727_v51  ;;  %v6615_v51 = vrot.slane %v25859_v4, 6 }
 0x5f0   : > { %6505 = vmatprep.subr.bf16.mxu1 %v22732_v23  ;;  %v6616_v23 = vrot.slane %v25848_v38, 7 }
 0x5f3   : > { %6506 = vmatpush1.bf16.msra.mxu1 %v22730_v2  ;;  %v22783_v2 = vld [vmem:[%s31290_s4 + $0xb64] ss:$8 sps:$4 sm:$0xff]  }
 0x5f4   : > { %6507 = vmatprep.subr.bf16.mxu1 %v22735_v39  ;;  %v6617_v39 = vor.u32 %v6616_v23, %v6615_v51 }
 0x5f6   : > { %6351 = vmatmul.mubr.bf16.gmra.mrb[128].mxu1 %v25898_v43  ;;  %v22739_v43 = vld [vmem:[%s31290_s4 + $0xa80] ss:$8 sps:$4 sm:$0xff]  }
 0x5f7   : > { %6360 = vmatprep.mubr.bf16.mxu1 %v31325_v54  ;;  %6508 = vmatpush1.bf16.msra.mxu1 %v22733_v8  ;;  %v22781_v8 = vld [vmem:[%s31290_s4 + $0xb60] ss:$8 sps:$4 sm:$0xff]  }
 0x5f8   : > { %6509 = vmatprep.subr.bf16.mxu1 %v22738_v22  ;;  %v6618_v22 = vsel %vm3572_vm9, %v26174_v25, %v6617_v39 }
 0x5fb   : > { %6510 = vmatpush1.bf16.msra.mxu1 %v22736_v35  ;;  %v6622_v35 = vrot.slane %v6620_v12, 6 }
 0x5fc   : > { %6710 = vmatprep.subr.bf16.mxu1 %v22741_v31  ;;  %v6625_v31 = vrot.slane %v6623_v55, 7  ;;  %v22787_v55 = vld [vmem:[%s31290_s4 + $0xb80] ss:$8 sps:$4 sm:$0xff]  }
 0x5fe   : > { %6361 = vmatmul.mubr.bf16.gmra.mrb[132].mxu1 %v25888_v34  ;;  %v22747_v34 = vld [vmem:[%s31290_s4 + $0xaa4] ss:$8 sps:$4 sm:$0xff]   ;;  %v6626_v25 = vor.u32 %v6625_v31, %v6622_v35  ;;  %v22884_v35 = vld [vmem:[%s31293_s7 + $0x2a8] ss:$12 sps:$4 sm:$0xff]  }
 0x5ff   : > { %6527 = vmatprep.mubr.bf16.mxu1 %v31325_v54  ;;  %v22885_v31 = vld [vmem:[%s31293_s7 + $0x1e8] ss:$12 sps:$4 sm:$0xff]  }
 0x600   : > { %v6627_v12 = vsel %vm3572_vm9, %v6617_v39, %v6626_v25  ;;  %v22880_v39 = vld [vmem:[%s31293_s7 + $0x1d0] ss:$12 sps:$4 sm:$0xff]  }
 0x606   : > { %6528 = vmatmul.mubr.bf16.vlgmr.msra.gmra.mrb[136].mxu1 %v26080_v30  ;;  %v22750_v30 = vld [vmem:[%s31290_s4 + $0xab4] ss:$8 sps:$4 sm:$0xff]  }
 0x607   : > { %6537 = vmatprep.mubr.bf16.mxu1 %v31325_v54  ;;  %6711 = vmatpush1.bf16.msra.mxu1 %v22739_v43  ;;  %v22784_v43 = vld [vmem:[%s31290_s4 + $0xb70] ss:$8 sps:$4 sm:$0xff]  }
 0x608   : > { %6712 = vmatprep.subr.bf16.mxu1 %v22744_v16  ;;  %v22789_v16 = vld [vmem:[%s31290_s4 + $0xb84] ss:$8 sps:$4 sm:$0xff]  }
 0x60b   : > { %6713 = vmatpush1.bf16.msra.mxu1 %v22742_v60  ;;  %v22792_v60 = vld [vmem:[%s31290_s4 + $0xb94] ss:$8 sps:$4 sm:$0xff]  }
 0x60c   : > { %6714 = vmatprep.subr.bf16.mxu1 %v22747_v34  ;;  %v22790_v34 = vld [vmem:[%s31290_s4 + $0xb90] ss:$8 sps:$4 sm:$0xff]  }
 0x60e   : > { %6538 = vmatmul.mubr.bf16.gmra.mrb[120].mxu1 %v26098_v10  ;;  %v22756_v10 = vld [vmem:[%s31290_s4 + $0xad4] ss:$8 sps:$4 sm:$0xff]  }
 0x60f   : > { %6547 = vmatprep.mubr.bf16.mxu1 %v31325_v54  ;;  %6715 = vmatpush1.bf16.msra.mxu1 %v22745_v1  ;;  %v22795_v1 = vld [vmem:[%s31290_s4 + $0xba4] ss:$8 sps:$4 sm:$0xff]  }
 0x610   : > { %6716 = vmatprep.subr.bf16.mxu1 %v22750_v30  ;;  %v22793_v30 = vld [vmem:[%s31290_s4 + $0xba0] ss:$8 sps:$4 sm:$0xff]  }
 0x613   : > { %6717 = vmatpush1.bf16.msra.mxu1 %v22748_v56  ;;  %v22796_v56 = vld [vmem:[%s31290_s4 + $0xbb0] ss:$8 sps:$4 sm:$0xff]  }
 0x614   : > { %6718 = vmatprep.subr.bf16.mxu1 %v22753_v40  ;;  %v22801_v40 = vld [vmem:[%s31290_s4 + $0xbc4] ss:$8 sps:$4 sm:$0xff]  }
 0x616   : > { %6548 = vmatmul.mubr.bf16.gmra.mrb[124].mxu1 %v26112_v15  ;;  %v22762_v15 = vld [vmem:[%s31290_s4 + $0xaf4] ss:$8 sps:$4 sm:$0xff]  }
 0x617   : > { %6557 = vmatprep.mubr.bf16.mxu1 %v31325_v54  ;;  %6719 = vmatpush1.bf16.msra.mxu1 %v22751_v0  ;;  %v22799_v0 = vld [vmem:[%s31290_s4 + $0xbc0] ss:$8 sps:$4 sm:$0xff]  }
 0x618   : > { %6720 = vmatprep.subr.bf16.mxu1 %v22756_v10  ;;  %v22802_v10 = vld [vmem:[%s31290_s4 + $0xbd0] ss:$8 sps:$4 sm:$0xff]  }
 0x61b   : > { %6721 = vmatpush1.bf16.msra.mxu1 %v22754_v6  ;;  %v22807_v6 = vld [vmem:[%s31290_s4 + $0xbe4] ss:$8 sps:$4 sm:$0xff]  }
 0x61c   : > { %6722 = vmatprep.subr.bf16.mxu1 %v22759_v50  ;;  %v6830_v50 = vrot.slane %v25727_v44, 7 }
 0x61e   : > { %6558 = vmatmul.mubr.bf16.gmra.mrb[128].mxu1 %v6410_v17  ;;  %v22813_v17 = vld [vmem:[%s31290_s4 + $0xc04] ss:$8 sps:$4 sm:$0xff]  }
 0x61f   : > { %6567 = vmatprep.mubr.bf16.mxu1 %v31325_v54  ;;  %6723 = vmatpush1.bf16.msra.mxu1 %v22757_v33  ;;  %v6831_v33 = vsel %vm1601_vm4, %v3811_v48, %v6830_v50  ;;  %v22811_v48 = vld [vmem:[%s31290_s4 + $0xc00] ss:$8 sps:$4 sm:$0xff]  }
 0x620   : > { %6724 = vmatprep.subr.bf16.mxu1 %v22762_v15  ;;  %v22808_v15 = vld [vmem:[%s31290_s4 + $0xbf0] ss:$8 sps:$4 sm:$0xff]  }
 0x623   : > { %6725 = vmatpush1.bf16.msra.mxu1 %v22760_v32  ;;  %v6832_v32 = vrot.slane %v25740_v18, 7 }
 0x624   : > { %6916 = vmatprep.subr.bf16.mxu1 %v22765_v13 }
 0x625   : > { %v6833_v13 = vsel %vm1601_vm4, %v6830_v50, %v6832_v32  ;;  %vm11698_vm4 = vcmask 105472  }
 0x626   : > { %6568 = vmatmul.mubr.bf16.gmra.mrb[132].mxu1 %v6412_v53  ;;  %v22814_v53 = vld [vmem:[%s31290_s4 + $0xc10] ss:$8 sps:$4 sm:$0xff]  }
 0x627   : > { %6742 = vmatprep.mubr.bf16.mxu1 %v31325_v54 }
 0x62e   : > { %6743 = vmatmul.mubr.bf16.vlgmr.msra.gmra.mrb[136].mxu1 %v25498_v3  ;;  %v22774_v3 = vld [vmem:[%s31290_s4 + $0xb34] ss:$8 sps:$4 sm:$0xff]  }
 0x62f   : > { %6752 = vmatprep.mubr.bf16.mxu1 %v31325_v54  ;;  %6917 = vmatpush1.bf16.msra.mxu1 %v22763_v36  ;;  %v22819_v36 = vld [vmem:[%s31290_s4 + $0xc24] ss:$8 sps:$4 sm:$0xff]  }
 0x630   : > { %6918 = vmatprep.subr.bf16.mxu1 %v22768_v45  ;;  %v22817_v45 = vld [vmem:[%s31290_s4 + $0xc20] ss:$8 sps:$4 sm:$0xff]  }
 0x633   : > { %6919 = vmatpush1.bf16.msra.mxu1 %v22766_v58  ;;  %v22820_v58 = vld [vmem:[%s31290_s4 + $0xc30] ss:$8 sps:$4 sm:$0xff]  }
 0x634   : > { %6920 = vmatprep.subr.bf16.mxu1 %v22771_v52  ;;  %v22825_v52 = vld [vmem:[%s31290_s4 + $0xc44] ss:$8 sps:$4 sm:$0xff]  }
 0x636   : > { %6753 = vmatmul.mubr.bf16.gmra.mrb[120].mxu1 %v25548_v19  ;;  %v22780_v19 = vld [vmem:[%s31290_s4 + $0xb54] ss:$8 sps:$4 sm:$0xff]  }
 0x637   : > { %6762 = vmatprep.mubr.bf16.mxu1 %v31325_v54  ;;  %6921 = vmatpush1.bf16.msra.mxu1 %v22769_v42  ;;  %v22823_v42 = vld [vmem:[%s31290_s4 + $0xc40] ss:$8 sps:$4 sm:$0xff]  }
 0x638   : > { %6922 = vmatprep.subr.bf16.mxu1 %v22774_v3  ;;  %v7036_v3 = vrot.slane %v25859_v4, 7  ;;  %v22829_v4 = vld [vmem:[%s31290_s4 + $0xc60] ss:$8 sps:$4 sm:$0xff]  }
 0x63a   : > { %v7041_v23 = vsel %vm4018_vm10, %v7036_v3, %v26382_v26  ;;  %v22875_v26 = vld [vmem:[%s31293_s7 + $0x1b8] ss:$12 sps:$4 sm:$0xff]  }
 0x63b   : > { %6923 = vmatpush1.bf16.msra.mxu1 %v22772_v37  ;;  %v22826_v37 = vld [vmem:[%s31290_s4 + $0xc50] ss:$8 sps:$4 sm:$0xff]  }
 0x63c   : > { %6924 = vmatprep.subr.bf16.mxu1 %v22777_v28  ;;  %v22831_v28 = vld [vmem:[%s31290_s4 + $0xc64] ss:$8 sps:$4 sm:$0xff]  }
 0x63e   : > { %6763 = vmatmul.mubr.bf16.gmra.mrb[124].mxu1 %v26179_v14  ;;  %v22786_v14 = vld [vmem:[%s31290_s4 + $0xb74] ss:$8 sps:$4 sm:$0xff]  }
 0x63f   : > { %6772 = vmatprep.mubr.bf16.mxu1 %v31325_v54  ;;  %6925 = vmatpush1.bf16.msra.mxu1 %v22775_v7  ;;  %v7037_v7 = vor.u32 %v7036_v3, %v25848_v38  ;;  %v22832_v38 = vld [vmem:[%s31290_s4 + $0xc70] ss:$8 sps:$4 sm:$0xff]  }
 0x640   : > { %6926 = vmatprep.subr.bf16.mxu1 %v22780_v19  ;;  %v31347_v19 = vrot.slane %v25544_v63, 7  ;;  %v22870_v63 = vld [vmem:[%s31293_s7 + $0x1a0] ss:$12 sps:$4 sm:$0xff]  }
 0x642   : > { %v7038_v51 = vsel %vm4018_vm10, %v31347_v19, %v7037_v7 }
 0x643   : > { %6927 = vmatpush1.bf16.msra.mxu1 %v22778_v46 }
 0x644   : > { %6928 = vmatprep.subr.bf16.mxu1 %v22783_v2  ;;  %v22879_v2 = vld [vmem:[%s31293_s7 + $0x290] ss:$12 sps:$4 sm:$0xff]  }
 0x646   : > { %6773 = vmatmul.mubr.bf16.gmra.mrb[128].mxu1 %v6618_v22 }
 0x647   : > { %6782 = vmatprep.mubr.bf16.mxu1 %v31325_v54  ;;  %6929 = vmatpush1.bf16.msra.mxu1 %v22781_v8  ;;  %v7427_v8 = vld [vmem:[%s31291_s5] sm:$0x3] }
 0x648   : > { %6930 = vmatprep.subr.bf16.mxu1 %v22786_v14 }
 0x64b   : > { %6931 = vmatpush1.bf16.msra.mxu1 %v22784_v43 }
 0x64c   : > { %7124 = vmatprep.subr.bf16.mxu1 %v22789_v16 }
 0x64e   : > { %6783 = vmatmul.mubr.bf16.gmra.mrb[132].mxu1 %v6627_v12 }
 0x64f   : > { %6948 = vmatprep.mubr.bf16.mxu1 %v31325_v54 }
 0x656   : > { %6949 = vmatmul.mubr.bf16.vlgmr.msra.gmra.mrb[136].mxu1 %v26221_v29  ;;  %v22798_v29 = vld [vmem:[%s31290_s4 + $0xbb4] ss:$8 sps:$4 sm:$0xff]  }
 0x657   : > { %6958 = vmatprep.mubr.bf16.mxu1 %v31325_v54  ;;  %7125 = vmatpush1.bf16.msra.mxu1 %v22787_v55 }
 0x658   : > { %7126 = vmatprep.subr.bf16.mxu1 %v22792_v60 }
 0x65b   : > { %7127 = vmatpush1.bf16.msra.mxu1 %v22790_v34 }
 0x65c   : > { %7128 = vmatprep.subr.bf16.mxu1 %v22795_v1 }
 0x65e   : > { %6959 = vmatmul.mubr.bf16.gmra.mrb[120].mxu1 %v26239_v24  ;;  %v22804_v24 = vld [vmem:[%s31290_s4 + $0xbd4] ss:$8 sps:$4 sm:$0xff]  }
 0x65f   : > { %6968 = vmatprep.mubr.bf16.mxu1 %v31325_v54  ;;  %7129 = vmatpush1.bf16.msra.mxu1 %v22793_v30 }
 0x660   : > { %7130 = vmatprep.subr.bf16.mxu1 %v22798_v29 }
 0x663   : > { %7131 = vmatpush1.bf16.msra.mxu1 %v22796_v56 }
 0x664   : > { %7132 = vmatprep.subr.bf16.mxu1 %v22801_v40 }
 0x666   : > { %6969 = vmatmul.mubr.bf16.gmra.mrb[124].mxu1 %v26253_v21  ;;  %v22810_v21 = vld [vmem:[%s31290_s4 + $0xbf4] ss:$8 sps:$4 sm:$0xff]  }
 0x667   : > { %6978 = vmatprep.mubr.bf16.mxu1 %v31325_v54  ;;  %7133 = vmatpush1.bf16.msra.mxu1 %v22799_v0 }
 0x668   : > { %7134 = vmatprep.subr.bf16.mxu1 %v22804_v24 }
 0x66b   : > { %7135 = vmatpush1.bf16.msra.mxu1 %v22802_v10 }
 0x66c   : > { %7136 = vmatprep.subr.bf16.mxu1 %v22807_v6 }
 0x66e   : > { %6979 = vmatmul.mubr.bf16.gmra.mrb[128].mxu1 %v6831_v33 }
 0x66f   : > { %6988 = vmatprep.mubr.bf16.mxu1 %v31325_v54  ;;  %7137 = vmatpush1.bf16.msra.mxu1 %v22805_v9 }
 0x670   : > { %7138 = vmatprep.subr.bf16.mxu1 %v22810_v21 }
 0x673   : > { %7139 = vmatpush1.bf16.msra.mxu1 %v22808_v15 }
 0x674   : > { %7324 = vmatprep.subr.bf16.mxu1 %v22813_v17 }
 0x676   : > { %6989 = vmatmul.mubr.bf16.gmra.mrb[132].mxu1 %v6833_v13 }
 0x677   : > { %7156 = vmatprep.mubr.bf16.mxu1 %v31325_v54 }
 0x67e   : > { %7157 = vmatmul.mubr.bf16.vlgmr.msra.gmra.mrb[136].mxu1 %v25525_v61  ;;  %v22822_v61 = vld [vmem:[%s31290_s4 + $0xc34] ss:$8 sps:$4 sm:$0xff]  }
 0x67f   : > { %7166 = vmatprep.mubr.bf16.mxu1 %v31325_v54  ;;  %7325 = vmatpush1.bf16.msra.mxu1 %v22811_v48 }
 0x680   : > { %7326 = vmatprep.subr.bf16.mxu1 %v22816_v41 }
 0x683   : > { %7327 = vmatpush1.bf16.msra.mxu1 %v22814_v53 }
 0x684   : > { %7328 = vmatprep.subr.bf16.mxu1 %v22819_v36 }
 0x686   : > { %7167 = vmatmul.mubr.bf16.gmra.mrb[120].mxu1 %v25564_v20  ;;  %v22828_v20 = vld [vmem:[%s31290_s4 + $0xc54] ss:$8 sps:$4 sm:$0xff]  }
 0x687   : > { %7176 = vmatprep.mubr.bf16.mxu1 %v31325_v54  ;;  %7329 = vmatpush1.bf16.msra.mxu1 %v22817_v45 }
 0x688   : > { %7330 = vmatprep.subr.bf16.mxu1 %v22822_v61 }
 0x68b   : > { %7331 = vmatpush1.bf16.msra.mxu1 %v22820_v58 }
 0x68c   : > { %7332 = vmatprep.subr.bf16.mxu1 %v22825_v52 }
 0x68e   : > { %7177 = vmatmul.mubr.bf16.gmra.mrb[124].mxu1 %v25589_v59  ;;  %v22834_v59 = vld [vmem:[%s31290_s4 + $0xc74] ss:$8 sps:$4 sm:$0xff]  }
 0x68f   : > { %7186 = vmatprep.mubr.bf16.mxu1 %v31325_v54  ;;  %7333 = vmatpush1.bf16.msra.mxu1 %v22823_v42 }
 0x690   : > { %7334 = vmatprep.subr.bf16.mxu1 %v22828_v20 }
 0x693   : > { %7335 = vmatpush1.bf16.msra.mxu1 %v22826_v37 }
 0x694   : > { %7336 = vmatprep.subr.bf16.mxu1 %v22831_v28 }
 0x696   : > { %7187 = vmatmul.mubr.bf16.gmra.mrb[128].mxu1 %v7038_v51 }
 0x697   : > { %7196 = vmatprep.mubr.bf16.mxu1 %v31325_v54  ;;  %7337 = vmatpush1.bf16.msra.mxu1 %v22829_v4 }
 0x698   : > { %7338 = vmatprep.subr.bf16.mxu1 %v22834_v59 }
 0x69b   : > { %7339 = vmatpush1.bf16.msra.mxu1 %v22832_v38 }
 0x69e   : > { %7197 = vmatmul.mubr.bf16.gmra.mrb[132].mxu1 %v7041_v23 }
 0x69f   : > { %7356 = vmatprep.mubr.bf16.mxu1 %v31325_v54 }
 0x6a6   : > { %7357 = vmatmul.mubr.bf16.vlgmr.msra.gmra.mrb[136].mxu1 %v25409_v11  ;;  %v22864_v11 = vld [vmem:[%s31293_s7 + $0x248] ss:$12 sps:$4 sm:$0xff]  }
 0x6a7   : > { %7366 = vmatprep.mubr.bf16.mxu1 %v31325_v54  ;;  %21203 = vmatprep.subr.bf16.mxu1 %v22864_v11 }
 0x6ae   : > { %7367 = vmatmul.mubr.bf16.gmra.mrb[120].mxu1 %v25466_v49  ;;  %v22865_v49 = vld [vmem:[%s31293_s7 + $0x188] ss:$12 sps:$4 sm:$0xff]  }
 0x6af   : > { %7376 = vmatprep.mubr.bf16.mxu1 %v31325_v54  ;;  %21204 = vmatpush3.bf16.msra.mxu1 %v22865_v49 }
 0x6b6   : > { %7377 = vmatmul.mubr.bf16.gmra.mrb[124].mxu1 %v25527_v47  ;;  %v22869_v47 = vld [vmem:[%s31293_s7 + $0x260] ss:$12 sps:$4 sm:$0xff]  }
 0x6b7   : > { %7386 = vmatprep.mubr.bf16.mxu1 %v31325_v54  ;;  %21205 = vmatprep.subr.bf16.mxu1 %v22869_v47 }
 0x6b8   : > { %21206 = vmatpush3.bf16.msra.mxu1 %v22870_v63 }
 0x6be   : > { %7387 = vmatmul.mubr.bf16.gmra.mrb[128].mxu1 %v25727_v44  ;;  %v7429_v44 = vlaneseq }
 0x6bf   : > { %7396 = vmatprep.mubr.bf16.mxu1 %v31325_v54 }
 0x6c0   : > { %v27207_v46 = vshrl.u32 %v7429_v44, 7 }
 0x6c2   : > { %v27219_v14 = vsub.s32 0, %v27207_v46  ;;  %v27222_v22 = vsub.s32 1, %v27207_v46 }
 0x6c4   : > { %v27231_v43 = vrot.slane %v7427_v8, %v27219_v14  ;;  %v27234_v25 = vrot.slane %v7427_v8, %v27222_v22 }
 0x6c6   : > { %7397 = vmatmul.mubr.bf16.gmra.mrb[132].mxu1 %v25740_v18  ;;  %v22874_v18 = vld [vmem:[%s31293_s7 + $0x278] ss:$12 sps:$4 sm:$0xff]  }
 0x6c7   : > { %21207 = vmatprep.subr.bf16.mxu1 %v22874_v18 }
 0x6c8   : > { %21208 = vmatpush3.bf16.msra.mxu1 %v22875_v26 }
 0x6c9   : > { %21209 = vmatprep.subr.bf16.mxu1 %v22879_v2 }
 0x6cc   : > { %21210 = vmatpush3.bf16.msra.mxu1 %v22880_v39 }
 0x6cd   : > { %21211 = vmatprep.subr.bf16.mxu1 %v22884_v35 }
 0x6d0   : > { %21212 = vmatpush3.bf16.msra.mxu1 %v22885_v31 }
 0x779   : > { %v7358_v16 = vpop.f32.mrb[136].mxu1 }
 0x77a   : > { %v21502_v12 = vadd.f32 %v7358_v16, %v26001_v57  ;;  %v7360_v55 = vpop.f32.mrb[137].mxu1 }
 0x77b   : > { %v21503_v60 = vadd.f32 %v7360_v55, %v26003_v62  ;;  %v7362_v34 = vpop.f32.mrb[138].mxu1 }
 0x77c   : > { %v7439_v1 = vadd.f32 %v21502_v12, %v27231_v43  ;;  %v21504_v30 = vadd.f32 %v7362_v34, %v26005_v5  ;;  %v7364_v29 = vpop.f32.mrb[139].mxu1 }
 0x77d   : > { %v7440_v56 = vadd.f32 %v21503_v60, %v27234_v25  ;;  %v21505_v40 = vadd.f32 %v7364_v29, %v26010_v27 }
 0x77e   : > { %v7459_v0 = vmax.f32 %v7439_v1, 0.0  ;;  %v7441_v24 = vadd.f32 %v21504_v30, %v27231_v43 }
 0x77f   : > { %v27243_v10 = vmax.f32 %v7440_v56, 0.0  ;;  %v7442_v57 = vadd.f32 %v21505_v40, %v27234_v25 }
 0x780   : > { %v7461_v6 = vmax.f32 %v7441_v24, 0.0  ;;  %v7497_v50 = vrot.slane %v7459_v0, 1  ;;  %v7569_v62 = vrot.slane %v7459_v0, 2 }
 0x781   : > { %v27246_v9 = vmax.f32 %v7442_v57, 0.0  ;;  %v7368_v21 = vpop.f32.mrb[120].mxu1  ;;  %v7500_v5 = vrot.slane %v27243_v10, 1  ;;  %v7572_v32 = vrot.slane %v27243_v10, 2 }
 0x782   : > { %v7498_v33 = vrot.slane %v7461_v6, 1  ;;  %v7570_v15 = vrot.slane %v7461_v6, 2  ;;  %v7443_v17 = vadd.f32 %v27231_v43, %v7368_v21  ;;  %v7370_v27 = vpop.f32.mrb[121].mxu1 }
 0x783   : > { %v7501_v13 = vrot.slane %v27246_v9, 1  ;;  %v7573_v48 = vrot.slane %v27246_v9, 2  ;;  %v7444_v41 = vadd.f32 %v27234_v25, %v7370_v27  ;;  %v7372_v53 = vpop.f32.mrb[122].mxu1 }
 0x784   : > { %v7499_v36 = vsel %vm1349_vm1, %v7497_v50, %v7498_v33  ;;  %v7571_v45 = vsel %vm1462_vm2, %v7569_v62, %v7570_v15  ;;  %v7463_v61 = vmax.f32 %v7443_v17, 0.0  ;;  %v7445_v58 = vadd.f32 %v27231_v43, %v7372_v53  ;;  %v7374_v52 = vpop.f32.mrb[123].mxu1 }
 0x785   : > { %v7549_v42 = vmax.f32 %v7459_v0, %v7499_v36  ;;  %v27258_v20 = vsel %vm1349_vm1, %v7500_v5, %v7501_v13  ;;  %v7464_v3 = vmax.f32 %v7444_v41, 0.0  ;;  %v7446_v37 = vadd.f32 %v27234_v25, %v7374_v52 }
 0x786   : > { %v7503_v28 = vrot.slane %v7463_v61, 1  ;;  %v7575_v7 = vrot.slane %v7463_v61, 2  ;;  %v7465_v4 = vmax.f32 %v7445_v58, 0.0  ;;  %v7550_v59 = vmax.f32 %v27243_v10, %v27258_v20 }
 0x787   : > { %v27263_v19 = vmax.f32 %v7549_v42, %v7571_v45  ;;  %v7505_v51 = vrot.slane %v7464_v3, 1  ;;  %v7577_v38 = vrot.slane %v7464_v3, 2  ;;  %v7466_v23 = vmax.f32 %v7446_v37, 0.0 }
 0x788   : > { %v7504_v11 = vsel %vm1349_vm1, %v7498_v33, %v7503_v28  ;;  %v7576_v49 = vsel %vm1462_vm2, %v7570_v15, %v7575_v7  ;;  %v7507_v47 = vrot.slane %v7465_v4, 1  ;;  %v7579_v63 = vrot.slane %v7465_v4, 2 }
 0x789   : > { %v7551_v18 = vmax.f32 %v7461_v6, %v7504_v11  ;;  %v27268_v26 = vsel %vm1349_vm1, %v7501_v13, %v7505_v51  ;;  %v27271_v2 = vsel %vm1462_vm2, %v7573_v48, %v7577_v38  ;;  %v7509_v39 = vrot.slane %v7466_v23, 1  ;;  %v7378_v8 = vpop.f32.mrb[124].mxu1 }
 0x78a   : > { %v7552_v35 = vmax.f32 %v27246_v9, %v27268_v26  ;;  %v7508_v31 = vsel %vm1349_vm1, %v7503_v28, %v7507_v47  ;;  %v7580_v16 = vsel %vm1462_vm2, %v7575_v7, %v7579_v63  ;;  %v7581_v12 = vrot.slane %v7466_v23, 2  ;;  %v7380_v55 = vpop.f32.mrb[125].mxu1 }
 0x78b   : > { %v27277_v60 = vmax.f32 %v7551_v18, %v7576_v49  ;;  %v7553_v34 = vmax.f32 %v7463_v61, %v7508_v31  ;;  %v7510_v1 = vsel %vm1349_vm1, %v7505_v51, %v7509_v39  ;;  %v7447_v30 = vadd.f32 %v27231_v43, %v7378_v8  ;;  %v7382_v29 = vpop.f32.mrb[126].mxu1 }
 0x78c   : > { %v7554_v56 = vmax.f32 %v7464_v3, %v7510_v1  ;;  %v7582_v40 = vsel %vm1462_vm2, %v7577_v38, %v7581_v12  ;;  %v7448_v0 = vadd.f32 %v27234_v25, %v7380_v55  ;;  %v7449_v24 = vadd.f32 %v27231_v43, %v7382_v29  ;;  %v7384_v57 = vpop.f32.mrb[127].mxu1 }
 0x78d   : > { %v7658_v6 = vrot.slane %v27277_v60, 3  ;;  %v27285_v50 = vmax.f32 %v7553_v34, %v7580_v16  ;;  %v7467_v62 = vmax.f32 %v7447_v30, 0.0  ;;  %v7450_v21 = vadd.f32 %v27234_v25, %v7384_v57 }
 0x78e   : > { %v27288_v5 = vmax.f32 %v7554_v56, %v7582_v40  ;;  %v7468_v33 = vmax.f32 %v7448_v0, 0.0  ;;  %v27290_v15 = vmax.f32 %v7449_v24, 0.0  ;;  %v7574_v17 = vsel %vm1462_vm2, %v7572_v32, %v7573_v48 }
 0x78f   : > { %v7659_v27 = vrot.slane %v27285_v50, 3  ;;  %v7511_v13 = vrot.slane %v7467_v62, 1  ;;  %v7583_v41 = vrot.slane %v7467_v62, 2  ;;  %v27294_v53 = vmax.f32 %v7450_v21, 0.0 }
 0x790   : > { %v7513_v36 = vrot.slane %v7468_v33, 1  ;;  %v7585_v45 = vrot.slane %v7468_v33, 2  ;;  %v7515_v61 = vrot.slane %v27290_v15, 1  ;;  %v7587_v58 = vrot.slane %v27290_v15, 2 }
 0x791   : > { %v7512_v52 = vsel %vm1349_vm1, %v7507_v47, %v7511_v13  ;;  %v7584_v42 = vsel %vm1462_vm2, %v7579_v63, %v7583_v41  ;;  %v7517_v3 = vrot.slane %v27294_v53, 1  ;;  %v7589_v32 = vrot.slane %v27294_v53, 2  ;;  %v7388_v48 = vpop.f32.mrb[128].mxu1 }
 0x792   : > { %v7555_v37 = vmax.f32 %v7465_v4, %v7512_v52  ;;  %v7514_v28 = vsel %vm1349_vm1, %v7509_v39, %v7513_v36  ;;  %v7586_v7 = vsel %vm1462_vm2, %v7581_v12, %v7585_v45  ;;  %v7516_v51 = vsel %vm1349_vm1, %v7511_v13, %v7515_v61  ;;  %v7390_v38 = vpop.f32.mrb[129].mxu1 }
 0x793   : > { %v7556_v11 = vmax.f32 %v7466_v23, %v7514_v28  ;;  %v7557_v49 = vmax.f32 %v7467_v62, %v7516_v51  ;;  %v7588_v18 = vsel %vm1462_vm2, %v7583_v41, %v7587_v58  ;;  %v7518_v47 = vsel %vm1349_vm1, %v7513_v36, %v7517_v3  ;;  %v7392_v63 = vpop.f32.mrb[130].mxu1 }
 0x794   : > { %v27307_v8 = vmax.f32 %v7555_v37, %v7584_v42  ;;  %v7558_v31 = vmax.f32 %v7468_v33, %v7518_v47  ;;  %v7590_v16 = vsel %vm1462_vm2, %v7585_v45, %v7589_v32  ;;  %v7451_v4 = vadd.f32 %v27231_v43, %v7388_v48  ;;  %v7394_v39 = vpop.f32.mrb[131].mxu1 }
 0x795   : > { %v27311_v55 = vmax.f32 %v7556_v11, %v7586_v7  ;;  %v27313_v12 = vmax.f32 %v7557_v49, %v7588_v18  ;;  %v7452_v23 = vadd.f32 %v27234_v25, %v7390_v38  ;;  %v7453_v34 = vadd.f32 %v27231_v43, %v7392_v63 }
 0x796   : > { %v7664_v1 = vrot.slane %v27307_v8, 3  ;;  %v27318_v30 = vmax.f32 %v7558_v31, %v7590_v16  ;;  %v7471_v29 = vmax.f32 %v7451_v4, 0.0  ;;  %v7454_v56 = vadd.f32 %v27234_v25, %v7394_v39 }
 0x797   : > { %v7668_v40 = vrot.slane %v27313_v12, 3  ;;  %v7472_v0 = vmax.f32 %v7452_v23, 0.0  ;;  %v27322_v24 = vmax.f32 %v7453_v34, 0.0  ;;  %v27327_v57 = vmax.f32 %v7550_v59, %v7574_v17 }
 0x798   : > { %v7519_v62 = vrot.slane %v7471_v29, 1  ;;  %v7591_v21 = vrot.slane %v7471_v29, 2  ;;  %v27329_v33 = vmax.f32 %v7454_v56, 0.0  ;;  %v27335_v13 = vmax.f32 %v7552_v35, %v27271_v2 }
 0x799   : > { %v7521_v41 = vrot.slane %v7472_v0, 1  ;;  %v7593_v36 = vrot.slane %v7472_v0, 2  ;;  %v7523_v45 = vrot.slane %v27322_v24, 1  ;;  %v7595_v52 = vrot.slane %v27322_v24, 2  ;;  %v7398_v42 = vpop.f32.mrb[132].mxu1 }
 0x79a   : > { %v7520_v10 = vsel %vm1349_vm1, %v7515_v61, %v7519_v62  ;;  %v7592_v20 = vsel %vm1462_vm2, %v7587_v58, %v7591_v21  ;;  %v7525_v59 = vrot.slane %v27329_v33, 1  ;;  %v7597_v17 = vrot.slane %v27329_v33, 2  ;;  %v7400_v48 = vpop.f32.mrb[133].mxu1 }
 0x79b   : > { %v7559_v9 = vmax.f32 %v27290_v15, %v7520_v10  ;;  %v7522_v26 = vsel %vm1349_vm1, %v7517_v3, %v7521_v41  ;;  %v7594_v2 = vsel %vm1462_vm2, %v7589_v32, %v7593_v36  ;;  %v7524_v35 = vsel %vm1349_vm1, %v7519_v62, %v7523_v45  ;;  %v7402_v37 = vpop.f32.mrb[134].mxu1 }
 0x79c   : > { %v7560_v28 = vmax.f32 %v27294_v53, %v7522_v26  ;;  %v7561_v7 = vmax.f32 %v7471_v29, %v7524_v35  ;;  %v7596_v61 = vsel %vm1462_vm2, %v7591_v21, %v7595_v52  ;;  %v7526_v58 = vsel %vm1349_vm1, %v7521_v41, %v7525_v59  ;;  %v7404_v51 = vpop.f32.mrb[135].mxu1 }
 0x79d   : > { %v27350_v38 = vmax.f32 %v7559_v9, %v7592_v20  ;;  %v7562_v11 = vmax.f32 %v7472_v0, %v7526_v58  ;;  %v7598_v15 = vsel %vm1462_vm2, %v7593_v36, %v7597_v17  ;;  %v7455_v3 = vadd.f32 %v27231_v43, %v7398_v42 }
 0x79e   : > { %v27354_v49 = vmax.f32 %v7560_v28, %v7594_v2  ;;  %v27356_v32 = vmax.f32 %v7561_v7, %v7596_v61  ;;  %v7456_v18 = vadd.f32 %v27234_v25, %v7400_v48  ;;  %v7457_v53 = vadd.f32 %v27231_v43, %v7402_v37 }
 0x79f   : > { %v7672_v47 = vrot.slane %v27350_v38, 3  ;;  %v27361_v63 = vmax.f32 %v7562_v11, %v7598_v15  ;;  %v7475_v31 = vmax.f32 %v7455_v3, 0.0  ;;  %v7458_v16 = vadd.f32 %v27234_v25, %v7404_v51 }
 0x7a0   : > { %v7676_v4 = vrot.slane %v27356_v32, 3  ;;  %v7476_v39 = vmax.f32 %v7456_v18, 0.0  ;;  %v7477_v23 = vmax.f32 %v7457_v53, 0.0  ;;  %v7661_v34 = vrot.slane %v27335_v13, 3 }
 0x7a1   : > { %v7527_v29 = vrot.slane %v7475_v31, 1  ;;  %v7599_v56 = vrot.slane %v7475_v31, 2  ;;  %v7478_v0 = vmax.f32 %v7458_v16, 0.0  ;;  %v7662_v62 = vrot.slane %v27288_v5, 3 }
 0x7a2   : > { %v7529_v21 = vrot.slane %v7476_v39, 1  ;;  %v7601_v43 = vrot.slane %v7476_v39, 2  ;;  %v7603_v41 = vrot.slane %v7477_v23, 2  ;;  %v7666_v36 = vrot.slane %v27311_v55, 3 }
 0x7a3   : > { %v7528_v42 = vsel %vm1349_vm1, %v7523_v45, %v7527_v29  ;;  %v7565_v10 = vmax.f32 %v7475_v31, %v7527_v29  ;;  %v7600_v25 = vsel %vm1462_vm2, %v7595_v52, %v7599_v56  ;;  %v7605_v20 = vrot.slane %v7478_v0, 2 }
 0x7a4   : > { %v7563_v48 = vmax.f32 %v27322_v24, %v7528_v42  ;;  %v7530_v9 = vsel %vm1349_vm1, %v7525_v59, %v7529_v21  ;;  %v7566_v26 = vmax.f32 %v7476_v39, %v7529_v21  ;;  %v7602_v2 = vsel %vm1462_vm2, %v7597_v17, %v7601_v43 }
 0x7a5   : > { %v7564_v35 = vmax.f32 %v27329_v33, %v7530_v9  ;;  %v7604_v37 = vsel %vm1462_vm2, %v7599_v56, %v7603_v41  ;;  %v7606_v28 = vsel %vm1462_vm2, %v7601_v43, %v7605_v20  ;;  %v7663_v7 = vsel %vm4240_vm11, %v7661_v34, %v7662_v62 }
 0x7a6   : > { %v27377_v45 = vmax.f32 %v7563_v48, %v7600_v25  ;;  %v7641_v61 = vmax.f32 %v7565_v10, %v7604_v37  ;;  %v7642_v52 = vmax.f32 %v7566_v26, %v7606_v28  ;;  %v7667_v58 = vsel %vm4240_vm11, %v7662_v62, %v7666_v36 }
 0x7a7   : > { %v27380_v24 = vmax.f32 %v7564_v35, %v7602_v2  ;;  %v7699_v59 = vmax.f32 %v27327_v57, %v7663_v7  ;;  %v7701_v17 = vmax.f32 %v27335_v13, %v7667_v58  ;;  %v7717_v33 = vrot.slane %v27288_v5, 6 }
 0x7a8   : > { %v7680_v51 = vrot.slane %v27377_v45, 3  ;;  %v7732_v11 = vrot.slane %v27377_v45, 6  ;;  %v27387_v15 = vrot.slane %v7641_v61, 6  ;;  %v27389_v3 = vrot.slane %v7642_v52, 6 }
 0x7a9   : > { %v7682_v18 = vrot.slane %v27380_v24, 3  ;;  %v7718_v53 = vrot.slane %v27311_v55, 6  ;;  %v7722_v31 = vrot.slane %v27318_v30, 6  ;;  %v7660_v57 = vsel %vm4240_vm11, %v7658_v6, %v7659_v27 }
 0x7aa   : > { %v7710_v13 = vmax.f32 %v27356_v32, %v7680_v51  ;;  %v7665_v16 = vsel %vm4240_vm11, %v7659_v27, %v7664_v1  ;;  %v7698_v39 = vmax.f32 %v27263_v19, %v7660_v57  ;;  %v7714_v23 = vrot.slane %v27285_v50, 6 }
 0x7ab   : > { %v7719_v34 = vsel %vm1703_vm5, %v7717_v33, %v7718_v53  ;;  %v7723_v29 = vsel %vm1703_vm5, %v7718_v53, %v7722_v31  ;;  %v7700_v56 = vmax.f32 %v27277_v60, %v7665_v16  ;;  %v7715_v6 = vrot.slane %v27307_v8, 6 }
 0x7ac   : > { %v27412_v0 = vmax.f32 %v7710_v13, %v27387_v15  ;;  %v7755_v62 = vmax.f32 %v7699_v59, %v7719_v34  ;;  %v7757_v21 = vmax.f32 %v7701_v17, %v7723_v29  ;;  %v7720_v43 = vrot.slane %v27313_v12, 6 }
 0x7ad   : > { %v7716_v27 = vsel %vm1703_vm5, %v7714_v23, %v7715_v6  ;;  %v7670_v19 = vrot.slane %v27318_v30, 3  ;;  %v7674_v41 = vrot.slane %v27354_v49, 3  ;;  %v7726_v42 = vrot.slane %v27354_v49, 6 }
 0x7ae   : > { %v7769_v10 = vpack.c.bf16 %v7757_v21, %v7755_v62  ;;  %v7721_v60 = vsel %vm1703_vm5, %v7715_v6, %v7720_v43  ;;  %v7754_v25 = vmax.f32 %v7698_v39, %v7716_v27  ;;  %v7730_v20 = vrot.slane %v27361_v63, 6 }
 0x7af   : > { %v7756_v48 = vmax.f32 %v7700_v56, %v7721_v60  ;;  %v7671_v9 = vsel %vm4240_vm11, %v7666_v36, %v7670_v19  ;;  %v7675_v26 = vsel %vm4240_vm11, %v7670_v19, %v7674_v41  ;;  %v7727_v2 = vsel %vm1703_vm5, %v7722_v31, %v7726_v42  ;;  %v22843_v60 = vld [vmem:[%s31293_s7 + $0x1b0] ss:$12 sps:$4 sm:$0xff]  }
 0x7b0   : > { %7803 = vmatprep.subr.bf16.mxu0 %v7769_v10  ;;  %v7703_v35 = vmax.f32 %v27288_v5, %v7671_v9  ;;  %v7705_v37 = vmax.f32 %v27311_v55, %v7675_v26  ;;  %v7731_v28 = vsel %vm1703_vm5, %v7726_v42, %v7730_v20  ;;  %v7669_v7 = vsel %vm4240_vm11, %v7664_v1, %v7668_v40  ;;  %v22845_v42 = vld [vmem:[%s31293_s7 + $0x1b4] ss:$12 sps:$4 sm:$0xff]   ;;  %v22836_v10 = vld [vmem:[%s31292_s6 + $0x8] sm:$0x1f]  }
 0x7b1   : > { %v7768_v61 = vpack.c.bf16 %v7756_v48, %v7754_v25  ;;  %v7673_v36 = vsel %vm4240_vm11, %v7668_v40, %v7672_v47  ;;  %v7702_v52 = vmax.f32 %v27285_v50, %v7669_v7  ;;  %v7724_v5 = vrot.slane %v27350_v38, 6  ;;  %v22848_v25 = vld [vmem:[%s31293_s7 + $0x1cc] ss:$12 sps:$4 sm:$0xff]   ;;  %v22851_v48 = vld [vmem:[%s31293_s7 + $0x1e4] ss:$12 sps:$4 sm:$0xff]  }
 0x7b2   : > { %v7759_v55 = vmax.f32 %v7703_v35, %v7727_v2  ;;  %v7761_v58 = vmax.f32 %v7705_v37, %v7731_v28  ;;  %v7704_v59 = vmax.f32 %v27307_v8, %v7673_v36  ;;  %v7728_v17 = vrot.slane %v27356_v32, 6  ;;  %v22849_v9 = vld [vmem:[%s31293_s7 + $0x1e0] ss:$12 sps:$4 sm:$0xff]   ;;  %v22854_v26 = vld [vmem:[%s31293_s7 + $0x1fc] ss:$12 sps:$4 sm:$0xff]  }
 0x7b3   : > { %7804 = vmatpush1.bf16.msra.mxu0 %v7768_v61  ;;  %v7725_v1 = vsel %vm1703_vm5, %v7720_v43, %v7724_v5  ;;  %v7678_v33 = vrot.slane %v27361_v63, 3  ;;  %v7734_v53 = vrot.slane %v27380_v24, 6  ;;  %v7677_v50 = vsel %vm4240_vm11, %v7672_v47, %v7676_v4  ;;  %v22839_v24 = vld [vmem:[%s31293_s7 + $0x184] ss:$12 sps:$4 sm:$0xff]   ;;  %v22857_v35 = vld [vmem:[%s31293_s7 + $0x214] ss:$12 sps:$4 sm:$0xff]  }
 0x7b4   : > { %v7771_v40 = vpack.c.bf16 %v7761_v58, %v7759_v55  ;;  %v7729_v31 = vsel %vm1703_vm5, %v7724_v5, %v7728_v17  ;;  %v7758_v57 = vmax.f32 %v7702_v52, %v7725_v1  ;;  %v7681_v8 = vsel %vm4240_vm11, %v7676_v4, %v7680_v51  ;;  %v22852_v2 = vld [vmem:[%s31293_s7 + $0x1f8] ss:$12 sps:$4 sm:$0xff]   ;;  %v22855_v37 = vld [vmem:[%s31293_s7 + $0x210] ss:$12 sps:$4 sm:$0xff]   ;;  %v22858_v7 = vld [vmem:[%s31293_s7 + $0x228] ss:$12 sps:$4 sm:$0xff]  }
 0x7b5   : > { %v7760_v13 = vmax.f32 %v7704_v59, %v7729_v31  ;;  %v7679_v16 = vsel %vm4240_vm11, %v7674_v41, %v7678_v33  ;;  %v7683_v39 = vsel %vm4240_vm11, %v7678_v33, %v7682_v18  ;;  %v7735_v23 = vsel %vm1703_vm5, %v7730_v20, %v7734_v53  ;;  %v22840_v41 = vld [vmem:[%s31293_s7 + $0x198] ss:$12 sps:$4 sm:$0xff]   ;;  %v22846_v20 = vld [vmem:[%s31293_s7 + $0x1c8] ss:$12 sps:$4 sm:$0xff]   ;;  %v22861_v36 = vld [vmem:[%s31293_s7 + $0x240] ss:$12 sps:$4 sm:$0xff]  }
 0x7b6   : > { %7805 = vmatprep.subr.bf16.mxu0 %v7771_v40  ;;  %v7707_v47 = vmax.f32 %v27318_v30, %v7679_v16  ;;  %v7709_v34 = vmax.f32 %v27354_v49, %v7683_v39  ;;  %v7739_v29 = vsel %vm1703_vm5, %v7734_v53, %v27389_v3  ;;  %v7706_v32 = vmax.f32 %v27313_v12, %v7677_v50  ;;  %v22860_v28 = vld [vmem:[%s31293_s7 + $0x22c] ss:$12 sps:$4 sm:$0xff]   ;;  %v22863_v61 = vld [vmem:[%s31293_s7 + $0x244] ss:$12 sps:$4 sm:$0xff]   ;;  %v22868_v52 = vld [vmem:[%s31293_s7 + $0x25c] ss:$12 sps:$4 sm:$0xff]  }
 0x7b7   : > { %v7770_v4 = vpack.c.bf16 %v7760_v13, %v7758_v57  ;;  %v7708_v51 = vmax.f32 %v27350_v38, %v7681_v8  ;;  %v7733_v56 = vsel %vm1703_vm5, %v7728_v17, %v7732_v11  ;;  %v7737_v6 = vsel %vm1703_vm5, %v7732_v11, %v27387_v15  ;;  %v31348_v11 = vld [vmem:[#allocation3_spill] sm:$0xff]  ;;  %v22871_v58 = vld [vmem:[%s31293_s7 + $0x270] ss:$12 sps:$4 sm:$0xff]   ;;  %v22878_v59 = vld [vmem:[%s31293_s7 + $0x28c] ss:$12 sps:$4 sm:$0xff]  }
 0x7b8   : > { %v7763_v30 = vmax.f32 %v7707_v47, %v7735_v23  ;;  %v7765_v62 = vmax.f32 %v7709_v34, %v7739_v29  ;;  %v7762_v49 = vmax.f32 %v7706_v32, %v7733_v56  ;;  %v7711_v21 = vmax.f32 %v27361_v63, %v7682_v18  ;;  %v22837_v18 = vld [vmem:[%s31293_s7 + $0x180] ss:$12 sps:$4 sm:$0xff]   ;;  %v22866_v5 = vld [vmem:[%s31293_s7 + $0x258] ss:$12 sps:$4 sm:$0xff]   ;;  %v22876_v17 = vld [vmem:[%s31293_s7 + $0x288] ss:$12 sps:$4 sm:$0xff]  }
 0x7b9   : > { %7806 = vmatpush1.bf16.msra.mxu0 %v7770_v4  ;;  %v7764_v12 = vmax.f32 %v7708_v51, %v7737_v6  ;;  %v7774_v19 = vpack.c.bf16 %v27412_v0, %v27412_v0  ;;  %v22842_v0 = vld [vmem:[%s31293_s7 + $0x19c] ss:$12 sps:$4 sm:$0xff]   ;;  %v22873_v55 = vld [vmem:[%s31293_s7 + $0x274] ss:$12 sps:$4 sm:$0xff]   ;;  %v22883_v1 = vld [vmem:[%s31293_s7 + $0x2a4] ss:$12 sps:$4 sm:$0xff]  }
 0x7ba   : > { %v7773_v43 = vpack.c.bf16 %v7765_v62, %v7763_v30  ;;  %v7767_v38 = vmax.f32 %v7711_v21, %v27389_v3  ;;  %v22835_v3 = vld [vmem:[%s31292_s6] sm:$0xff]   ;;  %v22888_v50 = vld [vmem:[%s31293_s7 + $0x2bc] ss:$12 sps:$4 sm:$0xff]   ;;  %v22898_v23 = vld [vmem:[%s31293_s7 + $0x2ec] ss:$12 sps:$4 sm:$0xff]  }
 0x7bb   : > { %v7772_v27 = vpack.c.bf16 %v7764_v12, %v7762_v49  ;;  %v7798_v63 = vand.u32 %v7774_v19, %v31348_v11  ;;  %v22881_v33 = vld [vmem:[%s31293_s7 + $0x2a0] ss:$12 sps:$4 sm:$0xff]   ;;  %v22886_v53 = vld [vmem:[%s31293_s7 + $0x2b8] ss:$12 sps:$4 sm:$0xff]   ;;  %v22891_v57 = vld [vmem:[%s31293_s7 + $0x2d0] ss:$12 sps:$4 sm:$0xff]  }
 0x7bc   : > { %7807 = vmatprep.subr.bf16.mxu0 %v7773_v43  ;;  %v7775_v45 = vpack.c.bf16 %v7767_v38, %v7767_v38  ;;  %v22889_v40 = vld [vmem:[%s31293_s7 + $0x2c0] ss:$12 sps:$4 sm:$0xff]   ;;  %v22894_v13 = vld [vmem:[%s31293_s7 + $0x2d8] ss:$12 sps:$4 sm:$0xff]   ;;  %v22896_v39 = vld [vmem:[%s31293_s7 + $0x2e8] ss:$12 sps:$4 sm:$0xff]  }
 0x7bd   : > { %7808 = vmatpush1.bf16.msra.mxu0 %v7772_v27  ;;  %21213 = vmatprep.subr.bf16.mxu1 %v22889_v40  ;;  %v22890_v31 = vld [vmem:[%s31293_s7 + $0x200] ss:$12 sps:$4 sm:$0xff]   ;;  %v22895_v16 = vld [vmem:[%s31293_s7 + $0x218] ss:$12 sps:$4 sm:$0xff]   ;;  %v22899_v47 = vld [vmem:[%s31293_s7 + $0x2f0] ss:$12 sps:$4 sm:$0xff]  }
 0x7be   : > { %v7801_v15 = vand.u32 %v7775_v45, %v31348_v11  ;;  %v22893_v8 = vld [vmem:[%s31293_s7 + $0x2d4] ss:$12 sps:$4 sm:$0xff]   ;;  %21214 = vmatpush3.bf16.msra.mxu1 %v22890_v31  ;;  %v22900_v34 = vld [vmem:[%s31293_s7 + $0x230] ss:$12 sps:$4 sm:$0xff]  }
 0x7bf   : > { %21215 = vmatprep.subr.bf16.mxu1 %v22894_v13  ;;  %v22903_v29 = vld [vmem:[%s31293_s7 + $0x4] ss:$12 sps:$4 sm:$0xff]  }
 0x7c0   : > { %7809 = vmatprep.subr.bf16.mxu0 %v7801_v15  ;;  %v22907_v13 = vld [vmem:[%s31293_s7 + $0x30] ss:$12 sps:$4 sm:$0xff]  }
 0x7c1   : > { %7810 = vmatpush1.bf16.msra.mxu0 %v7798_v63 }
 0x7c2   : > { %8261 = vmatprep.subr.bf16.mxu0 %v22839_v24  ;;  %21216 = vmatpush3.bf16.msra.mxu1 %v22895_v16 }
 0x7c3   : > { %21217 = vmatprep.subr.bf16.mxu1 %v22899_v47  ;;  %v22912_v47 = vld [vmem:[%s31293_s7 + $0x4c] ss:$12 sps:$4 sm:$0xff]  }
 0x7c4   : > { %18758 = vmatmul.mubr.msk.bf16.vlgmr.msra.gmra.mrb[36].mxu0 %vm7790_vm3, %v22835_v3 }
 0x7c5   : > { %7845 = vmatprep.mubr.bf16.mxu0 %v31325_v54  ;;  %8262 = vmatpush1.bf16.msra.mxu0 %v22837_v18 }
 0x7c6   : > { %8263 = vmatprep.subr.bf16.mxu0 %v22842_v0  ;;  %21218 = vmatpush3.bf16.msra.mxu1 %v22900_v34 }
 0x7c9   : > { %8264 = vmatpush1.bf16.msra.mxu0 %v22840_v41 }
 0x7ca   : > { %8265 = vmatprep.subr.bf16.mxu0 %v22845_v42 }
 0x7cc   : > { %18759 = vmatmul.mubr.msk.bf16.gmra.mrb[40].mxu0 %vm7790_vm3, %v22836_v10 }
 0x7cd   : > { %8266 = vmatpush1.bf16.msra.mxu0 %v22843_v60  ;;  %v22901_v60 = vld [vmem:[%s31293_s7] ss:$12 sps:$4 sm:$0xff]  }
 0x7ce   : > { %8267 = vmatprep.subr.bf16.mxu0 %v22848_v25 }
 0x7d1   : > { %8268 = vmatpush1.bf16.msra.mxu0 %v22846_v20 }
 0x7d2   : > { %8269 = vmatprep.subr.bf16.mxu0 %v22851_v48 }
 0x7d5   : > { %8270 = vmatpush1.bf16.msra.mxu0 %v22849_v9 }
 0x7d6   : > { %8271 = vmatprep.subr.bf16.mxu0 %v22854_v26  ;;  %v22906_v26 = vld [vmem:[%s31293_s7 + $0x1c] ss:$12 sps:$4 sm:$0xff]  }
 0x7d9   : > { %8272 = vmatpush1.bf16.msra.mxu0 %v22852_v2 }
 0x7da   : > { %8273 = vmatprep.subr.bf16.mxu0 %v22857_v35 }
 0x7dd   : > { %8274 = vmatpush1.bf16.msra.mxu0 %v22855_v37 }
 0x7de   : > { %8275 = vmatprep.subr.bf16.mxu0 %v22860_v28 }
 0x7e1   : > { %8276 = vmatpush1.bf16.msra.mxu0 %v22858_v7 }
 0x7e2   : > { %8277 = vmatprep.subr.bf16.mxu0 %v22863_v61 }
 0x7e5   : > { %8278 = vmatpush1.bf16.msra.mxu0 %v22861_v36 }
 0x7e6   : > { %8279 = vmatprep.subr.bf16.mxu0 %v22868_v52  ;;  %v22904_v52 = vld [vmem:[%s31293_s7 + $0x18] ss:$12 sps:$4 sm:$0xff]  }
 0x7e9   : > { %8280 = vmatpush1.bf16.msra.mxu0 %v22866_v5 }
 0x7ea   : > { %8281 = vmatprep.subr.bf16.mxu0 %v22873_v55 }
 0x7ed   : > { %8282 = vmatpush1.bf16.msra.mxu0 %v22871_v58 }
 0x7ee   : > { %8283 = vmatprep.subr.bf16.mxu0 %v22878_v59  ;;  %v22909_v59 = vld [vmem:[%s31293_s7 + $0x34] ss:$12 sps:$4 sm:$0xff]  }
 0x7f1   : > { %8284 = vmatpush1.bf16.msra.mxu0 %v22876_v17 }
 0x7f2   : > { %8285 = vmatprep.subr.bf16.mxu0 %v22883_v1 }
 0x7f5   : > { %8286 = vmatpush1.bf16.msra.mxu0 %v22881_v33 }
 0x7f6   : > { %8287 = vmatprep.subr.bf16.mxu0 %v22888_v50 }
 0x7f9   : > { %8288 = vmatpush1.bf16.msra.mxu0 %v22886_v53 }
 0x7fa   : > { %8289 = vmatprep.subr.bf16.mxu0 %v22893_v8 }
 0x7fd   : > { %8290 = vmatpush1.bf16.msra.mxu0 %v22891_v57 }
 0x7fe   : > { %8291 = vmatprep.subr.bf16.mxu0 %v22898_v23 }
 0x801   : > { %8292 = vmatpush1.bf16.msra.mxu0 %v22896_v39 }
 0x802   : > { %8601 = vmatprep.subr.bf16.mxu0 %v22903_v29 }
 0x897   : > { %v7837_v32 = vpop.f32.mrb[36].mxu0 }
 0x898   : > { %v7839_v4 = vpop.f32.mrb[37].mxu0 }
 0x899   : > { %v7841_v51 = vpop.f32.mrb[38].mxu0 }
 0x89a   : > { %v27603_v56 = vpack.c.bf16 %v7841_v51, %v7837_v32  ;;  %v7843_v6 = vpop.f32.mrb[39].mxu0 }
 0x89b   : > { %v27605_v30 = vpack.c.bf16 %v7843_v6, %v7839_v4 }
 0x89c   : > { %v27608_v62 = vshrl.u32 %v27603_v56, 16  ;;  %v27611_v49 = vshll.u32 %v27603_v56, 16 }
 0x89d   : > { %v7997_v21 = vshrl.u32 %v27605_v30, 16  ;;  %v7999_v12 = vshll.u32 %v27605_v30, 16 }
 0x89e   : > { %v7994_v43 = vrot.slane %v27611_v49, 1  ;;  %v9167_v38 = vrot.slane %v27608_v62, 2  ;;  %v9168_v27 = vrot.slane %v27611_v49, 3  ;;  %v10025_v19 = vrot.slane %v27608_v62, 3 }
 0x89f   : > { %v7847_v45 = vpop.f32.mrb[40].mxu0  ;;  %v8001_v11 = vrot.slane %v7999_v12, 1  ;;  %v9179_v15 = vrot.slane %v7997_v21, 2  ;;  %v9180_v24 = vrot.slane %v7999_v12, 3  ;;  %v10032_v63 = vrot.slane %v7997_v21, 3 }
 0x8a0   : > { %v7849_v3 = vpop.f32.mrb[41].mxu0  ;;  %v9169_v18 = vor.u32 %v9168_v27, %v9167_v38  ;;  %v10033_v0 = vrot.slane %v7999_v12, 4  ;;  %v10026_v41 = vrot.slane %v27611_v49, 4  ;;  %v7995_v9 = vor.u32 %v7994_v43, %v27608_v62  ;;  %v22910_v27 = vld [vmem:[%s31293_s7 + $0x48] ss:$12 sps:$4 sm:$0xff]  }
 0x8a1   : > { %v7851_v42 = vpop.f32.mrb[42].mxu0  ;;  %v8002_v10 = vor.u32 %v8001_v11, %v7997_v21  ;;  %v9181_v25 = vor.u32 %v9180_v24, %v9179_v15  ;;  %v10878_v28 = vrot.slane %v7997_v21, 5  ;;  %v10879_v7 = vrot.slane %v7999_v12, 6  ;;  %v22913_v24 = vld [vmem:[%s31293_s7 + $0x60] ss:$12 sps:$4 sm:$0xff]  }
 0x8a2   : > { %v27623_v20 = vpack.c.bf16 %v7851_v42, %v7847_v45  ;;  %v7853_v48 = vpop.f32.mrb[43].mxu0  ;;  %v10034_v2 = vor.u32 %v10033_v0, %v10032_v63  ;;  %v10027_v35 = vor.u32 %v10026_v41, %v10025_v19  ;;  %v10871_v23 = vrot.slane %v27608_v62, 5  ;;  %v22915_v45 = vld [vmem:[%s31293_s7 + $0x64] ss:$12 sps:$4 sm:$0xff]   ;;  %v22918_v63 = vld [vmem:[%s31293_s7 + $0x7c] ss:$12 sps:$4 sm:$0xff]  }
 0x8a3   : > { %v27629_v37 = vpack.c.bf16 %v7853_v48, %v7849_v3  ;;  %8293 = vmatprep.mubr.bf16.mxu0 %v8002_v10  ;;  %8336 = vmatprep.mubr.bf16.mxu1 %v8002_v10  ;;  %v10880_v58 = vor.u32 %v10879_v7, %v10878_v28  ;;  %v10872_v21 = vrot.slane %v27611_v49, 6  ;;  %v22916_v3 = vld [vmem:[%s31293_s7 + $0x78] ss:$12 sps:$4 sm:$0xff]   ;;  %v22919_v0 = vld [vmem:[%s31293_s7 + $0x90] ss:$12 sps:$4 sm:$0xff]  }
 0x8a4   : > { %v9171_v61 = vshrl.u32 %v27623_v20, 16  ;;  %v9174_v36 = vshll.u32 %v27623_v20, 16  ;;  %8294 = vmatmul.mubr.bf16.vlgmr.msra.gmra.mrb[44].mxu0 %v7995_v9  ;;  %8337 = vmatmul.mubr.bf16.vlgmr.msra.gmra.mrb[140].mxu1 %v7995_v9  ;;  %v22924_v41 = vld [vmem:[%s31293_s7 + $0xac] ss:$12 sps:$4 sm:$0xff]   ;;  %v22922_v42 = vld [vmem:[%s31293_s7 + $0xa8] ss:$12 sps:$4 sm:$0xff]  }
 0x8a5   : > { %8602 = vmatpush1.bf16.msra.mxu0 %v22901_v60  ;;  %8633 = vmatprep.mubr.bf16.mxu0 %v27605_v30  ;;  %v9183_v5 = vshrl.u32 %v27629_v37, 16  ;;  %v9186_v55 = vshll.u32 %v27629_v37, 16  ;;  %v10873_v19 = vor.u32 %v10872_v21, %v10871_v23  ;;  %v22927_v10 = vld [vmem:[%s31293_s7 + $0xc4] ss:$12 sps:$4 sm:$0xff]   ;;  %v22925_v60 = vld [vmem:[%s31293_s7 + $0xc0] ss:$12 sps:$4 sm:$0xff]  }
 0x8a6   : > { %8603 = vmatprep.subr.bf16.mxu0 %v22906_v26  ;;  %v9173_v17 = vrot.slane %v9171_v61, 2  ;;  %v9176_v1 = vrot.slane %v9174_v36, 3  ;;  %15445 = vmatprep.mubr.bf16.mxu1 %v31325_v54  ;;  %v10028_v57 = vrot.slane %v9171_v61, 3  ;;  %v10029_v8 = vrot.slane %v9174_v36, 4  ;;  %v22928_v48 = vld [vmem:[%s31293_s7 + $0xd8] ss:$12 sps:$4 sm:$0xff]  }
 0x8a7   : > { %v9185_v33 = vrot.slane %v9183_v5, 2  ;;  %v9188_v53 = vrot.slane %v9186_v55, 3  ;;  %v10035_v50 = vrot.slane %v9183_v5, 3  ;;  %v10036_v40 = vrot.slane %v9186_v55, 4  ;;  %v22933_v9 = vld [vmem:[%s31293_s7 + $0xf4] ss:$12 sps:$4 sm:$0xff]  }
 0x8a8   : > { %v9177_v31 = vor.u32 %v9176_v1, %v9173_v17  ;;  %v10030_v29 = vor.u32 %v10029_v8, %v10028_v57  ;;  %v10881_v32 = vrot.slane %v9183_v5, 5  ;;  %v10882_v4 = vrot.slane %v9186_v55, 6  ;;  %v22931_v26 = vld [vmem:[%s31293_s7 + $0xf0] ss:$12 sps:$4 sm:$0xff]   ;;  %v22937_v7 = vld [vmem:[%s31293_s7 + $0x120] ss:$12 sps:$4 sm:$0xff]  }
 0x8a9   : > { %8604 = vmatpush1.bf16.msra.mxu0 %v22904_v52  ;;  %v9189_v16 = vor.u32 %v9188_v53, %v9185_v33  ;;  %v10037_v39 = vor.u32 %v10036_v40, %v10035_v50  ;;  %v10874_v43 = vrot.slane %v9171_v61, 5  ;;  %v10875_v38 = vrot.slane %v9174_v36, 6  ;;  %v22939_v28 = vld [vmem:[%s31293_s7 + $0x124] ss:$12 sps:$4 sm:$0xff]   ;;  %v22942_v61 = vld [vmem:[%s31293_s7 + $0x13c] ss:$12 sps:$4 sm:$0xff]  }
 0x8aa   : > { %8605 = vmatprep.subr.bf16.mxu0 %v22909_v59  ;;  %v27651_v34 = vsel %vm6183_vm0, %v9169_v18, %v9177_v31  ;;  %v27661_v62 = vsel %vm4455_vm12, %v10027_v35, %v10030_v29  ;;  %v10883_v12 = vor.u32 %v10882_v4, %v10881_v32  ;;  %v22921_v18 = vld [vmem:[%s31293_s7 + $0x94] ss:$12 sps:$4 sm:$0xff]   ;;  %v22940_v36 = vld [vmem:[%s31293_s7 + $0x138] ss:$12 sps:$4 sm:$0xff]   ;;  %v22943_v5 = vld [vmem:[%s31293_s7 + $0x150] ss:$12 sps:$4 sm:$0xff]  }
 0x8ab   : > { %v27654_v51 = vsel %vm6183_vm0, %v9181_v25, %v9189_v16  ;;  %v27657_v6 = vsel %vm4455_vm12, %v10034_v2, %v10037_v39  ;;  %v10876_v49 = vor.u32 %v10875_v38, %v10874_v43  ;;  %v22930_v25 = vld [vmem:[%s31293_s7 + $0xdc] ss:$12 sps:$4 sm:$0xff]   ;;  %v22936_v2 = vld [vmem:[%s31293_s7 + $0x10c] ss:$12 sps:$4 sm:$0xff]   ;;  %v22945_v52 = vld [vmem:[%s31293_s7 + $0x154] ss:$12 sps:$4 sm:$0xff]  }
 0x8ac   : > { %v27670_v11 = vsel %vm3120_vm8, %v10880_v58, %v10883_v12  ;;  %v22934_v35 = vld [vmem:[%s31293_s7 + $0x108] ss:$12 sps:$4 sm:$0xff]   ;;  %v22948_v55 = vld [vmem:[%s31293_s7 + $0x16c] ss:$12 sps:$4 sm:$0xff]   ;;  %v22955_v40 = vld [vmem:[%s31293_s7 + $0x110] ss:$12 sps:$4 sm:$0xff]  }
 0x8ad   : > { %8606 = vmatpush1.bf16.msra.mxu0 %v22907_v13  ;;  %v27673_v15 = vsel %vm3120_vm8, %v10873_v19, %v10876_v49  ;;  %v22946_v58 = vld [vmem:[%s31293_s7 + $0x168] ss:$12 sps:$4 sm:$0xff]   ;;  %v22951_v1 = vld [vmem:[%s31293_s7 + $0xe0] ss:$12 sps:$4 sm:$0xff]   ;;  %v22953_v53 = vld [vmem:[%s31293_s7 + $0xf8] ss:$12 sps:$4 sm:$0xff]  }
 0x8ae   : > { %8607 = vmatprep.subr.bf16.mxu0 %v22912_v47  ;;  %v22949_v59 = vld [vmem:[%s31293_s7 + $0xc8] ss:$12 sps:$4 sm:$0xff]   ;;  %v22952_v33 = vld [vmem:[%s31293_s7 + $0x20] ss:$12 sps:$4 sm:$0xff]   ;;  %v22954_v50 = vld [vmem:[%s31293_s7 + $0x38] ss:$12 sps:$4 sm:$0xff]  }
 0x8af   : > { %v22950_v17 = vld [vmem:[%s31293_s7 + $0x8] ss:$12 sps:$4 sm:$0xff]   ;;  %v22956_v31 = vld [vmem:[%s31293_s7 + $0x50] ss:$12 sps:$4 sm:$0xff]   ;;  %v22959_v13 = vld [vmem:[%s31293_s7 + $0x140] ss:$12 sps:$4 sm:$0xff]  }
 0x8b0   : > { %v22957_v57 = vld [vmem:[%s31293_s7 + $0x128] ss:$12 sps:$4 sm:$0xff]   ;;  %v22960_v16 = vld [vmem:[%s31293_s7 + $0x80] ss:$12 sps:$4 sm:$0xff]   ;;  %v22961_v39 = vld [vmem:[%s31293_s7 + $0x158] ss:$12 sps:$4 sm:$0xff]  }
 0x8b1   : > { %8608 = vmatpush1.bf16.msra.mxu0 %v22910_v27  ;;  %v22958_v8 = vld [vmem:[%s31293_s7 + $0x68] ss:$12 sps:$4 sm:$0xff]   ;;  %v22962_v23 = vld [vmem:[%s31293_s7 + $0x98] ss:$12 sps:$4 sm:$0xff]   ;;  %v22963_v47 = vld [vmem:[%s31293_s7 + $0x170] ss:$12 sps:$4 sm:$0xff]  }
 0x8b2   : > { %8609 = vmatprep.subr.bf16.mxu0 %v22915_v45  ;;  %v22964_v29 = vld [vmem:[%s31293_s7 + $0xb0] ss:$12 sps:$4 sm:$0xff]   ;;  %v22965_v4 = vld [vmem:[%s31293_s7 + $0x300] ss:$12 sps:$4 sm:$0xff]   ;;  %v8753_v12 = vrot.slane %v27605_v30, 1 }
 0x8b3   : > { %v22967_v32 = vld [vmem:[%s31293_s7 + $0x304] ss:$12 sps:$4 sm:$0xff]   ;;  %v22970_v21 = vld [vmem:[%s31293_s7 + $0x31c] ss:$12 sps:$4 sm:$0xff]   ;;  %v22973_v38 = vld [vmem:[%s31293_s7 + $0x334] ss:$12 sps:$4 sm:$0xff]  }
 0x8b4   : > { %v22968_v43 = vld [vmem:[%s31293_s7 + $0x318] ss:$12 sps:$4 sm:$0xff]   ;;  %v22971_v27 = vld [vmem:[%s31293_s7 + $0x330] ss:$12 sps:$4 sm:$0xff]   ;;  %v22974_v45 = vld [vmem:[%s31293_s7 + $0x348] ss:$12 sps:$4 sm:$0xff]  }
 0x8b5   : > { %8610 = vmatpush1.bf16.msra.mxu0 %v22913_v24  ;;  %v22976_v19 = vld [vmem:[%s31293_s7 + $0x34c] ss:$12 sps:$4 sm:$0xff]   ;;  %v22979_v49 = vld [vmem:[%s31293_s7 + $0x364] ss:$12 sps:$4 sm:$0xff]  }
 0x8b6   : > { %8611 = vmatprep.subr.bf16.mxu0 %v22918_v63  ;;  %v22977_v24 = vld [vmem:[%s31293_s7 + $0x360] ss:$12 sps:$4 sm:$0xff]   ;;  %v22982_v63 = vld [vmem:[%s31293_s7 + $0x37c] ss:$12 sps:$4 sm:$0xff]  }
 0x8b9   : > { %8612 = vmatpush1.bf16.msra.mxu0 %v22916_v3  ;;  %v22980_v3 = vld [vmem:[%s31293_s7 + $0x378] ss:$12 sps:$4 sm:$0xff]  }
 0x8ba   : > { %8613 = vmatprep.subr.bf16.mxu0 %v22921_v18  ;;  %v22985_v18 = vld [vmem:[%s31293_s7 + $0x394] ss:$12 sps:$4 sm:$0xff]  }
 0x8bd   : > { %8614 = vmatpush1.bf16.msra.mxu0 %v22919_v0  ;;  %v22983_v0 = vld [vmem:[%s31293_s7 + $0x390] ss:$12 sps:$4 sm:$0xff]  }
 0x8be   : > { %8615 = vmatprep.subr.bf16.mxu0 %v22924_v41  ;;  %v22988_v41 = vld [vmem:[%s31293_s7 + $0x3ac] ss:$12 sps:$4 sm:$0xff]  }
 0x8c1   : > { %8616 = vmatpush1.bf16.msra.mxu0 %v22922_v42  ;;  %v22986_v42 = vld [vmem:[%s31293_s7 + $0x3a8] ss:$12 sps:$4 sm:$0xff]  }
 0x8c2   : > { %8617 = vmatprep.subr.bf16.mxu0 %v22927_v10  ;;  %v22991_v10 = vld [vmem:[%s31293_s7 + $0x3c4] ss:$12 sps:$4 sm:$0xff]  }
 0x8c5   : > { %8618 = vmatpush1.bf16.msra.mxu0 %v22925_v60  ;;  %v22989_v60 = vld [vmem:[%s31293_s7 + $0x3c0] ss:$12 sps:$4 sm:$0xff]  }
 0x8c6   : > { %8619 = vmatprep.subr.bf16.mxu0 %v22930_v25  ;;  %v22994_v25 = vld [vmem:[%s31293_s7 + $0x3dc] ss:$12 sps:$4 sm:$0xff]  }
 0x8c9   : > { %8620 = vmatpush1.bf16.msra.mxu0 %v22928_v48  ;;  %v22992_v48 = vld [vmem:[%s31293_s7 + $0x3d8] ss:$12 sps:$4 sm:$0xff]  }
 0x8ca   : > { %8621 = vmatprep.subr.bf16.mxu0 %v22933_v9  ;;  %v22997_v9 = vld [vmem:[%s31293_s7 + $0x3f4] ss:$12 sps:$4 sm:$0xff]  }
 0x8cd   : > { %8622 = vmatpush1.bf16.msra.mxu0 %v22931_v26  ;;  %v22995_v26 = vld [vmem:[%s31293_s7 + $0x3f0] ss:$12 sps:$4 sm:$0xff]  }
 0x8ce   : > { %8623 = vmatprep.subr.bf16.mxu0 %v22936_v2  ;;  %v23000_v2 = vld [vmem:[%s31293_s7 + $0x40c] ss:$12 sps:$4 sm:$0xff]  }
 0x8d1   : > { %8624 = vmatpush1.bf16.msra.mxu0 %v22934_v35  ;;  %v22998_v35 = vld [vmem:[%s31293_s7 + $0x408] ss:$12 sps:$4 sm:$0xff]  }
 0x8d2   : > { %8625 = vmatprep.subr.bf16.mxu0 %v22939_v28  ;;  %v23003_v28 = vld [vmem:[%s31293_s7 + $0x424] ss:$12 sps:$4 sm:$0xff]  }
 0x8d5   : > { %8626 = vmatpush1.bf16.msra.mxu0 %v22937_v7  ;;  %v23001_v7 = vld [vmem:[%s31293_s7 + $0x420] ss:$12 sps:$4 sm:$0xff]  }
 0x8d6   : > { %8627 = vmatprep.subr.bf16.mxu0 %v22942_v61  ;;  %v23006_v61 = vld [vmem:[%s31293_s7 + $0x43c] ss:$12 sps:$4 sm:$0xff]  }
 0x8d9   : > { %8628 = vmatpush1.bf16.msra.mxu0 %v22940_v36  ;;  %v23004_v36 = vld [vmem:[%s31293_s7 + $0x438] ss:$12 sps:$4 sm:$0xff]  }
 0x8da   : > { %8629 = vmatprep.subr.bf16.mxu0 %v22945_v52  ;;  %v23009_v52 = vld [vmem:[%s31293_s7 + $0x454] ss:$12 sps:$4 sm:$0xff]  }
 0x8dd   : > { %8630 = vmatpush1.bf16.msra.mxu0 %v22943_v5  ;;  %v23007_v5 = vld [vmem:[%s31293_s7 + $0x450] ss:$12 sps:$4 sm:$0xff]  }
 0x8de   : > { %8631 = vmatprep.subr.bf16.mxu0 %v22948_v55  ;;  %v23012_v55 = vld [vmem:[%s31293_s7 + $0x46c] ss:$12 sps:$4 sm:$0xff]  }
 0x8e1   : > { %8632 = vmatpush1.bf16.msra.mxu0 %v22946_v58  ;;  %v23010_v58 = vld [vmem:[%s31293_s7 + $0x468] ss:$12 sps:$4 sm:$0xff]  }
 0x8e2   : > { %21225 = vmatprep.subr.bf16.mxu0 %v22949_v59  ;;  %v23013_v59 = vld [vmem:[%s31293_s7 + $0x3c8] ss:$12 sps:$4 sm:$0xff]  }
 0x8e4   : > { %8634 = vmatmul.mubr.bf16.vlgmr.msra.gmra.mrb[44].mxu0 %v27603_v56 }
 0x8e5   : > { %21226 = vmatpush3.bf16.msra.mxu0 %v22950_v17  ;;  %8676 = vmatprep.mubr.bf16.mxu0 %v27605_v30  ;;  %v23014_v17 = vld [vmem:[%s31293_s7 + $0x308] ss:$12 sps:$4 sm:$0xff]  }
 0x8e6   : > { %21227 = vmatprep.subr.bf16.mxu0 %v22951_v1  ;;  %v8752_v1 = vrot.slane %v27603_v56, 1 }
 0x8e9   : > { %21228 = vmatpush3.bf16.msra.mxu0 %v22952_v33  ;;  %v23015_v33 = vld [vmem:[%s31293_s7 + $0x3e0] ss:$12 sps:$4 sm:$0xff]  }
 0x8ea   : > { %21229 = vmatprep.subr.bf16.mxu0 %v22953_v53  ;;  %v23016_v53 = vld [vmem:[%s31293_s7 + $0x320] ss:$12 sps:$4 sm:$0xff]  }
 0x8ed   : > { %21230 = vmatpush3.bf16.msra.mxu0 %v22954_v50  ;;  %v23017_v50 = vld [vmem:[%s31293_s7 + $0x3f8] ss:$12 sps:$4 sm:$0xff]  }
 0x8ee   : > { %21231 = vmatprep.subr.bf16.mxu0 %v22955_v40  ;;  %v23018_v40 = vld [vmem:[%s31293_s7 + $0x338] ss:$12 sps:$4 sm:$0xff]  }
 0x8f1   : > { %21232 = vmatpush3.bf16.msra.mxu0 %v22956_v31  ;;  %v23019_v31 = vld [vmem:[%s31293_s7 + $0x410] ss:$12 sps:$4 sm:$0xff]  }
 0x8f2   : > { %21233 = vmatprep.subr.bf16.mxu0 %v22957_v57  ;;  %v23020_v57 = vld [vmem:[%s31293_s7 + $0x350] ss:$12 sps:$4 sm:$0xff]  }
 0x8f5   : > { %21234 = vmatpush3.bf16.msra.mxu0 %v22958_v8  ;;  %v23021_v8 = vld [vmem:[%s31293_s7 + $0x428] ss:$12 sps:$4 sm:$0xff]  }
 0x8f6   : > { %21235 = vmatprep.subr.bf16.mxu0 %v22959_v13  ;;  %v23022_v13 = vld [vmem:[%s31293_s7 + $0x368] ss:$12 sps:$4 sm:$0xff]  }
 0x8f9   : > { %21236 = vmatpush3.bf16.msra.mxu0 %v22960_v16  ;;  %v23023_v16 = vld [vmem:[%s31293_s7 + $0x440] ss:$12 sps:$4 sm:$0xff]  }
 0x8fa   : > { %21237 = vmatprep.subr.bf16.mxu0 %v22961_v39  ;;  %v23024_v39 = vld [vmem:[%s31293_s7 + $0x380] ss:$12 sps:$4 sm:$0xff]  }
 0x8fd   : > { %21238 = vmatpush3.bf16.msra.mxu0 %v22962_v23  ;;  %v23025_v23 = vld [vmem:[%s31293_s7 + $0x458] ss:$12 sps:$4 sm:$0xff]  }
 0x8fe   : > { %21239 = vmatprep.subr.bf16.mxu0 %v22963_v47  ;;  %v23026_v47 = vld [vmem:[%s31293_s7 + $0x398] ss:$12 sps:$4 sm:$0xff]  }
 0x901   : > { %21240 = vmatpush3.bf16.msra.mxu0 %v22964_v29  ;;  %v23027_v29 = vld [vmem:[%s31293_s7 + $0x470] ss:$12 sps:$4 sm:$0xff]  }
 0x902   : > { %9012 = vmatprep.subr.bf16.mxu0 %v22967_v32  ;;  %v23028_v32 = vld [vmem:[%s31293_s7 + $0x3b0] ss:$12 sps:$4 sm:$0xff]  }
 0x904   : > { %8677 = vmatmul.mubr.bf16.vlgmr.msra.gmra.mrb[48].mxu0 %v27603_v56 }
 0x905   : > { %9013 = vmatpush1.bf16.msra.mxu0 %v22965_v4  ;;  %9044 = vmatprep.mubr.bf16.mxu0 %v8753_v12  ;;  %v23031_v4 = vld [vmem:[%s31293_s7 + $0x484] ss:$12 sps:$4 sm:$0xff]  }
 0x906   : > { %9014 = vmatprep.subr.bf16.mxu0 %v22970_v21  ;;  %v23029_v21 = vld [vmem:[%s31293_s7 + $0x480] ss:$12 sps:$4 sm:$0xff]  }
 0x909   : > { %9015 = vmatpush1.bf16.msra.mxu0 %v22968_v43  ;;  %v23032_v43 = vld [vmem:[%s31293_s7 + $0x498] ss:$12 sps:$4 sm:$0xff]  }
 0x90a   : > { %9016 = vmatprep.subr.bf16.mxu0 %v22973_v38  ;;  %v23037_v38 = vld [vmem:[%s31293_s7 + $0x4b4] ss:$12 sps:$4 sm:$0xff]  }
 0x90d   : > { %9017 = vmatpush1.bf16.msra.mxu0 %v22971_v27  ;;  %v23035_v27 = vld [vmem:[%s31293_s7 + $0x4b0] ss:$12 sps:$4 sm:$0xff]  }
 0x90e   : > { %9018 = vmatprep.subr.bf16.mxu0 %v22976_v19  ;;  %v23040_v19 = vld [vmem:[%s31293_s7 + $0x4cc] ss:$12 sps:$4 sm:$0xff]  }
 0x911   : > { %9019 = vmatpush1.bf16.msra.mxu0 %v22974_v45  ;;  %v23038_v45 = vld [vmem:[%s31293_s7 + $0x4c8] ss:$12 sps:$4 sm:$0xff]  }
 0x912   : > { %9020 = vmatprep.subr.bf16.mxu0 %v22979_v49  ;;  %v23043_v49 = vld [vmem:[%s31293_s7 + $0x4e4] ss:$12 sps:$4 sm:$0xff]  }
 0x915   : > { %9021 = vmatpush1.bf16.msra.mxu0 %v22977_v24  ;;  %v23041_v24 = vld [vmem:[%s31293_s7 + $0x4e0] ss:$12 sps:$4 sm:$0xff]  }
 0x916   : > { %9022 = vmatprep.subr.bf16.mxu0 %v22982_v63  ;;  %v23046_v63 = vld [vmem:[%s31293_s7 + $0x4fc] ss:$12 sps:$4 sm:$0xff]  }
 0x919   : > { %9023 = vmatpush1.bf16.msra.mxu0 %v22980_v3  ;;  %v23044_v3 = vld [vmem:[%s31293_s7 + $0x4f8] ss:$12 sps:$4 sm:$0xff]  }
 0x91a   : > { %9024 = vmatprep.subr.bf16.mxu0 %v22985_v18  ;;  %v23049_v18 = vld [vmem:[%s31293_s7 + $0x514] ss:$12 sps:$4 sm:$0xff]  }
 0x91d   : > { %9025 = vmatpush1.bf16.msra.mxu0 %v22983_v0 }
 0x91e   : > { %9026 = vmatprep.subr.bf16.mxu0 %v22988_v41 }
 0x921   : > { %9027 = vmatpush1.bf16.msra.mxu0 %v22986_v42 }
 0x922   : > { %9028 = vmatprep.subr.bf16.mxu0 %v22991_v10 }
 0x925   : > { %9029 = vmatpush1.bf16.msra.mxu0 %v22989_v60  ;;  %v23047_v60 = vld [vmem:[%s31293_s7 + $0x510] ss:$12 sps:$4 sm:$0xff]  }
 0x926   : > { %9030 = vmatprep.subr.bf16.mxu0 %v22994_v25 }
 0x929   : > { %9031 = vmatpush1.bf16.msra.mxu0 %v22992_v48  ;;  %v23052_v48 = vld [vmem:[%s31293_s7 + $0x52c] ss:$12 sps:$4 sm:$0xff]  }
 0x92a   : > { %9032 = vmatprep.subr.bf16.mxu0 %v22997_v9 }
 0x92d   : > { %9033 = vmatpush1.bf16.msra.mxu0 %v22995_v26  ;;  %v23050_v26 = vld [vmem:[%s31293_s7 + $0x528] ss:$12 sps:$4 sm:$0xff]  }
 0x92e   : > { %9034 = vmatprep.subr.bf16.mxu0 %v23000_v2  ;;  %v23055_v2 = vld [vmem:[%s31293_s7 + $0x544] ss:$12 sps:$4 sm:$0xff]  }
 0x931   : > { %9035 = vmatpush1.bf16.msra.mxu0 %v22998_v35  ;;  %v23053_v35 = vld [vmem:[%s31293_s7 + $0x540] ss:$12 sps:$4 sm:$0xff]  }
 0x932   : > { %9036 = vmatprep.subr.bf16.mxu0 %v23003_v28  ;;  %v23058_v28 = vld [vmem:[%s31293_s7 + $0x55c] ss:$12 sps:$4 sm:$0xff]  }
 0x935   : > { %9037 = vmatpush1.bf16.msra.mxu0 %v23001_v7  ;;  %v23056_v7 = vld [vmem:[%s31293_s7 + $0x558] ss:$12 sps:$4 sm:$0xff]  }
 0x936   : > { %9038 = vmatprep.subr.bf16.mxu0 %v23006_v61  ;;  %v23061_v61 = vld [vmem:[%s31293_s7 + $0x574] ss:$12 sps:$4 sm:$0xff]  }
 0x939   : > { %9039 = vmatpush1.bf16.msra.mxu0 %v23004_v36  ;;  %v23059_v36 = vld [vmem:[%s31293_s7 + $0x570] ss:$12 sps:$4 sm:$0xff]  }
 0x93a   : > { %9040 = vmatprep.subr.bf16.mxu0 %v23009_v52  ;;  %v23064_v52 = vld [vmem:[%s31293_s7 + $0x58c] ss:$12 sps:$4 sm:$0xff]  }
 0x93d   : > { %9041 = vmatpush1.bf16.msra.mxu0 %v23007_v5  ;;  %v23062_v5 = vld [vmem:[%s31293_s7 + $0x588] ss:$12 sps:$4 sm:$0xff]  }
 0x93e   : > { %9042 = vmatprep.subr.bf16.mxu0 %v23012_v55  ;;  %v23067_v55 = vld [vmem:[%s31293_s7 + $0x5a4] ss:$12 sps:$4 sm:$0xff]  }
 0x941   : > { %9043 = vmatpush1.bf16.msra.mxu0 %v23010_v58  ;;  %v23065_v58 = vld [vmem:[%s31293_s7 + $0x5a0] ss:$12 sps:$4 sm:$0xff]  }
 0x942   : > { %21247 = vmatprep.subr.bf16.mxu0 %v23013_v59  ;;  %v23070_v59 = vld [vmem:[%s31293_s7 + $0x5bc] ss:$12 sps:$4 sm:$0xff]  }
 0x944   : > { %9045 = vmatmul.mubr.bf16.vlgmr.msra.gmra.mrb[44].mxu0 %v8752_v1 }
 0x945   : > { %21248 = vmatpush3.bf16.msra.mxu0 %v23014_v17  ;;  %9087 = vmatprep.mubr.bf16.mxu0 %v8753_v12  ;;  %v23034_v12 = vld [vmem:[%s31293_s7 + $0x49c] ss:$12 sps:$4 sm:$0xff]   ;;  %v23068_v17 = vld [vmem:[%s31293_s7 + $0x5b8] ss:$12 sps:$4 sm:$0xff]  }
 0x946   : > { %21249 = vmatprep.subr.bf16.mxu0 %v23015_v33  ;;  %v23071_v33 = vld [vmem:[%s31293_s7 + $0x5d0] ss:$12 sps:$4 sm:$0xff]  }
 0x949   : > { %21250 = vmatpush3.bf16.msra.mxu0 %v23016_v53  ;;  %v23076_v53 = vld [vmem:[%s31293_s7 + $0x5ec] ss:$12 sps:$4 sm:$0xff]  }
 0x94a   : > { %21251 = vmatprep.subr.bf16.mxu0 %v23017_v50  ;;  %v23074_v50 = vld [vmem:[%s31293_s7 + $0x5e8] ss:$12 sps:$4 sm:$0xff]  }
 0x94d   : > { %21252 = vmatpush3.bf16.msra.mxu0 %v23018_v40  ;;  %v23077_v40 = vld [vmem:[%s31293_s7 + $0x548] ss:$12 sps:$4 sm:$0xff]  }
 0x94e   : > { %21253 = vmatprep.subr.bf16.mxu0 %v23019_v31  ;;  %v23078_v31 = vld [vmem:[%s31293_s7 + $0x488] ss:$12 sps:$4 sm:$0xff]  }
 0x951   : > { %21254 = vmatpush3.bf16.msra.mxu0 %v23020_v57  ;;  %v23079_v57 = vld [vmem:[%s31293_s7 + $0x560] ss:$12 sps:$4 sm:$0xff]  }
 0x952   : > { %21255 = vmatprep.subr.bf16.mxu0 %v23021_v8  ;;  %v23080_v8 = vld [vmem:[%s31293_s7 + $0x4a0] ss:$12 sps:$4 sm:$0xff]  }
 0x955   : > { %21256 = vmatpush3.bf16.msra.mxu0 %v23022_v13  ;;  %v23081_v13 = vld [vmem:[%s31293_s7 + $0x578] ss:$12 sps:$4 sm:$0xff]  }
 0x956   : > { %21257 = vmatprep.subr.bf16.mxu0 %v23023_v16  ;;  %v23082_v16 = vld [vmem:[%s31293_s7 + $0x4b8] ss:$12 sps:$4 sm:$0xff]  }
 0x959   : > { %21258 = vmatpush3.bf16.msra.mxu0 %v23024_v39  ;;  %v23083_v39 = vld [vmem:[%s31293_s7 + $0x590] ss:$12 sps:$4 sm:$0xff]  }
 0x95a   : > { %21259 = vmatprep.subr.bf16.mxu0 %v23025_v23  ;;  %v23085_v23 = vld [vmem:[%s31293_s7 + $0x5a8] ss:$12 sps:$4 sm:$0xff]  }
 0x95d   : > { %21260 = vmatpush3.bf16.msra.mxu0 %v23026_v47  ;;  %v23086_v47 = vld [vmem:[%s31293_s7 + $0x4e8] ss:$12 sps:$4 sm:$0xff]  }
 0x95e   : > { %21261 = vmatprep.subr.bf16.mxu0 %v23027_v29  ;;  %v23087_v29 = vld [vmem:[%s31293_s7 + $0x5c0] ss:$12 sps:$4 sm:$0xff]  }
 0x961   : > { %21262 = vmatpush3.bf16.msra.mxu0 %v23028_v32  ;;  %v23088_v32 = vld [vmem:[%s31293_s7 + $0x500] ss:$12 sps:$4 sm:$0xff]  }
 0x962   : > { %9449 = vmatprep.subr.bf16.mxu0 %v23031_v4  ;;  %v23089_v4 = vld [vmem:[%s31293_s7 + $0x5d8] ss:$12 sps:$4 sm:$0xff]  }
 0x964   : > { %9088 = vmatmul.mubr.bf16.vlgmr.msra.gmra.mrb[52].mxu0 %v8752_v1  ;;  %v23073_v1 = vld [vmem:[%s31293_s7 + $0x5d4] ss:$12 sps:$4 sm:$0xff]  }
 0x965   : > { %9450 = vmatpush1.bf16.msra.mxu0 %v23029_v21  ;;  %9481 = vmatprep.mubr.bf16.mxu0 %v27654_v51  ;;  %v23090_v21 = vld [vmem:[%s31293_s7 + $0x518] ss:$12 sps:$4 sm:$0xff]  }
 0x966   : > { %9451 = vmatprep.subr.bf16.mxu0 %v23034_v12  ;;  %v23091_v12 = vld [vmem:[%s31293_s7 + $0x5f0] ss:$12 sps:$4 sm:$0xff]  }
 0x969   : > { %9452 = vmatpush1.bf16.msra.mxu0 %v23032_v43  ;;  %v23092_v43 = vld [vmem:[%s31293_s7 + $0x530] ss:$12 sps:$4 sm:$0xff]  }
 0x96a   : > { %9453 = vmatprep.subr.bf16.mxu0 %v23037_v38  ;;  %v23095_v38 = vld [vmem:[%s31293_s7 + $0x604] ss:$12 sps:$4 sm:$0xff]  }
 0x96d   : > { %9454 = vmatpush1.bf16.msra.mxu0 %v23035_v27  ;;  %v9610_v27 = vrot.slane %v27629_v37, 3 }
 0x96e   : > { %9455 = vmatprep.subr.bf16.mxu0 %v23040_v19  ;;  %v23093_v19 = vld [vmem:[%s31293_s7 + $0x600] ss:$12 sps:$4 sm:$0xff]  }
 0x971   : > { %9456 = vmatpush1.bf16.msra.mxu0 %v23038_v45  ;;  %v9609_v45 = vrot.slane %v27605_v30, 3 }
 0x972   : > { %9457 = vmatprep.subr.bf16.mxu0 %v23043_v49  ;;  %v23098_v49 = vld [vmem:[%s31293_s7 + $0x61c] ss:$12 sps:$4 sm:$0xff]  }
 0x975   : > { %9458 = vmatpush1.bf16.msra.mxu0 %v23041_v24  ;;  %v28109_v24 = vsel %vm4240_vm11, %v9609_v45, %v9610_v27  ;;  %v23147_v27 = vld [vmem:[%s31293_s7 + $0x710] ss:$12 sps:$4 sm:$0xff]   ;;  %v23149_v45 = vld [vmem:[%s31293_s7 + $0x728] ss:$12 sps:$4 sm:$0xff]  }
 0x976   : > { %9459 = vmatprep.subr.bf16.mxu0 %v23046_v63  ;;  %v23096_v63 = vld [vmem:[%s31293_s7 + $0x618] ss:$12 sps:$4 sm:$0xff]  }
 0x977   : > { %v21219_v0 = vpop.f32.mrb[140].mxu1 }
 0x978   : > { %v21220_v41 = vpop.f32.mrb[141].mxu1 }
 0x979   : > { %v27985_v42 = vadd.f32 %v21220_v41, %v21219_v0  ;;  %9460 = vmatpush1.bf16.msra.mxu0 %v23044_v3  ;;  %v21222_v10 = vpop.f32.mrb[142].mxu1  ;;  %v23101_v3 = vld [vmem:[%s31293_s7 + $0x634] ss:$12 sps:$4 sm:$0xff]   ;;  %v23107_v41 = vld [vmem:[%s31293_s7 + $0x664] ss:$12 sps:$4 sm:$0xff]  }
 0x97a   : > { %v21223_v25 = vpop.f32.mrb[143].mxu1  ;;  %9461 = vmatprep.subr.bf16.mxu0 %v23049_v18  ;;  %v23104_v18 = vld [vmem:[%s31293_s7 + $0x64c] ss:$12 sps:$4 sm:$0xff]   ;;  %v23102_v0 = vld [vmem:[%s31293_s7 + $0x648] ss:$12 sps:$4 sm:$0xff]  }
 0x97b   : > { %v27993_v9 = vadd.f32 %v21223_v25, %v21222_v10  ;;  %v23105_v10 = vld [vmem:[%s31293_s7 + $0x660] ss:$12 sps:$4 sm:$0xff]   ;;  %v23108_v25 = vld [vmem:[%s31293_s7 + $0x678] ss:$12 sps:$4 sm:$0xff]  }
 0x97d   : > { %9462 = vmatpush1.bf16.msra.mxu0 %v23047_v60  ;;  %v23110_v60 = vld [vmem:[%s31293_s7 + $0x67c] ss:$12 sps:$4 sm:$0xff]  }
 0x97e   : > { %9463 = vmatprep.subr.bf16.mxu0 %v23052_v48  ;;  %v23113_v48 = vld [vmem:[%s31293_s7 + $0x694] ss:$12 sps:$4 sm:$0xff]  }
 0x981   : > { %9464 = vmatpush1.bf16.msra.mxu0 %v23050_v26 }
 0x982   : > { %9465 = vmatprep.subr.bf16.mxu0 %v23055_v2 }
 0x985   : > { %9466 = vmatpush1.bf16.msra.mxu0 %v23053_v35 }
 0x986   : > { %9467 = vmatprep.subr.bf16.mxu0 %v23058_v28 }
 0x989   : > { %9468 = vmatpush1.bf16.msra.mxu0 %v23056_v7  ;;  %v23111_v7 = vld [vmem:[%s31293_s7 + $0x690] ss:$12 sps:$4 sm:$0xff]  }
 0x98a   : > { %9469 = vmatprep.subr.bf16.mxu0 %v23061_v61 }
 0x98d   : > { %9470 = vmatpush1.bf16.msra.mxu0 %v23059_v36  ;;  %v23116_v36 = vld [vmem:[%s31293_s7 + $0x6ac] ss:$12 sps:$4 sm:$0xff]  }
 0x98e   : > { %9471 = vmatprep.subr.bf16.mxu0 %v23064_v52 }
 0x991   : > { %9472 = vmatpush1.bf16.msra.mxu0 %v23062_v5 }
 0x992   : > { %9473 = vmatprep.subr.bf16.mxu0 %v23067_v55 }
 0x995   : > { %9474 = vmatpush1.bf16.msra.mxu0 %v23065_v58  ;;  %v23114_v58 = vld [vmem:[%s31293_s7 + $0x6a8] ss:$12 sps:$4 sm:$0xff]  }
 0x996   : > { %9475 = vmatprep.subr.bf16.mxu0 %v23070_v59  ;;  %v23119_v59 = vld [vmem:[%s31293_s7 + $0x6c4] ss:$12 sps:$4 sm:$0xff]  }
 0x999   : > { %9476 = vmatpush1.bf16.msra.mxu0 %v23068_v17  ;;  %v23120_v17 = vld [vmem:[%s31293_s7 + $0x6d8] ss:$12 sps:$4 sm:$0xff]  }
 0x99a   : > { %9477 = vmatprep.subr.bf16.mxu0 %v23073_v1  ;;  %v23125_v1 = vld [vmem:[%s31293_s7 + $0x6f4] ss:$12 sps:$4 sm:$0xff]  }
 0x99d   : > { %9478 = vmatpush1.bf16.msra.mxu0 %v23071_v33  ;;  %v23123_v33 = vld [vmem:[%s31293_s7 + $0x6f0] ss:$12 sps:$4 sm:$0xff]  }
 0x99e   : > { %9479 = vmatprep.subr.bf16.mxu0 %v23076_v53  ;;  %v23128_v53 = vld [vmem:[%s31293_s7 + $0x70c] ss:$12 sps:$4 sm:$0xff]  }
 0x9a1   : > { %9480 = vmatpush1.bf16.msra.mxu0 %v23074_v50  ;;  %v23126_v50 = vld [vmem:[%s31293_s7 + $0x708] ss:$12 sps:$4 sm:$0xff]  }
 0x9a2   : > { %21269 = vmatprep.subr.bf16.mxu0 %v23077_v40  ;;  %v23131_v40 = vld [vmem:[%s31293_s7 + $0x724] ss:$12 sps:$4 sm:$0xff]  }
 0x9a4   : > { %9482 = vmatmul.mubr.bf16.vlgmr.msra.gmra.mrb[44].mxu0 %v27651_v34 }
 0x9a5   : > { %21270 = vmatpush3.bf16.msra.mxu0 %v23078_v31  ;;  %9524 = vmatprep.mubr.bf16.mxu0 %v27654_v51  ;;  %v23084_v51 = vld [vmem:[%s31293_s7 + $0x4d0] ss:$12 sps:$4 sm:$0xff]   ;;  %v23129_v31 = vld [vmem:[%s31293_s7 + $0x720] ss:$12 sps:$4 sm:$0xff]  }
 0x9a6   : > { %21271 = vmatprep.subr.bf16.mxu0 %v23079_v57  ;;  %v23134_v57 = vld [vmem:[%s31293_s7 + $0x73c] ss:$12 sps:$4 sm:$0xff]  }
 0x9a9   : > { %21272 = vmatpush3.bf16.msra.mxu0 %v23080_v8  ;;  %v23132_v8 = vld [vmem:[%s31293_s7 + $0x738] ss:$12 sps:$4 sm:$0xff]  }
 0x9aa   : > { %21273 = vmatprep.subr.bf16.mxu0 %v23081_v13  ;;  %v23137_v13 = vld [vmem:[%s31293_s7 + $0x754] ss:$12 sps:$4 sm:$0xff]  }
 0x9ad   : > { %21274 = vmatpush3.bf16.msra.mxu0 %v23082_v16  ;;  %v23135_v16 = vld [vmem:[%s31293_s7 + $0x750] ss:$12 sps:$4 sm:$0xff]  }
 0x9ae   : > { %21275 = vmatprep.subr.bf16.mxu0 %v23083_v39  ;;  %v23140_v39 = vld [vmem:[%s31293_s7 + $0x76c] ss:$12 sps:$4 sm:$0xff]  }
 0x9b1   : > { %21276 = vmatpush3.bf16.msra.mxu0 %v23084_v51  ;;  %v23138_v51 = vld [vmem:[%s31293_s7 + $0x768] ss:$12 sps:$4 sm:$0xff]  }
 0x9b2   : > { %21277 = vmatprep.subr.bf16.mxu0 %v23085_v23  ;;  %v23141_v23 = vld [vmem:[%s31293_s7 + $0x6c8] ss:$12 sps:$4 sm:$0xff]  }
 0x9b5   : > { %21278 = vmatpush3.bf16.msra.mxu0 %v23086_v47  ;;  %v9607_v47 = vrot.slane %v27623_v20, 3 }
 0x9b6   : > { %21279 = vmatprep.subr.bf16.mxu0 %v23087_v29  ;;  %v9606_v29 = vrot.slane %v27603_v56, 3 }
 0x9b9   : > { %21280 = vmatpush3.bf16.msra.mxu0 %v23088_v32  ;;  %v23142_v32 = vld [vmem:[%s31293_s7 + $0x608] ss:$12 sps:$4 sm:$0xff]  }
 0x9ba   : > { %21281 = vmatprep.subr.bf16.mxu0 %v23089_v4  ;;  %v23143_v4 = vld [vmem:[%s31293_s7 + $0x6e0] ss:$12 sps:$4 sm:$0xff]  }
 0x9bd   : > { %21282 = vmatpush3.bf16.msra.mxu0 %v23090_v21  ;;  %v9608_v21 = vsel %vm4240_vm11, %v9606_v29, %v9607_v47  ;;  %v23193_v47 = vld [vmem:[%s31293_s7 + $0x8a0] ss:$12 sps:$4 sm:$0xff]   ;;  %v23198_v29 = vld [vmem:[%s31293_s7 + $0x8bc] ss:$12 sps:$4 sm:$0xff]  }
 0x9be   : > { %21283 = vmatprep.subr.bf16.mxu0 %v23091_v12  ;;  %v23144_v12 = vld [vmem:[%s31293_s7 + $0x620] ss:$12 sps:$4 sm:$0xff]  }
 0x9c1   : > { %21284 = vmatpush3.bf16.msra.mxu0 %v23092_v43  ;;  %v23145_v43 = vld [vmem:[%s31293_s7 + $0x6f8] ss:$12 sps:$4 sm:$0xff]  }
 0x9c2   : > { %9870 = vmatprep.subr.bf16.mxu0 %v23095_v38  ;;  %v23146_v38 = vld [vmem:[%s31293_s7 + $0x638] ss:$12 sps:$4 sm:$0xff]  }
 0x9c4   : > { %9525 = vmatmul.mubr.bf16.vlgmr.msra.gmra.mrb[56].mxu0 %v27651_v34  ;;  %v23099_v34 = vld [vmem:[%s31293_s7 + $0x630] ss:$12 sps:$4 sm:$0xff]  }
 0x9c5   : > { %9871 = vmatpush1.bf16.msra.mxu0 %v23093_v19  ;;  %9902 = vmatprep.mubr.bf16.mxu0 %v28109_v24  ;;  %v23148_v19 = vld [vmem:[%s31293_s7 + $0x650] ss:$12 sps:$4 sm:$0xff]  }
 0x9c6   : > { %9872 = vmatprep.subr.bf16.mxu0 %v23098_v49  ;;  %v23150_v49 = vld [vmem:[%s31293_s7 + $0x668] ss:$12 sps:$4 sm:$0xff]  }
 0x9c9   : > { %9873 = vmatpush1.bf16.msra.mxu0 %v23096_v63  ;;  %v23152_v63 = vld [vmem:[%s31293_s7 + $0x680] ss:$12 sps:$4 sm:$0xff]  }
 0x9ca   : > { %9874 = vmatprep.subr.bf16.mxu0 %v23101_v3  ;;  %v23153_v3 = vld [vmem:[%s31293_s7 + $0x758] ss:$12 sps:$4 sm:$0xff]  }
 0x9cd   : > { %9875 = vmatpush1.bf16.msra.mxu0 %v23099_v34  ;;  %v23154_v34 = vld [vmem:[%s31293_s7 + $0x698] ss:$12 sps:$4 sm:$0xff]  }
 0x9ce   : > { %9876 = vmatprep.subr.bf16.mxu0 %v23104_v18  ;;  %v23155_v18 = vld [vmem:[%s31293_s7 + $0x770] ss:$12 sps:$4 sm:$0xff]  }
 0x9d1   : > { %9877 = vmatpush1.bf16.msra.mxu0 %v23102_v0  ;;  %v23156_v0 = vld [vmem:[%s31293_s7 + $0x6b0] ss:$12 sps:$4 sm:$0xff]  }
 0x9d2   : > { %9878 = vmatprep.subr.bf16.mxu0 %v23107_v41  ;;  %v23159_v41 = vld [vmem:[%s31293_s7 + $0x784] ss:$12 sps:$4 sm:$0xff]  }
 0x9d5   : > { %9879 = vmatpush1.bf16.msra.mxu0 %v23105_v10  ;;  %v23157_v10 = vld [vmem:[%s31293_s7 + $0x780] ss:$12 sps:$4 sm:$0xff]  }
 0x9d6   : > { %9880 = vmatprep.subr.bf16.mxu0 %v23110_v60  ;;  %v23162_v60 = vld [vmem:[%s31293_s7 + $0x79c] ss:$12 sps:$4 sm:$0xff]  }
 0x9d7   : > { %v21241_v26 = vpop.f32.mrb[48].mxu0 }
 0x9d8   : > { %v21242_v2 = vpop.f32.mrb[49].mxu0 }
 0x9d9   : > { %v21243_v35 = vadd.f32 %v21242_v2, %v21241_v26  ;;  %v21244_v28 = vpop.f32.mrb[50].mxu0  ;;  %9881 = vmatpush1.bf16.msra.mxu0 %v23108_v25  ;;  %v23160_v25 = vld [vmem:[%s31293_s7 + $0x798] ss:$12 sps:$4 sm:$0xff]   ;;  %v23163_v26 = vld [vmem:[%s31293_s7 + $0x7b0] ss:$12 sps:$4 sm:$0xff]  }
 0x9da   : > { %v21245_v61 = vpop.f32.mrb[51].mxu0  ;;  %9882 = vmatprep.subr.bf16.mxu0 %v23113_v48  ;;  %v23165_v48 = vld [vmem:[%s31293_s7 + $0x7b4] ss:$12 sps:$4 sm:$0xff]   ;;  %v23168_v2 = vld [vmem:[%s31293_s7 + $0x7cc] ss:$12 sps:$4 sm:$0xff]  }
 0x9db   : > { %v28149_v52 = vadd.f32 %v21243_v35, %v27985_v42  ;;  %v21246_v5 = vadd.f32 %v21245_v61, %v21244_v28  ;;  %v23117_v42 = vld [vmem:[%s31293_s7 + $0x6c0] ss:$12 sps:$4 sm:$0xff]   ;;  %v23166_v35 = vld [vmem:[%s31293_s7 + $0x7c8] ss:$12 sps:$4 sm:$0xff]   ;;  %v23171_v28 = vld [vmem:[%s31293_s7 + $0x7e4] ss:$12 sps:$4 sm:$0xff]  }
 0x9dc   : > { %v23174_v61 = vld [vmem:[%s31293_s7 + $0x7fc] ss:$12 sps:$4 sm:$0xff]  }
 0x9dd   : > { %v28152_v55 = vadd.f32 %v21246_v5, %v27993_v9  ;;  %9883 = vmatpush1.bf16.msra.mxu0 %v23111_v7  ;;  %v23122_v9 = vld [vmem:[%s31293_s7 + $0x6dc] ss:$12 sps:$4 sm:$0xff]   ;;  %v23169_v7 = vld [vmem:[%s31293_s7 + $0x7e0] ss:$12 sps:$4 sm:$0xff]  }
 0x9de   : > { %9884 = vmatprep.subr.bf16.mxu0 %v23116_v36  ;;  %v23172_v36 = vld [vmem:[%s31293_s7 + $0x7f8] ss:$12 sps:$4 sm:$0xff]   ;;  %v23177_v5 = vld [vmem:[%s31293_s7 + $0x814] ss:$12 sps:$4 sm:$0xff]  }
 0x9e1   : > { %9885 = vmatpush1.bf16.msra.mxu0 %v23114_v58 }
 0x9e2   : > { %9886 = vmatprep.subr.bf16.mxu0 %v23119_v59 }
 0x9e5   : > { %9887 = vmatpush1.bf16.msra.mxu0 %v23117_v42 }
 0x9e6   : > { %9888 = vmatprep.subr.bf16.mxu0 %v23122_v9 }
 0x9e9   : > { %9889 = vmatpush1.bf16.msra.mxu0 %v23120_v17  ;;  %v23175_v17 = vld [vmem:[%s31293_s7 + $0x810] ss:$12 sps:$4 sm:$0xff]  }
 0x9ea   : > { %9890 = vmatprep.subr.bf16.mxu0 %v23125_v1 }
 0x9ed   : > { %9891 = vmatpush1.bf16.msra.mxu0 %v23123_v33  ;;  %v23180_v33 = vld [vmem:[%s31293_s7 + $0x82c] ss:$12 sps:$4 sm:$0xff]  }
 0x9ee   : > { %9892 = vmatprep.subr.bf16.mxu0 %v23128_v53 }
 0x9f1   : > { %9893 = vmatpush1.bf16.msra.mxu0 %v23126_v50 }
 0x9f2   : > { %9894 = vmatprep.subr.bf16.mxu0 %v23131_v40 }
 0x9f5   : > { %9895 = vmatpush1.bf16.msra.mxu0 %v23129_v31  ;;  %v23178_v31 = vld [vmem:[%s31293_s7 + $0x828] ss:$12 sps:$4 sm:$0xff]  }
 0x9f6   : > { %9896 = vmatprep.subr.bf16.mxu0 %v23134_v57  ;;  %v23183_v57 = vld [vmem:[%s31293_s7 + $0x844] ss:$12 sps:$4 sm:$0xff]  }
 0x9f9   : > { %9897 = vmatpush1.bf16.msra.mxu0 %v23132_v8  ;;  %v23184_v8 = vld [vmem:[%s31293_s7 + $0x858] ss:$12 sps:$4 sm:$0xff]  }
 0x9fa   : > { %9898 = vmatprep.subr.bf16.mxu0 %v23137_v13  ;;  %v23189_v13 = vld [vmem:[%s31293_s7 + $0x874] ss:$12 sps:$4 sm:$0xff]  }
 0x9fd   : > { %9899 = vmatpush1.bf16.msra.mxu0 %v23135_v16  ;;  %v23187_v16 = vld [vmem:[%s31293_s7 + $0x870] ss:$12 sps:$4 sm:$0xff]  }
 0x9fe   : > { %9900 = vmatprep.subr.bf16.mxu0 %v23140_v39  ;;  %v23192_v39 = vld [vmem:[%s31293_s7 + $0x88c] ss:$12 sps:$4 sm:$0xff]  }
 0xa01   : > { %9901 = vmatpush1.bf16.msra.mxu0 %v23138_v51  ;;  %v23190_v51 = vld [vmem:[%s31293_s7 + $0x888] ss:$12 sps:$4 sm:$0xff]  }
 0xa02   : > { %21291 = vmatprep.subr.bf16.mxu0 %v23141_v23  ;;  %v23195_v23 = vld [vmem:[%s31293_s7 + $0x8a4] ss:$12 sps:$4 sm:$0xff]  }
 0xa04   : > { %9903 = vmatmul.mubr.bf16.vlgmr.msra.gmra.mrb[44].mxu0 %v9608_v21 }
 0xa05   : > { %21292 = vmatpush3.bf16.msra.mxu0 %v23142_v32  ;;  %9945 = vmatprep.mubr.bf16.mxu0 %v28109_v24  ;;  %v23151_v24 = vld [vmem:[%s31293_s7 + $0x740] ss:$12 sps:$4 sm:$0xff]   ;;  %v23196_v32 = vld [vmem:[%s31293_s7 + $0x8b8] ss:$12 sps:$4 sm:$0xff]  }
 0xa06   : > { %21293 = vmatprep.subr.bf16.mxu0 %v23143_v4  ;;  %v23201_v4 = vld [vmem:[%s31293_s7 + $0x8d4] ss:$12 sps:$4 sm:$0xff]  }
 0xa09   : > { %21294 = vmatpush3.bf16.msra.mxu0 %v23144_v12  ;;  %v23204_v12 = vld [vmem:[%s31293_s7 + $0x8ec] ss:$12 sps:$4 sm:$0xff]  }
 0xa0a   : > { %21295 = vmatprep.subr.bf16.mxu0 %v23145_v43  ;;  %v23202_v43 = vld [vmem:[%s31293_s7 + $0x8e8] ss:$12 sps:$4 sm:$0xff]  }
 0xa0d   : > { %21296 = vmatpush3.bf16.msra.mxu0 %v23146_v38  ;;  %v23205_v38 = vld [vmem:[%s31293_s7 + $0x848] ss:$12 sps:$4 sm:$0xff]  }
 0xa0e   : > { %21297 = vmatprep.subr.bf16.mxu0 %v23147_v27  ;;  %v23206_v27 = vld [vmem:[%s31293_s7 + $0x788] ss:$12 sps:$4 sm:$0xff]  }
 0xa11   : > { %21298 = vmatpush3.bf16.msra.mxu0 %v23148_v19  ;;  %v23207_v19 = vld [vmem:[%s31293_s7 + $0x860] ss:$12 sps:$4 sm:$0xff]  }
 0xa12   : > { %21299 = vmatprep.subr.bf16.mxu0 %v23149_v45  ;;  %v23208_v45 = vld [vmem:[%s31293_s7 + $0x7a0] ss:$12 sps:$4 sm:$0xff]  }
 0xa15   : > { %21300 = vmatpush3.bf16.msra.mxu0 %v23150_v49  ;;  %v23209_v49 = vld [vmem:[%s31293_s7 + $0x878] ss:$12 sps:$4 sm:$0xff]  }
 0xa16   : > { %21301 = vmatprep.subr.bf16.mxu0 %v23151_v24  ;;  %v23210_v24 = vld [vmem:[%s31293_s7 + $0x7b8] ss:$12 sps:$4 sm:$0xff]  }
 0xa19   : > { %21302 = vmatpush3.bf16.msra.mxu0 %v23152_v63  ;;  %v23211_v63 = vld [vmem:[%s31293_s7 + $0x890] ss:$12 sps:$4 sm:$0xff]  }
 0xa1a   : > { %21303 = vmatprep.subr.bf16.mxu0 %v23153_v3  ;;  %v23213_v3 = vld [vmem:[%s31293_s7 + $0x8a8] ss:$12 sps:$4 sm:$0xff]  }
 0xa1d   : > { %21304 = vmatpush3.bf16.msra.mxu0 %v23154_v34  ;;  %v23214_v34 = vld [vmem:[%s31293_s7 + $0x7e8] ss:$12 sps:$4 sm:$0xff]  }
 0xa1e   : > { %21305 = vmatprep.subr.bf16.mxu0 %v23155_v18  ;;  %v23215_v18 = vld [vmem:[%s31293_s7 + $0x8c0] ss:$12 sps:$4 sm:$0xff]  }
 0xa21   : > { %21306 = vmatpush3.bf16.msra.mxu0 %v23156_v0  ;;  %v23216_v0 = vld [vmem:[%s31293_s7 + $0x800] ss:$12 sps:$4 sm:$0xff]  }
 0xa22   : > { %10297 = vmatprep.subr.bf16.mxu0 %v23159_v41  ;;  %v23217_v41 = vld [vmem:[%s31293_s7 + $0x8d8] ss:$12 sps:$4 sm:$0xff]  }
 0xa24   : > { %9946 = vmatmul.mubr.bf16.vlgmr.msra.gmra.mrb[60].mxu0 %v9608_v21  ;;  %v23199_v21 = vld [vmem:[%s31293_s7 + $0x8d0] ss:$12 sps:$4 sm:$0xff]  }
 0xa25   : > { %10298 = vmatpush1.bf16.msra.mxu0 %v23157_v10  ;;  %10329 = vmatprep.mubr.bf16.mxu0 %v27657_v6  ;;  %v23218_v10 = vld [vmem:[%s31293_s7 + $0x818] ss:$12 sps:$4 sm:$0xff]  }
 0xa26   : > { %10299 = vmatprep.subr.bf16.mxu0 %v23162_v60  ;;  %v23219_v60 = vld [vmem:[%s31293_s7 + $0x8f0] ss:$12 sps:$4 sm:$0xff]  }
 0xa29   : > { %10300 = vmatpush1.bf16.msra.mxu0 %v23160_v25  ;;  %v23220_v25 = vld [vmem:[%s31293_s7 + $0x830] ss:$12 sps:$4 sm:$0xff]  }
 0xa2a   : > { %10301 = vmatprep.subr.bf16.mxu0 %v23165_v48  ;;  %v23223_v48 = vld [vmem:[%s31293_s7 + $0x904] ss:$12 sps:$4 sm:$0xff]  }
 0xa2d   : > { %10302 = vmatpush1.bf16.msra.mxu0 %v23163_v26  ;;  %v10456_v26 = vrot.slane %v27629_v37, 5 }
 0xa2e   : > { %10303 = vmatprep.subr.bf16.mxu0 %v23168_v2  ;;  %v23221_v2 = vld [vmem:[%s31293_s7 + $0x900] ss:$12 sps:$4 sm:$0xff]  }
 0xa31   : > { %10304 = vmatpush1.bf16.msra.mxu0 %v23166_v35  ;;  %v10455_v35 = vrot.slane %v27605_v30, 5 }
 0xa32   : > { %10305 = vmatprep.subr.bf16.mxu0 %v23171_v28  ;;  %v23226_v28 = vld [vmem:[%s31293_s7 + $0x91c] ss:$12 sps:$4 sm:$0xff]  }
 0xa35   : > { %10306 = vmatpush1.bf16.msra.mxu0 %v23169_v7  ;;  %v28423_v7 = vsel %vm5132_vm15, %v10455_v35, %v10456_v26  ;;  %v23277_v26 = vld [vmem:[%s31293_s7 + $0xa28] ss:$12 sps:$4 sm:$0xff]   ;;  %v23279_v35 = vld [vmem:[%s31293_s7 + $0xa40] ss:$12 sps:$4 sm:$0xff]  }
 0xa36   : > { %10307 = vmatprep.subr.bf16.mxu0 %v23174_v61  ;;  %v23224_v61 = vld [vmem:[%s31293_s7 + $0x918] ss:$12 sps:$4 sm:$0xff]  }
 0xa37   : > { %v21263_v58 = vpop.f32.mrb[52].mxu0 }
 0xa38   : > { %v21264_v59 = vpop.f32.mrb[53].mxu0 }
 0xa39   : > { %v21265_v42 = vadd.f32 %v21264_v59, %v21263_v58  ;;  %v21266_v9 = vpop.f32.mrb[54].mxu0  ;;  %10308 = vmatpush1.bf16.msra.mxu0 %v23172_v36  ;;  %v23229_v36 = vld [vmem:[%s31293_s7 + $0x934] ss:$12 sps:$4 sm:$0xff]   ;;  %v23235_v59 = vld [vmem:[%s31293_s7 + $0x964] ss:$12 sps:$4 sm:$0xff]  }
 0xa3a   : > { %v21267_v1 = vpop.f32.mrb[55].mxu0  ;;  %10309 = vmatprep.subr.bf16.mxu0 %v23177_v5  ;;  %v23232_v5 = vld [vmem:[%s31293_s7 + $0x94c] ss:$12 sps:$4 sm:$0xff]   ;;  %v23230_v58 = vld [vmem:[%s31293_s7 + $0x948] ss:$12 sps:$4 sm:$0xff]  }
 0xa3b   : > { %v28304_v53 = vadd.f32 %v21265_v42, %v28149_v52  ;;  %v21268_v50 = vadd.f32 %v21267_v1, %v21266_v9  ;;  %v23181_v52 = vld [vmem:[%s31293_s7 + $0x840] ss:$12 sps:$4 sm:$0xff]   ;;  %v23238_v9 = vld [vmem:[%s31293_s7 + $0x97c] ss:$12 sps:$4 sm:$0xff]  }
 0xa3c   : > { %v23233_v42 = vld [vmem:[%s31293_s7 + $0x960] ss:$12 sps:$4 sm:$0xff]  }
 0xa3d   : > { %v28307_v40 = vadd.f32 %v21268_v50, %v28152_v55  ;;  %10310 = vmatpush1.bf16.msra.mxu0 %v23175_v17  ;;  %v23186_v55 = vld [vmem:[%s31293_s7 + $0x85c] ss:$12 sps:$4 sm:$0xff]   ;;  %v23236_v17 = vld [vmem:[%s31293_s7 + $0x978] ss:$12 sps:$4 sm:$0xff]   ;;  %v23241_v1 = vld [vmem:[%s31293_s7 + $0x994] ss:$12 sps:$4 sm:$0xff]  }
 0xa3e   : > { %10311 = vmatprep.subr.bf16.mxu0 %v23180_v33 }
 0xa41   : > { %10312 = vmatpush1.bf16.msra.mxu0 %v23178_v31 }
 0xa42   : > { %10313 = vmatprep.subr.bf16.mxu0 %v23183_v57 }
 0xa45   : > { %10314 = vmatpush1.bf16.msra.mxu0 %v23181_v52  ;;  %v23239_v52 = vld [vmem:[%s31293_s7 + $0x990] ss:$12 sps:$4 sm:$0xff]  }
 0xa46   : > { %10315 = vmatprep.subr.bf16.mxu0 %v23186_v55 }
 0xa49   : > { %10316 = vmatpush1.bf16.msra.mxu0 %v23184_v8  ;;  %v23244_v8 = vld [vmem:[%s31293_s7 + $0x9ac] ss:$12 sps:$4 sm:$0xff]  }
 0xa4a   : > { %10317 = vmatprep.subr.bf16.mxu0 %v23189_v13 }
 0xa4d   : > { %10318 = vmatpush1.bf16.msra.mxu0 %v23187_v16 }
 0xa4e   : > { %10319 = vmatprep.subr.bf16.mxu0 %v23192_v39 }
 0xa51   : > { %10320 = vmatpush1.bf16.msra.mxu0 %v23190_v51  ;;  %v23242_v51 = vld [vmem:[%s31293_s7 + $0x9a8] ss:$12 sps:$4 sm:$0xff]  }
 0xa52   : > { %10321 = vmatprep.subr.bf16.mxu0 %v23195_v23  ;;  %v23247_v23 = vld [vmem:[%s31293_s7 + $0x9c4] ss:$12 sps:$4 sm:$0xff]  }
 0xa55   : > { %10322 = vmatpush1.bf16.msra.mxu0 %v23193_v47  ;;  %v23248_v47 = vld [vmem:[%s31293_s7 + $0x9d8] ss:$12 sps:$4 sm:$0xff]  }
 0xa56   : > { %10323 = vmatprep.subr.bf16.mxu0 %v23198_v29  ;;  %v23253_v29 = vld [vmem:[%s31293_s7 + $0x9f4] ss:$12 sps:$4 sm:$0xff]  }
 0xa59   : > { %10324 = vmatpush1.bf16.msra.mxu0 %v23196_v32  ;;  %v23251_v32 = vld [vmem:[%s31293_s7 + $0x9f0] ss:$12 sps:$4 sm:$0xff]  }
 0xa5a   : > { %10325 = vmatprep.subr.bf16.mxu0 %v23201_v4  ;;  %v23256_v4 = vld [vmem:[%s31293_s7 + $0xa0c] ss:$12 sps:$4 sm:$0xff]  }
 0xa5d   : > { %10326 = vmatpush1.bf16.msra.mxu0 %v23199_v21  ;;  %v23254_v21 = vld [vmem:[%s31293_s7 + $0xa08] ss:$12 sps:$4 sm:$0xff]  }
 0xa5e   : > { %10327 = vmatprep.subr.bf16.mxu0 %v23204_v12  ;;  %v23259_v12 = vld [vmem:[%s31293_s7 + $0xa24] ss:$12 sps:$4 sm:$0xff]  }
 0xa61   : > { %10328 = vmatpush1.bf16.msra.mxu0 %v23202_v43  ;;  %v23257_v43 = vld [vmem:[%s31293_s7 + $0xa20] ss:$12 sps:$4 sm:$0xff]  }
 0xa62   : > { %21313 = vmatprep.subr.bf16.mxu0 %v23205_v38  ;;  %v23262_v38 = vld [vmem:[%s31293_s7 + $0xa3c] ss:$12 sps:$4 sm:$0xff]  }
 0xa64   : > { %10330 = vmatmul.mubr.bf16.vlgmr.msra.gmra.mrb[44].mxu0 %v27661_v62 }
 0xa65   : > { %21314 = vmatpush3.bf16.msra.mxu0 %v23206_v27  ;;  %10372 = vmatprep.mubr.bf16.mxu0 %v27657_v6  ;;  %v23212_v6 = vld [vmem:[%s31293_s7 + $0x7d0] ss:$12 sps:$4 sm:$0xff]   ;;  %v23260_v27 = vld [vmem:[%s31293_s7 + $0xa38] ss:$12 sps:$4 sm:$0xff]  }
 0xa66   : > { %21315 = vmatprep.subr.bf16.mxu0 %v23207_v19  ;;  %v23265_v19 = vld [vmem:[%s31293_s7 + $0xa54] ss:$12 sps:$4 sm:$0xff]  }
 0xa69   : > { %21316 = vmatpush3.bf16.msra.mxu0 %v23208_v45  ;;  %v23263_v45 = vld [vmem:[%s31293_s7 + $0xa50] ss:$12 sps:$4 sm:$0xff]  }
 0xa6a   : > { %21317 = vmatprep.subr.bf16.mxu0 %v23209_v49  ;;  %v23268_v49 = vld [vmem:[%s31293_s7 + $0xa6c] ss:$12 sps:$4 sm:$0xff]  }
 0xa6d   : > { %21318 = vmatpush3.bf16.msra.mxu0 %v23210_v24  ;;  %v23266_v24 = vld [vmem:[%s31293_s7 + $0xa68] ss:$12 sps:$4 sm:$0xff]  }
 0xa6e   : > { %21319 = vmatprep.subr.bf16.mxu0 %v23211_v63  ;;  %v23269_v63 = vld [vmem:[%s31293_s7 + $0x9c8] ss:$12 sps:$4 sm:$0xff]  }
 0xa71   : > { %21320 = vmatpush3.bf16.msra.mxu0 %v23212_v6  ;;  %v10453_v6 = vrot.slane %v27623_v20, 5 }
 0xa72   : > { %21321 = vmatprep.subr.bf16.mxu0 %v23213_v3  ;;  %v10452_v3 = vrot.slane %v27603_v56, 5 }
 0xa75   : > { %21322 = vmatpush3.bf16.msra.mxu0 %v23214_v34  ;;  %v23270_v34 = vld [vmem:[%s31293_s7 + $0x908] ss:$12 sps:$4 sm:$0xff]  }
 0xa76   : > { %21323 = vmatprep.subr.bf16.mxu0 %v23215_v18  ;;  %v23271_v18 = vld [vmem:[%s31293_s7 + $0x9e0] ss:$12 sps:$4 sm:$0xff]  }
 0xa79   : > { %21324 = vmatpush3.bf16.msra.mxu0 %v23216_v0  ;;  %v10454_v0 = vsel %vm5132_vm15, %v10452_v3, %v10453_v6  ;;  %v23324_v6 = vld [vmem:[%s31293_s7 + $0xbb8] ss:$12 sps:$4 sm:$0xff]   ;;  %v23329_v3 = vld [vmem:[%s31293_s7 + $0xbd4] ss:$12 sps:$4 sm:$0xff]  }
 0xa7a   : > { %21325 = vmatprep.subr.bf16.mxu0 %v23217_v41  ;;  %v23272_v41 = vld [vmem:[%s31293_s7 + $0x920] ss:$12 sps:$4 sm:$0xff]  }
 0xa7d   : > { %21326 = vmatpush3.bf16.msra.mxu0 %v23218_v10  ;;  %v23273_v10 = vld [vmem:[%s31293_s7 + $0x9f8] ss:$12 sps:$4 sm:$0xff]  }
 0xa7e   : > { %21327 = vmatprep.subr.bf16.mxu0 %v23219_v60  ;;  %v23274_v60 = vld [vmem:[%s31293_s7 + $0x938] ss:$12 sps:$4 sm:$0xff]  }
 0xa81   : > { %21328 = vmatpush3.bf16.msra.mxu0 %v23220_v25  ;;  %v23275_v25 = vld [vmem:[%s31293_s7 + $0xa10] ss:$12 sps:$4 sm:$0xff]  }
 0xa82   : > { %10716 = vmatprep.subr.bf16.mxu0 %v23223_v48  ;;  %v23276_v48 = vld [vmem:[%s31293_s7 + $0x950] ss:$12 sps:$4 sm:$0xff]  }
 0xa84   : > { %10373 = vmatmul.mubr.bf16.vlgmr.msra.gmra.mrb[64].mxu0 %v27661_v62  ;;  %v23227_v62 = vld [vmem:[%s31293_s7 + $0x930] ss:$12 sps:$4 sm:$0xff]  }
 0xa85   : > { %10717 = vmatpush1.bf16.msra.mxu0 %v23221_v2  ;;  %10748 = vmatprep.mubr.bf16.mxu0 %v28423_v7  ;;  %v23278_v2 = vld [vmem:[%s31293_s7 + $0x968] ss:$12 sps:$4 sm:$0xff]  }
 0xa86   : > { %10718 = vmatprep.subr.bf16.mxu0 %v23226_v28  ;;  %v23280_v28 = vld [vmem:[%s31293_s7 + $0x980] ss:$12 sps:$4 sm:$0xff]  }
 0xa89   : > { %10719 = vmatpush1.bf16.msra.mxu0 %v23224_v61  ;;  %v23282_v61 = vld [vmem:[%s31293_s7 + $0x998] ss:$12 sps:$4 sm:$0xff]  }
 0xa8a   : > { %10720 = vmatprep.subr.bf16.mxu0 %v23229_v36  ;;  %v23283_v36 = vld [vmem:[%s31293_s7 + $0xa70] ss:$12 sps:$4 sm:$0xff]  }
 0xa8d   : > { %10721 = vmatpush1.bf16.msra.mxu0 %v23227_v62  ;;  %v23284_v62 = vld [vmem:[%s31293_s7 + $0x9b0] ss:$12 sps:$4 sm:$0xff]  }
 0xa8e   : > { %10722 = vmatprep.subr.bf16.mxu0 %v23232_v5  ;;  %v23287_v5 = vld [vmem:[%s31293_s7 + $0xa84] ss:$12 sps:$4 sm:$0xff]  }
 0xa91   : > { %10723 = vmatpush1.bf16.msra.mxu0 %v23230_v58  ;;  %v23285_v58 = vld [vmem:[%s31293_s7 + $0xa80] ss:$12 sps:$4 sm:$0xff]  }
 0xa92   : > { %10724 = vmatprep.subr.bf16.mxu0 %v23235_v59  ;;  %v23290_v59 = vld [vmem:[%s31293_s7 + $0xa9c] ss:$12 sps:$4 sm:$0xff]  }
 0xa95   : > { %10725 = vmatpush1.bf16.msra.mxu0 %v23233_v42  ;;  %v23288_v42 = vld [vmem:[%s31293_s7 + $0xa98] ss:$12 sps:$4 sm:$0xff]  }
 0xa96   : > { %10726 = vmatprep.subr.bf16.mxu0 %v23238_v9  ;;  %v23293_v9 = vld [vmem:[%s31293_s7 + $0xab4] ss:$12 sps:$4 sm:$0xff]  }
 0xa97   : > { %v21285_v33 = vpop.f32.mrb[56].mxu0 }
 0xa98   : > { %v21286_v50 = vpop.f32.mrb[57].mxu0 }
 0xa99   : > { %v21287_v31 = vadd.f32 %v21286_v50, %v21285_v33  ;;  %v21288_v57 = vpop.f32.mrb[58].mxu0  ;;  %10727 = vmatpush1.bf16.msra.mxu0 %v23236_v17  ;;  %v23291_v17 = vld [vmem:[%s31293_s7 + $0xab0] ss:$12 sps:$4 sm:$0xff]   ;;  %v23294_v33 = vld [vmem:[%s31293_s7 + $0xac8] ss:$12 sps:$4 sm:$0xff]  }
 0xa9a   : > { %v21289_v55 = vpop.f32.mrb[59].mxu0  ;;  %10728 = vmatprep.subr.bf16.mxu0 %v23241_v1  ;;  %v23296_v1 = vld [vmem:[%s31293_s7 + $0xacc] ss:$12 sps:$4 sm:$0xff]   ;;  %v23299_v50 = vld [vmem:[%s31293_s7 + $0xae4] ss:$12 sps:$4 sm:$0xff]  }
 0xa9b   : > { %v28463_v13 = vadd.f32 %v21287_v31, %v28304_v53  ;;  %v21290_v16 = vadd.f32 %v21289_v55, %v21288_v57  ;;  %v23245_v53 = vld [vmem:[%s31293_s7 + $0x9c0] ss:$12 sps:$4 sm:$0xff]   ;;  %v23302_v57 = vld [vmem:[%s31293_s7 + $0xafc] ss:$12 sps:$4 sm:$0xff]  }
 0xa9c   : > { %v23297_v31 = vld [vmem:[%s31293_s7 + $0xae0] ss:$12 sps:$4 sm:$0xff]  }
 0xa9d   : > { %v28466_v39 = vadd.f32 %v21290_v16, %v28307_v40  ;;  %10729 = vmatpush1.bf16.msra.mxu0 %v23239_v52  ;;  %v23250_v40 = vld [vmem:[%s31293_s7 + $0x9dc] ss:$12 sps:$4 sm:$0xff]   ;;  %v23300_v52 = vld [vmem:[%s31293_s7 + $0xaf8] ss:$12 sps:$4 sm:$0xff]   ;;  %v23305_v55 = vld [vmem:[%s31293_s7 + $0xb14] ss:$12 sps:$4 sm:$0xff]  }
 0xa9e   : > { %10730 = vmatprep.subr.bf16.mxu0 %v23244_v8 }
 0xaa1   : > { %10731 = vmatpush1.bf16.msra.mxu0 %v23242_v51 }
 0xaa2   : > { %10732 = vmatprep.subr.bf16.mxu0 %v23247_v23 }
 0xaa5   : > { %10733 = vmatpush1.bf16.msra.mxu0 %v23245_v53  ;;  %v23303_v53 = vld [vmem:[%s31293_s7 + $0xb10] ss:$12 sps:$4 sm:$0xff]  }
 0xaa6   : > { %10734 = vmatprep.subr.bf16.mxu0 %v23250_v40 }
 0xaa9   : > { %10735 = vmatpush1.bf16.msra.mxu0 %v23248_v47  ;;  %v23308_v47 = vld [vmem:[%s31293_s7 + $0xb2c] ss:$12 sps:$4 sm:$0xff]  }
 0xaaa   : > { %10736 = vmatprep.subr.bf16.mxu0 %v23253_v29 }
 0xaad   : > { %10737 = vmatpush1.bf16.msra.mxu0 %v23251_v32 }
 0xaae   : > { %10738 = vmatprep.subr.bf16.mxu0 %v23256_v4 }
 0xab1   : > { %10739 = vmatpush1.bf16.msra.mxu0 %v23254_v21  ;;  %v23306_v21 = vld [vmem:[%s31293_s7 + $0xb28] ss:$12 sps:$4 sm:$0xff]  }
 0xab2   : > { %10740 = vmatprep.subr.bf16.mxu0 %v23259_v12  ;;  %v23311_v12 = vld [vmem:[%s31293_s7 + $0xb44] ss:$12 sps:$4 sm:$0xff]  }
 0xab5   : > { %10741 = vmatpush1.bf16.msra.mxu0 %v23257_v43  ;;  %v23312_v43 = vld [vmem:[%s31293_s7 + $0xb58] ss:$12 sps:$4 sm:$0xff]  }
 0xab6   : > { %10742 = vmatprep.subr.bf16.mxu0 %v23262_v38  ;;  %v23317_v38 = vld [vmem:[%s31293_s7 + $0xb74] ss:$12 sps:$4 sm:$0xff]  }
 0xab9   : > { %10743 = vmatpush1.bf16.msra.mxu0 %v23260_v27  ;;  %v23315_v27 = vld [vmem:[%s31293_s7 + $0xb70] ss:$12 sps:$4 sm:$0xff]  }
 0xaba   : > { %10744 = vmatprep.subr.bf16.mxu0 %v23265_v19  ;;  %v23320_v19 = vld [vmem:[%s31293_s7 + $0xb8c] ss:$12 sps:$4 sm:$0xff]  }
 0xabd   : > { %10745 = vmatpush1.bf16.msra.mxu0 %v23263_v45  ;;  %v23318_v45 = vld [vmem:[%s31293_s7 + $0xb88] ss:$12 sps:$4 sm:$0xff]  }
 0xabe   : > { %10746 = vmatprep.subr.bf16.mxu0 %v23268_v49  ;;  %v23323_v49 = vld [vmem:[%s31293_s7 + $0xba4] ss:$12 sps:$4 sm:$0xff]  }
 0xac1   : > { %10747 = vmatpush1.bf16.msra.mxu0 %v23266_v24  ;;  %v23321_v24 = vld [vmem:[%s31293_s7 + $0xba0] ss:$12 sps:$4 sm:$0xff]  }
 0xac2   : > { %21335 = vmatprep.subr.bf16.mxu0 %v23269_v63  ;;  %v23326_v63 = vld [vmem:[%s31293_s7 + $0xbbc] ss:$12 sps:$4 sm:$0xff]  }
 0xac4   : > { %10749 = vmatmul.mubr.bf16.vlgmr.msra.gmra.mrb[44].mxu0 %v10454_v0 }
 0xac5   : > { %21336 = vmatpush3.bf16.msra.mxu0 %v23270_v34  ;;  %10791 = vmatprep.mubr.bf16.mxu0 %v28423_v7  ;;  %v23281_v7 = vld [vmem:[%s31293_s7 + $0xa58] ss:$12 sps:$4 sm:$0xff]   ;;  %v23327_v34 = vld [vmem:[%s31293_s7 + $0xbd0] ss:$12 sps:$4 sm:$0xff]  }
 0xac6   : > { %21337 = vmatprep.subr.bf16.mxu0 %v23271_v18  ;;  %v23332_v18 = vld [vmem:[%s31293_s7 + $0xbec] ss:$12 sps:$4 sm:$0xff]  }
 0xac9   : > { %21338 = vmatpush3.bf16.msra.mxu0 %v23272_v41  ;;  %v23333_v41 = vld [vmem:[%s31293_s7 + $0xb48] ss:$12 sps:$4 sm:$0xff]  }
 0xaca   : > { %21339 = vmatprep.subr.bf16.mxu0 %v23273_v10  ;;  %v23334_v10 = vld [vmem:[%s31293_s7 + $0xa88] ss:$12 sps:$4 sm:$0xff]  }
 0xacd   : > { %21340 = vmatpush3.bf16.msra.mxu0 %v23274_v60  ;;  %v23335_v60 = vld [vmem:[%s31293_s7 + $0xb60] ss:$12 sps:$4 sm:$0xff]  }
 0xace   : > { %21341 = vmatprep.subr.bf16.mxu0 %v23275_v25  ;;  %v23336_v25 = vld [vmem:[%s31293_s7 + $0xaa0] ss:$12 sps:$4 sm:$0xff]  }
 0xad1   : > { %21342 = vmatpush3.bf16.msra.mxu0 %v23276_v48  ;;  %v23337_v48 = vld [vmem:[%s31293_s7 + $0xb78] ss:$12 sps:$4 sm:$0xff]  }
 0xad2   : > { %21343 = vmatprep.subr.bf16.mxu0 %v23277_v26  ;;  %v23338_v26 = vld [vmem:[%s31293_s7 + $0xab8] ss:$12 sps:$4 sm:$0xff]  }
 0xad5   : > { %21344 = vmatpush3.bf16.msra.mxu0 %v23278_v2  ;;  %v23339_v2 = vld [vmem:[%s31293_s7 + $0xb90] ss:$12 sps:$4 sm:$0xff]  }
 0xad6   : > { %21345 = vmatprep.subr.bf16.mxu0 %v23279_v35  ;;  %v23341_v35 = vld [vmem:[%s31293_s7 + $0xba8] ss:$12 sps:$4 sm:$0xff]  }
 0xad9   : > { %21346 = vmatpush3.bf16.msra.mxu0 %v23280_v28  ;;  %v23342_v28 = vld [vmem:[%s31293_s7 + $0xae8] ss:$12 sps:$4 sm:$0xff]  }
 0xada   : > { %21347 = vmatprep.subr.bf16.mxu0 %v23281_v7  ;;  %v23343_v7 = vld [vmem:[%s31293_s7 + $0xbc0] ss:$12 sps:$4 sm:$0xff]  }
 0xadd   : > { %21348 = vmatpush3.bf16.msra.mxu0 %v23282_v61  ;;  %v23344_v61 = vld [vmem:[%s31293_s7 + $0xb00] ss:$12 sps:$4 sm:$0xff]  }
 0xade   : > { %21349 = vmatprep.subr.bf16.mxu0 %v23283_v36  ;;  %v23345_v36 = vld [vmem:[%s31293_s7 + $0xbd8] ss:$12 sps:$4 sm:$0xff]  }
 0xae1   : > { %21350 = vmatpush3.bf16.msra.mxu0 %v23284_v62  ;;  %v23346_v62 = vld [vmem:[%s31293_s7 + $0xb18] ss:$12 sps:$4 sm:$0xff]  }
 0xae2   : > { %11143 = vmatprep.subr.bf16.mxu0 %v23287_v5  ;;  %v23347_v5 = vld [vmem:[%s31293_s7 + $0xbf0] ss:$12 sps:$4 sm:$0xff]  }
 0xae4   : > { %10792 = vmatmul.mubr.bf16.vlgmr.msra.gmra.mrb[68].mxu0 %v10454_v0  ;;  %v23330_v0 = vld [vmem:[%s31293_s7 + $0xbe8] ss:$12 sps:$4 sm:$0xff]  }
 0xae5   : > { %11144 = vmatpush1.bf16.msra.mxu0 %v23285_v58  ;;  %11175 = vmatprep.mubr.bf16.mxu0 %v27670_v11  ;;  %v23348_v58 = vld [vmem:[%s31293_s7 + $0xb30] ss:$12 sps:$4 sm:$0xff]  }
 0xae6   : > { %11145 = vmatprep.subr.bf16.mxu0 %v23290_v59  ;;  %v23351_v59 = vld [vmem:[%s31293_s7 + $0xc04] ss:$12 sps:$4 sm:$0xff]  }
 0xae9   : > { %11146 = vmatpush1.bf16.msra.mxu0 %v23288_v42  ;;  %v11302_v42 = vrot.slane %v27629_v37, 6  ;;  %v23352_v37 = vld [vmem:[%s31293_s7 + $0xc18] ss:$12 sps:$4 sm:$0xff]  }
 0xaea   : > { %11147 = vmatprep.subr.bf16.mxu0 %v23293_v9  ;;  %v23349_v9 = vld [vmem:[%s31293_s7 + $0xc00] ss:$12 sps:$4 sm:$0xff]  }
 0xaed   : > { %11148 = vmatpush1.bf16.msra.mxu0 %v23291_v17  ;;  %v11301_v17 = vrot.slane %v27605_v30, 6  ;;  %v23357_v30 = vld [vmem:[%s31293_s7 + $0xc34] ss:$12 sps:$4 sm:$0xff]  }
 0xaee   : > { %11149 = vmatprep.subr.bf16.mxu0 %v23296_v1  ;;  %v23354_v1 = vld [vmem:[%s31293_s7 + $0xc1c] ss:$12 sps:$4 sm:$0xff]  }
 0xaf1   : > { %11150 = vmatpush1.bf16.msra.mxu0 %v23294_v33  ;;  %v28737_v33 = vsel %vm1703_vm5, %v11301_v17, %v11302_v42  ;;  %v23411_v42 = vld [vmem:[%s31293_s7 + $0xd70] ss:$12 sps:$4 sm:$0xff]  }
 0xaf2   : > { %11151 = vmatprep.subr.bf16.mxu0 %v23299_v50  ;;  %v23360_v50 = vld [vmem:[%s31293_s7 + $0xc4c] ss:$12 sps:$4 sm:$0xff]  }
 0xaf5   : > { %11152 = vmatpush1.bf16.msra.mxu0 %v23297_v31  ;;  %v23358_v31 = vld [vmem:[%s31293_s7 + $0xc48] ss:$12 sps:$4 sm:$0xff]  }
 0xaf6   : > { %11153 = vmatprep.subr.bf16.mxu0 %v23302_v57  ;;  %v23363_v57 = vld [vmem:[%s31293_s7 + $0xc64] ss:$12 sps:$4 sm:$0xff]  }
 0xaf7   : > { %v21307_v8 = vpop.f32.mrb[60].mxu0 }
 0xaf8   : > { %v21308_v16 = vpop.f32.mrb[61].mxu0 }
 0xaf9   : > { %v21309_v51 = vadd.f32 %v21308_v16, %v21307_v8  ;;  %v21310_v23 = vpop.f32.mrb[62].mxu0  ;;  %11154 = vmatpush1.bf16.msra.mxu0 %v23300_v52  ;;  %v23361_v52 = vld [vmem:[%s31293_s7 + $0xc60] ss:$12 sps:$4 sm:$0xff]   ;;  %v23364_v8 = vld [vmem:[%s31293_s7 + $0xc78] ss:$12 sps:$4 sm:$0xff]  }
 0xafa   : > { %v21311_v40 = vpop.f32.mrb[63].mxu0  ;;  %11155 = vmatprep.subr.bf16.mxu0 %v23305_v55  ;;  %v23366_v55 = vld [vmem:[%s31293_s7 + $0xc7c] ss:$12 sps:$4 sm:$0xff]   ;;  %v23369_v16 = vld [vmem:[%s31293_s7 + $0xc94] ss:$12 sps:$4 sm:$0xff]  }
 0xafb   : > { %v28618_v29 = vadd.f32 %v21309_v51, %v28463_v13  ;;  %v21312_v32 = vadd.f32 %v21311_v40, %v21310_v23  ;;  %v23309_v13 = vld [vmem:[%s31293_s7 + $0xb40] ss:$12 sps:$4 sm:$0xff]  }
 0xafd   : > { %v28621_v4 = vadd.f32 %v21312_v32, %v28466_v39  ;;  %11156 = vmatpush1.bf16.msra.mxu0 %v23303_v53  ;;  %v23314_v39 = vld [vmem:[%s31293_s7 + $0xb5c] ss:$12 sps:$4 sm:$0xff]  }
 0xafe   : > { %11157 = vmatprep.subr.bf16.mxu0 %v23308_v47  ;;  %v23367_v47 = vld [vmem:[%s31293_s7 + $0xc90] ss:$12 sps:$4 sm:$0xff]  }
 0xb01   : > { %11158 = vmatpush1.bf16.msra.mxu0 %v23306_v21  ;;  %v23372_v21 = vld [vmem:[%s31293_s7 + $0xcac] ss:$12 sps:$4 sm:$0xff]  }
 0xb02   : > { %11159 = vmatprep.subr.bf16.mxu0 %v23311_v12 }
 0xb05   : > { %11160 = vmatpush1.bf16.msra.mxu0 %v23309_v13 }
 0xb06   : > { %11161 = vmatprep.subr.bf16.mxu0 %v23314_v39 }
 0xb09   : > { %11162 = vmatpush1.bf16.msra.mxu0 %v23312_v43  ;;  %v23370_v43 = vld [vmem:[%s31293_s7 + $0xca8] ss:$12 sps:$4 sm:$0xff]  }
 0xb0a   : > { %11163 = vmatprep.subr.bf16.mxu0 %v23317_v38  ;;  %v23375_v38 = vld [vmem:[%s31293_s7 + $0xcc4] ss:$12 sps:$4 sm:$0xff]  }
 0xb0d   : > { %11164 = vmatpush1.bf16.msra.mxu0 %v23315_v27  ;;  %v23376_v27 = vld [vmem:[%s31293_s7 + $0xcd8] ss:$12 sps:$4 sm:$0xff]  }
 0xb0e   : > { %11165 = vmatprep.subr.bf16.mxu0 %v23320_v19  ;;  %v23381_v19 = vld [vmem:[%s31293_s7 + $0xcf4] ss:$12 sps:$4 sm:$0xff]  }
 0xb11   : > { %11166 = vmatpush1.bf16.msra.mxu0 %v23318_v45  ;;  %v23379_v45 = vld [vmem:[%s31293_s7 + $0xcf0] ss:$12 sps:$4 sm:$0xff]  }
 0xb12   : > { %11167 = vmatprep.subr.bf16.mxu0 %v23323_v49  ;;  %v23384_v49 = vld [vmem:[%s31293_s7 + $0xd0c] ss:$12 sps:$4 sm:$0xff]  }
 0xb15   : > { %11168 = vmatpush1.bf16.msra.mxu0 %v23321_v24  ;;  %v23382_v24 = vld [vmem:[%s31293_s7 + $0xd08] ss:$12 sps:$4 sm:$0xff]  }
 0xb16   : > { %11169 = vmatprep.subr.bf16.mxu0 %v23326_v63  ;;  %v23387_v63 = vld [vmem:[%s31293_s7 + $0xd24] ss:$12 sps:$4 sm:$0xff]  }
 0xb19   : > { %11170 = vmatpush1.bf16.msra.mxu0 %v23324_v6  ;;  %v23385_v6 = vld [vmem:[%s31293_s7 + $0xd20] ss:$12 sps:$4 sm:$0xff]  }
 0xb1a   : > { %11171 = vmatprep.subr.bf16.mxu0 %v23329_v3  ;;  %v23390_v3 = vld [vmem:[%s31293_s7 + $0xd3c] ss:$12 sps:$4 sm:$0xff]  }
 0xb1d   : > { %11172 = vmatpush1.bf16.msra.mxu0 %v23327_v34  ;;  %v23388_v34 = vld [vmem:[%s31293_s7 + $0xd38] ss:$12 sps:$4 sm:$0xff]  }
 0xb1e   : > { %11173 = vmatprep.subr.bf16.mxu0 %v23332_v18  ;;  %v23393_v18 = vld [vmem:[%s31293_s7 + $0xd54] ss:$12 sps:$4 sm:$0xff]  }
 0xb21   : > { %11174 = vmatpush1.bf16.msra.mxu0 %v23330_v0  ;;  %v23391_v0 = vld [vmem:[%s31293_s7 + $0xd50] ss:$12 sps:$4 sm:$0xff]  }
 0xb22   : > { %21357 = vmatprep.subr.bf16.mxu0 %v23333_v41  ;;  %v23396_v41 = vld [vmem:[%s31293_s7 + $0xd6c] ss:$12 sps:$4 sm:$0xff]  }
 0xb24   : > { %11176 = vmatmul.mubr.bf16.vlgmr.msra.gmra.mrb[44].mxu0 %v27673_v15 }
 0xb25   : > { %21358 = vmatpush3.bf16.msra.mxu0 %v23334_v10  ;;  %11218 = vmatprep.mubr.bf16.mxu0 %v27670_v11  ;;  %v23340_v11 = vld [vmem:[%s31293_s7 + $0xad0] ss:$12 sps:$4 sm:$0xff]   ;;  %v23394_v10 = vld [vmem:[%s31293_s7 + $0xd68] ss:$12 sps:$4 sm:$0xff]  }
 0xb26   : > { %21359 = vmatprep.subr.bf16.mxu0 %v23335_v60  ;;  %v23397_v60 = vld [vmem:[%s31293_s7 + $0xcc8] ss:$12 sps:$4 sm:$0xff]  }
 0xb29   : > { %21360 = vmatpush3.bf16.msra.mxu0 %v23336_v25  ;;  %v11299_v25 = vrot.slane %v27623_v20, 6  ;;  %v23400_v20 = vld [vmem:[%s31293_s7 + $0xc20] ss:$12 sps:$4 sm:$0xff]  }
 0xb2a   : > { %21361 = vmatprep.subr.bf16.mxu0 %v23337_v48  ;;  %v11298_v48 = vrot.slane %v27603_v56, 6  ;;  %v23401_v56 = vld [vmem:[%s31293_s7 + $0xcf8] ss:$12 sps:$4 sm:$0xff]  }
 0xb2d   : > { %21362 = vmatpush3.bf16.msra.mxu0 %v23338_v26  ;;  %v23398_v26 = vld [vmem:[%s31293_s7 + $0xc08] ss:$12 sps:$4 sm:$0xff]  }
 0xb2e   : > { %21363 = vmatprep.subr.bf16.mxu0 %v23339_v2  ;;  %v23399_v2 = vld [vmem:[%s31293_s7 + $0xce0] ss:$12 sps:$4 sm:$0xff]  }
 0xb31   : > { %21364 = vmatpush3.bf16.msra.mxu0 %v23340_v11  ;;  %v11300_v11 = vsel %vm1703_vm5, %v11298_v48, %v11299_v25 }
 0xb32   : > { %21365 = vmatprep.subr.bf16.mxu0 %v23341_v35  ;;  %v23402_v35 = vld [vmem:[%s31293_s7 + $0xc38] ss:$12 sps:$4 sm:$0xff]  }
 0xb35   : > { %21366 = vmatpush3.bf16.msra.mxu0 %v23342_v28  ;;  %v23403_v28 = vld [vmem:[%s31293_s7 + $0xd10] ss:$12 sps:$4 sm:$0xff]  }
 0xb36   : > { %21367 = vmatprep.subr.bf16.mxu0 %v23343_v7  ;;  %v23404_v7 = vld [vmem:[%s31293_s7 + $0xc50] ss:$12 sps:$4 sm:$0xff]  }
 0xb39   : > { %21368 = vmatpush3.bf16.msra.mxu0 %v23344_v61  ;;  %v23405_v61 = vld [vmem:[%s31293_s7 + $0xd28] ss:$12 sps:$4 sm:$0xff]  }
 0xb3a   : > { %21369 = vmatprep.subr.bf16.mxu0 %v23345_v36  ;;  %v23406_v36 = vld [vmem:[%s31293_s7 + $0xc68] ss:$12 sps:$4 sm:$0xff]  }
 0xb3d   : > { %21370 = vmatpush3.bf16.msra.mxu0 %v23346_v62  ;;  %v23407_v62 = vld [vmem:[%s31293_s7 + $0xd40] ss:$12 sps:$4 sm:$0xff]  }
 0xb3e   : > { %21371 = vmatprep.subr.bf16.mxu0 %v23347_v5  ;;  %v23408_v5 = vld [vmem:[%s31293_s7 + $0xc80] ss:$12 sps:$4 sm:$0xff]  }
 0xb41   : > { %21372 = vmatpush3.bf16.msra.mxu0 %v23348_v58  ;;  %v23409_v58 = vld [vmem:[%s31293_s7 + $0xd58] ss:$12 sps:$4 sm:$0xff]  }
 0xb42   : > { %11562 = vmatprep.subr.bf16.mxu0 %v23351_v59  ;;  %v23410_v59 = vld [vmem:[%s31293_s7 + $0xc98] ss:$12 sps:$4 sm:$0xff]  }
 0xb44   : > { %11219 = vmatmul.mubr.bf16.vlgmr.msra.gmra.mrb[72].mxu0 %v27673_v15  ;;  %v23355_v15 = vld [vmem:[%s31293_s7 + $0xc30] ss:$12 sps:$4 sm:$0xff]  }
 0xb45   : > { %11563 = vmatpush1.bf16.msra.mxu0 %v23349_v9  ;;  %11594 = vmatprep.mubr.bf16.mxu0 %v28737_v33  ;;  %v23412_v9 = vld [vmem:[%s31293_s7 + $0xcb0] ss:$12 sps:$4 sm:$0xff]  }
 0xb46   : > { %11564 = vmatprep.subr.bf16.mxu0 %v23354_v1 }
 0xb49   : > { %11565 = vmatpush1.bf16.msra.mxu0 %v23352_v37 }
 0xb4a   : > { %11566 = vmatprep.subr.bf16.mxu0 %v23357_v30 }
 0xb4d   : > { %11567 = vmatpush1.bf16.msra.mxu0 %v23355_v15 }
 0xb4e   : > { %11568 = vmatprep.subr.bf16.mxu0 %v23360_v50 }
 0xb51   : > { %11569 = vmatpush1.bf16.msra.mxu0 %v23358_v31 }
 0xb52   : > { %11570 = vmatprep.subr.bf16.mxu0 %v23363_v57 }
 0xb55   : > { %11571 = vmatpush1.bf16.msra.mxu0 %v23361_v52 }
 0xb56   : > { %11572 = vmatprep.subr.bf16.mxu0 %v23366_v55 }
 0xb57   : > { %v21329_v51 = vpop.f32.mrb[64].mxu0 }
 0xb58   : > { %v21330_v23 = vpop.f32.mrb[65].mxu0 }
 0xb59   : > { %v21331_v53 = vadd.f32 %v21330_v23, %v21329_v51  ;;  %v21332_v40 = vpop.f32.mrb[66].mxu0  ;;  %11573 = vmatpush1.bf16.msra.mxu0 %v23364_v8 }
 0xb5a   : > { %v21333_v32 = vpop.f32.mrb[67].mxu0  ;;  %11574 = vmatprep.subr.bf16.mxu0 %v23369_v16 }
 0xb5b   : > { %v28777_v12 = vadd.f32 %v21331_v53, %v28618_v29  ;;  %v21334_v13 = vadd.f32 %v21333_v32, %v21332_v40  ;;  %v23373_v29 = vld [vmem:[%s31293_s7 + $0xcc0] ss:$12 sps:$4 sm:$0xff]  }
 0xb5c   : > { %v11652_v40 = vld [vmem:[%s31294_s8] sm:$0x7] }
 0xb5d   : > { %v28780_v39 = vadd.f32 %v21334_v13, %v28621_v4  ;;  %11575 = vmatpush1.bf16.msra.mxu0 %v23367_v47  ;;  %v23378_v4 = vld [vmem:[%s31293_s7 + $0xcdc] ss:$12 sps:$4 sm:$0xff]   ;;  %v11657_v47 = vrot.slane %v11652_v40, %v27219_v14  ;;  %v11661_v32 = vrot.slane %v11652_v40, %v27222_v22 }
 0xb5e   : > { %11576 = vmatprep.subr.bf16.mxu0 %v23372_v21 }
 0xb61   : > { %11577 = vmatpush1.bf16.msra.mxu0 %v23370_v43 }
 0xb62   : > { %11578 = vmatprep.subr.bf16.mxu0 %v23375_v38 }
 0xb65   : > { %11579 = vmatpush1.bf16.msra.mxu0 %v23373_v29 }
 0xb66   : > { %11580 = vmatprep.subr.bf16.mxu0 %v23378_v4  ;;  %v24521_v4 = vmov 65535  }
 0xb69   : > { %11581 = vmatpush1.bf16.msra.mxu0 %v23376_v27  ;;  %v11705_v27 = vsel %vm1462_vm2, 4294967295, %v24521_v4  ;;  %v23457_v4 = vld [vmem:[%s31296_s10 + $0x260] ss:$8 sps:$4 sm:$0xff]  }
 0xb6a   : > { %11582 = vmatprep.subr.bf16.mxu0 %v23381_v19 }
 0xb6d   : > { %11583 = vmatpush1.bf16.msra.mxu0 %v23379_v45 }
 0xb6e   : > { %11584 = vmatprep.subr.bf16.mxu0 %v23384_v49 }
 0xb71   : > { %11585 = vmatpush1.bf16.msra.mxu0 %v23382_v24 }
 0xb72   : > { %11586 = vmatprep.subr.bf16.mxu0 %v23387_v63 }
 0xb75   : > { %11587 = vmatpush1.bf16.msra.mxu0 %v23385_v6 }
 0xb76   : > { %11588 = vmatprep.subr.bf16.mxu0 %v23390_v3  ;;  %v28895_v3 = vsel %vm1349_vm1, %v11705_v27, 0  ;;  %v23460_v27 = vld [vmem:[%s31296_s10 + $0x270] ss:$8 sps:$4 sm:$0xff]  }
 0xb79   : > { %11589 = vmatpush1.bf16.msra.mxu0 %v23388_v34 }
 0xb7a   : > { %11590 = vmatprep.subr.bf16.mxu0 %v23393_v18 }
 0xb7d   : > { %11591 = vmatpush1.bf16.msra.mxu0 %v23391_v0 }
 0xb7e   : > { %11592 = vmatprep.subr.bf16.mxu0 %v23396_v41  ;;  %v23413_v41 = vld [vmem:[%s31295_s9] sm:$0xff]  }
 0xb81   : > { %11593 = vmatpush1.bf16.msra.mxu0 %v23394_v10  ;;  %v23414_v10 = vld [vmem:[%s31295_s9 + $0x8] sm:$0x1f]  }
 0xb82   : > { %21379 = vmatprep.subr.bf16.mxu0 %v23397_v60  ;;  %v11664_v60 = vsub.s32 2, %v27207_v46 }
 0xb84   : > { %11595 = vmatmul.mubr.bf16.vlgmr.msra.gmra.mrb[44].mxu0 %v11300_v11 }
 0xb85   : > { %21380 = vmatpush3.bf16.msra.mxu0 %v23398_v26  ;;  %11637 = vmatprep.mubr.bf16.mxu0 %v28737_v33 }
 0xb86   : > { %21381 = vmatprep.subr.bf16.mxu0 %v23399_v2  ;;  %v11665_v2 = vrot.slane %v11652_v40, %v11664_v60  ;;  %v23442_v40 = vld [vmem:[%s31296_s10 + $0x210] ss:$8 sps:$4 sm:$0xff]  }
 0xb89   : > { %21382 = vmatpush3.bf16.msra.mxu0 %v23400_v20 }
 0xb8a   : > { %21383 = vmatprep.subr.bf16.mxu0 %v23401_v56 }
 0xb8d   : > { %21384 = vmatpush3.bf16.msra.mxu0 %v23402_v35 }
 0xb8e   : > { %21385 = vmatprep.subr.bf16.mxu0 %v23403_v28 }
 0xb91   : > { %21386 = vmatpush3.bf16.msra.mxu0 %v23404_v7 }
 0xb92   : > { %21387 = vmatprep.subr.bf16.mxu0 %v23405_v61 }
 0xb95   : > { %21388 = vmatpush3.bf16.msra.mxu0 %v23406_v36 }
 0xb96   : > { %21389 = vmatprep.subr.bf16.mxu0 %v23407_v62 }
 0xb99   : > { %21390 = vmatpush3.bf16.msra.mxu0 %v23408_v5 }
 0xb9a   : > { %21391 = vmatprep.subr.bf16.mxu0 %v23409_v58 }
 0xb9d   : > { %21392 = vmatpush3.bf16.msra.mxu0 %v23410_v59  ;;  %v23417_v59 = vld [vmem:[%s31296_s10 + $0x184] ss:$8 sps:$4 sm:$0xff]  }
 0xb9e   : > { %21393 = vmatprep.subr.bf16.mxu0 %v23411_v42  ;;  %v23415_v42 = vld [vmem:[%s31296_s10 + $0x180] ss:$8 sps:$4 sm:$0xff]  }
 0xba1   : > { %21394 = vmatpush3.bf16.msra.mxu0 %v23412_v9  ;;  %v23420_v9 = vld [vmem:[%s31296_s10 + $0x194] ss:$8 sps:$4 sm:$0xff]  }
 0xba4   : > { %11638 = vmatmul.mubr.bf16.vlgmr.msra.gmra.mrb[76].mxu0 %v11300_v11 }
 0xba5   : > { %11748 = vmatprep.mubr.bf16.mxu0 %v31325_v54 }
 0xbb7   : > { %v21351_v17 = vpop.f32.mrb[68].mxu0 }
 0xbb8   : > { %v21352_v1 = vpop.f32.mrb[69].mxu0 }
 0xbb9   : > { %v21353_v33 = vadd.f32 %v21352_v1, %v21351_v17  ;;  %v21354_v37 = vpop.f32.mrb[70].mxu0  ;;  %v23418_v17 = vld [vmem:[%s31296_s10 + $0x190] ss:$8 sps:$4 sm:$0xff]   ;;  %v23423_v1 = vld [vmem:[%s31296_s10 + $0x1a4] ss:$8 sps:$4 sm:$0xff]  }
 0xbba   : > { %v21355_v30 = vpop.f32.mrb[71].mxu0 }
 0xbbb   : > { %v10802_v15 = vadd.f32 %v21353_v33, %v28777_v12  ;;  %v21356_v50 = vadd.f32 %v21355_v30, %v21354_v37  ;;  %v23421_v33 = vld [vmem:[%s31296_s10 + $0x1a0] ss:$8 sps:$4 sm:$0xff]   ;;  %v23426_v37 = vld [vmem:[%s31296_s10 + $0x1b4] ss:$8 sps:$4 sm:$0xff]   ;;  %v23424_v30 = vld [vmem:[%s31296_s10 + $0x1b0] ss:$8 sps:$4 sm:$0xff]  }
 0xbbd   : > { %v10805_v31 = vadd.f32 %v21356_v50, %v28780_v39  ;;  %v23427_v50 = vld [vmem:[%s31296_s10 + $0x1c0] ss:$8 sps:$4 sm:$0xff]  }
 0xc17   : > { %v21373_v57 = vpop.f32.mrb[72].mxu0 }
 0xc18   : > { %v21374_v52 = vpop.f32.mrb[73].mxu0 }
 0xc19   : > { %v21375_v55 = vadd.f32 %v21374_v52, %v21373_v57  ;;  %v21376_v8 = vpop.f32.mrb[74].mxu0  ;;  %v23430_v57 = vld [vmem:[%s31296_s10 + $0x1d0] ss:$8 sps:$4 sm:$0xff]   ;;  %v23435_v52 = vld [vmem:[%s31296_s10 + $0x1e4] ss:$8 sps:$4 sm:$0xff]  }
 0xc1a   : > { %v21377_v16 = vpop.f32.mrb[75].mxu0 }
 0xc1b   : > { %v11229_v51 = vadd.f32 %v21375_v55, %v10802_v15  ;;  %v21378_v23 = vadd.f32 %v21377_v16, %v21376_v8  ;;  %v23429_v15 = vld [vmem:[%s31296_s10 + $0x1c4] ss:$8 sps:$4 sm:$0xff]   ;;  %v23433_v55 = vld [vmem:[%s31296_s10 + $0x1e0] ss:$8 sps:$4 sm:$0xff]   ;;  %v23438_v8 = vld [vmem:[%s31296_s10 + $0x1f4] ss:$8 sps:$4 sm:$0xff]  }
 0xc1c   : > { %v23436_v16 = vld [vmem:[%s31296_s10 + $0x1f0] ss:$8 sps:$4 sm:$0xff]  }
 0xc1d   : > { %v11232_v53 = vadd.f32 %v21378_v23, %v10805_v31  ;;  %v23432_v31 = vld [vmem:[%s31296_s10 + $0x1d4] ss:$8 sps:$4 sm:$0xff]   ;;  %v23439_v23 = vld [vmem:[%s31296_s10 + $0x200] ss:$8 sps:$4 sm:$0xff]  }
 0xc57   : > { %v11596_v21 = vpop.f32.mrb[44].mxu0 }
 0xc58   : > { %v11669_v12 = vadd.f32 %v11657_v47, %v11596_v21  ;;  %v11598_v13 = vpop.f32.mrb[45].mxu0  ;;  %v23450_v21 = vld [vmem:[%s31296_s10 + $0x234] ss:$8 sps:$4 sm:$0xff]  }
 0xc59   : > { %v11670_v39 = vadd.f32 %v11661_v32, %v11598_v13  ;;  %v11600_v43 = vpop.f32.mrb[46].mxu0  ;;  %v23453_v13 = vld [vmem:[%s31296_s10 + $0x244] ss:$8 sps:$4 sm:$0xff]  }
 0xc5a   : > { %v11672_v38 = vadd.f32 %v11657_v47, %v11600_v43  ;;  %v11602_v29 = vpop.f32.mrb[47].mxu0  ;;  %v11675_v45 = vmax.f32 %v11669_v12, 0.0  ;;  %v23447_v47 = vld [vmem:[%s31296_s10 + $0x224] ss:$8 sps:$4 sm:$0xff]   ;;  %v23448_v12 = vld [vmem:[%s31296_s10 + $0x230] ss:$8 sps:$4 sm:$0xff]  }
 0xc5b   : > { %v11673_v19 = vadd.f32 %v11661_v32, %v11602_v29  ;;  %v11676_v24 = vmax.f32 %v11670_v39, 0.0  ;;  %v23445_v32 = vld [vmem:[%s31296_s10 + $0x220] ss:$8 sps:$4 sm:$0xff]   ;;  %v23456_v43 = vld [vmem:[%s31296_s10 + $0x254] ss:$8 sps:$4 sm:$0xff]  }
 0xc5c   : > { %v11678_v49 = vmax.f32 %v11672_v38, 0.0  ;;  %v23451_v39 = vld [vmem:[%s31296_s10 + $0x240] ss:$8 sps:$4 sm:$0xff]   ;;  %v23454_v38 = vld [vmem:[%s31296_s10 + $0x250] ss:$8 sps:$4 sm:$0xff]  }
 0xc5d   : > { %v11679_v63 = vmax.f32 %v11673_v19, 0.0  ;;  %v23459_v29 = vld [vmem:[%s31296_s10 + $0x264] ss:$8 sps:$4 sm:$0xff]   ;;  %v23462_v19 = vld [vmem:[%s31296_s10 + $0x274] ss:$8 sps:$4 sm:$0xff]  }
 0xc5e   : > { %v11685_v6 = vpack.c.bf16 %v11678_v49, %v11675_v45  ;;  %v23465_v45 = vld [vmem:[%s31296_s10 + $0x284] ss:$8 sps:$4 sm:$0xff]  }
 0xc5f   : > { %v11686_v34 = vpack.c.bf16 %v11679_v63, %v11676_v24 }
 0xc60   : > { %v11708_v0 = vand.u32 %v28895_v3, %v11685_v6 }
 0xc61   : > { %v11711_v18 = vand.u32 %v28895_v3, %v11686_v34 }
 0xc63   : > { %11716 = vmatprep.subr.bf16.mxu0 %v11711_v18 }
 0xc64   : > { %11717 = vmatpush1.bf16.msra.mxu0 %v11708_v0 }
 0xc67   : > { %19706 = vmatmul.mubr.msk.bf16.vlgmr.msra.gmra.mrb[80].mxu0 %vm11698_vm4, %v23413_v41 }
 0xc68   : > { %11758 = vmatprep.mubr.bf16.mxu0 %v31325_v54 }
 0xc6f   : > { %19707 = vmatmul.mubr.msk.bf16.gmra.mrb[84].mxu0 %vm11698_vm4, %v23414_v10 }
 0xc70   : > { %21482 = vmatprep.mubr.msk.bf16.mxu0 %vm11698_vm4, %v23413_v41 }
 0xc77   : > { %v21395_v25 = vpop.f32.mrb[76].mxu0 }
 0xc78   : > { %v21396_v48 = vpop.f32.mrb[77].mxu0 }
 0xc79   : > { %v21397_v26 = vadd.f32 %v21396_v48, %v21395_v25  ;;  %v21398_v11 = vpop.f32.mrb[78].mxu0 }
 0xc7a   : > { %v21399_v20 = vpop.f32.mrb[79].mxu0 }
 0xc7b   : > { %v11648_v56 = vadd.f32 %v21397_v26, %v11229_v51  ;;  %v21400_v35 = vadd.f32 %v21399_v20, %v21398_v11  ;;  %v23441_v51 = vld [vmem:[%s31296_s10 + $0x204] ss:$8 sps:$4 sm:$0xff]  }
 0xc7d   : > { %v11671_v28 = vadd.f32 %v11665_v2, %v11648_v56  ;;  %v11651_v7 = vadd.f32 %v21400_v35, %v11232_v53  ;;  %v23444_v53 = vld [vmem:[%s31296_s10 + $0x214] ss:$8 sps:$4 sm:$0xff]  }
 0xc7f   : > { %v11674_v61 = vadd.f32 %v11665_v2, %v11651_v7  ;;  %v11677_v36 = vmax.f32 %v11671_v28, 0.0 }
 0xc81   : > { %v11680_v62 = vmax.f32 %v11674_v61, 0.0 }
 0xc83   : > { %v11687_v5 = vpack.c.bf16 %v11680_v62, %v11677_v36  ;;  %v23463_v62 = vld [vmem:[%s31296_s10 + $0x280] ss:$8 sps:$4 sm:$0xff]  }
 0xc85   : > { %v11714_v58 = vand.u32 %v28895_v3, %v11687_v5 }
 0xc87   : > { %21480 = vmatprep.subr.bf16.mxu0 %v11714_v58 }
 0xc88   : > { %21481 = vmatpush3.bf16.msra.mxu0 %v11714_v58 }
 0xc89   : > { %12185 = vmatprep.subr.bf16.mxu0 %v23417_v59 }
 0xc8b   : > { %21483 = vmatmul.mubr.msk.bf16.vlgmr.msra.gmra.mrb[88].mxu0 %vm11698_vm4, %v23414_v10 }
 0xc8c   : > { %12186 = vmatpush1.bf16.msra.mxu0 %v23415_v42 }
 0xc8d   : > { %12187 = vmatprep.subr.bf16.mxu0 %v23420_v9 }
 0xc90   : > { %12188 = vmatpush1.bf16.msra.mxu0 %v23418_v17 }
 0xc91   : > { %12189 = vmatprep.subr.bf16.mxu0 %v23423_v1  ;;  %v23468_v1 = vld [vmem:[%s31296_s10 + $0x294] ss:$8 sps:$4 sm:$0xff]  }
 0xc94   : > { %12190 = vmatpush1.bf16.msra.mxu0 %v23421_v33 }
 0xc95   : > { %12191 = vmatprep.subr.bf16.mxu0 %v23426_v37 }
 0xc98   : > { %12192 = vmatpush1.bf16.msra.mxu0 %v23424_v30 }
 0xc99   : > { %12193 = vmatprep.subr.bf16.mxu0 %v23429_v15 }
 0xc9c   : > { %12194 = vmatpush1.bf16.msra.mxu0 %v23427_v50 }
 0xc9d   : > { %12195 = vmatprep.subr.bf16.mxu0 %v23432_v31 }
 0xca0   : > { %12196 = vmatpush1.bf16.msra.mxu0 %v23430_v57 }
 0xca1   : > { %12197 = vmatprep.subr.bf16.mxu0 %v23435_v52 }
 0xca4   : > { %12198 = vmatpush1.bf16.msra.mxu0 %v23433_v55 }
 0xca5   : > { %12199 = vmatprep.subr.bf16.mxu0 %v23438_v8 }
 0xca8   : > { %12200 = vmatpush1.bf16.msra.mxu0 %v23436_v16  ;;  %v23466_v16 = vld [vmem:[%s31296_s10 + $0x290] ss:$8 sps:$4 sm:$0xff]  }
 0xca9   : > { %12201 = vmatprep.subr.bf16.mxu0 %v23441_v51 }
 0xcac   : > { %12202 = vmatpush1.bf16.msra.mxu0 %v23439_v23 }
 0xcad   : > { %12203 = vmatprep.subr.bf16.mxu0 %v23444_v53 }
 0xcb0   : > { %12204 = vmatpush1.bf16.msra.mxu0 %v23442_v40 }
 0xcb1   : > { %12205 = vmatprep.subr.bf16.mxu0 %v23447_v47  ;;  %v23471_v47 = vld [vmem:[%s31296_s10 + $0x2a4] ss:$8 sps:$4 sm:$0xff]  }
 0xcb4   : > { %12206 = vmatpush1.bf16.msra.mxu0 %v23445_v32 }
 0xcb5   : > { %12207 = vmatprep.subr.bf16.mxu0 %v23450_v21 }
 0xcb8   : > { %12208 = vmatpush1.bf16.msra.mxu0 %v23448_v12 }
 0xcb9   : > { %12209 = vmatprep.subr.bf16.mxu0 %v23453_v13 }
 0xcbc   : > { %12210 = vmatpush1.bf16.msra.mxu0 %v23451_v39 }
 0xcbd   : > { %12211 = vmatprep.subr.bf16.mxu0 %v23456_v43 }
 0xcc0   : > { %12212 = vmatpush1.bf16.msra.mxu0 %v23454_v38 }
 0xcc1   : > { %12213 = vmatprep.subr.bf16.mxu0 %v23459_v29 }
 0xcc4   : > { %12214 = vmatpush1.bf16.msra.mxu0 %v23457_v4 }
 0xcc5   : > { %12215 = vmatprep.subr.bf16.mxu0 %v23462_v19 }
 0xcc8   : > { %12216 = vmatpush1.bf16.msra.mxu0 %v23460_v27 }
 0xcc9   : > { %12228 = vmatprep.subr.bf16.mxu0 %v23465_v45  ;;  %v23469_v45 = vld [vmem:[%s31296_s10 + $0x2a0] ss:$8 sps:$4 sm:$0xff]  }
 0xd3a   : > { %v11750_v49 = vpop.f32.mrb[80].mxu0 }
 0xd3b   : > { %v11752_v24 = vpop.f32.mrb[81].mxu0 }
 0xd3c   : > { %v11754_v63 = vpop.f32.mrb[82].mxu0 }
 0xd3d   : > { %v29011_v6 = vpack.c.bf16 %v11754_v63, %v11750_v49  ;;  %v11756_v34 = vpop.f32.mrb[83].mxu0 }
 0xd3e   : > { %v29013_v18 = vpack.c.bf16 %v11756_v34, %v11752_v24  ;;  %v23474_v34 = vld [vmem:[%s31296_s10 + $0x2b4] ss:$8 sps:$4 sm:$0xff]  }
 0xd3f   : > { %v29016_v0 = vshrl.u32 %v29011_v6, 16  ;;  %v29019_v41 = vshll.u32 %v29011_v6, 16 }
 0xd40   : > { %v11929_v10 = vshrl.u32 %v29013_v18, 16  ;;  %v11931_v60 = vshll.u32 %v29013_v18, 16  ;;  %v13458_v33 = vrot.slane %v29013_v18, 3  ;;  %v14252_v50 = vrot.slane %v29013_v18, 5 }
 0xd41   : > { %v11926_v25 = vrot.slane %v29019_v41, 1  ;;  %v13034_v48 = vrot.slane %v29016_v0, 2  ;;  %v13035_v26 = vrot.slane %v29019_v41, 3  ;;  %v13846_v59 = vrot.slane %v29016_v0, 3 }
 0xd42   : > { %v11760_v2 = vpop.f32.mrb[84].mxu0  ;;  %v11933_v11 = vrot.slane %v11931_v60, 1  ;;  %v13046_v20 = vrot.slane %v11929_v10, 2  ;;  %v13047_v56 = vrot.slane %v11931_v60, 3  ;;  %v13853_v7 = vrot.slane %v11929_v10, 3 }
 0xd43   : > { %v11762_v35 = vpop.f32.mrb[85].mxu0  ;;  %v13036_v28 = vor.u32 %v13035_v26, %v13034_v48  ;;  %v13854_v58 = vrot.slane %v11931_v60, 4  ;;  %v11927_v17 = vor.u32 %v11926_v25, %v29016_v0  ;;  %v13847_v37 = vrot.slane %v29019_v41, 4 }
 0xd44   : > { %v11764_v61 = vpop.f32.mrb[86].mxu0  ;;  %v11934_v36 = vor.u32 %v11933_v11, %v11929_v10  ;;  %v13048_v5 = vor.u32 %v13047_v56, %v13046_v20  ;;  %v14647_v31 = vrot.slane %v11929_v10, 5  ;;  %v14648_v8 = vrot.slane %v11931_v60, 6 }
 0xd45   : > { %v29030_v42 = vpack.c.bf16 %v11764_v61, %v11760_v2  ;;  %v11766_v9 = vpop.f32.mrb[87].mxu0  ;;  %v13855_v15 = vor.u32 %v13854_v58, %v13853_v7  ;;  %v13848_v55 = vor.u32 %v13847_v37, %v13846_v59  ;;  %v14640_v48 = vrot.slane %v29016_v0, 5  ;;  %v23483_v37 = vld [vmem:[%s31296_s10 + $0x2e4] ss:$8 sps:$4 sm:$0xff]  }
 0xd46   : > { %v11822_v30 = vpack.c.bf16 %v11766_v9, %v11762_v35  ;;  %12217 = vmatprep.mubr.bf16.mxu0 %v11934_v36  ;;  %v14649_v19 = vor.u32 %v14648_v8, %v14647_v31  ;;  %v14641_v11 = vrot.slane %v29019_v41, 6  ;;  %v15046_v36 = vrot.slane %v29013_v18, 6  ;;  %v23477_v41 = vld [vmem:[%s31296_s10 + $0x2c4] ss:$8 sps:$4 sm:$0xff]  }
 0xd47   : > { %v13038_v57 = vshrl.u32 %v29030_v42, 16  ;;  %v13041_v52 = vshll.u32 %v29030_v42, 16  ;;  %12218 = vmatmul.mubr.bf16.vlgmr.msra.gmra.mrb[92].mxu0 %v11927_v17  ;;  %v23475_v17 = vld [vmem:[%s31296_s10 + $0x2c0] ss:$8 sps:$4 sm:$0xff]  }
 0xd48   : > { %12229 = vmatpush1.bf16.msra.mxu0 %v23463_v62  ;;  %12260 = vmatprep.mubr.bf16.mxu0 %v31325_v54  ;;  %v13050_v51 = vshrl.u32 %v11822_v30, 16  ;;  %v13053_v23 = vshll.u32 %v11822_v30, 16  ;;  %v13459_v53 = vrot.slane %v11822_v30, 3  ;;  %v14253_v40 = vrot.slane %v11822_v30, 5 }
 0xd49   : > { %12230 = vmatprep.subr.bf16.mxu0 %v23468_v1  ;;  %v13040_v32 = vrot.slane %v13038_v57, 2  ;;  %v13043_v21 = vrot.slane %v13041_v52, 3  ;;  %v13849_v12 = vrot.slane %v13038_v57, 3  ;;  %v13850_v24 = vrot.slane %v13041_v52, 4  ;;  %v23480_v1 = vld [vmem:[%s31296_s10 + $0x2d4] ss:$8 sps:$4 sm:$0xff]  }
 0xd4a   : > { %v13052_v13 = vrot.slane %v13050_v51, 2  ;;  %v13055_v39 = vrot.slane %v13053_v23, 3  ;;  %v29049_v43 = vsel %vm4240_vm11, %v13458_v33, %v13459_v53  ;;  %v29052_v38 = vsel %vm5132_vm15, %v14252_v50, %v14253_v40  ;;  %v23478_v33 = vld [vmem:[%s31296_s10 + $0x2d0] ss:$8 sps:$4 sm:$0xff]  }
 0xd4b   : > { %v13044_v29 = vor.u32 %v13043_v21, %v13040_v32  ;;  %v13856_v4 = vrot.slane %v13050_v51, 3  ;;  %v13857_v27 = vrot.slane %v13053_v23, 4  ;;  %v14650_v63 = vrot.slane %v13050_v51, 5 }
 0xd4c   : > { %12231 = vmatpush1.bf16.msra.mxu0 %v23466_v16  ;;  %v13056_v49 = vor.u32 %v13055_v39, %v13052_v13  ;;  %v14651_v25 = vrot.slane %v13053_v23, 6  ;;  %v13851_v2 = vor.u32 %v13850_v24, %v13849_v12  ;;  %v14643_v35 = vrot.slane %v13038_v57, 5  ;;  %v23489_v16 = vld [vmem:[%s31296_s10 + $0x4] ss:$8 sps:$4 sm:$0xff]  }
 0xd4d   : > { %12232 = vmatprep.subr.bf16.mxu0 %v23471_v47  ;;  %v29061_v10 = vsel %vm6183_vm0, %v13036_v28, %v13044_v29  ;;  %v13858_v60 = vor.u32 %v13857_v27, %v13856_v4  ;;  %v14644_v7 = vrot.slane %v13041_v52, 6  ;;  %v23472_v28 = vld [vmem:[%s31296_s10 + $0x2b0] ss:$8 sps:$4 sm:$0xff]   ;;  %v14642_v0 = vor.u32 %v14641_v11, %v14640_v48  ;;  %v23487_v27 = vld [vmem:[%s31296_s10] ss:$8 sps:$4 sm:$0xff]  }
 0xd4e   : > { %v29065_v26 = vsel %vm6183_vm0, %v13048_v5, %v13056_v49  ;;  %v14652_v56 = vor.u32 %v14651_v25, %v14650_v63  ;;  %v29075_v61 = vsel %vm4455_vm12, %v13848_v55, %v13851_v2  ;;  %v15047_v62 = vrot.slane %v11822_v30, 6  ;;  %v23481_v30 = vld [vmem:[%s31296_s10 + $0x2e0] ss:$8 sps:$4 sm:$0xff]   ;;  %v23484_v52 = vld [vmem:[%s31296_s10 + $0x2f0] ss:$8 sps:$4 sm:$0xff]  }
 0xd4f   : > { %v29069_v20 = vsel %vm4455_vm12, %v13855_v15, %v13858_v60  ;;  %v14645_v58 = vor.u32 %v14644_v7, %v14643_v35  ;;  %v23486_v15 = vld [vmem:[%s31296_s10 + $0x2f4] ss:$8 sps:$4 sm:$0xff]   ;;  %v23490_v7 = vld [vmem:[%s31296_s10 + $0x10] ss:$8 sps:$4 sm:$0xff]  }
 0xd50   : > { %12233 = vmatpush1.bf16.msra.mxu0 %v23469_v45  ;;  %v29082_v5 = vsel %vm3120_vm8, %v14649_v19, %v14652_v56  ;;  %v29085_v59 = vsel %vm1703_vm5, %v15046_v36, %v15047_v62  ;;  %v23492_v63 = vld [vmem:[%s31296_s10 + $0x14] ss:$8 sps:$4 sm:$0xff]   ;;  %v23495_v36 = vld [vmem:[%s31296_s10 + $0x24] ss:$8 sps:$4 sm:$0xff]  }
 0xd51   : > { %12234 = vmatprep.subr.bf16.mxu0 %v23474_v34  ;;  %v29088_v9 = vsel %vm3120_vm8, %v14642_v0, %v14645_v58  ;;  %v23493_v58 = vld [vmem:[%s31296_s10 + $0x20] ss:$8 sps:$4 sm:$0xff]  }
 0xd54   : > { %12235 = vmatpush1.bf16.msra.mxu0 %v23472_v28 }
 0xd55   : > { %12236 = vmatprep.subr.bf16.mxu0 %v23477_v41 }
 0xd58   : > { %12237 = vmatpush1.bf16.msra.mxu0 %v23475_v17  ;;  %v23498_v17 = vld [vmem:[%s31296_s10 + $0x34] ss:$8 sps:$4 sm:$0xff]  }
 0xd59   : > { %12238 = vmatprep.subr.bf16.mxu0 %v23480_v1  ;;  %v23496_v1 = vld [vmem:[%s31296_s10 + $0x30] ss:$8 sps:$4 sm:$0xff]  }
 0xd5c   : > { %12239 = vmatpush1.bf16.msra.mxu0 %v23478_v33  ;;  %v23501_v33 = vld [vmem:[%s31296_s10 + $0x44] ss:$8 sps:$4 sm:$0xff]  }
 0xd5d   : > { %12240 = vmatprep.subr.bf16.mxu0 %v23483_v37  ;;  %v23499_v37 = vld [vmem:[%s31296_s10 + $0x40] ss:$8 sps:$4 sm:$0xff]  }
 0xd5e   : > { %v21484_v50 = vpop.f32.mrb[88].mxu0 }
 0xd5f   : > { %v11803_v31 = vpop.f32.mrb[89].mxu0 }
 0xd60   : > { %v21485_v57 = vpop.f32.mrb[90].mxu0  ;;  %12241 = vmatpush1.bf16.msra.mxu0 %v23481_v30  ;;  %v23504_v30 = vld [vmem:[%s31296_s10 + $0x54] ss:$8 sps:$4 sm:$0xff]  }
 0xd61   : > { %v29111_v55 = vpack.c.bf16 %v21485_v57, %v21484_v50  ;;  %v11806_v8 = vpop.f32.mrb[91].mxu0  ;;  %12242 = vmatprep.subr.bf16.mxu0 %v23486_v15  ;;  %v23502_v15 = vld [vmem:[%s31296_s10 + $0x50] ss:$8 sps:$4 sm:$0xff]   ;;  %v23507_v50 = vld [vmem:[%s31296_s10 + $0x64] ss:$8 sps:$4 sm:$0xff]  }
 0xd62   : > { %v29116_v51 = vpack.c.bf16 %v11806_v8, %v11803_v31  ;;  %v23505_v31 = vld [vmem:[%s31296_s10 + $0x60] ss:$8 sps:$4 sm:$0xff]   ;;  %v23510_v57 = vld [vmem:[%s31296_s10 + $0x74] ss:$8 sps:$4 sm:$0xff]   ;;  %v23513_v8 = vld [vmem:[%s31296_s10 + $0x84] ss:$8 sps:$4 sm:$0xff]  }
 0xd63   : > { %v13062_v23 = vshrl.u32 %v29111_v55, 16  ;;  %v13065_v53 = vshll.u32 %v29111_v55, 16 }
 0xd64   : > { %12243 = vmatpush1.bf16.msra.mxu0 %v23484_v52  ;;  %v11936_v40 = vshrl.u32 %v29116_v51, 16  ;;  %v11938_v47 = vshll.u32 %v29116_v51, 16  ;;  %v23508_v52 = vld [vmem:[%s31296_s10 + $0x70] ss:$8 sps:$4 sm:$0xff]  }
 0xd65   : > { %12511 = vmatprep.subr.bf16.mxu0 %v23489_v16  ;;  %v13064_v32 = vrot.slane %v13062_v23, 2  ;;  %v13067_v21 = vrot.slane %v13065_v53, 3  ;;  %v13863_v12 = vrot.slane %v13062_v23, 3  ;;  %v13864_v49 = vrot.slane %v13065_v53, 4  ;;  %v23511_v16 = vld [vmem:[%s31296_s10 + $0x80] ss:$8 sps:$4 sm:$0xff]  }
 0xd66   : > { %v11940_v13 = vrot.slane %v11938_v47, 1  ;;  %v13058_v39 = vrot.slane %v11936_v40, 2  ;;  %v13059_v29 = vrot.slane %v11938_v47, 3  ;;  %v13860_v4 = vrot.slane %v11936_v40, 3 }
 0xd67   : > { %v13068_v19 = vor.u32 %v13067_v21, %v13064_v32  ;;  %v13861_v45 = vrot.slane %v11938_v47, 4  ;;  %v13865_v25 = vor.u32 %v13864_v49, %v13863_v12  ;;  %v14654_v48 = vrot.slane %v11936_v40, 5  ;;  %v23522_v32 = vld [vmem:[%s31296_s10 + $0xb4] ss:$8 sps:$4 sm:$0xff]   ;;  %v23520_v21 = vld [vmem:[%s31296_s10 + $0xb0] ss:$8 sps:$4 sm:$0xff]  }
 0xd68   : > { %v11941_v24 = vor.u32 %v11940_v13, %v11936_v40  ;;  %v13060_v34 = vor.u32 %v13059_v29, %v13058_v39  ;;  %v14655_v2 = vrot.slane %v11938_v47, 6  ;;  %v14657_v56 = vrot.slane %v13062_v23, 5  ;;  %v23516_v23 = vld [vmem:[%s31296_s10 + $0x94] ss:$8 sps:$4 sm:$0xff]   ;;  %v23519_v40 = vld [vmem:[%s31296_s10 + $0xa4] ss:$8 sps:$4 sm:$0xff]  }
 0xd69   : > { %v13862_v60 = vor.u32 %v13861_v45, %v13860_v4  ;;  %v14658_v35 = vrot.slane %v13065_v53, 6  ;;  %v23514_v53 = vld [vmem:[%s31296_s10 + $0x90] ss:$8 sps:$4 sm:$0xff]   ;;  %v23517_v47 = vld [vmem:[%s31296_s10 + $0xa0] ss:$8 sps:$4 sm:$0xff]  }
 0xd6a   : > { %12261 = vmatmul.mubr.bf16.vlgmr.msra.gmra.mrb[92].mxu0 %v11941_v24  ;;  %v29129_v11 = vsel %vm6183_vm0, %v13060_v34, %v13068_v19  ;;  %v14656_v0 = vor.u32 %v14655_v2, %v14654_v48  ;;  %v23525_v12 = vld [vmem:[%s31296_s10 + $0xc4] ss:$8 sps:$4 sm:$0xff]   ;;  %v23523_v13 = vld [vmem:[%s31296_s10 + $0xc0] ss:$8 sps:$4 sm:$0xff]   ;;  %v23528_v39 = vld [vmem:[%s31296_s10 + $0xd4] ss:$8 sps:$4 sm:$0xff]  }
 0xd6b   : > { %12512 = vmatpush1.bf16.msra.mxu0 %v23487_v27  ;;  %12543 = vmatprep.mubr.bf16.mxu0 %v29013_v18  ;;  %v29136_v28 = vsel %vm4455_vm12, %v13862_v60, %v13865_v25  ;;  %v14659_v62 = vor.u32 %v14658_v35, %v14657_v56  ;;  %v23526_v29 = vld [vmem:[%s31296_s10 + $0xd0] ss:$8 sps:$4 sm:$0xff]   ;;  %v23531_v4 = vld [vmem:[%s31296_s10 + $0xe4] ss:$8 sps:$4 sm:$0xff]   ;;  %v23529_v27 = vld [vmem:[%s31296_s10 + $0xe0] ss:$8 sps:$4 sm:$0xff]  }
 0xd6c   : > { %12513 = vmatprep.subr.bf16.mxu0 %v23492_v63  ;;  %v23534_v19 = vld [vmem:[%s31296_s10 + $0xf4] ss:$8 sps:$4 sm:$0xff]   ;;  %v23532_v45 = vld [vmem:[%s31296_s10 + $0xf0] ss:$8 sps:$4 sm:$0xff]   ;;  %v23537_v49 = vld [vmem:[%s31296_s10 + $0x104] ss:$8 sps:$4 sm:$0xff]  }
 0xd6d   : > { %v29142_v41 = vsel %vm3120_vm8, %v14656_v0, %v14659_v62  ;;  %v23535_v24 = vld [vmem:[%s31296_s10 + $0x100] ss:$8 sps:$4 sm:$0xff]   ;;  %v23540_v63 = vld [vmem:[%s31296_s10 + $0x114] ss:$8 sps:$4 sm:$0xff]   ;;  %v23538_v34 = vld [vmem:[%s31296_s10 + $0x110] ss:$8 sps:$4 sm:$0xff]  }
 0xd6e   : > { %v23543_v60 = vld [vmem:[%s31296_s10 + $0x124] ss:$8 sps:$4 sm:$0xff]   ;;  %v23541_v25 = vld [vmem:[%s31296_s10 + $0x120] ss:$8 sps:$4 sm:$0xff]   ;;  %v23546_v48 = vld [vmem:[%s31296_s10 + $0x134] ss:$8 sps:$4 sm:$0xff]  }
 0xd6f   : > { %12514 = vmatpush1.bf16.msra.mxu0 %v23490_v7  ;;  %v23544_v2 = vld [vmem:[%s31296_s10 + $0x130] ss:$8 sps:$4 sm:$0xff]   ;;  %v23549_v56 = vld [vmem:[%s31296_s10 + $0x144] ss:$8 sps:$4 sm:$0xff]   ;;  %v23547_v35 = vld [vmem:[%s31296_s10 + $0x140] ss:$8 sps:$4 sm:$0xff]  }
 0xd70   : > { %12515 = vmatprep.subr.bf16.mxu0 %v23495_v36  ;;  %v23552_v7 = vld [vmem:[%s31296_s10 + $0x154] ss:$8 sps:$4 sm:$0xff]   ;;  %v23550_v0 = vld [vmem:[%s31296_s10 + $0x150] ss:$8 sps:$4 sm:$0xff]   ;;  %v23555_v36 = vld [vmem:[%s31296_s10 + $0x164] ss:$8 sps:$4 sm:$0xff]  }
 0xd71   : > { %v23553_v62 = vld [vmem:[%s31296_s10 + $0x160] ss:$8 sps:$4 sm:$0xff]  }
 0xd73   : > { %12516 = vmatpush1.bf16.msra.mxu0 %v23493_v58  ;;  %v23558_v58 = vld [vmem:[%s31296_s10 + $0x174] ss:$8 sps:$4 sm:$0xff]  }
 0xd74   : > { %12517 = vmatprep.subr.bf16.mxu0 %v23498_v17  ;;  %v23556_v17 = vld [vmem:[%s31296_s10 + $0x170] ss:$8 sps:$4 sm:$0xff]  }
 0xd77   : > { %12518 = vmatpush1.bf16.msra.mxu0 %v23496_v1  ;;  %v23561_v1 = vld [vmem:[%s31296_s10 + $0x304] ss:$8 sps:$4 sm:$0xff]  }
 0xd78   : > { %12519 = vmatprep.subr.bf16.mxu0 %v23501_v33  ;;  %v23559_v33 = vld [vmem:[%s31296_s10 + $0x300] ss:$8 sps:$4 sm:$0xff]  }
 0xd7b   : > { %12520 = vmatpush1.bf16.msra.mxu0 %v23499_v37  ;;  %v23564_v37 = vld [vmem:[%s31296_s10 + $0x314] ss:$8 sps:$4 sm:$0xff]  }
 0xd7c   : > { %12521 = vmatprep.subr.bf16.mxu0 %v23504_v30  ;;  %v12650_v30 = vrot.slane %v29013_v18, 1  ;;  %v23570_v18 = vld [vmem:[%s31296_s10 + $0x334] ss:$8 sps:$4 sm:$0xff]  }
 0xd7f   : > { %12522 = vmatpush1.bf16.msra.mxu0 %v23502_v15  ;;  %v23562_v15 = vld [vmem:[%s31296_s10 + $0x310] ss:$8 sps:$4 sm:$0xff]  }
 0xd80   : > { %12523 = vmatprep.subr.bf16.mxu0 %v23507_v50  ;;  %v23567_v50 = vld [vmem:[%s31296_s10 + $0x324] ss:$8 sps:$4 sm:$0xff]  }
 0xd83   : > { %12524 = vmatpush1.bf16.msra.mxu0 %v23505_v31  ;;  %v23565_v31 = vld [vmem:[%s31296_s10 + $0x320] ss:$8 sps:$4 sm:$0xff]  }
 0xd84   : > { %12525 = vmatprep.subr.bf16.mxu0 %v23510_v57  ;;  %v23568_v57 = vld [vmem:[%s31296_s10 + $0x330] ss:$8 sps:$4 sm:$0xff]  }
 0xd87   : > { %12526 = vmatpush1.bf16.msra.mxu0 %v23508_v52  ;;  %v23573_v52 = vld [vmem:[%s31296_s10 + $0x344] ss:$8 sps:$4 sm:$0xff]  }
 0xd88   : > { %12527 = vmatprep.subr.bf16.mxu0 %v23513_v8  ;;  %v23571_v8 = vld [vmem:[%s31296_s10 + $0x340] ss:$8 sps:$4 sm:$0xff]  }
 0xd8b   : > { %12528 = vmatpush1.bf16.msra.mxu0 %v23511_v16  ;;  %v23576_v16 = vld [vmem:[%s31296_s10 + $0x354] ss:$8 sps:$4 sm:$0xff]  }
 0xd8c   : > { %12529 = vmatprep.subr.bf16.mxu0 %v23516_v23  ;;  %v23574_v23 = vld [vmem:[%s31296_s10 + $0x350] ss:$8 sps:$4 sm:$0xff]  }
 0xd8f   : > { %12530 = vmatpush1.bf16.msra.mxu0 %v23514_v53  ;;  %v23579_v53 = vld [vmem:[%s31296_s10 + $0x364] ss:$8 sps:$4 sm:$0xff]  }
 0xd90   : > { %12531 = vmatprep.subr.bf16.mxu0 %v23519_v40  ;;  %v23577_v40 = vld [vmem:[%s31296_s10 + $0x360] ss:$8 sps:$4 sm:$0xff]  }
 0xd93   : > { %12532 = vmatpush1.bf16.msra.mxu0 %v23517_v47  ;;  %v23582_v47 = vld [vmem:[%s31296_s10 + $0x374] ss:$8 sps:$4 sm:$0xff]  }
 0xd94   : > { %12533 = vmatprep.subr.bf16.mxu0 %v23522_v32  ;;  %v23580_v32 = vld [vmem:[%s31296_s10 + $0x370] ss:$8 sps:$4 sm:$0xff]  }
 0xd97   : > { %12534 = vmatpush1.bf16.msra.mxu0 %v23520_v21  ;;  %v23585_v21 = vld [vmem:[%s31296_s10 + $0x384] ss:$8 sps:$4 sm:$0xff]  }
 0xd98   : > { %12535 = vmatprep.subr.bf16.mxu0 %v23525_v12  ;;  %v23583_v12 = vld [vmem:[%s31296_s10 + $0x380] ss:$8 sps:$4 sm:$0xff]  }
 0xd9b   : > { %12536 = vmatpush1.bf16.msra.mxu0 %v23523_v13  ;;  %v23588_v13 = vld [vmem:[%s31296_s10 + $0x394] ss:$8 sps:$4 sm:$0xff]  }
 0xd9c   : > { %12537 = vmatprep.subr.bf16.mxu0 %v23528_v39  ;;  %v23586_v39 = vld [vmem:[%s31296_s10 + $0x390] ss:$8 sps:$4 sm:$0xff]  }
 0xd9f   : > { %12538 = vmatpush1.bf16.msra.mxu0 %v23526_v29  ;;  %v23591_v29 = vld [vmem:[%s31296_s10 + $0x3a4] ss:$8 sps:$4 sm:$0xff]  }
 0xda0   : > { %12539 = vmatprep.subr.bf16.mxu0 %v23531_v4  ;;  %v23589_v4 = vld [vmem:[%s31296_s10 + $0x3a0] ss:$8 sps:$4 sm:$0xff]  }
 0xda3   : > { %12540 = vmatpush1.bf16.msra.mxu0 %v23529_v27  ;;  %v23594_v27 = vld [vmem:[%s31296_s10 + $0x3b4] ss:$8 sps:$4 sm:$0xff]  }
 0xda4   : > { %12541 = vmatprep.subr.bf16.mxu0 %v23534_v19  ;;  %v23592_v19 = vld [vmem:[%s31296_s10 + $0x3b0] ss:$8 sps:$4 sm:$0xff]  }
 0xda7   : > { %12542 = vmatpush1.bf16.msra.mxu0 %v23532_v45  ;;  %v23597_v45 = vld [vmem:[%s31296_s10 + $0x3c4] ss:$8 sps:$4 sm:$0xff]  }
 0xda8   : > { %12554 = vmatprep.subr.bf16.mxu0 %v23537_v49  ;;  %v23595_v49 = vld [vmem:[%s31296_s10 + $0x3c0] ss:$8 sps:$4 sm:$0xff]  }
 0xdaa   : > { %12544 = vmatmul.mubr.bf16.vlgmr.msra.gmra.mrb[92].mxu0 %v29011_v6 }
 0xdab   : > { %12555 = vmatpush1.bf16.msra.mxu0 %v23535_v24  ;;  %12586 = vmatprep.mubr.bf16.mxu0 %v31325_v54  ;;  %v23600_v24 = vld [vmem:[%s31296_s10 + $0x3d4] ss:$8 sps:$4 sm:$0xff]  }
 0xdac   : > { %12556 = vmatprep.subr.bf16.mxu0 %v23540_v63  ;;  %v23598_v63 = vld [vmem:[%s31296_s10 + $0x3d0] ss:$8 sps:$4 sm:$0xff]  }
 0xdaf   : > { %12557 = vmatpush1.bf16.msra.mxu0 %v23538_v34  ;;  %v23603_v34 = vld [vmem:[%s31296_s10 + $0x3e4] ss:$8 sps:$4 sm:$0xff]  }
 0xdb0   : > { %12558 = vmatprep.subr.bf16.mxu0 %v23543_v60  ;;  %v23601_v60 = vld [vmem:[%s31296_s10 + $0x3e0] ss:$8 sps:$4 sm:$0xff]  }
 0xdb3   : > { %12559 = vmatpush1.bf16.msra.mxu0 %v23541_v25  ;;  %v23606_v25 = vld [vmem:[%s31296_s10 + $0x3f4] ss:$8 sps:$4 sm:$0xff]  }
 0xdb4   : > { %12560 = vmatprep.subr.bf16.mxu0 %v23546_v48  ;;  %v23604_v48 = vld [vmem:[%s31296_s10 + $0x3f0] ss:$8 sps:$4 sm:$0xff]  }
 0xdb7   : > { %12561 = vmatpush1.bf16.msra.mxu0 %v23544_v2  ;;  %v23609_v2 = vld [vmem:[%s31296_s10 + $0x404] ss:$8 sps:$4 sm:$0xff]  }
 0xdb8   : > { %12562 = vmatprep.subr.bf16.mxu0 %v23549_v56  ;;  %v23607_v56 = vld [vmem:[%s31296_s10 + $0x400] ss:$8 sps:$4 sm:$0xff]  }
 0xdbb   : > { %12563 = vmatpush1.bf16.msra.mxu0 %v23547_v35  ;;  %v12649_v35 = vrot.slane %v29011_v6, 1 }
 0xdbc   : > { %12564 = vmatprep.subr.bf16.mxu0 %v23552_v7  ;;  %v23612_v7 = vld [vmem:[%s31296_s10 + $0x414] ss:$8 sps:$4 sm:$0xff]  }
 0xdbf   : > { %12565 = vmatpush1.bf16.msra.mxu0 %v23550_v0  ;;  %v23610_v0 = vld [vmem:[%s31296_s10 + $0x410] ss:$8 sps:$4 sm:$0xff]  }
 0xdc0   : > { %12566 = vmatprep.subr.bf16.mxu0 %v23555_v36  ;;  %v23615_v36 = vld [vmem:[%s31296_s10 + $0x424] ss:$8 sps:$4 sm:$0xff]  }
 0xdc3   : > { %12567 = vmatpush1.bf16.msra.mxu0 %v23553_v62  ;;  %v23613_v62 = vld [vmem:[%s31296_s10 + $0x420] ss:$8 sps:$4 sm:$0xff]  }
 0xdc4   : > { %12568 = vmatprep.subr.bf16.mxu0 %v23558_v58  ;;  %v23618_v58 = vld [vmem:[%s31296_s10 + $0x434] ss:$8 sps:$4 sm:$0xff]  }
 0xdc7   : > { %12569 = vmatpush1.bf16.msra.mxu0 %v23556_v17  ;;  %v23616_v17 = vld [vmem:[%s31296_s10 + $0x430] ss:$8 sps:$4 sm:$0xff]  }
 0xdc8   : > { %12895 = vmatprep.subr.bf16.mxu0 %v23561_v1  ;;  %v23621_v1 = vld [vmem:[%s31296_s10 + $0x444] ss:$8 sps:$4 sm:$0xff]  }
 0xdca   : > { %12587 = vmatmul.mubr.bf16.vlgmr.msra.gmra.mrb[92].mxu0 %v29116_v51 }
 0xdcb   : > { %12896 = vmatpush1.bf16.msra.mxu0 %v23559_v33  ;;  %12927 = vmatprep.mubr.bf16.mxu0 %v12650_v30  ;;  %v23619_v33 = vld [vmem:[%s31296_s10 + $0x440] ss:$8 sps:$4 sm:$0xff]   ;;  %v23622_v30 = vld [vmem:[%s31296_s10 + $0x450] ss:$8 sps:$4 sm:$0xff]  }
 0xdcc   : > { %12897 = vmatprep.subr.bf16.mxu0 %v23564_v37  ;;  %v23624_v37 = vld [vmem:[%s31296_s10 + $0x454] ss:$8 sps:$4 sm:$0xff]  }
 0xdcf   : > { %12898 = vmatpush1.bf16.msra.mxu0 %v23562_v15  ;;  %v23627_v15 = vld [vmem:[%s31296_s10 + $0x464] ss:$8 sps:$4 sm:$0xff]  }
 0xdd0   : > { %12899 = vmatprep.subr.bf16.mxu0 %v23567_v50  ;;  %v23625_v50 = vld [vmem:[%s31296_s10 + $0x460] ss:$8 sps:$4 sm:$0xff]  }
 0xdd3   : > { %12900 = vmatpush1.bf16.msra.mxu0 %v23565_v31  ;;  %v23630_v31 = vld [vmem:[%s31296_s10 + $0x474] ss:$8 sps:$4 sm:$0xff]  }
 0xdd4   : > { %12901 = vmatprep.subr.bf16.mxu0 %v23570_v18  ;;  %v23628_v18 = vld [vmem:[%s31296_s10 + $0x470] ss:$8 sps:$4 sm:$0xff]  }
 0xdd7   : > { %12902 = vmatpush1.bf16.msra.mxu0 %v23568_v57  ;;  %v23633_v57 = vld [vmem:[%s31296_s10 + $0x484] ss:$8 sps:$4 sm:$0xff]  }
 0xdd8   : > { %12903 = vmatprep.subr.bf16.mxu0 %v23573_v52  ;;  %v23631_v52 = vld [vmem:[%s31296_s10 + $0x480] ss:$8 sps:$4 sm:$0xff]  }
 0xddb   : > { %12904 = vmatpush1.bf16.msra.mxu0 %v23571_v8  ;;  %v12651_v8 = vrot.slane %v29116_v51, 1 }
 0xddc   : > { %12905 = vmatprep.subr.bf16.mxu0 %v23576_v16  ;;  %v23636_v16 = vld [vmem:[%s31296_s10 + $0x494] ss:$8 sps:$4 sm:$0xff]  }
 0xddf   : > { %12906 = vmatpush1.bf16.msra.mxu0 %v23574_v23  ;;  %v23634_v23 = vld [vmem:[%s31296_s10 + $0x490] ss:$8 sps:$4 sm:$0xff]  }
 0xde0   : > { %12907 = vmatprep.subr.bf16.mxu0 %v23579_v53  ;;  %v23639_v53 = vld [vmem:[%s31296_s10 + $0x4a4] ss:$8 sps:$4 sm:$0xff]  }
 0xde3   : > { %12908 = vmatpush1.bf16.msra.mxu0 %v23577_v40  ;;  %v23637_v40 = vld [vmem:[%s31296_s10 + $0x4a0] ss:$8 sps:$4 sm:$0xff]  }
 0xde4   : > { %12909 = vmatprep.subr.bf16.mxu0 %v23582_v47  ;;  %v23642_v47 = vld [vmem:[%s31296_s10 + $0x4b4] ss:$8 sps:$4 sm:$0xff]  }
 0xde7   : > { %12910 = vmatpush1.bf16.msra.mxu0 %v23580_v32  ;;  %v23645_v32 = vld [vmem:[%s31296_s10 + $0x4c4] ss:$8 sps:$4 sm:$0xff]  }
 0xde8   : > { %12911 = vmatprep.subr.bf16.mxu0 %v23585_v21  ;;  %v23643_v21 = vld [vmem:[%s31296_s10 + $0x4c0] ss:$8 sps:$4 sm:$0xff]  }
 0xdeb   : > { %12912 = vmatpush1.bf16.msra.mxu0 %v23583_v12  ;;  %v23648_v12 = vld [vmem:[%s31296_s10 + $0x4d4] ss:$8 sps:$4 sm:$0xff]  }
 0xdec   : > { %12913 = vmatprep.subr.bf16.mxu0 %v23588_v13  ;;  %v23646_v13 = vld [vmem:[%s31296_s10 + $0x4d0] ss:$8 sps:$4 sm:$0xff]  }
 0xdef   : > { %12914 = vmatpush1.bf16.msra.mxu0 %v23586_v39  ;;  %v23651_v39 = vld [vmem:[%s31296_s10 + $0x4e4] ss:$8 sps:$4 sm:$0xff]  }
 0xdf0   : > { %12915 = vmatprep.subr.bf16.mxu0 %v23591_v29  ;;  %v23649_v29 = vld [vmem:[%s31296_s10 + $0x4e0] ss:$8 sps:$4 sm:$0xff]  }
 0xdf3   : > { %12916 = vmatpush1.bf16.msra.mxu0 %v23589_v4  ;;  %v23654_v4 = vld [vmem:[%s31296_s10 + $0x4f4] ss:$8 sps:$4 sm:$0xff]  }
 0xdf4   : > { %12917 = vmatprep.subr.bf16.mxu0 %v23594_v27  ;;  %v23652_v27 = vld [vmem:[%s31296_s10 + $0x4f0] ss:$8 sps:$4 sm:$0xff]  }
 0xdf7   : > { %12918 = vmatpush1.bf16.msra.mxu0 %v23592_v19  ;;  %v23657_v19 = vld [vmem:[%s31296_s10 + $0x504] ss:$8 sps:$4 sm:$0xff]  }
 0xdf8   : > { %12919 = vmatprep.subr.bf16.mxu0 %v23597_v45  ;;  %v23655_v45 = vld [vmem:[%s31296_s10 + $0x500] ss:$8 sps:$4 sm:$0xff]  }
 0xdfb   : > { %12920 = vmatpush1.bf16.msra.mxu0 %v23595_v49  ;;  %v23660_v49 = vld [vmem:[%s31296_s10 + $0x514] ss:$8 sps:$4 sm:$0xff]  }
 0xdfc   : > { %12921 = vmatprep.subr.bf16.mxu0 %v23600_v24  ;;  %v23658_v24 = vld [vmem:[%s31296_s10 + $0x510] ss:$8 sps:$4 sm:$0xff]  }
 0xdff   : > { %12922 = vmatpush1.bf16.msra.mxu0 %v23598_v63  ;;  %v23663_v63 = vld [vmem:[%s31296_s10 + $0x524] ss:$8 sps:$4 sm:$0xff]  }
 0xe00   : > { %12923 = vmatprep.subr.bf16.mxu0 %v23603_v34  ;;  %v23661_v34 = vld [vmem:[%s31296_s10 + $0x520] ss:$8 sps:$4 sm:$0xff]  }
 0xe03   : > { %12924 = vmatpush1.bf16.msra.mxu0 %v23601_v60  ;;  %v23666_v60 = vld [vmem:[%s31296_s10 + $0x534] ss:$8 sps:$4 sm:$0xff]  }
 0xe04   : > { %12925 = vmatprep.subr.bf16.mxu0 %v23606_v25  ;;  %v23664_v25 = vld [vmem:[%s31296_s10 + $0x530] ss:$8 sps:$4 sm:$0xff]  }
 0xe07   : > { %12926 = vmatpush1.bf16.msra.mxu0 %v23604_v48  ;;  %v23669_v48 = vld [vmem:[%s31296_s10 + $0x544] ss:$8 sps:$4 sm:$0xff]  }
 0xe08   : > { %12938 = vmatprep.subr.bf16.mxu0 %v23609_v2  ;;  %v23667_v2 = vld [vmem:[%s31296_s10 + $0x540] ss:$8 sps:$4 sm:$0xff]  }
 0xe0a   : > { %12928 = vmatmul.mubr.bf16.vlgmr.msra.gmra.mrb[92].mxu0 %v12649_v35  ;;  %v23670_v35 = vld [vmem:[%s31296_s10 + $0x550] ss:$8 sps:$4 sm:$0xff]  }
 0xe0b   : > { %12939 = vmatpush1.bf16.msra.mxu0 %v23607_v56  ;;  %12970 = vmatprep.mubr.bf16.mxu0 %v31325_v54  ;;  %v23672_v56 = vld [vmem:[%s31296_s10 + $0x554] ss:$8 sps:$4 sm:$0xff]  }
 0xe0c   : > { %12940 = vmatprep.subr.bf16.mxu0 %v23612_v7  ;;  %v23675_v7 = vld [vmem:[%s31296_s10 + $0x564] ss:$8 sps:$4 sm:$0xff]  }
 0xe0f   : > { %12941 = vmatpush1.bf16.msra.mxu0 %v23610_v0  ;;  %v23673_v0 = vld [vmem:[%s31296_s10 + $0x560] ss:$8 sps:$4 sm:$0xff]  }
 0xe10   : > { %12942 = vmatprep.subr.bf16.mxu0 %v23615_v36  ;;  %v23678_v36 = vld [vmem:[%s31296_s10 + $0x574] ss:$8 sps:$4 sm:$0xff]  }
 0xe13   : > { %12943 = vmatpush1.bf16.msra.mxu0 %v23613_v62  ;;  %v23676_v62 = vld [vmem:[%s31296_s10 + $0x570] ss:$8 sps:$4 sm:$0xff]  }
 0xe14   : > { %12944 = vmatprep.subr.bf16.mxu0 %v23618_v58  ;;  %v23681_v58 = vld [vmem:[%s31296_s10 + $0x584] ss:$8 sps:$4 sm:$0xff]  }
 0xe17   : > { %12945 = vmatpush1.bf16.msra.mxu0 %v23616_v17  ;;  %v23679_v17 = vld [vmem:[%s31296_s10 + $0x580] ss:$8 sps:$4 sm:$0xff]  }
 0xe18   : > { %12946 = vmatprep.subr.bf16.mxu0 %v23621_v1  ;;  %v23684_v1 = vld [vmem:[%s31296_s10 + $0x594] ss:$8 sps:$4 sm:$0xff]  }
 0xe1b   : > { %12947 = vmatpush1.bf16.msra.mxu0 %v23619_v33  ;;  %v23682_v33 = vld [vmem:[%s31296_s10 + $0x590] ss:$8 sps:$4 sm:$0xff]  }
 0xe1c   : > { %12948 = vmatprep.subr.bf16.mxu0 %v23624_v37  ;;  %v23687_v37 = vld [vmem:[%s31296_s10 + $0x5a4] ss:$8 sps:$4 sm:$0xff]  }
 0xe1f   : > { %12949 = vmatpush1.bf16.msra.mxu0 %v23622_v30  ;;  %v23685_v30 = vld [vmem:[%s31296_s10 + $0x5a0] ss:$8 sps:$4 sm:$0xff]  }
 0xe20   : > { %12950 = vmatprep.subr.bf16.mxu0 %v23627_v15  ;;  %v23688_v15 = vld [vmem:[%s31296_s10 + $0x5b0] ss:$8 sps:$4 sm:$0xff]  }
 0xe23   : > { %12951 = vmatpush1.bf16.msra.mxu0 %v23625_v50  ;;  %v23693_v50 = vld [vmem:[%s31296_s10 + $0x5c4] ss:$8 sps:$4 sm:$0xff]  }
 0xe24   : > { %12952 = vmatprep.subr.bf16.mxu0 %v23630_v31  ;;  %v23691_v31 = vld [vmem:[%s31296_s10 + $0x5c0] ss:$8 sps:$4 sm:$0xff]  }
 0xe27   : > { %12953 = vmatpush1.bf16.msra.mxu0 %v23628_v18  ;;  %v23696_v18 = vld [vmem:[%s31296_s10 + $0x5d4] ss:$8 sps:$4 sm:$0xff]  }
 0xe28   : > { %13313 = vmatprep.subr.bf16.mxu0 %v23633_v57  ;;  %v23694_v57 = vld [vmem:[%s31296_s10 + $0x5d0] ss:$8 sps:$4 sm:$0xff]  }
 0xe2a   : > { %12971 = vmatmul.mubr.bf16.vlgmr.msra.gmra.mrb[92].mxu0 %v12651_v8  ;;  %v23697_v8 = vld [vmem:[%s31296_s10 + $0x5e0] ss:$8 sps:$4 sm:$0xff]  }
 0xe2b   : > { %13314 = vmatpush1.bf16.msra.mxu0 %v23631_v52  ;;  %13345 = vmatprep.mubr.bf16.mxu0 %v29065_v26  ;;  %v23640_v26 = vld [vmem:[%s31296_s10 + $0x4b0] ss:$8 sps:$4 sm:$0xff]   ;;  %v23699_v52 = vld [vmem:[%s31296_s10 + $0x5e4] ss:$8 sps:$4 sm:$0xff]  }
 0xe2c   : > { %13315 = vmatprep.subr.bf16.mxu0 %v23636_v16  ;;  %v23702_v16 = vld [vmem:[%s31296_s10 + $0x5f4] ss:$8 sps:$4 sm:$0xff]  }
 0xe2f   : > { %13316 = vmatpush1.bf16.msra.mxu0 %v23634_v23  ;;  %v23700_v23 = vld [vmem:[%s31296_s10 + $0x5f0] ss:$8 sps:$4 sm:$0xff]  }
 0xe30   : > { %13317 = vmatprep.subr.bf16.mxu0 %v23639_v53  ;;  %v23705_v53 = vld [vmem:[%s31296_s10 + $0x604] ss:$8 sps:$4 sm:$0xff]  }
 0xe33   : > { %13318 = vmatpush1.bf16.msra.mxu0 %v23637_v40  ;;  %v23703_v40 = vld [vmem:[%s31296_s10 + $0x600] ss:$8 sps:$4 sm:$0xff]  }
 0xe34   : > { %13319 = vmatprep.subr.bf16.mxu0 %v23642_v47  ;;  %v23708_v47 = vld [vmem:[%s31296_s10 + $0x614] ss:$8 sps:$4 sm:$0xff]  }
 0xe37   : > { %13320 = vmatpush1.bf16.msra.mxu0 %v23640_v26  ;;  %v23706_v26 = vld [vmem:[%s31296_s10 + $0x610] ss:$8 sps:$4 sm:$0xff]  }
 0xe38   : > { %13321 = vmatprep.subr.bf16.mxu0 %v23645_v32  ;;  %v23711_v32 = vld [vmem:[%s31296_s10 + $0x624] ss:$8 sps:$4 sm:$0xff]  }
 0xe3b   : > { %13322 = vmatpush1.bf16.msra.mxu0 %v23643_v21  ;;  %v23709_v21 = vld [vmem:[%s31296_s10 + $0x620] ss:$8 sps:$4 sm:$0xff]  }
 0xe3c   : > { %13323 = vmatprep.subr.bf16.mxu0 %v23648_v12  ;;  %v23717_v12 = vld [vmem:[%s31296_s10 + $0x644] ss:$8 sps:$4 sm:$0xff]  }
 0xe3f   : > { %13324 = vmatpush1.bf16.msra.mxu0 %v23646_v13  ;;  %v23715_v13 = vld [vmem:[%s31296_s10 + $0x640] ss:$8 sps:$4 sm:$0xff]  }
 0xe40   : > { %13325 = vmatprep.subr.bf16.mxu0 %v23651_v39  ;;  %v23720_v39 = vld [vmem:[%s31296_s10 + $0x654] ss:$8 sps:$4 sm:$0xff]  }
 0xe43   : > { %13326 = vmatpush1.bf16.msra.mxu0 %v23649_v29  ;;  %v23718_v29 = vld [vmem:[%s31296_s10 + $0x650] ss:$8 sps:$4 sm:$0xff]  }
 0xe44   : > { %13327 = vmatprep.subr.bf16.mxu0 %v23654_v4  ;;  %v23723_v4 = vld [vmem:[%s31296_s10 + $0x664] ss:$8 sps:$4 sm:$0xff]  }
 0xe47   : > { %13328 = vmatpush1.bf16.msra.mxu0 %v23652_v27  ;;  %v23721_v27 = vld [vmem:[%s31296_s10 + $0x660] ss:$8 sps:$4 sm:$0xff]  }
 0xe48   : > { %13329 = vmatprep.subr.bf16.mxu0 %v23657_v19  ;;  %v23726_v19 = vld [vmem:[%s31296_s10 + $0x674] ss:$8 sps:$4 sm:$0xff]  }
 0xe4b   : > { %13330 = vmatpush1.bf16.msra.mxu0 %v23655_v45  ;;  %v23724_v45 = vld [vmem:[%s31296_s10 + $0x670] ss:$8 sps:$4 sm:$0xff]  }
 0xe4c   : > { %13331 = vmatprep.subr.bf16.mxu0 %v23660_v49  ;;  %v23729_v49 = vld [vmem:[%s31296_s10 + $0x684] ss:$8 sps:$4 sm:$0xff]  }
 0xe4f   : > { %13332 = vmatpush1.bf16.msra.mxu0 %v23658_v24  ;;  %v23727_v24 = vld [vmem:[%s31296_s10 + $0x680] ss:$8 sps:$4 sm:$0xff]  }
 0xe50   : > { %13333 = vmatprep.subr.bf16.mxu0 %v23663_v63  ;;  %v23732_v63 = vld [vmem:[%s31296_s10 + $0x694] ss:$8 sps:$4 sm:$0xff]  }
 0xe53   : > { %13334 = vmatpush1.bf16.msra.mxu0 %v23661_v34  ;;  %v23730_v34 = vld [vmem:[%s31296_s10 + $0x690] ss:$8 sps:$4 sm:$0xff]  }
 0xe54   : > { %13335 = vmatprep.subr.bf16.mxu0 %v23666_v60  ;;  %v23735_v60 = vld [vmem:[%s31296_s10 + $0x6a4] ss:$8 sps:$4 sm:$0xff]  }
 0xe57   : > { %13336 = vmatpush1.bf16.msra.mxu0 %v23664_v25  ;;  %v23733_v25 = vld [vmem:[%s31296_s10 + $0x6a0] ss:$8 sps:$4 sm:$0xff]  }
 0xe58   : > { %13337 = vmatprep.subr.bf16.mxu0 %v23669_v48  ;;  %v23738_v48 = vld [vmem:[%s31296_s10 + $0x6b4] ss:$8 sps:$4 sm:$0xff]  }
 0xe5b   : > { %13338 = vmatpush1.bf16.msra.mxu0 %v23667_v2  ;;  %v23736_v2 = vld [vmem:[%s31296_s10 + $0x6b0] ss:$8 sps:$4 sm:$0xff]  }
 0xe5c   : > { %13339 = vmatprep.subr.bf16.mxu0 %v23672_v56  ;;  %v23741_v56 = vld [vmem:[%s31296_s10 + $0x6c4] ss:$8 sps:$4 sm:$0xff]  }
 0xe5f   : > { %13340 = vmatpush1.bf16.msra.mxu0 %v23670_v35  ;;  %v23739_v35 = vld [vmem:[%s31296_s10 + $0x6c0] ss:$8 sps:$4 sm:$0xff]  }
 0xe60   : > { %13341 = vmatprep.subr.bf16.mxu0 %v23675_v7  ;;  %v23744_v7 = vld [vmem:[%s31296_s10 + $0x6d4] ss:$8 sps:$4 sm:$0xff]  }
 0xe63   : > { %13342 = vmatpush1.bf16.msra.mxu0 %v23673_v0  ;;  %v23742_v0 = vld [vmem:[%s31296_s10 + $0x6d0] ss:$8 sps:$4 sm:$0xff]  }
 0xe64   : > { %13343 = vmatprep.subr.bf16.mxu0 %v23678_v36  ;;  %v23747_v36 = vld [vmem:[%s31296_s10 + $0x6e4] ss:$8 sps:$4 sm:$0xff]  }
 0xe67   : > { %13344 = vmatpush1.bf16.msra.mxu0 %v23676_v62  ;;  %v23745_v62 = vld [vmem:[%s31296_s10 + $0x6e0] ss:$8 sps:$4 sm:$0xff]  }
 0xe68   : > { %13356 = vmatprep.subr.bf16.mxu0 %v23681_v58  ;;  %v23750_v58 = vld [vmem:[%s31296_s10 + $0x6f4] ss:$8 sps:$4 sm:$0xff]  }
 0xe6a   : > { %13346 = vmatmul.mubr.bf16.vlgmr.msra.gmra.mrb[92].mxu0 %v29061_v10  ;;  %v23690_v10 = vld [vmem:[%s31296_s10 + $0x5b4] ss:$8 sps:$4 sm:$0xff]  }
 0xe6b   : > { %13357 = vmatpush1.bf16.msra.mxu0 %v23679_v17  ;;  %13388 = vmatprep.mubr.bf16.mxu0 %v31325_v54  ;;  %v23748_v17 = vld [vmem:[%s31296_s10 + $0x6f0] ss:$8 sps:$4 sm:$0xff]  }
 0xe6c   : > { %13358 = vmatprep.subr.bf16.mxu0 %v23684_v1  ;;  %v23753_v1 = vld [vmem:[%s31296_s10 + $0x704] ss:$8 sps:$4 sm:$0xff]  }
 0xe6f   : > { %13359 = vmatpush1.bf16.msra.mxu0 %v23682_v33  ;;  %v13456_v33 = vrot.slane %v29030_v42, 3 }
 0xe70   : > { %13360 = vmatprep.subr.bf16.mxu0 %v23687_v37  ;;  %v13455_v37 = vrot.slane %v29011_v6, 3 }
 0xe73   : > { %13361 = vmatpush1.bf16.msra.mxu0 %v23685_v30  ;;  %v23751_v30 = vld [vmem:[%s31296_s10 + $0x700] ss:$8 sps:$4 sm:$0xff]  }
 0xe74   : > { %13362 = vmatprep.subr.bf16.mxu0 %v23690_v10  ;;  %v23756_v10 = vld [vmem:[%s31296_s10 + $0x714] ss:$8 sps:$4 sm:$0xff]  }
 0xe77   : > { %13363 = vmatpush1.bf16.msra.mxu0 %v23688_v15  ;;  %v13457_v15 = vsel %vm4240_vm11, %v13455_v37, %v13456_v33  ;;  %v23816_v33 = vld [vmem:[%s31296_s10 + $0x854] ss:$8 sps:$4 sm:$0xff]   ;;  %v23814_v37 = vld [vmem:[%s31296_s10 + $0x850] ss:$8 sps:$4 sm:$0xff]  }
 0xe78   : > { %13364 = vmatprep.subr.bf16.mxu0 %v23693_v50  ;;  %v23754_v50 = vld [vmem:[%s31296_s10 + $0x710] ss:$8 sps:$4 sm:$0xff]  }
 0xe7b   : > { %13365 = vmatpush1.bf16.msra.mxu0 %v23691_v31  ;;  %v23759_v31 = vld [vmem:[%s31296_s10 + $0x724] ss:$8 sps:$4 sm:$0xff]  }
 0xe7c   : > { %13366 = vmatprep.subr.bf16.mxu0 %v23696_v18  ;;  %v23757_v18 = vld [vmem:[%s31296_s10 + $0x720] ss:$8 sps:$4 sm:$0xff]  }
 0xe7f   : > { %13367 = vmatpush1.bf16.msra.mxu0 %v23694_v57  ;;  %v23762_v57 = vld [vmem:[%s31296_s10 + $0x734] ss:$8 sps:$4 sm:$0xff]  }
 0xe80   : > { %13368 = vmatprep.subr.bf16.mxu0 %v23699_v52  ;;  %v23760_v52 = vld [vmem:[%s31296_s10 + $0x730] ss:$8 sps:$4 sm:$0xff]  }
 0xe83   : > { %13369 = vmatpush1.bf16.msra.mxu0 %v23697_v8  ;;  %v23765_v8 = vld [vmem:[%s31296_s10 + $0x744] ss:$8 sps:$4 sm:$0xff]  }
 0xe84   : > { %13370 = vmatprep.subr.bf16.mxu0 %v23702_v16  ;;  %v23763_v16 = vld [vmem:[%s31296_s10 + $0x740] ss:$8 sps:$4 sm:$0xff]  }
 0xe87   : > { %13371 = vmatpush1.bf16.msra.mxu0 %v23700_v23  ;;  %v23768_v23 = vld [vmem:[%s31296_s10 + $0x754] ss:$8 sps:$4 sm:$0xff]  }
 0xe88   : > { %13707 = vmatprep.subr.bf16.mxu0 %v23705_v53  ;;  %v23766_v53 = vld [vmem:[%s31296_s10 + $0x750] ss:$8 sps:$4 sm:$0xff]  }
 0xe8a   : > { %13389 = vmatmul.mubr.bf16.vlgmr.msra.gmra.mrb[92].mxu0 %v29129_v11  ;;  %v23714_v11 = vld [vmem:[%s31296_s10 + $0x634] ss:$8 sps:$4 sm:$0xff]  }
 0xe8b   : > { %13708 = vmatpush1.bf16.msra.mxu0 %v23703_v40  ;;  %13739 = vmatprep.mubr.bf16.mxu0 %v29049_v43  ;;  %v23712_v43 = vld [vmem:[%s31296_s10 + $0x630] ss:$8 sps:$4 sm:$0xff]   ;;  %v23771_v40 = vld [vmem:[%s31296_s10 + $0x764] ss:$8 sps:$4 sm:$0xff]  }
 0xe8c   : > { %13709 = vmatprep.subr.bf16.mxu0 %v23708_v47  ;;  %v23769_v47 = vld [vmem:[%s31296_s10 + $0x760] ss:$8 sps:$4 sm:$0xff]  }
 0xe8f   : > { %13710 = vmatpush1.bf16.msra.mxu0 %v23706_v26  ;;  %v23774_v26 = vld [vmem:[%s31296_s10 + $0x774] ss:$8 sps:$4 sm:$0xff]  }
 0xe90   : > { %13711 = vmatprep.subr.bf16.mxu0 %v23711_v32  ;;  %v23772_v32 = vld [vmem:[%s31296_s10 + $0x770] ss:$8 sps:$4 sm:$0xff]  }
 0xe93   : > { %13712 = vmatpush1.bf16.msra.mxu0 %v23709_v21  ;;  %v23777_v21 = vld [vmem:[%s31296_s10 + $0x784] ss:$8 sps:$4 sm:$0xff]  }
 0xe94   : > { %13713 = vmatprep.subr.bf16.mxu0 %v23714_v11  ;;  %v13461_v11 = vrot.slane %v29116_v51, 3 }
 0xe97   : > { %13714 = vmatpush1.bf16.msra.mxu0 %v23712_v43  ;;  %v13462_v43 = vrot.slane %v29111_v55, 3 }
 0xe98   : > { %13715 = vmatprep.subr.bf16.mxu0 %v23717_v12  ;;  %v23775_v12 = vld [vmem:[%s31296_s10 + $0x780] ss:$8 sps:$4 sm:$0xff]  }
 0xe9b   : > { %13716 = vmatpush1.bf16.msra.mxu0 %v23715_v13  ;;  %v23780_v13 = vld [vmem:[%s31296_s10 + $0x794] ss:$8 sps:$4 sm:$0xff]  }
 0xe9c   : > { %13717 = vmatprep.subr.bf16.mxu0 %v23720_v39  ;;  %v13463_v39 = vsel %vm4240_vm11, %v13461_v11, %v13462_v43  ;;  %v23846_v11 = vld [vmem:[%s31296_s10 + $0x8f4] ss:$8 sps:$4 sm:$0xff]   ;;  %v23844_v43 = vld [vmem:[%s31296_s10 + $0x8f0] ss:$8 sps:$4 sm:$0xff]  }
 0xe9f   : > { %13718 = vmatpush1.bf16.msra.mxu0 %v23718_v29  ;;  %v23778_v29 = vld [vmem:[%s31296_s10 + $0x790] ss:$8 sps:$4 sm:$0xff]  }
 0xea0   : > { %13719 = vmatprep.subr.bf16.mxu0 %v23723_v4  ;;  %v23783_v4 = vld [vmem:[%s31296_s10 + $0x7a4] ss:$8 sps:$4 sm:$0xff]  }
 0xea3   : > { %13720 = vmatpush1.bf16.msra.mxu0 %v23721_v27  ;;  %v23781_v27 = vld [vmem:[%s31296_s10 + $0x7a0] ss:$8 sps:$4 sm:$0xff]  }
 0xea4   : > { %13721 = vmatprep.subr.bf16.mxu0 %v23726_v19  ;;  %v23786_v19 = vld [vmem:[%s31296_s10 + $0x7b4] ss:$8 sps:$4 sm:$0xff]  }
 0xea7   : > { %13722 = vmatpush1.bf16.msra.mxu0 %v23724_v45  ;;  %v23789_v45 = vld [vmem:[%s31296_s10 + $0x7c4] ss:$8 sps:$4 sm:$0xff]  }
 0xea8   : > { %13723 = vmatprep.subr.bf16.mxu0 %v23729_v49  ;;  %v23787_v49 = vld [vmem:[%s31296_s10 + $0x7c0] ss:$8 sps:$4 sm:$0xff]  }
 0xeab   : > { %13724 = vmatpush1.bf16.msra.mxu0 %v23727_v24  ;;  %v23792_v24 = vld [vmem:[%s31296_s10 + $0x7d4] ss:$8 sps:$4 sm:$0xff]  }
 0xeac   : > { %13725 = vmatprep.subr.bf16.mxu0 %v23732_v63  ;;  %v23790_v63 = vld [vmem:[%s31296_s10 + $0x7d0] ss:$8 sps:$4 sm:$0xff]  }
 0xeaf   : > { %13726 = vmatpush1.bf16.msra.mxu0 %v23730_v34  ;;  %v23795_v34 = vld [vmem:[%s31296_s10 + $0x7e4] ss:$8 sps:$4 sm:$0xff]  }
 0xeb0   : > { %13727 = vmatprep.subr.bf16.mxu0 %v23735_v60  ;;  %v23793_v60 = vld [vmem:[%s31296_s10 + $0x7e0] ss:$8 sps:$4 sm:$0xff]  }
 0xeb3   : > { %13728 = vmatpush1.bf16.msra.mxu0 %v23733_v25  ;;  %v23798_v25 = vld [vmem:[%s31296_s10 + $0x7f4] ss:$8 sps:$4 sm:$0xff]  }
 0xeb4   : > { %13729 = vmatprep.subr.bf16.mxu0 %v23738_v48  ;;  %v23796_v48 = vld [vmem:[%s31296_s10 + $0x7f0] ss:$8 sps:$4 sm:$0xff]  }
 0xeb7   : > { %13730 = vmatpush1.bf16.msra.mxu0 %v23736_v2  ;;  %v23801_v2 = vld [vmem:[%s31296_s10 + $0x804] ss:$8 sps:$4 sm:$0xff]  }
 0xeb8   : > { %13731 = vmatprep.subr.bf16.mxu0 %v23741_v56  ;;  %v23799_v56 = vld [vmem:[%s31296_s10 + $0x800] ss:$8 sps:$4 sm:$0xff]  }
 0xebb   : > { %13732 = vmatpush1.bf16.msra.mxu0 %v23739_v35  ;;  %v23804_v35 = vld [vmem:[%s31296_s10 + $0x814] ss:$8 sps:$4 sm:$0xff]  }
 0xebc   : > { %13733 = vmatprep.subr.bf16.mxu0 %v23744_v7  ;;  %v23802_v7 = vld [vmem:[%s31296_s10 + $0x810] ss:$8 sps:$4 sm:$0xff]  }
 0xebf   : > { %13734 = vmatpush1.bf16.msra.mxu0 %v23742_v0  ;;  %v23807_v0 = vld [vmem:[%s31296_s10 + $0x824] ss:$8 sps:$4 sm:$0xff]  }
 0xec0   : > { %13735 = vmatprep.subr.bf16.mxu0 %v23747_v36  ;;  %v23805_v36 = vld [vmem:[%s31296_s10 + $0x820] ss:$8 sps:$4 sm:$0xff]  }
 0xec3   : > { %13736 = vmatpush1.bf16.msra.mxu0 %v23745_v62  ;;  %v23810_v62 = vld [vmem:[%s31296_s10 + $0x834] ss:$8 sps:$4 sm:$0xff]  }
 0xec4   : > { %13737 = vmatprep.subr.bf16.mxu0 %v23750_v58  ;;  %v23808_v58 = vld [vmem:[%s31296_s10 + $0x830] ss:$8 sps:$4 sm:$0xff]  }
 0xec7   : > { %13738 = vmatpush1.bf16.msra.mxu0 %v23748_v17  ;;  %v23813_v17 = vld [vmem:[%s31296_s10 + $0x844] ss:$8 sps:$4 sm:$0xff]  }
 0xec8   : > { %13750 = vmatprep.subr.bf16.mxu0 %v23753_v1  ;;  %v23811_v1 = vld [vmem:[%s31296_s10 + $0x840] ss:$8 sps:$4 sm:$0xff]  }
 0xeca   : > { %13740 = vmatmul.mubr.bf16.vlgmr.msra.gmra.mrb[92].mxu0 %v13457_v15  ;;  %v23822_v15 = vld [vmem:[%s31296_s10 + $0x874] ss:$8 sps:$4 sm:$0xff]  }
 0xecb   : > { %13751 = vmatpush1.bf16.msra.mxu0 %v23751_v30  ;;  %13782 = vmatprep.mubr.bf16.mxu0 %v31325_v54  ;;  %v23819_v30 = vld [vmem:[%s31296_s10 + $0x864] ss:$8 sps:$4 sm:$0xff]  }
 0xecc   : > { %13752 = vmatprep.subr.bf16.mxu0 %v23756_v10  ;;  %v23817_v10 = vld [vmem:[%s31296_s10 + $0x860] ss:$8 sps:$4 sm:$0xff]  }
 0xecf   : > { %13753 = vmatpush1.bf16.msra.mxu0 %v23754_v50  ;;  %v23820_v50 = vld [vmem:[%s31296_s10 + $0x870] ss:$8 sps:$4 sm:$0xff]  }
 0xed0   : > { %13754 = vmatprep.subr.bf16.mxu0 %v23759_v31  ;;  %v23825_v31 = vld [vmem:[%s31296_s10 + $0x884] ss:$8 sps:$4 sm:$0xff]  }
 0xed3   : > { %13755 = vmatpush1.bf16.msra.mxu0 %v23757_v18  ;;  %v23823_v18 = vld [vmem:[%s31296_s10 + $0x880] ss:$8 sps:$4 sm:$0xff]  }
 0xed4   : > { %13756 = vmatprep.subr.bf16.mxu0 %v23762_v57  ;;  %v23828_v57 = vld [vmem:[%s31296_s10 + $0x894] ss:$8 sps:$4 sm:$0xff]  }
 0xed7   : > { %13757 = vmatpush1.bf16.msra.mxu0 %v23760_v52  ;;  %v23826_v52 = vld [vmem:[%s31296_s10 + $0x890] ss:$8 sps:$4 sm:$0xff]  }
 0xed8   : > { %13758 = vmatprep.subr.bf16.mxu0 %v23765_v8  ;;  %v23831_v8 = vld [vmem:[%s31296_s10 + $0x8a4] ss:$8 sps:$4 sm:$0xff]  }
 0xedb   : > { %13759 = vmatpush1.bf16.msra.mxu0 %v23763_v16  ;;  %v23829_v16 = vld [vmem:[%s31296_s10 + $0x8a0] ss:$8 sps:$4 sm:$0xff]  }
 0xedc   : > { %13760 = vmatprep.subr.bf16.mxu0 %v23768_v23  ;;  %v23832_v23 = vld [vmem:[%s31296_s10 + $0x8b0] ss:$8 sps:$4 sm:$0xff]  }
 0xedf   : > { %13761 = vmatpush1.bf16.msra.mxu0 %v23766_v53  ;;  %v23837_v53 = vld [vmem:[%s31296_s10 + $0x8c4] ss:$8 sps:$4 sm:$0xff]  }
 0xee0   : > { %13762 = vmatprep.subr.bf16.mxu0 %v23771_v40  ;;  %v23835_v40 = vld [vmem:[%s31296_s10 + $0x8c0] ss:$8 sps:$4 sm:$0xff]  }
 0xee3   : > { %13763 = vmatpush1.bf16.msra.mxu0 %v23769_v47  ;;  %v23840_v47 = vld [vmem:[%s31296_s10 + $0x8d4] ss:$8 sps:$4 sm:$0xff]  }
 0xee4   : > { %13764 = vmatprep.subr.bf16.mxu0 %v23774_v26  ;;  %v23838_v26 = vld [vmem:[%s31296_s10 + $0x8d0] ss:$8 sps:$4 sm:$0xff]  }
 0xee7   : > { %13765 = vmatpush1.bf16.msra.mxu0 %v23772_v32  ;;  %v23843_v32 = vld [vmem:[%s31296_s10 + $0x8e4] ss:$8 sps:$4 sm:$0xff]  }
 0xee8   : > { %14110 = vmatprep.subr.bf16.mxu0 %v23777_v21  ;;  %v23841_v21 = vld [vmem:[%s31296_s10 + $0x8e0] ss:$8 sps:$4 sm:$0xff]  }
 0xeea   : > { %13783 = vmatmul.mubr.bf16.vlgmr.msra.gmra.mrb[92].mxu0 %v13463_v39  ;;  %v23852_v39 = vld [vmem:[%s31296_s10 + $0x914] ss:$8 sps:$4 sm:$0xff]  }
 0xeeb   : > { %14111 = vmatpush1.bf16.msra.mxu0 %v23775_v12  ;;  %14142 = vmatprep.mubr.bf16.mxu0 %v29069_v20  ;;  %v23784_v20 = vld [vmem:[%s31296_s10 + $0x7b0] ss:$8 sps:$4 sm:$0xff]   ;;  %v23849_v12 = vld [vmem:[%s31296_s10 + $0x904] ss:$8 sps:$4 sm:$0xff]  }
 0xeec   : > { %14112 = vmatprep.subr.bf16.mxu0 %v23780_v13  ;;  %v23847_v13 = vld [vmem:[%s31296_s10 + $0x900] ss:$8 sps:$4 sm:$0xff]  }
 0xeef   : > { %14113 = vmatpush1.bf16.msra.mxu0 %v23778_v29  ;;  %v23850_v29 = vld [vmem:[%s31296_s10 + $0x910] ss:$8 sps:$4 sm:$0xff]  }
 0xef0   : > { %14114 = vmatprep.subr.bf16.mxu0 %v23783_v4  ;;  %v23855_v4 = vld [vmem:[%s31296_s10 + $0x924] ss:$8 sps:$4 sm:$0xff]  }
 0xef3   : > { %14115 = vmatpush1.bf16.msra.mxu0 %v23781_v27  ;;  %v23853_v27 = vld [vmem:[%s31296_s10 + $0x920] ss:$8 sps:$4 sm:$0xff]  }
 0xef4   : > { %14116 = vmatprep.subr.bf16.mxu0 %v23786_v19  ;;  %v23861_v19 = vld [vmem:[%s31296_s10 + $0x944] ss:$8 sps:$4 sm:$0xff]  }
 0xef7   : > { %14117 = vmatpush1.bf16.msra.mxu0 %v23784_v20  ;;  %v23859_v20 = vld [vmem:[%s31296_s10 + $0x940] ss:$8 sps:$4 sm:$0xff]  }
 0xef8   : > { %14118 = vmatprep.subr.bf16.mxu0 %v23789_v45  ;;  %v23864_v45 = vld [vmem:[%s31296_s10 + $0x954] ss:$8 sps:$4 sm:$0xff]  }
 0xefb   : > { %14119 = vmatpush1.bf16.msra.mxu0 %v23787_v49  ;;  %v23862_v49 = vld [vmem:[%s31296_s10 + $0x950] ss:$8 sps:$4 sm:$0xff]  }
 0xefc   : > { %14120 = vmatprep.subr.bf16.mxu0 %v23792_v24  ;;  %v23867_v24 = vld [vmem:[%s31296_s10 + $0x964] ss:$8 sps:$4 sm:$0xff]  }
 0xeff   : > { %14121 = vmatpush1.bf16.msra.mxu0 %v23790_v63  ;;  %v23865_v63 = vld [vmem:[%s31296_s10 + $0x960] ss:$8 sps:$4 sm:$0xff]  }
 0xf00   : > { %14122 = vmatprep.subr.bf16.mxu0 %v23795_v34  ;;  %v23870_v34 = vld [vmem:[%s31296_s10 + $0x974] ss:$8 sps:$4 sm:$0xff]  }
 0xf03   : > { %14123 = vmatpush1.bf16.msra.mxu0 %v23793_v60  ;;  %v23868_v60 = vld [vmem:[%s31296_s10 + $0x970] ss:$8 sps:$4 sm:$0xff]  }
 0xf04   : > { %14124 = vmatprep.subr.bf16.mxu0 %v23798_v25  ;;  %v23873_v25 = vld [vmem:[%s31296_s10 + $0x984] ss:$8 sps:$4 sm:$0xff]  }
 0xf07   : > { %14125 = vmatpush1.bf16.msra.mxu0 %v23796_v48  ;;  %v23871_v48 = vld [vmem:[%s31296_s10 + $0x980] ss:$8 sps:$4 sm:$0xff]  }
 0xf08   : > { %14126 = vmatprep.subr.bf16.mxu0 %v23801_v2  ;;  %v23876_v2 = vld [vmem:[%s31296_s10 + $0x994] ss:$8 sps:$4 sm:$0xff]  }
 0xf0b   : > { %14127 = vmatpush1.bf16.msra.mxu0 %v23799_v56  ;;  %v23874_v56 = vld [vmem:[%s31296_s10 + $0x990] ss:$8 sps:$4 sm:$0xff]  }
 0xf0c   : > { %14128 = vmatprep.subr.bf16.mxu0 %v23804_v35  ;;  %v23879_v35 = vld [vmem:[%s31296_s10 + $0x9a4] ss:$8 sps:$4 sm:$0xff]  }
 0xf0f   : > { %14129 = vmatpush1.bf16.msra.mxu0 %v23802_v7  ;;  %v23877_v7 = vld [vmem:[%s31296_s10 + $0x9a0] ss:$8 sps:$4 sm:$0xff]  }
 0xf10   : > { %14130 = vmatprep.subr.bf16.mxu0 %v23807_v0  ;;  %v23882_v0 = vld [vmem:[%s31296_s10 + $0x9b4] ss:$8 sps:$4 sm:$0xff]  }
 0xf13   : > { %14131 = vmatpush1.bf16.msra.mxu0 %v23805_v36  ;;  %v23880_v36 = vld [vmem:[%s31296_s10 + $0x9b0] ss:$8 sps:$4 sm:$0xff]  }
 0xf14   : > { %14132 = vmatprep.subr.bf16.mxu0 %v23810_v62  ;;  %v23885_v62 = vld [vmem:[%s31296_s10 + $0x9c4] ss:$8 sps:$4 sm:$0xff]  }
 0xf17   : > { %14133 = vmatpush1.bf16.msra.mxu0 %v23808_v58  ;;  %v23883_v58 = vld [vmem:[%s31296_s10 + $0x9c0] ss:$8 sps:$4 sm:$0xff]  }
 0xf18   : > { %14134 = vmatprep.subr.bf16.mxu0 %v23813_v17  ;;  %v23888_v17 = vld [vmem:[%s31296_s10 + $0x9d4] ss:$8 sps:$4 sm:$0xff]  }
 0xf1b   : > { %14135 = vmatpush1.bf16.msra.mxu0 %v23811_v1  ;;  %v23886_v1 = vld [vmem:[%s31296_s10 + $0x9d0] ss:$8 sps:$4 sm:$0xff]  }
 0xf1c   : > { %14136 = vmatprep.subr.bf16.mxu0 %v23816_v33  ;;  %v23891_v33 = vld [vmem:[%s31296_s10 + $0x9e4] ss:$8 sps:$4 sm:$0xff]  }
 0xf1f   : > { %14137 = vmatpush1.bf16.msra.mxu0 %v23814_v37  ;;  %v23889_v37 = vld [vmem:[%s31296_s10 + $0x9e0] ss:$8 sps:$4 sm:$0xff]  }
 0xf20   : > { %14138 = vmatprep.subr.bf16.mxu0 %v23819_v30  ;;  %v23894_v30 = vld [vmem:[%s31296_s10 + $0x9f4] ss:$8 sps:$4 sm:$0xff]  }
 0xf23   : > { %14139 = vmatpush1.bf16.msra.mxu0 %v23817_v10  ;;  %v23892_v10 = vld [vmem:[%s31296_s10 + $0x9f0] ss:$8 sps:$4 sm:$0xff]  }
 0xf24   : > { %14140 = vmatprep.subr.bf16.mxu0 %v23822_v15  ;;  %v23897_v15 = vld [vmem:[%s31296_s10 + $0xa04] ss:$8 sps:$4 sm:$0xff]  }
 0xf27   : > { %14141 = vmatpush1.bf16.msra.mxu0 %v23820_v50  ;;  %v14250_v50 = vrot.slane %v29030_v42, 5 }
 0xf28   : > { %14153 = vmatprep.subr.bf16.mxu0 %v23825_v31  ;;  %v14249_v31 = vrot.slane %v29011_v6, 5 }
 0xf2a   : > { %14143 = vmatmul.mubr.bf16.vlgmr.msra.gmra.mrb[92].mxu0 %v29075_v61  ;;  %v23834_v61 = vld [vmem:[%s31296_s10 + $0x8b4] ss:$8 sps:$4 sm:$0xff]  }
 0xf2b   : > { %14154 = vmatpush1.bf16.msra.mxu0 %v23823_v18  ;;  %14185 = vmatprep.mubr.bf16.mxu0 %v31325_v54  ;;  %v23895_v18 = vld [vmem:[%s31296_s10 + $0xa00] ss:$8 sps:$4 sm:$0xff]  }
 0xf2c   : > { %14155 = vmatprep.subr.bf16.mxu0 %v23828_v57  ;;  %v23900_v57 = vld [vmem:[%s31296_s10 + $0xa14] ss:$8 sps:$4 sm:$0xff]  }
 0xf2f   : > { %14156 = vmatpush1.bf16.msra.mxu0 %v23826_v52  ;;  %v14251_v52 = vsel %vm5132_vm15, %v14249_v31, %v14250_v50  ;;  %v23966_v50 = vld [vmem:[%s31296_s10 + $0xb74] ss:$8 sps:$4 sm:$0xff]   ;;  %v23964_v31 = vld [vmem:[%s31296_s10 + $0xb70] ss:$8 sps:$4 sm:$0xff]  }
 0xf30   : > { %14157 = vmatprep.subr.bf16.mxu0 %v23831_v8  ;;  %v23898_v8 = vld [vmem:[%s31296_s10 + $0xa10] ss:$8 sps:$4 sm:$0xff]  }
 0xf33   : > { %14158 = vmatpush1.bf16.msra.mxu0 %v23829_v16  ;;  %v23903_v16 = vld [vmem:[%s31296_s10 + $0xa24] ss:$8 sps:$4 sm:$0xff]  }
 0xf34   : > { %14159 = vmatprep.subr.bf16.mxu0 %v23834_v61  ;;  %v23901_v61 = vld [vmem:[%s31296_s10 + $0xa20] ss:$8 sps:$4 sm:$0xff]  }
 0xf37   : > { %14160 = vmatpush1.bf16.msra.mxu0 %v23832_v23  ;;  %v23906_v23 = vld [vmem:[%s31296_s10 + $0xa34] ss:$8 sps:$4 sm:$0xff]  }
 0xf38   : > { %14161 = vmatprep.subr.bf16.mxu0 %v23837_v53  ;;  %v23904_v53 = vld [vmem:[%s31296_s10 + $0xa30] ss:$8 sps:$4 sm:$0xff]  }
 0xf3b   : > { %14162 = vmatpush1.bf16.msra.mxu0 %v23835_v40  ;;  %v23909_v40 = vld [vmem:[%s31296_s10 + $0xa44] ss:$8 sps:$4 sm:$0xff]  }
 0xf3c   : > { %14163 = vmatprep.subr.bf16.mxu0 %v23840_v47  ;;  %v23907_v47 = vld [vmem:[%s31296_s10 + $0xa40] ss:$8 sps:$4 sm:$0xff]  }
 0xf3f   : > { %14164 = vmatpush1.bf16.msra.mxu0 %v23838_v26  ;;  %v23912_v26 = vld [vmem:[%s31296_s10 + $0xa54] ss:$8 sps:$4 sm:$0xff]  }
 0xf40   : > { %14165 = vmatprep.subr.bf16.mxu0 %v23843_v32  ;;  %v23910_v32 = vld [vmem:[%s31296_s10 + $0xa50] ss:$8 sps:$4 sm:$0xff]  }
 0xf43   : > { %14166 = vmatpush1.bf16.msra.mxu0 %v23841_v21  ;;  %v23915_v21 = vld [vmem:[%s31296_s10 + $0xa64] ss:$8 sps:$4 sm:$0xff]  }
 0xf44   : > { %14167 = vmatprep.subr.bf16.mxu0 %v23846_v11  ;;  %v23913_v11 = vld [vmem:[%s31296_s10 + $0xa60] ss:$8 sps:$4 sm:$0xff]  }
 0xf47   : > { %14168 = vmatpush1.bf16.msra.mxu0 %v23844_v43  ;;  %v23918_v43 = vld [vmem:[%s31296_s10 + $0xa74] ss:$8 sps:$4 sm:$0xff]  }
 0xf48   : > { %14501 = vmatprep.subr.bf16.mxu0 %v23849_v12  ;;  %v23916_v12 = vld [vmem:[%s31296_s10 + $0xa70] ss:$8 sps:$4 sm:$0xff]  }
 0xf4a   : > { %14186 = vmatmul.mubr.bf16.vlgmr.msra.gmra.mrb[92].mxu0 %v29136_v28  ;;  %v23858_v28 = vld [vmem:[%s31296_s10 + $0x934] ss:$8 sps:$4 sm:$0xff]  }
 0xf4b   : > { %14502 = vmatpush1.bf16.msra.mxu0 %v23847_v13  ;;  %14533 = vmatprep.mubr.bf16.mxu0 %v29052_v38  ;;  %v23856_v38 = vld [vmem:[%s31296_s10 + $0x930] ss:$8 sps:$4 sm:$0xff]   ;;  %v23921_v13 = vld [vmem:[%s31296_s10 + $0xa84] ss:$8 sps:$4 sm:$0xff]  }
 0xf4c   : > { %14503 = vmatprep.subr.bf16.mxu0 %v23852_v39  ;;  %v14255_v39 = vrot.slane %v29116_v51, 5 }
 0xf4f   : > { %14504 = vmatpush1.bf16.msra.mxu0 %v23850_v29  ;;  %v14256_v29 = vrot.slane %v29111_v55, 5 }
 0xf50   : > { %14505 = vmatprep.subr.bf16.mxu0 %v23855_v4  ;;  %v23919_v4 = vld [vmem:[%s31296_s10 + $0xa80] ss:$8 sps:$4 sm:$0xff]  }
 0xf53   : > { %14506 = vmatpush1.bf16.msra.mxu0 %v23853_v27  ;;  %v23924_v27 = vld [vmem:[%s31296_s10 + $0xa94] ss:$8 sps:$4 sm:$0xff]  }
 0xf54   : > { %14507 = vmatprep.subr.bf16.mxu0 %v23858_v28  ;;  %v14257_v28 = vsel %vm5132_vm15, %v14255_v39, %v14256_v29  ;;  %v23996_v39 = vld [vmem:[%s31296_s10 + $0xc14] ss:$8 sps:$4 sm:$0xff]   ;;  %v23994_v29 = vld [vmem:[%s31296_s10 + $0xc10] ss:$8 sps:$4 sm:$0xff]  }
 0xf57   : > { %14508 = vmatpush1.bf16.msra.mxu0 %v23856_v38  ;;  %v23922_v38 = vld [vmem:[%s31296_s10 + $0xa90] ss:$8 sps:$4 sm:$0xff]  }
 0xf58   : > { %14509 = vmatprep.subr.bf16.mxu0 %v23861_v19  ;;  %v23927_v19 = vld [vmem:[%s31296_s10 + $0xaa4] ss:$8 sps:$4 sm:$0xff]  }
 0xf5b   : > { %14510 = vmatpush1.bf16.msra.mxu0 %v23859_v20  ;;  %v23925_v20 = vld [vmem:[%s31296_s10 + $0xaa0] ss:$8 sps:$4 sm:$0xff]  }
 0xf5c   : > { %14511 = vmatprep.subr.bf16.mxu0 %v23864_v45  ;;  %v23930_v45 = vld [vmem:[%s31296_s10 + $0xab4] ss:$8 sps:$4 sm:$0xff]  }
 0xf5f   : > { %14512 = vmatpush1.bf16.msra.mxu0 %v23862_v49  ;;  %v23933_v49 = vld [vmem:[%s31296_s10 + $0xac4] ss:$8 sps:$4 sm:$0xff]  }
 0xf60   : > { %14513 = vmatprep.subr.bf16.mxu0 %v23867_v24  ;;  %v23931_v24 = vld [vmem:[%s31296_s10 + $0xac0] ss:$8 sps:$4 sm:$0xff]  }
 0xf63   : > { %14514 = vmatpush1.bf16.msra.mxu0 %v23865_v63  ;;  %v23936_v63 = vld [vmem:[%s31296_s10 + $0xad4] ss:$8 sps:$4 sm:$0xff]  }
 0xf64   : > { %14515 = vmatprep.subr.bf16.mxu0 %v23870_v34  ;;  %v23934_v34 = vld [vmem:[%s31296_s10 + $0xad0] ss:$8 sps:$4 sm:$0xff]  }
 0xf67   : > { %14516 = vmatpush1.bf16.msra.mxu0 %v23868_v60  ;;  %v23939_v60 = vld [vmem:[%s31296_s10 + $0xae4] ss:$8 sps:$4 sm:$0xff]  }
 0xf68   : > { %14517 = vmatprep.subr.bf16.mxu0 %v23873_v25  ;;  %v23937_v25 = vld [vmem:[%s31296_s10 + $0xae0] ss:$8 sps:$4 sm:$0xff]  }
 0xf6b   : > { %14518 = vmatpush1.bf16.msra.mxu0 %v23871_v48  ;;  %v23942_v48 = vld [vmem:[%s31296_s10 + $0xaf4] ss:$8 sps:$4 sm:$0xff]  }
 0xf6c   : > { %14519 = vmatprep.subr.bf16.mxu0 %v23876_v2  ;;  %v23940_v2 = vld [vmem:[%s31296_s10 + $0xaf0] ss:$8 sps:$4 sm:$0xff]  }
 0xf6f   : > { %14520 = vmatpush1.bf16.msra.mxu0 %v23874_v56  ;;  %v23945_v56 = vld [vmem:[%s31296_s10 + $0xb04] ss:$8 sps:$4 sm:$0xff]  }
 0xf70   : > { %14521 = vmatprep.subr.bf16.mxu0 %v23879_v35  ;;  %v23943_v35 = vld [vmem:[%s31296_s10 + $0xb00] ss:$8 sps:$4 sm:$0xff]  }
 0xf73   : > { %14522 = vmatpush1.bf16.msra.mxu0 %v23877_v7  ;;  %v23948_v7 = vld [vmem:[%s31296_s10 + $0xb14] ss:$8 sps:$4 sm:$0xff]  }
 0xf74   : > { %14523 = vmatprep.subr.bf16.mxu0 %v23882_v0  ;;  %v23946_v0 = vld [vmem:[%s31296_s10 + $0xb10] ss:$8 sps:$4 sm:$0xff]  }
 0xf77   : > { %14524 = vmatpush1.bf16.msra.mxu0 %v23880_v36  ;;  %v23951_v36 = vld [vmem:[%s31296_s10 + $0xb24] ss:$8 sps:$4 sm:$0xff]  }
 0xf78   : > { %14525 = vmatprep.subr.bf16.mxu0 %v23885_v62  ;;  %v23949_v62 = vld [vmem:[%s31296_s10 + $0xb20] ss:$8 sps:$4 sm:$0xff]  }
 0xf7b   : > { %14526 = vmatpush1.bf16.msra.mxu0 %v23883_v58  ;;  %v23954_v58 = vld [vmem:[%s31296_s10 + $0xb34] ss:$8 sps:$4 sm:$0xff]  }
 0xf7c   : > { %14527 = vmatprep.subr.bf16.mxu0 %v23888_v17  ;;  %v23952_v17 = vld [vmem:[%s31296_s10 + $0xb30] ss:$8 sps:$4 sm:$0xff]  }
 0xf7f   : > { %14528 = vmatpush1.bf16.msra.mxu0 %v23886_v1  ;;  %v23957_v1 = vld [vmem:[%s31296_s10 + $0xb44] ss:$8 sps:$4 sm:$0xff]  }
 0xf80   : > { %14529 = vmatprep.subr.bf16.mxu0 %v23891_v33  ;;  %v23955_v33 = vld [vmem:[%s31296_s10 + $0xb40] ss:$8 sps:$4 sm:$0xff]  }
 0xf83   : > { %14530 = vmatpush1.bf16.msra.mxu0 %v23889_v37  ;;  %v23960_v37 = vld [vmem:[%s31296_s10 + $0xb54] ss:$8 sps:$4 sm:$0xff]  }
 0xf84   : > { %14531 = vmatprep.subr.bf16.mxu0 %v23894_v30  ;;  %v23958_v30 = vld [vmem:[%s31296_s10 + $0xb50] ss:$8 sps:$4 sm:$0xff]  }
 0xf87   : > { %14532 = vmatpush1.bf16.msra.mxu0 %v23892_v10  ;;  %v23963_v10 = vld [vmem:[%s31296_s10 + $0xb64] ss:$8 sps:$4 sm:$0xff]  }
 0xf88   : > { %14544 = vmatprep.subr.bf16.mxu0 %v23897_v15  ;;  %v23961_v15 = vld [vmem:[%s31296_s10 + $0xb60] ss:$8 sps:$4 sm:$0xff]  }
 0xf8a   : > { %14534 = vmatmul.mubr.bf16.vlgmr.msra.gmra.mrb[92].mxu0 %v14251_v52  ;;  %v23972_v52 = vld [vmem:[%s31296_s10 + $0xb94] ss:$8 sps:$4 sm:$0xff]  }
 0xf8b   : > { %14545 = vmatpush1.bf16.msra.mxu0 %v23895_v18  ;;  %14576 = vmatprep.mubr.bf16.mxu0 %v31325_v54  ;;  %v23969_v18 = vld [vmem:[%s31296_s10 + $0xb84] ss:$8 sps:$4 sm:$0xff]  }
 0xf8c   : > { %14546 = vmatprep.subr.bf16.mxu0 %v23900_v57  ;;  %v23967_v57 = vld [vmem:[%s31296_s10 + $0xb80] ss:$8 sps:$4 sm:$0xff]  }
 0xf8f   : > { %14547 = vmatpush1.bf16.msra.mxu0 %v23898_v8  ;;  %v23970_v8 = vld [vmem:[%s31296_s10 + $0xb90] ss:$8 sps:$4 sm:$0xff]  }
 0xf90   : > { %14548 = vmatprep.subr.bf16.mxu0 %v23903_v16  ;;  %v23975_v16 = vld [vmem:[%s31296_s10 + $0xba4] ss:$8 sps:$4 sm:$0xff]  }
 0xf93   : > { %14549 = vmatpush1.bf16.msra.mxu0 %v23901_v61  ;;  %v23973_v61 = vld [vmem:[%s31296_s10 + $0xba0] ss:$8 sps:$4 sm:$0xff]  }
 0xf94   : > { %14550 = vmatprep.subr.bf16.mxu0 %v23906_v23  ;;  %v23976_v23 = vld [vmem:[%s31296_s10 + $0xbb0] ss:$8 sps:$4 sm:$0xff]  }
 0xf97   : > { %14551 = vmatpush1.bf16.msra.mxu0 %v23904_v53  ;;  %v23981_v53 = vld [vmem:[%s31296_s10 + $0xbc4] ss:$8 sps:$4 sm:$0xff]  }
 0xf98   : > { %14552 = vmatprep.subr.bf16.mxu0 %v23909_v40  ;;  %v23979_v40 = vld [vmem:[%s31296_s10 + $0xbc0] ss:$8 sps:$4 sm:$0xff]  }
 0xf9b   : > { %14553 = vmatpush1.bf16.msra.mxu0 %v23907_v47  ;;  %v23984_v47 = vld [vmem:[%s31296_s10 + $0xbd4] ss:$8 sps:$4 sm:$0xff]  }
 0xf9c   : > { %14554 = vmatprep.subr.bf16.mxu0 %v23912_v26  ;;  %v23982_v26 = vld [vmem:[%s31296_s10 + $0xbd0] ss:$8 sps:$4 sm:$0xff]  }
 0xf9f   : > { %14555 = vmatpush1.bf16.msra.mxu0 %v23910_v32  ;;  %v23987_v32 = vld [vmem:[%s31296_s10 + $0xbe4] ss:$8 sps:$4 sm:$0xff]  }
 0xfa0   : > { %14556 = vmatprep.subr.bf16.mxu0 %v23915_v21  ;;  %v23985_v21 = vld [vmem:[%s31296_s10 + $0xbe0] ss:$8 sps:$4 sm:$0xff]  }
 0xfa3   : > { %14557 = vmatpush1.bf16.msra.mxu0 %v23913_v11  ;;  %v23990_v11 = vld [vmem:[%s31296_s10 + $0xbf4] ss:$8 sps:$4 sm:$0xff]  }
 0xfa4   : > { %14558 = vmatprep.subr.bf16.mxu0 %v23918_v43  ;;  %v23988_v43 = vld [vmem:[%s31296_s10 + $0xbf0] ss:$8 sps:$4 sm:$0xff]  }
 0xfa7   : > { %14559 = vmatpush1.bf16.msra.mxu0 %v23916_v12  ;;  %v23993_v12 = vld [vmem:[%s31296_s10 + $0xc04] ss:$8 sps:$4 sm:$0xff]  }
 0xfa8   : > { %14904 = vmatprep.subr.bf16.mxu0 %v23921_v13  ;;  %v23991_v13 = vld [vmem:[%s31296_s10 + $0xc00] ss:$8 sps:$4 sm:$0xff]  }
 0xfaa   : > { %14577 = vmatmul.mubr.bf16.vlgmr.msra.gmra.mrb[92].mxu0 %v14257_v28  ;;  %v24005_v28 = vld [vmem:[%s31296_s10 + $0xc44] ss:$8 sps:$4 sm:$0xff]  }
 0xfab   : > { %14905 = vmatpush1.bf16.msra.mxu0 %v23919_v4  ;;  %14936 = vmatprep.mubr.bf16.mxu0 %v29082_v5  ;;  %v23928_v5 = vld [vmem:[%s31296_s10 + $0xab0] ss:$8 sps:$4 sm:$0xff]   ;;  %v23999_v4 = vld [vmem:[%s31296_s10 + $0xc24] ss:$8 sps:$4 sm:$0xff]  }
 0xfac   : > { %14906 = vmatprep.subr.bf16.mxu0 %v23924_v27  ;;  %v23997_v27 = vld [vmem:[%s31296_s10 + $0xc20] ss:$8 sps:$4 sm:$0xff]  }
 0xfaf   : > { %14907 = vmatpush1.bf16.msra.mxu0 %v23922_v38  ;;  %v24003_v38 = vld [vmem:[%s31296_s10 + $0xc40] ss:$8 sps:$4 sm:$0xff]  }
 0xfb0   : > { %14908 = vmatprep.subr.bf16.mxu0 %v23927_v19  ;;  %v24008_v19 = vld [vmem:[%s31296_s10 + $0xc54] ss:$8 sps:$4 sm:$0xff]  }
 0xfb3   : > { %14909 = vmatpush1.bf16.msra.mxu0 %v23925_v20  ;;  %v24006_v20 = vld [vmem:[%s31296_s10 + $0xc50] ss:$8 sps:$4 sm:$0xff]  }
 0xfb4   : > { %14910 = vmatprep.subr.bf16.mxu0 %v23930_v45  ;;  %v24011_v45 = vld [vmem:[%s31296_s10 + $0xc64] ss:$8 sps:$4 sm:$0xff]  }
 0xfb7   : > { %14911 = vmatpush1.bf16.msra.mxu0 %v23928_v5  ;;  %v24009_v5 = vld [vmem:[%s31296_s10 + $0xc60] ss:$8 sps:$4 sm:$0xff]  }
 0xfb8   : > { %14912 = vmatprep.subr.bf16.mxu0 %v23933_v49  ;;  %v24014_v49 = vld [vmem:[%s31296_s10 + $0xc74] ss:$8 sps:$4 sm:$0xff]  }
 0xfbb   : > { %14913 = vmatpush1.bf16.msra.mxu0 %v23931_v24  ;;  %v24012_v24 = vld [vmem:[%s31296_s10 + $0xc70] ss:$8 sps:$4 sm:$0xff]  }
 0xfbc   : > { %14914 = vmatprep.subr.bf16.mxu0 %v23936_v63  ;;  %v24017_v63 = vld [vmem:[%s31296_s10 + $0xc84] ss:$8 sps:$4 sm:$0xff]  }
 0xfbf   : > { %14915 = vmatpush1.bf16.msra.mxu0 %v23934_v34  ;;  %v24015_v34 = vld [vmem:[%s31296_s10 + $0xc80] ss:$8 sps:$4 sm:$0xff]  }
 0xfc0   : > { %14916 = vmatprep.subr.bf16.mxu0 %v23939_v60  ;;  %v24020_v60 = vld [vmem:[%s31296_s10 + $0xc94] ss:$8 sps:$4 sm:$0xff]  }
 0xfc3   : > { %14917 = vmatpush1.bf16.msra.mxu0 %v23937_v25  ;;  %v24018_v25 = vld [vmem:[%s31296_s10 + $0xc90] ss:$8 sps:$4 sm:$0xff]  }
 0xfc4   : > { %14918 = vmatprep.subr.bf16.mxu0 %v23942_v48  ;;  %v24023_v48 = vld [vmem:[%s31296_s10 + $0xca4] ss:$8 sps:$4 sm:$0xff]  }
 0xfc7   : > { %14919 = vmatpush1.bf16.msra.mxu0 %v23940_v2  ;;  %v24021_v2 = vld [vmem:[%s31296_s10 + $0xca0] ss:$8 sps:$4 sm:$0xff]  }
 0xfc8   : > { %14920 = vmatprep.subr.bf16.mxu0 %v23945_v56  ;;  %v24026_v56 = vld [vmem:[%s31296_s10 + $0xcb4] ss:$8 sps:$4 sm:$0xff]  }
 0xfcb   : > { %14921 = vmatpush1.bf16.msra.mxu0 %v23943_v35  ;;  %v24024_v35 = vld [vmem:[%s31296_s10 + $0xcb0] ss:$8 sps:$4 sm:$0xff]  }
 0xfcc   : > { %14922 = vmatprep.subr.bf16.mxu0 %v23948_v7  ;;  %v24029_v7 = vld [vmem:[%s31296_s10 + $0xcc4] ss:$8 sps:$4 sm:$0xff]  }
 0xfcf   : > { %14923 = vmatpush1.bf16.msra.mxu0 %v23946_v0  ;;  %v24027_v0 = vld [vmem:[%s31296_s10 + $0xcc0] ss:$8 sps:$4 sm:$0xff]  }
 0xfd0   : > { %14924 = vmatprep.subr.bf16.mxu0 %v23951_v36  ;;  %v24032_v36 = vld [vmem:[%s31296_s10 + $0xcd4] ss:$8 sps:$4 sm:$0xff]  }
 0xfd3   : > { %14925 = vmatpush1.bf16.msra.mxu0 %v23949_v62  ;;  %v24030_v62 = vld [vmem:[%s31296_s10 + $0xcd0] ss:$8 sps:$4 sm:$0xff]  }
 0xfd4   : > { %14926 = vmatprep.subr.bf16.mxu0 %v23954_v58  ;;  %v24035_v58 = vld [vmem:[%s31296_s10 + $0xce4] ss:$8 sps:$4 sm:$0xff]  }
 0xfd7   : > { %14927 = vmatpush1.bf16.msra.mxu0 %v23952_v17  ;;  %v24033_v17 = vld [vmem:[%s31296_s10 + $0xce0] ss:$8 sps:$4 sm:$0xff]  }
 0xfd8   : > { %14928 = vmatprep.subr.bf16.mxu0 %v23957_v1  ;;  %v24038_v1 = vld [vmem:[%s31296_s10 + $0xcf4] ss:$8 sps:$4 sm:$0xff]  }
 0xfdb   : > { %14929 = vmatpush1.bf16.msra.mxu0 %v23955_v33  ;;  %v24036_v33 = vld [vmem:[%s31296_s10 + $0xcf0] ss:$8 sps:$4 sm:$0xff]  }
 0xfdc   : > { %14930 = vmatprep.subr.bf16.mxu0 %v23960_v37  ;;  %v24041_v37 = vld [vmem:[%s31296_s10 + $0xd04] ss:$8 sps:$4 sm:$0xff]  }
 0xfdf   : > { %14931 = vmatpush1.bf16.msra.mxu0 %v23958_v30  ;;  %v15044_v30 = vrot.slane %v29030_v42, 6  ;;  %v24042_v42 = vld [vmem:[%s31296_s10 + $0xd10] ss:$8 sps:$4 sm:$0xff]  }
 0xfe0   : > { %14932 = vmatprep.subr.bf16.mxu0 %v23963_v10  ;;  %v15043_v10 = vrot.slane %v29011_v6, 6  ;;  %v24047_v6 = vld [vmem:[%s31296_s10 + $0xd24] ss:$8 sps:$4 sm:$0xff]  }
 0xfe3   : > { %14933 = vmatpush1.bf16.msra.mxu0 %v23961_v15  ;;  %v24039_v15 = vld [vmem:[%s31296_s10 + $0xd00] ss:$8 sps:$4 sm:$0xff]  }
 0xfe4   : > { %14934 = vmatprep.subr.bf16.mxu0 %v23966_v50  ;;  %v24044_v50 = vld [vmem:[%s31296_s10 + $0xd14] ss:$8 sps:$4 sm:$0xff]  }
 0xfe7   : > { %14935 = vmatpush1.bf16.msra.mxu0 %v23964_v31  ;;  %v15045_v31 = vsel %vm1703_vm5, %v15043_v10, %v15044_v30  ;;  %v24092_v30 = vld [vmem:[%s31298_s12 + $0x194] ss:$8 sps:$4 sm:$0xff]   ;;  %v24090_v10 = vld [vmem:[%s31298_s12 + $0x190] ss:$8 sps:$4 sm:$0xff]  }
 0xfe8   : > { %14947 = vmatprep.subr.bf16.mxu0 %v23969_v18  ;;  %v24045_v18 = vld [vmem:[%s31296_s10 + $0xd20] ss:$8 sps:$4 sm:$0xff]  }
 0xfea   : > { %14937 = vmatmul.mubr.bf16.vlgmr.msra.gmra.mrb[92].mxu0 %v29088_v9  ;;  %v23978_v9 = vld [vmem:[%s31296_s10 + $0xbb4] ss:$8 sps:$4 sm:$0xff]  }
 0xfeb   : > { %14948 = vmatpush1.bf16.msra.mxu0 %v23967_v57  ;;  %14979 = vmatprep.mubr.bf16.mxu0 %v31325_v54  ;;  %v24050_v57 = vld [vmem:[%s31296_s10 + $0xd34] ss:$8 sps:$4 sm:$0xff]  }
 0xfec   : > { %14949 = vmatprep.subr.bf16.mxu0 %v23972_v52  ;;  %v24048_v52 = vld [vmem:[%s31296_s10 + $0xd30] ss:$8 sps:$4 sm:$0xff]  }
 0xfef   : > { %14950 = vmatpush1.bf16.msra.mxu0 %v23970_v8  ;;  %v24053_v8 = vld [vmem:[%s31296_s10 + $0xd44] ss:$8 sps:$4 sm:$0xff]  }
 0xff0   : > { %14951 = vmatprep.subr.bf16.mxu0 %v23975_v16  ;;  %v24051_v16 = vld [vmem:[%s31296_s10 + $0xd40] ss:$8 sps:$4 sm:$0xff]  }
 0xff3   : > { %14952 = vmatpush1.bf16.msra.mxu0 %v23973_v61  ;;  %v24056_v61 = vld [vmem:[%s31296_s10 + $0xd54] ss:$8 sps:$4 sm:$0xff]  }
 0xff4   : > { %14953 = vmatprep.subr.bf16.mxu0 %v23978_v9  ;;  %v24054_v9 = vld [vmem:[%s31296_s10 + $0xd50] ss:$8 sps:$4 sm:$0xff]  }
 0xff7   : > { %14954 = vmatpush1.bf16.msra.mxu0 %v23976_v23  ;;  %v24059_v23 = vld [vmem:[%s31296_s10 + $0xd64] ss:$8 sps:$4 sm:$0xff]  }
 0xff8   : > { %14955 = vmatprep.subr.bf16.mxu0 %v23981_v53  ;;  %v24057_v53 = vld [vmem:[%s31296_s10 + $0xd60] ss:$8 sps:$4 sm:$0xff]  }
 0xffb   : > { %14956 = vmatpush1.bf16.msra.mxu0 %v23979_v40  ;;  %v24062_v40 = vld [vmem:[%s31296_s10 + $0xd74] ss:$8 sps:$4 sm:$0xff]  }
 0xffc   : > { %14957 = vmatprep.subr.bf16.mxu0 %v23984_v47  ;;  %v24060_v47 = vld [vmem:[%s31296_s10 + $0xd70] ss:$8 sps:$4 sm:$0xff]  }
 0xfff   : > { %14958 = vmatpush1.bf16.msra.mxu0 %v23982_v26  ;;  %v15049_v26 = vrot.slane %v29116_v51, 6 }
0x1000   : > { %14959 = vmatprep.subr.bf16.mxu0 %v23987_v32  ;;  %v15050_v32 = vrot.slane %v29111_v55, 6 }
0x1003   : > { %14960 = vmatpush1.bf16.msra.mxu0 %v23985_v21  ;;  %v15051_v21 = vsel %vm1703_vm5, %v15049_v26, %v15050_v32 }
0x1004   : > { %14961 = vmatprep.subr.bf16.mxu0 %v23990_v11  ;;  %v15385_v11 = vld [vmem:[%s31297_s11] sm:$0x3] }
0x1007   : > { %14962 = vmatpush1.bf16.msra.mxu0 %v23988_v43  ;;  %v15390_v43 = vrot.slane %v15385_v11, %v27219_v14 }
0x1008   : > { %15295 = vmatprep.subr.bf16.mxu0 %v23993_v12  ;;  %v15394_v12 = vrot.slane %v15385_v11, %v27222_v22 }
0x100a   : > { %14980 = vmatmul.mubr.bf16.vlgmr.msra.gmra.mrb[92].mxu0 %v29142_v41  ;;  %v24002_v41 = vld [vmem:[%s31296_s10 + $0xc34] ss:$8 sps:$4 sm:$0xff]  }
0x100b   : > { %15296 = vmatpush1.bf16.msra.mxu0 %v23991_v13  ;;  %15327 = vmatprep.mubr.bf16.mxu0 %v29085_v59  ;;  %v24000_v59 = vld [vmem:[%s31296_s10 + $0xc30] ss:$8 sps:$4 sm:$0xff]  }
0x100c   : > { %15297 = vmatprep.subr.bf16.mxu0 %v23996_v39 }
0x100f   : > { %15298 = vmatpush1.bf16.msra.mxu0 %v23994_v29 }
0x1010   : > { %15299 = vmatprep.subr.bf16.mxu0 %v23999_v4 }
0x1013   : > { %15300 = vmatpush1.bf16.msra.mxu0 %v23997_v27 }
0x1014   : > { %15301 = vmatprep.subr.bf16.mxu0 %v24002_v41 }
0x1017   : > { %15302 = vmatpush1.bf16.msra.mxu0 %v24000_v59 }
0x1018   : > { %15303 = vmatprep.subr.bf16.mxu0 %v24005_v28 }
0x101b   : > { %15304 = vmatpush1.bf16.msra.mxu0 %v24003_v38 }
0x101c   : > { %15305 = vmatprep.subr.bf16.mxu0 %v24008_v19 }
0x101f   : > { %15306 = vmatpush1.bf16.msra.mxu0 %v24006_v20 }
0x1020   : > { %15307 = vmatprep.subr.bf16.mxu0 %v24011_v45 }
0x1023   : > { %15308 = vmatpush1.bf16.msra.mxu0 %v24009_v5 }
0x1024   : > { %15309 = vmatprep.subr.bf16.mxu0 %v24014_v49  ;;  %v24065_v49 = vld [vmem:[%s31298_s12 + $0x104] ss:$8 sps:$4 sm:$0xff]  }
0x1027   : > { %15310 = vmatpush1.bf16.msra.mxu0 %v24012_v24 }
0x1028   : > { %15311 = vmatprep.subr.bf16.mxu0 %v24017_v63  ;;  %v24063_v63 = vld [vmem:[%s31298_s12 + $0x100] ss:$8 sps:$4 sm:$0xff]  }
0x102b   : > { %15312 = vmatpush1.bf16.msra.mxu0 %v24015_v34  ;;  %v24068_v34 = vld [vmem:[%s31298_s12 + $0x114] ss:$8 sps:$4 sm:$0xff]  }
0x102c   : > { %15313 = vmatprep.subr.bf16.mxu0 %v24020_v60  ;;  %v24508_v60 = vld [vmem:[%s31295_s9] sm:$0xff]  }
0x102f   : > { %15314 = vmatpush1.bf16.msra.mxu0 %v24018_v25  ;;  %v24071_v25 = vld [vmem:[%s31298_s12 + $0x124] ss:$8 sps:$4 sm:$0xff]  }
0x1030   : > { %15315 = vmatprep.subr.bf16.mxu0 %v24023_v48  ;;  %v24069_v48 = vld [vmem:[%s31298_s12 + $0x120] ss:$8 sps:$4 sm:$0xff]  }
0x1033   : > { %15316 = vmatpush1.bf16.msra.mxu0 %v24021_v2  ;;  %v24509_v2 = vld [vmem:[%s31295_s9 + $0x8] sm:$0x1f]  }
0x1034   : > { %15317 = vmatprep.subr.bf16.mxu0 %v24026_v56  ;;  %v24072_v56 = vld [vmem:[%s31298_s12 + $0x130] ss:$8 sps:$4 sm:$0xff]  }
0x1037   : > { %15318 = vmatpush1.bf16.msra.mxu0 %v24024_v35  ;;  %v24077_v35 = vld [vmem:[%s31298_s12 + $0x144] ss:$8 sps:$4 sm:$0xff]  }
0x1038   : > { %15319 = vmatprep.subr.bf16.mxu0 %v24029_v7  ;;  %v24075_v7 = vld [vmem:[%s31298_s12 + $0x140] ss:$8 sps:$4 sm:$0xff]  }
0x103b   : > { %15320 = vmatpush1.bf16.msra.mxu0 %v24027_v0  ;;  %v24080_v0 = vld [vmem:[%s31298_s12 + $0x154] ss:$8 sps:$4 sm:$0xff]  }
0x103c   : > { %15321 = vmatprep.subr.bf16.mxu0 %v24032_v36  ;;  %v24078_v36 = vld [vmem:[%s31298_s12 + $0x150] ss:$8 sps:$4 sm:$0xff]  }
0x103f   : > { %15322 = vmatpush1.bf16.msra.mxu0 %v24030_v62  ;;  %v24083_v62 = vld [vmem:[%s31298_s12 + $0x164] ss:$8 sps:$4 sm:$0xff]  }
0x1040   : > { %15323 = vmatprep.subr.bf16.mxu0 %v24035_v58  ;;  %v24081_v58 = vld [vmem:[%s31298_s12 + $0x160] ss:$8 sps:$4 sm:$0xff]  }
0x1043   : > { %15324 = vmatpush1.bf16.msra.mxu0 %v24033_v17  ;;  %v24086_v17 = vld [vmem:[%s31298_s12 + $0x174] ss:$8 sps:$4 sm:$0xff]  }
0x1044   : > { %15325 = vmatprep.subr.bf16.mxu0 %v24038_v1  ;;  %v24084_v1 = vld [vmem:[%s31298_s12 + $0x170] ss:$8 sps:$4 sm:$0xff]  }
0x1047   : > { %15326 = vmatpush1.bf16.msra.mxu0 %v24036_v33  ;;  %v24089_v33 = vld [vmem:[%s31298_s12 + $0x184] ss:$8 sps:$4 sm:$0xff]  }
0x1048   : > { %15338 = vmatprep.subr.bf16.mxu0 %v24041_v37  ;;  %v24087_v37 = vld [vmem:[%s31298_s12 + $0x180] ss:$8 sps:$4 sm:$0xff]  }
0x104a   : > { %15328 = vmatmul.mubr.bf16.vlgmr.msra.gmra.mrb[92].mxu0 %v15045_v31  ;;  %v24098_v31 = vld [vmem:[%s31298_s12 + $0x1b4] ss:$8 sps:$4 sm:$0xff]  }
0x104b   : > { %15339 = vmatpush1.bf16.msra.mxu0 %v24039_v15  ;;  %15370 = vmatprep.mubr.bf16.mxu0 %v31325_v54  ;;  %v24095_v15 = vld [vmem:[%s31298_s12 + $0x1a4] ss:$8 sps:$4 sm:$0xff]  }
0x104c   : > { %15340 = vmatprep.subr.bf16.mxu0 %v24044_v50  ;;  %v24093_v50 = vld [vmem:[%s31298_s12 + $0x1a0] ss:$8 sps:$4 sm:$0xff]  }
0x104f   : > { %15341 = vmatpush1.bf16.msra.mxu0 %v24042_v42  ;;  %v24096_v42 = vld [vmem:[%s31298_s12 + $0x1b0] ss:$8 sps:$4 sm:$0xff]  }
0x1050   : > { %15342 = vmatprep.subr.bf16.mxu0 %v24047_v6  ;;  %v24101_v6 = vld [vmem:[%s31298_s12 + $0x1c4] ss:$8 sps:$4 sm:$0xff]  }
0x1053   : > { %15343 = vmatpush1.bf16.msra.mxu0 %v24045_v18  ;;  %v24099_v18 = vld [vmem:[%s31298_s12 + $0x1c0] ss:$8 sps:$4 sm:$0xff]  }
0x1054   : > { %15344 = vmatprep.subr.bf16.mxu0 %v24050_v57  ;;  %v24102_v57 = vld [vmem:[%s31298_s12 + $0x1d0] ss:$8 sps:$4 sm:$0xff]  }
0x1057   : > { %15345 = vmatpush1.bf16.msra.mxu0 %v24048_v52  ;;  %v24104_v52 = vld [vmem:[%s31298_s12 + $0x1d4] ss:$8 sps:$4 sm:$0xff]  }
0x1058   : > { %15346 = vmatprep.subr.bf16.mxu0 %v24053_v8  ;;  %v24105_v8 = vld [vmem:[%s31298_s12 + $0x1e0] ss:$8 sps:$4 sm:$0xff]  }
0x105b   : > { %15347 = vmatpush1.bf16.msra.mxu0 %v24051_v16  ;;  %v24107_v16 = vld [vmem:[%s31298_s12 + $0x1e4] ss:$8 sps:$4 sm:$0xff]  }
0x105c   : > { %15348 = vmatprep.subr.bf16.mxu0 %v24056_v61  ;;  %v24110_v61 = vld [vmem:[%s31298_s12 + $0x1f4] ss:$8 sps:$4 sm:$0xff]  }
0x105f   : > { %15349 = vmatpush1.bf16.msra.mxu0 %v24054_v9  ;;  %v24108_v9 = vld [vmem:[%s31298_s12 + $0x1f0] ss:$8 sps:$4 sm:$0xff]  }
0x1060   : > { %15350 = vmatprep.subr.bf16.mxu0 %v24059_v23  ;;  %v24113_v23 = vld [vmem:[%s31298_s12 + $0x4] ss:$8 sps:$4 sm:$0xff]  }
0x1063   : > { %15351 = vmatpush1.bf16.msra.mxu0 %v24057_v53 }
0x1064   : > { %15352 = vmatprep.subr.bf16.mxu0 %v24062_v40 }
0x1067   : > { %15353 = vmatpush1.bf16.msra.mxu0 %v24060_v47 }
0x106a   : > { %15371 = vmatmul.mubr.bf16.vlgmr.msra.gmra.mrb[92].mxu0 %v15051_v21 }
0x113d   : > { %v15372_v13 = vpop.f32.mrb[92].mxu0 }
0x113e   : > { %v15397_v39 = vadd.f32 %v15390_v43, %v15372_v13  ;;  %v15374_v29 = vpop.f32.mrb[93].mxu0 }
0x113f   : > { %v15398_v4 = vadd.f32 %v15394_v12, %v15374_v29  ;;  %v15376_v27 = vpop.f32.mrb[94].mxu0 }
0x1140   : > { %v15399_v51 = vadd.f32 %v15390_v43, %v15376_v27  ;;  %v15378_v41 = vpop.f32.mrb[95].mxu0  ;;  %v15401_v59 = vmax.f32 %v15397_v39, 0.0 }
0x1141   : > { %v15400_v55 = vadd.f32 %v15394_v12, %v15378_v41  ;;  %v15402_v38 = vmax.f32 %v15398_v4, 0.0 }
0x1142   : > { %v15403_v28 = vmax.f32 %v15399_v51, 0.0 }
0x1143   : > { %v15404_v19 = vmax.f32 %v15400_v55, 0.0 }
0x1144   : > { %v15405_v20 = vpack.c.bf16 %v15403_v28, %v15401_v59 }
0x1145   : > { %v15406_v45 = vpack.c.bf16 %v15404_v19, %v15402_v38 }
0x1146   : > { %v15408_v24 = vand.u32 %v15405_v20, %v28895_v3 }
0x1147   : > { %v15411_v5 = vand.u32 %v15406_v45, %v28895_v3  ;;  %v24066_v3 = vld [vmem:[%s31298_s12 + $0x110] ss:$8 sps:$4 sm:$0xff]  }
0x1149   : > { %15413 = vmatprep.subr.bf16.mxu1 %v15411_v5 }
0x114a   : > { %15414 = vmatpush1.bf16.msra.mxu1 %v15408_v24  ;;  %v24111_v24 = vld [vmem:[%s31298_s12] ss:$8 sps:$4 sm:$0xff]  }
0x114b   : > { %15711 = vmatprep.subr.bf16.mxu1 %v24065_v49 }
0x114d   : > { %20526 = vmatmul.mubr.msk.bf16.vlgmr.msra.gmra.mrb[144].mxu1 %vm11698_vm4, %v24508_v60 }
0x114e   : > { %15455 = vmatprep.mubr.bf16.mxu1 %v31325_v54  ;;  %15712 = vmatpush1.bf16.msra.mxu1 %v24063_v63  ;;  %v24074_v54 = vld [vmem:[%s31298_s12 + $0x134] ss:$8 sps:$4 sm:$0xff]  }
0x114f   : > { %15713 = vmatprep.subr.bf16.mxu1 %v24068_v34 }
0x1152   : > { %15714 = vmatpush1.bf16.msra.mxu1 %v24066_v3 }
0x1153   : > { %15715 = vmatprep.subr.bf16.mxu1 %v24071_v25  ;;  %v24116_v25 = vld [vmem:[%s31298_s12 + $0x14] ss:$8 sps:$4 sm:$0xff]  }
0x1155   : > { %20527 = vmatmul.mubr.msk.bf16.gmra.mrb[148].mxu1 %vm11698_vm4, %v24509_v2 }
0x1156   : > { %15716 = vmatpush1.bf16.msra.mxu1 %v24069_v48 }
0x1157   : > { %15717 = vmatprep.subr.bf16.mxu1 %v24074_v54 }
0x115a   : > { %15718 = vmatpush1.bf16.msra.mxu1 %v24072_v56 }
0x115b   : > { %15719 = vmatprep.subr.bf16.mxu1 %v24077_v35 }
0x115e   : > { %15720 = vmatpush1.bf16.msra.mxu1 %v24075_v7 }
0x115f   : > { %15721 = vmatprep.subr.bf16.mxu1 %v24080_v0 }
0x1162   : > { %15722 = vmatpush1.bf16.msra.mxu1 %v24078_v36 }
0x1163   : > { %15723 = vmatprep.subr.bf16.mxu1 %v24083_v62 }
0x1166   : > { %15724 = vmatpush1.bf16.msra.mxu1 %v24081_v58  ;;  %v24114_v58 = vld [vmem:[%s31298_s12 + $0x10] ss:$8 sps:$4 sm:$0xff]  }
0x1167   : > { %15725 = vmatprep.subr.bf16.mxu1 %v24086_v17 }
0x116a   : > { %15726 = vmatpush1.bf16.msra.mxu1 %v24084_v1 }
0x116b   : > { %15727 = vmatprep.subr.bf16.mxu1 %v24089_v33 }
0x116e   : > { %15728 = vmatpush1.bf16.msra.mxu1 %v24087_v37 }
0x116f   : > { %15729 = vmatprep.subr.bf16.mxu1 %v24092_v30  ;;  %v24119_v30 = vld [vmem:[%s31298_s12 + $0x24] ss:$8 sps:$4 sm:$0xff]  }
0x1172   : > { %15730 = vmatpush1.bf16.msra.mxu1 %v24090_v10 }
0x1173   : > { %15731 = vmatprep.subr.bf16.mxu1 %v24095_v15 }
0x1176   : > { %15732 = vmatpush1.bf16.msra.mxu1 %v24093_v50 }
0x1177   : > { %15733 = vmatprep.subr.bf16.mxu1 %v24098_v31 }
0x117a   : > { %15734 = vmatpush1.bf16.msra.mxu1 %v24096_v42 }
0x117b   : > { %15735 = vmatprep.subr.bf16.mxu1 %v24101_v6 }
0x117e   : > { %15736 = vmatpush1.bf16.msra.mxu1 %v24099_v18 }
0x117f   : > { %15737 = vmatprep.subr.bf16.mxu1 %v24104_v52 }
0x1182   : > { %15738 = vmatpush1.bf16.msra.mxu1 %v24102_v57 }
0x1183   : > { %15739 = vmatprep.subr.bf16.mxu1 %v24107_v16 }
0x1186   : > { %15740 = vmatpush1.bf16.msra.mxu1 %v24105_v8 }
0x1187   : > { %15741 = vmatprep.subr.bf16.mxu1 %v24110_v61 }
0x118a   : > { %15742 = vmatpush1.bf16.msra.mxu1 %v24108_v9  ;;  %v24117_v9 = vld [vmem:[%s31298_s12 + $0x20] ss:$8 sps:$4 sm:$0xff]  }
0x118b   : > { %15914 = vmatprep.subr.bf16.mxu1 %v24113_v23 }
0x1220   : > { %v15447_v53 = vpop.f32.mrb[144].mxu1 }
0x1221   : > { %v15449_v40 = vpop.f32.mrb[145].mxu1 }
0x1222   : > { %v15451_v47 = vpop.f32.mrb[146].mxu1 }
0x1223   : > { %v30439_v26 = vpack.c.bf16 %v15451_v47, %v15447_v53  ;;  %v15453_v32 = vpop.f32.mrb[147].mxu1 }
0x1224   : > { %v30441_v21 = vpack.c.bf16 %v15453_v32, %v15449_v40  ;;  %v24122_v32 = vld [vmem:[%s31298_s12 + $0x34] ss:$8 sps:$4 sm:$0xff]  }
0x1225   : > { %v15536_v11 = vshrl.u32 %v30439_v26, 16  ;;  %v15538_v43 = vshll.u32 %v30439_v26, 16 }
0x1226   : > { %v15543_v12 = vshrl.u32 %v30441_v21, 16  ;;  %v15545_v13 = vshll.u32 %v30441_v21, 16  ;;  %v16507_v50 = vrot.slane %v30441_v21, 3  ;;  %v17011_v61 = vrot.slane %v30441_v21, 5 }
0x1227   : > { %v15540_v39 = vrot.slane %v15538_v43, 1  ;;  %v16236_v29 = vrot.slane %v15536_v11, 2  ;;  %v16237_v4 = vrot.slane %v15538_v43, 3  ;;  %v16752_v27 = vrot.slane %v15536_v11, 3 }
0x1228   : > { %v15457_v51 = vpop.f32.mrb[148].mxu1  ;;  %v15547_v41 = vrot.slane %v15545_v13, 1  ;;  %v16248_v55 = vrot.slane %v15543_v12, 2  ;;  %v16249_v59 = vrot.slane %v15545_v13, 3  ;;  %v16759_v28 = vrot.slane %v15543_v12, 3 }
0x1229   : > { %v15459_v38 = vpop.f32.mrb[149].mxu1  ;;  %v16238_v19 = vor.u32 %v16237_v4, %v16236_v29  ;;  %v16760_v20 = vrot.slane %v15545_v13, 4  ;;  %v16753_v45 = vrot.slane %v15538_v43, 4  ;;  %v15541_v63 = vor.u32 %v15540_v39, %v15536_v11 }
0x122a   : > { %v15461_v5 = vpop.f32.mrb[150].mxu1  ;;  %v15548_v49 = vor.u32 %v15547_v41, %v15543_v12  ;;  %v16250_v34 = vor.u32 %v16249_v59, %v16248_v55  ;;  %v17263_v2 = vrot.slane %v15543_v12, 5  ;;  %v17264_v35 = vrot.slane %v15545_v13, 6  ;;  %v24120_v55 = vld [vmem:[%s31298_s12 + $0x30] ss:$8 sps:$4 sm:$0xff]  }
0x122b   : > { %v30450_v60 = vpack.c.bf16 %v15461_v5, %v15457_v51  ;;  %v15463_v3 = vpop.f32.mrb[151].mxu1  ;;  %v16761_v48 = vor.u32 %v16760_v20, %v16759_v28  ;;  %v16754_v54 = vor.u32 %v16753_v45, %v16752_v27  ;;  %v17256_v7 = vrot.slane %v15536_v11, 5 }
0x122c   : > { %15743 = vmatprep.mubr.bf16.mxu1 %v15548_v49  ;;  %v15469_v56 = vpack.c.bf16 %v15463_v3, %v15459_v38  ;;  %v17257_v0 = vrot.slane %v15538_v43, 6  ;;  %v17265_v33 = vor.u32 %v17264_v35, %v17263_v2  ;;  %v17515_v28 = vrot.slane %v30441_v21, 6  ;;  %v24131_v3 = vld [vmem:[%s31298_s12 + $0x64] ss:$8 sps:$4 sm:$0xff]   ;;  %v24140_v35 = vld [vmem:[%s31298_s12 + $0x94] ss:$8 sps:$4 sm:$0xff]  }
0x122d   : > { %v16240_v36 = vshrl.u32 %v30450_v60, 16  ;;  %v16243_v62 = vshll.u32 %v30450_v60, 16  ;;  %15744 = vmatmul.mubr.bf16.vlgmr.msra.gmra.mrb[152].mxu1 %v15541_v63  ;;  %v24128_v63 = vld [vmem:[%s31298_s12 + $0x54] ss:$8 sps:$4 sm:$0xff]   ;;  %v24137_v2 = vld [vmem:[%s31298_s12 + $0x84] ss:$8 sps:$4 sm:$0xff]  }
0x122e   : > { %15915 = vmatpush1.bf16.msra.mxu1 %v24111_v24  ;;  %15946 = vmatprep.mubr.bf16.mxu1 %v30441_v21  ;;  %v16252_v17 = vshrl.u32 %v15469_v56, 16  ;;  %v16255_v1 = vshll.u32 %v15469_v56, 16  ;;  %v17258_v37 = vor.u32 %v17257_v0, %v17256_v7  ;;  %v16508_v31 = vrot.slane %v15469_v56, 3  ;;  %v24123_v24 = vld [vmem:[%s31298_s12 + $0x40] ss:$8 sps:$4 sm:$0xff]  }
0x122f   : > { %15916 = vmatprep.subr.bf16.mxu1 %v24116_v25  ;;  %v16242_v10 = vrot.slane %v16240_v36, 2  ;;  %v16245_v15 = vrot.slane %v16243_v62, 3  ;;  %v16755_v16 = vrot.slane %v16240_v36, 3  ;;  %v16756_v40 = vrot.slane %v16243_v62, 4  ;;  %v24129_v25 = vld [vmem:[%s31298_s12 + $0x60] ss:$8 sps:$4 sm:$0xff]  }
0x1230   : > { %v16254_v42 = vrot.slane %v16252_v17, 2  ;;  %v16257_v6 = vrot.slane %v16255_v1, 3  ;;  %v16762_v18 = vrot.slane %v16252_v17, 3  ;;  %v16763_v57 = vrot.slane %v16255_v1, 4  ;;  %v24138_v7 = vld [vmem:[%s31298_s12 + $0x90] ss:$8 sps:$4 sm:$0xff]  }
0x1231   : > { %v16246_v52 = vor.u32 %v16245_v15, %v16242_v10  ;;  %v30466_v8 = vsel %vm4240_vm11, %v16507_v50, %v16508_v31  ;;  %v17012_v47 = vrot.slane %v15469_v56, 5  ;;  %v17266_v43 = vrot.slane %v16252_v17, 5  ;;  %v24143_v0 = vld [vmem:[%s31298_s12 + $0xa4] ss:$8 sps:$4 sm:$0xff]   ;;  %v24153_v10 = vld [vmem:[%s31298_s12 + $0xe0] ss:$8 sps:$4 sm:$0xff]  }
0x1232   : > { %15917 = vmatpush1.bf16.msra.mxu1 %v24114_v58  ;;  %v16258_v23 = vor.u32 %v16257_v6, %v16254_v42  ;;  %v16764_v53 = vor.u32 %v16763_v57, %v16762_v18  ;;  %v17267_v12 = vrot.slane %v16255_v1, 6  ;;  %v16757_v29 = vor.u32 %v16756_v40, %v16755_v16  ;;  %v24144_v58 = vld [vmem:[%s31298_s12 + $0xb0] ss:$8 sps:$4 sm:$0xff]   ;;  %v24149_v17 = vld [vmem:[%s31298_s12 + $0xc4] ss:$8 sps:$4 sm:$0xff]  }
0x1233   : > { %15918 = vmatprep.subr.bf16.mxu1 %v24119_v30  ;;  %v30476_v11 = vsel %vm6183_vm0, %v16238_v19, %v16246_v52  ;;  %v30485_v4 = vsel %vm5132_vm15, %v17011_v61, %v17012_v47  ;;  %v17259_v51 = vrot.slane %v16240_v36, 5  ;;  %v17260_v41 = vrot.slane %v16243_v62, 6  ;;  %v24125_v19 = vld [vmem:[%s31298_s12 + $0x44] ss:$8 sps:$4 sm:$0xff]   ;;  %v24141_v36 = vld [vmem:[%s31298_s12 + $0xa0] ss:$8 sps:$4 sm:$0xff]  }
0x1234   : > { %v30479_v13 = vsel %vm6183_vm0, %v16250_v34, %v16258_v23  ;;  %v30482_v39 = vsel %vm4455_vm12, %v16761_v48, %v16764_v53  ;;  %v17268_v27 = vor.u32 %v17267_v12, %v17266_v43  ;;  %v30491_v59 = vsel %vm4455_vm12, %v16754_v54, %v16757_v29  ;;  %v24126_v34 = vld [vmem:[%s31298_s12 + $0x50] ss:$8 sps:$4 sm:$0xff]   ;;  %v24134_v48 = vld [vmem:[%s31298_s12 + $0x74] ss:$8 sps:$4 sm:$0xff]   ;;  %v24147_v1 = vld [vmem:[%s31298_s12 + $0xc0] ss:$8 sps:$4 sm:$0xff]  }
0x1235   : > { %v17516_v38 = vrot.slane %v15469_v56, 6  ;;  %v17261_v45 = vor.u32 %v17260_v41, %v17259_v51  ;;  %v24132_v54 = vld [vmem:[%s31298_s12 + $0x70] ss:$8 sps:$4 sm:$0xff]   ;;  %v24135_v56 = vld [vmem:[%s31298_s12 + $0x80] ss:$8 sps:$4 sm:$0xff]   ;;  %v15993_v18 = vrot.slane %v30441_v21, 1 }
0x1236   : > { %15919 = vmatpush1.bf16.msra.mxu1 %v24117_v9  ;;  %v30498_v20 = vsel %vm3120_vm8, %v17265_v33, %v17268_v27  ;;  %v24146_v62 = vld [vmem:[%s31298_s12 + $0xb4] ss:$8 sps:$4 sm:$0xff]   ;;  %v24155_v30 = vld [vmem:[%s31298_s12 + $0xe4] ss:$8 sps:$4 sm:$0xff]   ;;  %v24156_v50 = vld [vmem:[%s31298_s12 + $0xf0] ss:$8 sps:$4 sm:$0xff]  }
0x1237   : > { %15920 = vmatprep.subr.bf16.mxu1 %v24122_v32  ;;  %v30501_v5 = vsel %vm1703_vm5, %v17515_v28, %v17516_v38  ;;  %v30504_v49 = vsel %vm3120_vm8, %v17258_v37, %v17261_v45  ;;  %v24152_v33 = vld [vmem:[%s31298_s12 + $0xd4] ss:$8 sps:$4 sm:$0xff]   ;;  %v24150_v37 = vld [vmem:[%s31298_s12 + $0xd0] ss:$8 sps:$4 sm:$0xff]   ;;  %v24161_v31 = vld [vmem:[%s31298_s12 + $0x204] ss:$8 sps:$4 sm:$0xff]  }
0x1238   : > { %v24158_v15 = vld [vmem:[%s31298_s12 + $0xf4] ss:$8 sps:$4 sm:$0xff]   ;;  %v24159_v42 = vld [vmem:[%s31298_s12 + $0x200] ss:$8 sps:$4 sm:$0xff]   ;;  %v24162_v57 = vld [vmem:[%s31298_s12 + $0x210] ss:$8 sps:$4 sm:$0xff]  }
0x1239   : > { %v24164_v6 = vld [vmem:[%s31298_s12 + $0x214] ss:$8 sps:$4 sm:$0xff]   ;;  %v24167_v52 = vld [vmem:[%s31298_s12 + $0x224] ss:$8 sps:$4 sm:$0xff]   ;;  %v24165_v16 = vld [vmem:[%s31298_s12 + $0x220] ss:$8 sps:$4 sm:$0xff]  }
0x123a   : > { %15921 = vmatpush1.bf16.msra.mxu1 %v24120_v55  ;;  %v24170_v21 = vld [vmem:[%s31298_s12 + $0x234] ss:$8 sps:$4 sm:$0xff]   ;;  %v24168_v61 = vld [vmem:[%s31298_s12 + $0x230] ss:$8 sps:$4 sm:$0xff]   ;;  %v24173_v9 = vld [vmem:[%s31298_s12 + $0x244] ss:$8 sps:$4 sm:$0xff]  }
0x123b   : > { %15922 = vmatprep.subr.bf16.mxu1 %v24125_v19  ;;  %v24171_v23 = vld [vmem:[%s31298_s12 + $0x240] ss:$8 sps:$4 sm:$0xff]   ;;  %v24176_v53 = vld [vmem:[%s31298_s12 + $0x254] ss:$8 sps:$4 sm:$0xff]   ;;  %v24174_v40 = vld [vmem:[%s31298_s12 + $0x250] ss:$8 sps:$4 sm:$0xff]  }
0x123c   : > { %v24179_v47 = vld [vmem:[%s31298_s12 + $0x264] ss:$8 sps:$4 sm:$0xff]   ;;  %v24177_v32 = vld [vmem:[%s31298_s12 + $0x260] ss:$8 sps:$4 sm:$0xff]   ;;  %v24182_v43 = vld [vmem:[%s31298_s12 + $0x274] ss:$8 sps:$4 sm:$0xff]  }
0x123d   : > { %v24180_v12 = vld [vmem:[%s31298_s12 + $0x270] ss:$8 sps:$4 sm:$0xff]   ;;  %v24185_v29 = vld [vmem:[%s31298_s12 + $0x284] ss:$8 sps:$4 sm:$0xff]   ;;  %v24183_v27 = vld [vmem:[%s31298_s12 + $0x280] ss:$8 sps:$4 sm:$0xff]  }
0x123e   : > { %15923 = vmatpush1.bf16.msra.mxu1 %v24123_v24  ;;  %v24188_v51 = vld [vmem:[%s31298_s12 + $0x294] ss:$8 sps:$4 sm:$0xff]   ;;  %v24186_v41 = vld [vmem:[%s31298_s12 + $0x290] ss:$8 sps:$4 sm:$0xff]   ;;  %v24191_v55 = vld [vmem:[%s31298_s12 + $0x2a4] ss:$8 sps:$4 sm:$0xff]  }
0x123f   : > { %15924 = vmatprep.subr.bf16.mxu1 %v24128_v63  ;;  %v24189_v28 = vld [vmem:[%s31298_s12 + $0x2a0] ss:$8 sps:$4 sm:$0xff]   ;;  %v24194_v38 = vld [vmem:[%s31298_s12 + $0x2b4] ss:$8 sps:$4 sm:$0xff]   ;;  %v24192_v19 = vld [vmem:[%s31298_s12 + $0x2b0] ss:$8 sps:$4 sm:$0xff]  }
0x1240   : > { %v24197_v45 = vld [vmem:[%s31298_s12 + $0x2c4] ss:$8 sps:$4 sm:$0xff]   ;;  %v24195_v24 = vld [vmem:[%s31298_s12 + $0x2c0] ss:$8 sps:$4 sm:$0xff]   ;;  %v24200_v63 = vld [vmem:[%s31298_s12 + $0x2d4] ss:$8 sps:$4 sm:$0xff]  }
0x1242   : > { %15925 = vmatpush1.bf16.msra.mxu1 %v24126_v34  ;;  %v24198_v34 = vld [vmem:[%s31298_s12 + $0x2d0] ss:$8 sps:$4 sm:$0xff]  }
0x1243   : > { %15926 = vmatprep.subr.bf16.mxu1 %v24131_v3  ;;  %v24203_v3 = vld [vmem:[%s31298_s12 + $0x2e4] ss:$8 sps:$4 sm:$0xff]  }
0x1246   : > { %15927 = vmatpush1.bf16.msra.mxu1 %v24129_v25  ;;  %v24201_v25 = vld [vmem:[%s31298_s12 + $0x2e0] ss:$8 sps:$4 sm:$0xff]  }
0x1247   : > { %15928 = vmatprep.subr.bf16.mxu1 %v24134_v48  ;;  %v24206_v48 = vld [vmem:[%s31298_s12 + $0x2f4] ss:$8 sps:$4 sm:$0xff]  }
0x124a   : > { %15929 = vmatpush1.bf16.msra.mxu1 %v24132_v54  ;;  %v24204_v54 = vld [vmem:[%s31298_s12 + $0x2f0] ss:$8 sps:$4 sm:$0xff]  }
0x124b   : > { %15930 = vmatprep.subr.bf16.mxu1 %v24137_v2  ;;  %v24209_v2 = vld [vmem:[%s31298_s12 + $0x304] ss:$8 sps:$4 sm:$0xff]  }
0x124e   : > { %15931 = vmatpush1.bf16.msra.mxu1 %v24135_v56  ;;  %v24207_v56 = vld [vmem:[%s31298_s12 + $0x300] ss:$8 sps:$4 sm:$0xff]  }
0x124f   : > { %15932 = vmatprep.subr.bf16.mxu1 %v24140_v35  ;;  %v15992_v35 = vrot.slane %v30439_v26, 1 }
0x1252   : > { %15933 = vmatpush1.bf16.msra.mxu1 %v24138_v7  ;;  %v24212_v7 = vld [vmem:[%s31298_s12 + $0x314] ss:$8 sps:$4 sm:$0xff]  }
0x1253   : > { %15934 = vmatprep.subr.bf16.mxu1 %v24143_v0  ;;  %v24210_v0 = vld [vmem:[%s31298_s12 + $0x310] ss:$8 sps:$4 sm:$0xff]  }
0x1256   : > { %15935 = vmatpush1.bf16.msra.mxu1 %v24141_v36  ;;  %v24215_v36 = vld [vmem:[%s31298_s12 + $0x324] ss:$8 sps:$4 sm:$0xff]  }
0x1257   : > { %15936 = vmatprep.subr.bf16.mxu1 %v24146_v62  ;;  %v24213_v62 = vld [vmem:[%s31298_s12 + $0x320] ss:$8 sps:$4 sm:$0xff]  }
0x125a   : > { %15937 = vmatpush1.bf16.msra.mxu1 %v24144_v58  ;;  %v24218_v58 = vld [vmem:[%s31298_s12 + $0x334] ss:$8 sps:$4 sm:$0xff]  }
0x125b   : > { %15938 = vmatprep.subr.bf16.mxu1 %v24149_v17  ;;  %v24221_v17 = vld [vmem:[%s31298_s12 + $0x344] ss:$8 sps:$4 sm:$0xff]  }
0x125e   : > { %15939 = vmatpush1.bf16.msra.mxu1 %v24147_v1  ;;  %v24219_v1 = vld [vmem:[%s31298_s12 + $0x340] ss:$8 sps:$4 sm:$0xff]  }
0x125f   : > { %15940 = vmatprep.subr.bf16.mxu1 %v24152_v33  ;;  %v24224_v33 = vld [vmem:[%s31298_s12 + $0x354] ss:$8 sps:$4 sm:$0xff]  }
0x1262   : > { %15941 = vmatpush1.bf16.msra.mxu1 %v24150_v37  ;;  %v24222_v37 = vld [vmem:[%s31298_s12 + $0x350] ss:$8 sps:$4 sm:$0xff]  }
0x1263   : > { %15942 = vmatprep.subr.bf16.mxu1 %v24155_v30  ;;  %v24227_v30 = vld [vmem:[%s31298_s12 + $0x364] ss:$8 sps:$4 sm:$0xff]  }
0x1266   : > { %15943 = vmatpush1.bf16.msra.mxu1 %v24153_v10  ;;  %v24225_v10 = vld [vmem:[%s31298_s12 + $0x360] ss:$8 sps:$4 sm:$0xff]  }
0x1267   : > { %15944 = vmatprep.subr.bf16.mxu1 %v24158_v15  ;;  %v24230_v15 = vld [vmem:[%s31298_s12 + $0x374] ss:$8 sps:$4 sm:$0xff]  }
0x126a   : > { %15945 = vmatpush1.bf16.msra.mxu1 %v24156_v50  ;;  %v24228_v50 = vld [vmem:[%s31298_s12 + $0x370] ss:$8 sps:$4 sm:$0xff]  }
0x126b   : > { %16156 = vmatprep.subr.bf16.mxu1 %v24161_v31  ;;  %v24233_v31 = vld [vmem:[%s31298_s12 + $0x384] ss:$8 sps:$4 sm:$0xff]  }
0x126d   : > { %15947 = vmatmul.mubr.bf16.vlgmr.msra.gmra.mrb[152].mxu1 %v30439_v26 }
0x126e   : > { %16157 = vmatpush1.bf16.msra.mxu1 %v24159_v42  ;;  %16188 = vmatprep.mubr.bf16.mxu1 %v15993_v18  ;;  %v24231_v42 = vld [vmem:[%s31298_s12 + $0x380] ss:$8 sps:$4 sm:$0xff]   ;;  %v24234_v18 = vld [vmem:[%s31298_s12 + $0x390] ss:$8 sps:$4 sm:$0xff]  }
0x126f   : > { %16158 = vmatprep.subr.bf16.mxu1 %v24164_v6  ;;  %v24236_v6 = vld [vmem:[%s31298_s12 + $0x394] ss:$8 sps:$4 sm:$0xff]  }
0x1272   : > { %16159 = vmatpush1.bf16.msra.mxu1 %v24162_v57  ;;  %v24239_v57 = vld [vmem:[%s31298_s12 + $0x3a4] ss:$8 sps:$4 sm:$0xff]  }
0x1273   : > { %16160 = vmatprep.subr.bf16.mxu1 %v24167_v52  ;;  %v24237_v52 = vld [vmem:[%s31298_s12 + $0x3a0] ss:$8 sps:$4 sm:$0xff]  }
0x1276   : > { %16161 = vmatpush1.bf16.msra.mxu1 %v24165_v16  ;;  %v24242_v16 = vld [vmem:[%s31298_s12 + $0x3b4] ss:$8 sps:$4 sm:$0xff]  }
0x1277   : > { %16162 = vmatprep.subr.bf16.mxu1 %v24170_v21  ;;  %v24240_v21 = vld [vmem:[%s31298_s12 + $0x3b0] ss:$8 sps:$4 sm:$0xff]  }
0x127a   : > { %16163 = vmatpush1.bf16.msra.mxu1 %v24168_v61  ;;  %v24245_v61 = vld [vmem:[%s31298_s12 + $0x3c4] ss:$8 sps:$4 sm:$0xff]  }
0x127b   : > { %16164 = vmatprep.subr.bf16.mxu1 %v24173_v9  ;;  %v24243_v9 = vld [vmem:[%s31298_s12 + $0x3c0] ss:$8 sps:$4 sm:$0xff]  }
0x127e   : > { %16165 = vmatpush1.bf16.msra.mxu1 %v24171_v23  ;;  %v24248_v23 = vld [vmem:[%s31298_s12 + $0x3d4] ss:$8 sps:$4 sm:$0xff]  }
0x127f   : > { %16166 = vmatprep.subr.bf16.mxu1 %v24176_v53  ;;  %v24246_v53 = vld [vmem:[%s31298_s12 + $0x3d0] ss:$8 sps:$4 sm:$0xff]  }
0x1282   : > { %16167 = vmatpush1.bf16.msra.mxu1 %v24174_v40  ;;  %v24251_v40 = vld [vmem:[%s31298_s12 + $0x3e4] ss:$8 sps:$4 sm:$0xff]  }
0x1283   : > { %16168 = vmatprep.subr.bf16.mxu1 %v24179_v47  ;;  %v24249_v47 = vld [vmem:[%s31298_s12 + $0x3e0] ss:$8 sps:$4 sm:$0xff]  }
0x1286   : > { %16169 = vmatpush1.bf16.msra.mxu1 %v24177_v32  ;;  %v24254_v32 = vld [vmem:[%s31298_s12 + $0x3f4] ss:$8 sps:$4 sm:$0xff]  }
0x1287   : > { %16170 = vmatprep.subr.bf16.mxu1 %v24182_v43  ;;  %v24252_v43 = vld [vmem:[%s31298_s12 + $0x3f0] ss:$8 sps:$4 sm:$0xff]  }
0x128a   : > { %16171 = vmatpush1.bf16.msra.mxu1 %v24180_v12  ;;  %v24257_v12 = vld [vmem:[%s31298_s12 + $0x404] ss:$8 sps:$4 sm:$0xff]  }
0x128b   : > { %16172 = vmatprep.subr.bf16.mxu1 %v24185_v29  ;;  %v24255_v29 = vld [vmem:[%s31298_s12 + $0x400] ss:$8 sps:$4 sm:$0xff]  }
0x128e   : > { %16173 = vmatpush1.bf16.msra.mxu1 %v24183_v27  ;;  %v24260_v27 = vld [vmem:[%s31298_s12 + $0x414] ss:$8 sps:$4 sm:$0xff]  }
0x128f   : > { %16174 = vmatprep.subr.bf16.mxu1 %v24188_v51  ;;  %v24258_v51 = vld [vmem:[%s31298_s12 + $0x410] ss:$8 sps:$4 sm:$0xff]  }
0x1292   : > { %16175 = vmatpush1.bf16.msra.mxu1 %v24186_v41  ;;  %v24263_v41 = vld [vmem:[%s31298_s12 + $0x424] ss:$8 sps:$4 sm:$0xff]  }
0x1293   : > { %16176 = vmatprep.subr.bf16.mxu1 %v24191_v55  ;;  %v24261_v55 = vld [vmem:[%s31298_s12 + $0x420] ss:$8 sps:$4 sm:$0xff]  }
0x1296   : > { %16177 = vmatpush1.bf16.msra.mxu1 %v24189_v28  ;;  %v24269_v28 = vld [vmem:[%s31298_s12 + $0x444] ss:$8 sps:$4 sm:$0xff]  }
0x1297   : > { %16178 = vmatprep.subr.bf16.mxu1 %v24194_v38  ;;  %v24267_v38 = vld [vmem:[%s31298_s12 + $0x440] ss:$8 sps:$4 sm:$0xff]  }
0x129a   : > { %16179 = vmatpush1.bf16.msra.mxu1 %v24192_v19  ;;  %v24272_v19 = vld [vmem:[%s31298_s12 + $0x454] ss:$8 sps:$4 sm:$0xff]  }
0x129b   : > { %16180 = vmatprep.subr.bf16.mxu1 %v24197_v45  ;;  %v24270_v45 = vld [vmem:[%s31298_s12 + $0x450] ss:$8 sps:$4 sm:$0xff]  }
0x129e   : > { %16181 = vmatpush1.bf16.msra.mxu1 %v24195_v24  ;;  %v24275_v24 = vld [vmem:[%s31298_s12 + $0x464] ss:$8 sps:$4 sm:$0xff]  }
0x129f   : > { %16182 = vmatprep.subr.bf16.mxu1 %v24200_v63  ;;  %v24273_v63 = vld [vmem:[%s31298_s12 + $0x460] ss:$8 sps:$4 sm:$0xff]  }
0x12a2   : > { %16183 = vmatpush1.bf16.msra.mxu1 %v24198_v34  ;;  %v24278_v34 = vld [vmem:[%s31298_s12 + $0x474] ss:$8 sps:$4 sm:$0xff]  }
0x12a3   : > { %16184 = vmatprep.subr.bf16.mxu1 %v24203_v3  ;;  %v24276_v3 = vld [vmem:[%s31298_s12 + $0x470] ss:$8 sps:$4 sm:$0xff]  }
0x12a6   : > { %16185 = vmatpush1.bf16.msra.mxu1 %v24201_v25  ;;  %v24281_v25 = vld [vmem:[%s31298_s12 + $0x484] ss:$8 sps:$4 sm:$0xff]  }
0x12a7   : > { %16186 = vmatprep.subr.bf16.mxu1 %v24206_v48  ;;  %v24279_v48 = vld [vmem:[%s31298_s12 + $0x480] ss:$8 sps:$4 sm:$0xff]  }
0x12aa   : > { %16187 = vmatpush1.bf16.msra.mxu1 %v24204_v54  ;;  %v24284_v54 = vld [vmem:[%s31298_s12 + $0x494] ss:$8 sps:$4 sm:$0xff]  }
0x12ab   : > { %16422 = vmatprep.subr.bf16.mxu1 %v24209_v2  ;;  %v24282_v2 = vld [vmem:[%s31298_s12 + $0x490] ss:$8 sps:$4 sm:$0xff]  }
0x12ad   : > { %16189 = vmatmul.mubr.bf16.vlgmr.msra.gmra.mrb[152].mxu1 %v15992_v35  ;;  %v24285_v35 = vld [vmem:[%s31298_s12 + $0x4a0] ss:$8 sps:$4 sm:$0xff]  }
0x12ae   : > { %16423 = vmatpush1.bf16.msra.mxu1 %v24207_v56  ;;  %16454 = vmatprep.mubr.bf16.mxu1 %v30479_v13  ;;  %v24216_v13 = vld [vmem:[%s31298_s12 + $0x330] ss:$8 sps:$4 sm:$0xff]   ;;  %v24287_v56 = vld [vmem:[%s31298_s12 + $0x4a4] ss:$8 sps:$4 sm:$0xff]  }
0x12af   : > { %16424 = vmatprep.subr.bf16.mxu1 %v24212_v7  ;;  %v24290_v7 = vld [vmem:[%s31298_s12 + $0x4b4] ss:$8 sps:$4 sm:$0xff]  }
0x12b2   : > { %16425 = vmatpush1.bf16.msra.mxu1 %v24210_v0  ;;  %v24288_v0 = vld [vmem:[%s31298_s12 + $0x4b0] ss:$8 sps:$4 sm:$0xff]  }
0x12b3   : > { %16426 = vmatprep.subr.bf16.mxu1 %v24215_v36  ;;  %v24293_v36 = vld [vmem:[%s31298_s12 + $0x4c4] ss:$8 sps:$4 sm:$0xff]  }
0x12b6   : > { %16427 = vmatpush1.bf16.msra.mxu1 %v24213_v62  ;;  %v24291_v62 = vld [vmem:[%s31298_s12 + $0x4c0] ss:$8 sps:$4 sm:$0xff]  }
0x12b7   : > { %16428 = vmatprep.subr.bf16.mxu1 %v24218_v58  ;;  %v24296_v58 = vld [vmem:[%s31298_s12 + $0x4d4] ss:$8 sps:$4 sm:$0xff]  }
0x12ba   : > { %16429 = vmatpush1.bf16.msra.mxu1 %v24216_v13  ;;  %v24294_v13 = vld [vmem:[%s31298_s12 + $0x4d0] ss:$8 sps:$4 sm:$0xff]  }
0x12bb   : > { %16430 = vmatprep.subr.bf16.mxu1 %v24221_v17  ;;  %v24299_v17 = vld [vmem:[%s31298_s12 + $0x4e4] ss:$8 sps:$4 sm:$0xff]  }
0x12be   : > { %16431 = vmatpush1.bf16.msra.mxu1 %v24219_v1  ;;  %v24297_v1 = vld [vmem:[%s31298_s12 + $0x4e0] ss:$8 sps:$4 sm:$0xff]  }
0x12bf   : > { %16432 = vmatprep.subr.bf16.mxu1 %v24224_v33  ;;  %v24302_v33 = vld [vmem:[%s31298_s12 + $0x4f4] ss:$8 sps:$4 sm:$0xff]  }
0x12c2   : > { %16433 = vmatpush1.bf16.msra.mxu1 %v24222_v37  ;;  %v24300_v37 = vld [vmem:[%s31298_s12 + $0x4f0] ss:$8 sps:$4 sm:$0xff]  }
0x12c3   : > { %16434 = vmatprep.subr.bf16.mxu1 %v24227_v30  ;;  %v24305_v30 = vld [vmem:[%s31298_s12 + $0x504] ss:$8 sps:$4 sm:$0xff]  }
0x12c6   : > { %16435 = vmatpush1.bf16.msra.mxu1 %v24225_v10  ;;  %v16505_v10 = vrot.slane %v30450_v60, 3 }
0x12c7   : > { %16436 = vmatprep.subr.bf16.mxu1 %v24230_v15  ;;  %v16504_v15 = vrot.slane %v30439_v26, 3 }
0x12ca   : > { %16437 = vmatpush1.bf16.msra.mxu1 %v24228_v50  ;;  %v24303_v50 = vld [vmem:[%s31298_s12 + $0x500] ss:$8 sps:$4 sm:$0xff]  }
0x12cb   : > { %16438 = vmatprep.subr.bf16.mxu1 %v24233_v31  ;;  %v24308_v31 = vld [vmem:[%s31298_s12 + $0x514] ss:$8 sps:$4 sm:$0xff]  }
0x12ce   : > { %16439 = vmatpush1.bf16.msra.mxu1 %v24231_v42  ;;  %v16506_v42 = vsel %vm4240_vm11, %v16504_v15, %v16505_v10  ;;  %v24381_v10 = vld [vmem:[%s31298_s12 + $0x6a0] ss:$8 sps:$4 sm:$0xff]   ;;  %v24386_v15 = vld [vmem:[%s31298_s12 + $0x6b4] ss:$8 sps:$4 sm:$0xff]  }
0x12cf   : > { %16440 = vmatprep.subr.bf16.mxu1 %v24236_v6  ;;  %v24306_v6 = vld [vmem:[%s31298_s12 + $0x510] ss:$8 sps:$4 sm:$0xff]  }
0x12d2   : > { %16441 = vmatpush1.bf16.msra.mxu1 %v24234_v18  ;;  %v24311_v18 = vld [vmem:[%s31298_s12 + $0x524] ss:$8 sps:$4 sm:$0xff]  }
0x12d3   : > { %16442 = vmatprep.subr.bf16.mxu1 %v24239_v57  ;;  %v24309_v57 = vld [vmem:[%s31298_s12 + $0x520] ss:$8 sps:$4 sm:$0xff]  }
0x12d6   : > { %16443 = vmatpush1.bf16.msra.mxu1 %v24237_v52  ;;  %v24314_v52 = vld [vmem:[%s31298_s12 + $0x534] ss:$8 sps:$4 sm:$0xff]  }
0x12d7   : > { %16444 = vmatprep.subr.bf16.mxu1 %v24242_v16  ;;  %v24317_v16 = vld [vmem:[%s31298_s12 + $0x544] ss:$8 sps:$4 sm:$0xff]  }
0x12da   : > { %16445 = vmatpush1.bf16.msra.mxu1 %v24240_v21  ;;  %v24315_v21 = vld [vmem:[%s31298_s12 + $0x540] ss:$8 sps:$4 sm:$0xff]  }
0x12db   : > { %16446 = vmatprep.subr.bf16.mxu1 %v24245_v61  ;;  %v24320_v61 = vld [vmem:[%s31298_s12 + $0x554] ss:$8 sps:$4 sm:$0xff]  }
0x12de   : > { %16447 = vmatpush1.bf16.msra.mxu1 %v24243_v9  ;;  %v24318_v9 = vld [vmem:[%s31298_s12 + $0x550] ss:$8 sps:$4 sm:$0xff]  }
0x12df   : > { %16448 = vmatprep.subr.bf16.mxu1 %v24248_v23  ;;  %v24323_v23 = vld [vmem:[%s31298_s12 + $0x564] ss:$8 sps:$4 sm:$0xff]  }
0x12e2   : > { %16449 = vmatpush1.bf16.msra.mxu1 %v24246_v53  ;;  %v24321_v53 = vld [vmem:[%s31298_s12 + $0x560] ss:$8 sps:$4 sm:$0xff]  }
0x12e3   : > { %16450 = vmatprep.subr.bf16.mxu1 %v24251_v40  ;;  %v24326_v40 = vld [vmem:[%s31298_s12 + $0x574] ss:$8 sps:$4 sm:$0xff]  }
0x12e6   : > { %16451 = vmatpush1.bf16.msra.mxu1 %v24249_v47  ;;  %v24324_v47 = vld [vmem:[%s31298_s12 + $0x570] ss:$8 sps:$4 sm:$0xff]  }
0x12e7   : > { %16452 = vmatprep.subr.bf16.mxu1 %v24254_v32  ;;  %v24329_v32 = vld [vmem:[%s31298_s12 + $0x584] ss:$8 sps:$4 sm:$0xff]  }
0x12ea   : > { %16453 = vmatpush1.bf16.msra.mxu1 %v24252_v43  ;;  %v24327_v43 = vld [vmem:[%s31298_s12 + $0x580] ss:$8 sps:$4 sm:$0xff]  }
0x12eb   : > { %16672 = vmatprep.subr.bf16.mxu1 %v24257_v12  ;;  %v24332_v12 = vld [vmem:[%s31298_s12 + $0x594] ss:$8 sps:$4 sm:$0xff]  }
0x12ed   : > { %16455 = vmatmul.mubr.bf16.vlgmr.msra.gmra.mrb[152].mxu1 %v30476_v11  ;;  %v24266_v11 = vld [vmem:[%s31298_s12 + $0x434] ss:$8 sps:$4 sm:$0xff]  }
0x12ee   : > { %16673 = vmatpush1.bf16.msra.mxu1 %v24255_v29  ;;  %16704 = vmatprep.mubr.bf16.mxu1 %v30466_v8  ;;  %v24264_v8 = vld [vmem:[%s31298_s12 + $0x430] ss:$8 sps:$4 sm:$0xff]  }
0x12ef   : > { %16674 = vmatprep.subr.bf16.mxu1 %v24260_v27  ;;  %v24330_v29 = vld [vmem:[%s31298_s12 + $0x590] ss:$8 sps:$4 sm:$0xff]   ;;  %v24335_v27 = vld [vmem:[%s31298_s12 + $0x5a4] ss:$8 sps:$4 sm:$0xff]  }
0x12f2   : > { %16675 = vmatpush1.bf16.msra.mxu1 %v24258_v51  ;;  %v24333_v51 = vld [vmem:[%s31298_s12 + $0x5a0] ss:$8 sps:$4 sm:$0xff]  }
0x12f3   : > { %16676 = vmatprep.subr.bf16.mxu1 %v24263_v41  ;;  %v24338_v41 = vld [vmem:[%s31298_s12 + $0x5b4] ss:$8 sps:$4 sm:$0xff]  }
0x12f6   : > { %16677 = vmatpush1.bf16.msra.mxu1 %v24261_v55  ;;  %v24336_v55 = vld [vmem:[%s31298_s12 + $0x5b0] ss:$8 sps:$4 sm:$0xff]  }
0x12f7   : > { %16678 = vmatprep.subr.bf16.mxu1 %v24266_v11  ;;  %v24341_v11 = vld [vmem:[%s31298_s12 + $0x5c4] ss:$8 sps:$4 sm:$0xff]  }
0x12fa   : > { %16679 = vmatpush1.bf16.msra.mxu1 %v24264_v8  ;;  %v24339_v8 = vld [vmem:[%s31298_s12 + $0x5c0] ss:$8 sps:$4 sm:$0xff]  }
0x12fb   : > { %16680 = vmatprep.subr.bf16.mxu1 %v24269_v28  ;;  %v24344_v28 = vld [vmem:[%s31298_s12 + $0x5d4] ss:$8 sps:$4 sm:$0xff]  }
0x12fe   : > { %16681 = vmatpush1.bf16.msra.mxu1 %v24267_v38  ;;  %v24342_v38 = vld [vmem:[%s31298_s12 + $0x5d0] ss:$8 sps:$4 sm:$0xff]  }
0x12ff   : > { %16682 = vmatprep.subr.bf16.mxu1 %v24272_v19  ;;  %v24347_v19 = vld [vmem:[%s31298_s12 + $0x5e4] ss:$8 sps:$4 sm:$0xff]  }
0x1302   : > { %16683 = vmatpush1.bf16.msra.mxu1 %v24270_v45  ;;  %v24345_v45 = vld [vmem:[%s31298_s12 + $0x5e0] ss:$8 sps:$4 sm:$0xff]  }
0x1303   : > { %16684 = vmatprep.subr.bf16.mxu1 %v24275_v24  ;;  %v24350_v24 = vld [vmem:[%s31298_s12 + $0x5f4] ss:$8 sps:$4 sm:$0xff]  }
0x1306   : > { %16685 = vmatpush1.bf16.msra.mxu1 %v24273_v63  ;;  %v24348_v63 = vld [vmem:[%s31298_s12 + $0x5f0] ss:$8 sps:$4 sm:$0xff]  }
0x1307   : > { %16686 = vmatprep.subr.bf16.mxu1 %v24278_v34  ;;  %v24353_v34 = vld [vmem:[%s31298_s12 + $0x604] ss:$8 sps:$4 sm:$0xff]  }
0x130a   : > { %16687 = vmatpush1.bf16.msra.mxu1 %v24276_v3  ;;  %v24351_v3 = vld [vmem:[%s31298_s12 + $0x600] ss:$8 sps:$4 sm:$0xff]  }
0x130b   : > { %16688 = vmatprep.subr.bf16.mxu1 %v24281_v25  ;;  %v24356_v25 = vld [vmem:[%s31298_s12 + $0x614] ss:$8 sps:$4 sm:$0xff]  }
0x130e   : > { %16689 = vmatpush1.bf16.msra.mxu1 %v24279_v48  ;;  %v24354_v48 = vld [vmem:[%s31298_s12 + $0x610] ss:$8 sps:$4 sm:$0xff]  }
0x130f   : > { %16690 = vmatprep.subr.bf16.mxu1 %v24284_v54  ;;  %v24359_v54 = vld [vmem:[%s31298_s12 + $0x624] ss:$8 sps:$4 sm:$0xff]  }
0x1312   : > { %16691 = vmatpush1.bf16.msra.mxu1 %v24282_v2  ;;  %v24357_v2 = vld [vmem:[%s31298_s12 + $0x620] ss:$8 sps:$4 sm:$0xff]  }
0x1313   : > { %16692 = vmatprep.subr.bf16.mxu1 %v24287_v56  ;;  %v24365_v56 = vld [vmem:[%s31298_s12 + $0x644] ss:$8 sps:$4 sm:$0xff]  }
0x1316   : > { %16693 = vmatpush1.bf16.msra.mxu1 %v24285_v35  ;;  %v24363_v35 = vld [vmem:[%s31298_s12 + $0x640] ss:$8 sps:$4 sm:$0xff]  }
0x1317   : > { %16694 = vmatprep.subr.bf16.mxu1 %v24290_v7  ;;  %v24368_v7 = vld [vmem:[%s31298_s12 + $0x654] ss:$8 sps:$4 sm:$0xff]  }
0x131a   : > { %16695 = vmatpush1.bf16.msra.mxu1 %v24288_v0  ;;  %v24366_v0 = vld [vmem:[%s31298_s12 + $0x650] ss:$8 sps:$4 sm:$0xff]  }
0x131b   : > { %16696 = vmatprep.subr.bf16.mxu1 %v24293_v36  ;;  %v24371_v36 = vld [vmem:[%s31298_s12 + $0x664] ss:$8 sps:$4 sm:$0xff]  }
0x131e   : > { %16697 = vmatpush1.bf16.msra.mxu1 %v24291_v62  ;;  %v24369_v62 = vld [vmem:[%s31298_s12 + $0x660] ss:$8 sps:$4 sm:$0xff]  }
0x131f   : > { %16698 = vmatprep.subr.bf16.mxu1 %v24296_v58  ;;  %v24374_v58 = vld [vmem:[%s31298_s12 + $0x674] ss:$8 sps:$4 sm:$0xff]  }
0x1322   : > { %16699 = vmatpush1.bf16.msra.mxu1 %v24294_v13  ;;  %v24372_v13 = vld [vmem:[%s31298_s12 + $0x670] ss:$8 sps:$4 sm:$0xff]  }
0x1323   : > { %16700 = vmatprep.subr.bf16.mxu1 %v24299_v17  ;;  %v24377_v17 = vld [vmem:[%s31298_s12 + $0x684] ss:$8 sps:$4 sm:$0xff]  }
0x1326   : > { %16701 = vmatpush1.bf16.msra.mxu1 %v24297_v1  ;;  %v24375_v1 = vld [vmem:[%s31298_s12 + $0x680] ss:$8 sps:$4 sm:$0xff]  }
0x1327   : > { %16702 = vmatprep.subr.bf16.mxu1 %v24302_v33  ;;  %v24380_v33 = vld [vmem:[%s31298_s12 + $0x694] ss:$8 sps:$4 sm:$0xff]  }
0x132a   : > { %16703 = vmatpush1.bf16.msra.mxu1 %v24300_v37  ;;  %v24378_v37 = vld [vmem:[%s31298_s12 + $0x690] ss:$8 sps:$4 sm:$0xff]  }
0x132b   : > { %16928 = vmatprep.subr.bf16.mxu1 %v24305_v30  ;;  %v24383_v30 = vld [vmem:[%s31298_s12 + $0x6a4] ss:$8 sps:$4 sm:$0xff]  }
0x132d   : > { %16705 = vmatmul.mubr.bf16.vlgmr.msra.gmra.mrb[152].mxu1 %v16506_v42  ;;  %v24387_v42 = vld [vmem:[%s31298_s12 + $0x6c0] ss:$8 sps:$4 sm:$0xff]  }
0x132e   : > { %16929 = vmatpush1.bf16.msra.mxu1 %v24303_v50  ;;  %16960 = vmatprep.mubr.bf16.mxu1 %v30482_v39  ;;  %v24312_v39 = vld [vmem:[%s31298_s12 + $0x530] ss:$8 sps:$4 sm:$0xff]  }
0x132f   : > { %16930 = vmatprep.subr.bf16.mxu1 %v24308_v31  ;;  %v24384_v50 = vld [vmem:[%s31298_s12 + $0x6b0] ss:$8 sps:$4 sm:$0xff]   ;;  %v24389_v31 = vld [vmem:[%s31298_s12 + $0x6c4] ss:$8 sps:$4 sm:$0xff]  }
0x1332   : > { %16931 = vmatpush1.bf16.msra.mxu1 %v24306_v6  ;;  %v24392_v6 = vld [vmem:[%s31298_s12 + $0x6d4] ss:$8 sps:$4 sm:$0xff]  }
0x1333   : > { %16932 = vmatprep.subr.bf16.mxu1 %v24311_v18  ;;  %v24390_v18 = vld [vmem:[%s31298_s12 + $0x6d0] ss:$8 sps:$4 sm:$0xff]  }
0x1336   : > { %16933 = vmatpush1.bf16.msra.mxu1 %v24309_v57  ;;  %v24395_v57 = vld [vmem:[%s31298_s12 + $0x6e4] ss:$8 sps:$4 sm:$0xff]  }
0x1337   : > { %16934 = vmatprep.subr.bf16.mxu1 %v24314_v52  ;;  %v24393_v52 = vld [vmem:[%s31298_s12 + $0x6e0] ss:$8 sps:$4 sm:$0xff]  }
0x133a   : > { %16935 = vmatpush1.bf16.msra.mxu1 %v24312_v39  ;;  %v24398_v39 = vld [vmem:[%s31298_s12 + $0x6f4] ss:$8 sps:$4 sm:$0xff]  }
0x133b   : > { %16936 = vmatprep.subr.bf16.mxu1 %v24317_v16  ;;  %v24396_v16 = vld [vmem:[%s31298_s12 + $0x6f0] ss:$8 sps:$4 sm:$0xff]  }
0x133e   : > { %16937 = vmatpush1.bf16.msra.mxu1 %v24315_v21  ;;  %v24401_v21 = vld [vmem:[%s31298_s12 + $0x704] ss:$8 sps:$4 sm:$0xff]  }
0x133f   : > { %16938 = vmatprep.subr.bf16.mxu1 %v24320_v61  ;;  %v17009_v61 = vrot.slane %v30450_v60, 5 }
0x1342   : > { %16939 = vmatpush1.bf16.msra.mxu1 %v24318_v9  ;;  %v17008_v9 = vrot.slane %v30439_v26, 5 }
0x1343   : > { %16940 = vmatprep.subr.bf16.mxu1 %v24323_v23  ;;  %v24399_v23 = vld [vmem:[%s31298_s12 + $0x700] ss:$8 sps:$4 sm:$0xff]  }
0x1346   : > { %16941 = vmatpush1.bf16.msra.mxu1 %v24321_v53  ;;  %v24404_v53 = vld [vmem:[%s31298_s12 + $0x714] ss:$8 sps:$4 sm:$0xff]  }
0x1347   : > { %16942 = vmatprep.subr.bf16.mxu1 %v24326_v40  ;;  %v17010_v40 = vsel %vm5132_vm15, %v17008_v9, %v17009_v61  ;;  %v24485_v61 = vld [vmem:[%s31298_s12 + $0x8c4] ss:$8 sps:$4 sm:$0xff]   ;;  %v24483_v9 = vld [vmem:[%s31298_s12 + $0x8c0] ss:$8 sps:$4 sm:$0xff]  }
0x134a   : > { %16943 = vmatpush1.bf16.msra.mxu1 %v24324_v47  ;;  %v24402_v47 = vld [vmem:[%s31298_s12 + $0x710] ss:$8 sps:$4 sm:$0xff]  }
0x134b   : > { %16944 = vmatprep.subr.bf16.mxu1 %v24329_v32  ;;  %v24407_v32 = vld [vmem:[%s31298_s12 + $0x724] ss:$8 sps:$4 sm:$0xff]  }
0x134e   : > { %16945 = vmatpush1.bf16.msra.mxu1 %v24327_v43  ;;  %v24405_v43 = vld [vmem:[%s31298_s12 + $0x720] ss:$8 sps:$4 sm:$0xff]  }
0x134f   : > { %16946 = vmatprep.subr.bf16.mxu1 %v24332_v12  ;;  %v24410_v12 = vld [vmem:[%s31298_s12 + $0x734] ss:$8 sps:$4 sm:$0xff]  }
0x1352   : > { %16947 = vmatpush1.bf16.msra.mxu1 %v24330_v29  ;;  %v24413_v29 = vld [vmem:[%s31298_s12 + $0x744] ss:$8 sps:$4 sm:$0xff]  }
0x1353   : > { %16948 = vmatprep.subr.bf16.mxu1 %v24335_v27  ;;  %v24411_v27 = vld [vmem:[%s31298_s12 + $0x740] ss:$8 sps:$4 sm:$0xff]  }
0x1356   : > { %16949 = vmatpush1.bf16.msra.mxu1 %v24333_v51  ;;  %v24416_v51 = vld [vmem:[%s31298_s12 + $0x754] ss:$8 sps:$4 sm:$0xff]  }
0x1357   : > { %16950 = vmatprep.subr.bf16.mxu1 %v24338_v41  ;;  %v24414_v41 = vld [vmem:[%s31298_s12 + $0x750] ss:$8 sps:$4 sm:$0xff]  }
0x135a   : > { %16951 = vmatpush1.bf16.msra.mxu1 %v24336_v55  ;;  %v24419_v55 = vld [vmem:[%s31298_s12 + $0x764] ss:$8 sps:$4 sm:$0xff]  }
0x135b   : > { %16952 = vmatprep.subr.bf16.mxu1 %v24341_v11  ;;  %v24417_v11 = vld [vmem:[%s31298_s12 + $0x760] ss:$8 sps:$4 sm:$0xff]  }
0x135e   : > { %16953 = vmatpush1.bf16.msra.mxu1 %v24339_v8  ;;  %v24422_v8 = vld [vmem:[%s31298_s12 + $0x774] ss:$8 sps:$4 sm:$0xff]  }
0x135f   : > { %16954 = vmatprep.subr.bf16.mxu1 %v24344_v28  ;;  %v24420_v28 = vld [vmem:[%s31298_s12 + $0x770] ss:$8 sps:$4 sm:$0xff]  }
0x1362   : > { %16955 = vmatpush1.bf16.msra.mxu1 %v24342_v38  ;;  %v24425_v38 = vld [vmem:[%s31298_s12 + $0x784] ss:$8 sps:$4 sm:$0xff]  }
0x1363   : > { %16956 = vmatprep.subr.bf16.mxu1 %v24347_v19  ;;  %v24423_v19 = vld [vmem:[%s31298_s12 + $0x780] ss:$8 sps:$4 sm:$0xff]  }
0x1366   : > { %16957 = vmatpush1.bf16.msra.mxu1 %v24345_v45  ;;  %v24428_v45 = vld [vmem:[%s31298_s12 + $0x794] ss:$8 sps:$4 sm:$0xff]  }
0x1367   : > { %16958 = vmatprep.subr.bf16.mxu1 %v24350_v24  ;;  %v24426_v24 = vld [vmem:[%s31298_s12 + $0x790] ss:$8 sps:$4 sm:$0xff]  }
0x136a   : > { %16959 = vmatpush1.bf16.msra.mxu1 %v24348_v63  ;;  %v24431_v63 = vld [vmem:[%s31298_s12 + $0x7a4] ss:$8 sps:$4 sm:$0xff]  }
0x136b   : > { %17176 = vmatprep.subr.bf16.mxu1 %v24353_v34  ;;  %v24429_v34 = vld [vmem:[%s31298_s12 + $0x7a0] ss:$8 sps:$4 sm:$0xff]  }
0x136d   : > { %16961 = vmatmul.mubr.bf16.vlgmr.msra.gmra.mrb[152].mxu1 %v30491_v59  ;;  %v24362_v59 = vld [vmem:[%s31298_s12 + $0x634] ss:$8 sps:$4 sm:$0xff]  }
0x136e   : > { %17177 = vmatpush1.bf16.msra.mxu1 %v24351_v3  ;;  %17208 = vmatprep.mubr.bf16.mxu1 %v30485_v4  ;;  %v24360_v4 = vld [vmem:[%s31298_s12 + $0x630] ss:$8 sps:$4 sm:$0xff]   ;;  %v24434_v3 = vld [vmem:[%s31298_s12 + $0x7b4] ss:$8 sps:$4 sm:$0xff]  }
0x136f   : > { %17178 = vmatprep.subr.bf16.mxu1 %v24356_v25  ;;  %v24432_v25 = vld [vmem:[%s31298_s12 + $0x7b0] ss:$8 sps:$4 sm:$0xff]  }
0x1372   : > { %17179 = vmatpush1.bf16.msra.mxu1 %v24354_v48  ;;  %v24437_v48 = vld [vmem:[%s31298_s12 + $0x7c4] ss:$8 sps:$4 sm:$0xff]  }
0x1373   : > { %17180 = vmatprep.subr.bf16.mxu1 %v24359_v54  ;;  %v24435_v54 = vld [vmem:[%s31298_s12 + $0x7c0] ss:$8 sps:$4 sm:$0xff]  }
0x1376   : > { %17181 = vmatpush1.bf16.msra.mxu1 %v24357_v2  ;;  %v24440_v2 = vld [vmem:[%s31298_s12 + $0x7d4] ss:$8 sps:$4 sm:$0xff]  }
0x1377   : > { %17182 = vmatprep.subr.bf16.mxu1 %v24362_v59  ;;  %v24438_v59 = vld [vmem:[%s31298_s12 + $0x7d0] ss:$8 sps:$4 sm:$0xff]  }
0x137a   : > { %17183 = vmatpush1.bf16.msra.mxu1 %v24360_v4  ;;  %v24443_v4 = vld [vmem:[%s31298_s12 + $0x7e4] ss:$8 sps:$4 sm:$0xff]  }
0x137b   : > { %17184 = vmatprep.subr.bf16.mxu1 %v24365_v56  ;;  %v24441_v56 = vld [vmem:[%s31298_s12 + $0x7e0] ss:$8 sps:$4 sm:$0xff]  }
0x137e   : > { %17185 = vmatpush1.bf16.msra.mxu1 %v24363_v35  ;;  %v24446_v35 = vld [vmem:[%s31298_s12 + $0x7f4] ss:$8 sps:$4 sm:$0xff]  }
0x137f   : > { %17186 = vmatprep.subr.bf16.mxu1 %v24368_v7  ;;  %v24444_v7 = vld [vmem:[%s31298_s12 + $0x7f0] ss:$8 sps:$4 sm:$0xff]  }
0x1382   : > { %17187 = vmatpush1.bf16.msra.mxu1 %v24366_v0  ;;  %v24449_v0 = vld [vmem:[%s31298_s12 + $0x804] ss:$8 sps:$4 sm:$0xff]  }
0x1383   : > { %17188 = vmatprep.subr.bf16.mxu1 %v24371_v36  ;;  %v24447_v36 = vld [vmem:[%s31298_s12 + $0x800] ss:$8 sps:$4 sm:$0xff]  }
0x1386   : > { %17189 = vmatpush1.bf16.msra.mxu1 %v24369_v62  ;;  %v24452_v62 = vld [vmem:[%s31298_s12 + $0x814] ss:$8 sps:$4 sm:$0xff]  }
0x1387   : > { %17190 = vmatprep.subr.bf16.mxu1 %v24374_v58  ;;  %v24450_v58 = vld [vmem:[%s31298_s12 + $0x810] ss:$8 sps:$4 sm:$0xff]  }
0x138a   : > { %17191 = vmatpush1.bf16.msra.mxu1 %v24372_v13  ;;  %v24455_v13 = vld [vmem:[%s31298_s12 + $0x824] ss:$8 sps:$4 sm:$0xff]  }
0x138b   : > { %17192 = vmatprep.subr.bf16.mxu1 %v24377_v17  ;;  %v24453_v17 = vld [vmem:[%s31298_s12 + $0x820] ss:$8 sps:$4 sm:$0xff]  }
0x138e   : > { %17193 = vmatpush1.bf16.msra.mxu1 %v24375_v1  ;;  %v24461_v1 = vld [vmem:[%s31298_s12 + $0x844] ss:$8 sps:$4 sm:$0xff]  }
0x138f   : > { %17194 = vmatprep.subr.bf16.mxu1 %v24380_v33  ;;  %v24459_v33 = vld [vmem:[%s31298_s12 + $0x840] ss:$8 sps:$4 sm:$0xff]  }
0x1392   : > { %17195 = vmatpush1.bf16.msra.mxu1 %v24378_v37  ;;  %v24464_v37 = vld [vmem:[%s31298_s12 + $0x854] ss:$8 sps:$4 sm:$0xff]  }
0x1393   : > { %17196 = vmatprep.subr.bf16.mxu1 %v24383_v30  ;;  %v24462_v30 = vld [vmem:[%s31298_s12 + $0x850] ss:$8 sps:$4 sm:$0xff]  }
0x1396   : > { %17197 = vmatpush1.bf16.msra.mxu1 %v24381_v10  ;;  %v24467_v10 = vld [vmem:[%s31298_s12 + $0x864] ss:$8 sps:$4 sm:$0xff]  }
0x1397   : > { %17198 = vmatprep.subr.bf16.mxu1 %v24386_v15  ;;  %v24465_v15 = vld [vmem:[%s31298_s12 + $0x860] ss:$8 sps:$4 sm:$0xff]  }
0x139a   : > { %17199 = vmatpush1.bf16.msra.mxu1 %v24384_v50  ;;  %v24470_v50 = vld [vmem:[%s31298_s12 + $0x874] ss:$8 sps:$4 sm:$0xff]  }
0x139b   : > { %17200 = vmatprep.subr.bf16.mxu1 %v24389_v31  ;;  %v24468_v31 = vld [vmem:[%s31298_s12 + $0x870] ss:$8 sps:$4 sm:$0xff]  }
0x139e   : > { %17201 = vmatpush1.bf16.msra.mxu1 %v24387_v42  ;;  %v24473_v42 = vld [vmem:[%s31298_s12 + $0x884] ss:$8 sps:$4 sm:$0xff]  }
0x139f   : > { %17202 = vmatprep.subr.bf16.mxu1 %v24392_v6  ;;  %v24471_v6 = vld [vmem:[%s31298_s12 + $0x880] ss:$8 sps:$4 sm:$0xff]  }
0x13a2   : > { %17203 = vmatpush1.bf16.msra.mxu1 %v24390_v18  ;;  %v24476_v18 = vld [vmem:[%s31298_s12 + $0x894] ss:$8 sps:$4 sm:$0xff]  }
0x13a3   : > { %17204 = vmatprep.subr.bf16.mxu1 %v24395_v57  ;;  %v24474_v57 = vld [vmem:[%s31298_s12 + $0x890] ss:$8 sps:$4 sm:$0xff]  }
0x13a6   : > { %17205 = vmatpush1.bf16.msra.mxu1 %v24393_v52  ;;  %v24479_v52 = vld [vmem:[%s31298_s12 + $0x8a4] ss:$8 sps:$4 sm:$0xff]  }
0x13a7   : > { %17206 = vmatprep.subr.bf16.mxu1 %v24398_v39  ;;  %v24477_v39 = vld [vmem:[%s31298_s12 + $0x8a0] ss:$8 sps:$4 sm:$0xff]  }
0x13aa   : > { %17207 = vmatpush1.bf16.msra.mxu1 %v24396_v16  ;;  %v24482_v16 = vld [vmem:[%s31298_s12 + $0x8b4] ss:$8 sps:$4 sm:$0xff]  }
0x13ab   : > { %17432 = vmatprep.subr.bf16.mxu1 %v24401_v21  ;;  %v24480_v21 = vld [vmem:[%s31298_s12 + $0x8b0] ss:$8 sps:$4 sm:$0xff]  }
0x13ad   : > { %17209 = vmatmul.mubr.bf16.vlgmr.msra.gmra.mrb[152].mxu1 %v17010_v40  ;;  %v24491_v40 = vld [vmem:[%s31298_s12 + $0x8e4] ss:$8 sps:$4 sm:$0xff]  }
0x13ae   : > { %17433 = vmatpush1.bf16.msra.mxu1 %v24399_v23  ;;  %17464 = vmatprep.mubr.bf16.mxu1 %v30498_v20  ;;  %v24408_v20 = vld [vmem:[%s31298_s12 + $0x730] ss:$8 sps:$4 sm:$0xff]   ;;  %v24488_v23 = vld [vmem:[%s31298_s12 + $0x8d4] ss:$8 sps:$4 sm:$0xff]  }
0x13af   : > { %17434 = vmatprep.subr.bf16.mxu1 %v24404_v53  ;;  %v24486_v53 = vld [vmem:[%s31298_s12 + $0x8d0] ss:$8 sps:$4 sm:$0xff]  }
0x13b2   : > { %17435 = vmatpush1.bf16.msra.mxu1 %v24402_v47  ;;  %v24489_v47 = vld [vmem:[%s31298_s12 + $0x8e0] ss:$8 sps:$4 sm:$0xff]  }
0x13b3   : > { %17436 = vmatprep.subr.bf16.mxu1 %v24407_v32  ;;  %v24494_v32 = vld [vmem:[%s31298_s12 + $0x8f4] ss:$8 sps:$4 sm:$0xff]  }
0x13b6   : > { %17437 = vmatpush1.bf16.msra.mxu1 %v24405_v43  ;;  %v24492_v43 = vld [vmem:[%s31298_s12 + $0x8f0] ss:$8 sps:$4 sm:$0xff]  }
0x13b7   : > { %17438 = vmatprep.subr.bf16.mxu1 %v24410_v12  ;;  %v17513_v12 = vrot.slane %v30450_v60, 6 }
0x13ba   : > { %17439 = vmatpush1.bf16.msra.mxu1 %v24408_v20  ;;  %v17512_v20 = vrot.slane %v30439_v26, 6 }
0x13bb   : > { %17440 = vmatprep.subr.bf16.mxu1 %v24413_v29 }
0x13bc   : > { %v17514_v29 = vsel %vm1703_vm5, %v17512_v20, %v17513_v12 }
0x13be   : > { %17441 = vmatpush1.bf16.msra.mxu1 %v24411_v27  ;;  %v17727_v27 = vld [vmem:[%s31299_s13] sm:$0x3] }
0x13bf   : > { %17442 = vmatprep.subr.bf16.mxu1 %v24416_v51  ;;  %v17732_v51 = vrot.slane %v17727_v27, %v27219_v14 }
0x13c2   : > { %17443 = vmatpush1.bf16.msra.mxu1 %v24414_v41  ;;  %v17736_v41 = vrot.slane %v17727_v27, %v27222_v22 }
0x13c3   : > { %17444 = vmatprep.subr.bf16.mxu1 %v24419_v55 }
0x13c6   : > { %17445 = vmatpush1.bf16.msra.mxu1 %v24417_v11 }
0x13c7   : > { %17446 = vmatprep.subr.bf16.mxu1 %v24422_v8 }
0x13ca   : > { %17447 = vmatpush1.bf16.msra.mxu1 %v24420_v28 }
0x13cb   : > { %17448 = vmatprep.subr.bf16.mxu1 %v24425_v38 }
0x13ce   : > { %17449 = vmatpush1.bf16.msra.mxu1 %v24423_v19 }
0x13cf   : > { %17450 = vmatprep.subr.bf16.mxu1 %v24428_v45 }
0x13d2   : > { %17451 = vmatpush1.bf16.msra.mxu1 %v24426_v24 }
0x13d3   : > { %17452 = vmatprep.subr.bf16.mxu1 %v24431_v63 }
0x13d6   : > { %17453 = vmatpush1.bf16.msra.mxu1 %v24429_v34 }
0x13d7   : > { %17454 = vmatprep.subr.bf16.mxu1 %v24434_v3 }
0x13da   : > { %17455 = vmatpush1.bf16.msra.mxu1 %v24432_v25 }
0x13db   : > { %17456 = vmatprep.subr.bf16.mxu1 %v24437_v48 }
0x13de   : > { %17457 = vmatpush1.bf16.msra.mxu1 %v24435_v54 }
0x13df   : > { %17458 = vmatprep.subr.bf16.mxu1 %v24440_v2 }
0x13e2   : > { %17459 = vmatpush1.bf16.msra.mxu1 %v24438_v59 }
0x13e3   : > { %17460 = vmatprep.subr.bf16.mxu1 %v24443_v4 }
0x13e6   : > { %17461 = vmatpush1.bf16.msra.mxu1 %v24441_v56 }
0x13e7   : > { %17462 = vmatprep.subr.bf16.mxu1 %v24446_v35 }
0x13ea   : > { %17463 = vmatpush1.bf16.msra.mxu1 %v24444_v7 }
0x13eb   : > { %17680 = vmatprep.subr.bf16.mxu1 %v24449_v0 }
0x13ed   : > { %17465 = vmatmul.mubr.bf16.vlgmr.msra.gmra.mrb[152].mxu1 %v30504_v49  ;;  %v24458_v49 = vld [vmem:[%s31298_s12 + $0x834] ss:$8 sps:$4 sm:$0xff]  }
0x13ee   : > { %17681 = vmatpush1.bf16.msra.mxu1 %v24447_v36  ;;  %17712 = vmatprep.mubr.bf16.mxu1 %v30501_v5  ;;  %v24456_v5 = vld [vmem:[%s31298_s12 + $0x830] ss:$8 sps:$4 sm:$0xff]  }
0x13ef   : > { %17682 = vmatprep.subr.bf16.mxu1 %v24452_v62 }
0x13f2   : > { %17683 = vmatpush1.bf16.msra.mxu1 %v24450_v58 }
0x13f3   : > { %17684 = vmatprep.subr.bf16.mxu1 %v24455_v13  ;;  %v24522_v13 = vmov 1966171168  }
0x13f6   : > { %17685 = vmatpush1.bf16.msra.mxu1 %v24453_v17  ;;  %v17799_v17 = vunpack.c.l.s4 %v24522_v13 }
0x13f7   : > { %17686 = vmatprep.subr.bf16.mxu1 %v24458_v49 }
0x13fa   : > { %17687 = vmatpush1.bf16.msra.mxu1 %v24456_v5 }
0x13fb   : > { %17688 = vmatprep.subr.bf16.mxu1 %v24461_v1 }
0x13fe   : > { %17689 = vmatpush1.bf16.msra.mxu1 %v24459_v33 }
0x13ff   : > { %17690 = vmatprep.subr.bf16.mxu1 %v24464_v37 }
0x1402   : > { %17691 = vmatpush1.bf16.msra.mxu1 %v24462_v30 }
0x1403   : > { %17692 = vmatprep.subr.bf16.mxu1 %v24467_v10  ;;  %v17800_v10 = vunpack.c.0.s8 %v17799_v17 }
0x1406   : > { %17693 = vmatpush1.bf16.msra.mxu1 %v24465_v15 }
0x1407   : > { %17694 = vmatprep.subr.bf16.mxu1 %v24470_v50 }
0x140a   : > { %17695 = vmatpush1.bf16.msra.mxu1 %v24468_v31 }
0x140b   : > { %17696 = vmatprep.subr.bf16.mxu1 %v24473_v42 }
0x140e   : > { %17697 = vmatpush1.bf16.msra.mxu1 %v24471_v6 }
0x140f   : > { %17698 = vmatprep.subr.bf16.mxu1 %v24476_v18 }
0x1412   : > { %17699 = vmatpush1.bf16.msra.mxu1 %v24474_v57  ;;  %v17803_v57 = vsub.s32 %v17800_v10, %v27207_v46 }
0x1413   : > { %17700 = vmatprep.subr.bf16.mxu1 %v24479_v52 }
0x1416   : > { %17701 = vmatpush1.bf16.msra.mxu1 %v24477_v39 }
0x1417   : > { %17702 = vmatprep.subr.bf16.mxu1 %v24482_v16 }
0x141a   : > { %17703 = vmatpush1.bf16.msra.mxu1 %v24480_v21 }
0x141b   : > { %17704 = vmatprep.subr.bf16.mxu1 %v24485_v61 }
0x141e   : > { %17705 = vmatpush1.bf16.msra.mxu1 %v24483_v9 }
0x141f   : > { %17706 = vmatprep.subr.bf16.mxu1 %v24488_v23 }
0x1422   : > { %17707 = vmatpush1.bf16.msra.mxu1 %v24486_v53 }
0x1423   : > { %17708 = vmatprep.subr.bf16.mxu1 %v24491_v40 }
0x1426   : > { %17709 = vmatpush1.bf16.msra.mxu1 %v24489_v47 }
0x1427   : > { %17710 = vmatprep.subr.bf16.mxu1 %v24494_v32 }
0x142a   : > { %17711 = vmatpush1.bf16.msra.mxu1 %v24492_v43 }
0x142d   : > { %17713 = vmatmul.mubr.bf16.vlgmr.msra.gmra.mrb[152].mxu1 %v17514_v29 }
0x1500   : > { %v17714_v55 = vpop.f32.mrb[152].mxu1 }
0x1501   : > { %v17739_v11 = vadd.f32 %v17732_v51, %v17714_v55  ;;  %v17716_v8 = vpop.f32.mrb[153].mxu1 }
0x1502   : > { %v17740_v28 = vadd.f32 %v17736_v41, %v17716_v8  ;;  %v17718_v38 = vpop.f32.mrb[154].mxu1 }
0x1503   : > { %v17743_v60 = vmax.f32 %v17739_v11, 0.0  ;;  %v17741_v19 = vadd.f32 %v17732_v51, %v17718_v38  ;;  %v17720_v45 = vpop.f32.mrb[155].mxu1 }
0x1504   : > { %v17744_v26 = vmax.f32 %v17740_v28, 0.0  ;;  %v17742_v24 = vadd.f32 %v17736_v41, %v17720_v45 }
0x1505   : > { %v17745_v63 = vmax.f32 %v17741_v19, 0.0  ;;  %v17751_v3 = vrot.slane %v17743_v60, 1  ;;  %v17765_v25 = vrot.slane %v17743_v60, 2 }
0x1506   : > { %v17746_v34 = vmax.f32 %v17742_v24, 0.0  ;;  %v17754_v2 = vrot.slane %v17744_v26, 1  ;;  %v17768_v14 = vrot.slane %v17744_v26, 2 }
0x1507   : > { %v17752_v48 = vrot.slane %v17745_v63, 1  ;;  %v17766_v54 = vrot.slane %v17745_v63, 2 }
0x1508   : > { %v17755_v59 = vrot.slane %v17746_v34, 1  ;;  %v17769_v22 = vrot.slane %v17746_v34, 2 }
0x1509   : > { %v17753_v4 = vsel %vm1349_vm1, %v17751_v3, %v17752_v48  ;;  %v17763_v56 = vmax.f32 %v17745_v63, %v17752_v48  ;;  %v17767_v35 = vsel %vm1462_vm2, %v17765_v25, %v17766_v54 }
0x150a   : > { %v17761_v7 = vmax.f32 %v17743_v60, %v17753_v4  ;;  %v17756_v0 = vsel %vm1349_vm1, %v17754_v2, %v17755_v59  ;;  %v17764_v36 = vmax.f32 %v17746_v34, %v17755_v59  ;;  %v17770_v62 = vsel %vm1462_vm2, %v17768_v14, %v17769_v22 }
0x150b   : > { %v17762_v58 = vmax.f32 %v17744_v26, %v17756_v0  ;;  %v17777_v5 = vmax.f32 %v17763_v56, %v17766_v54  ;;  %vm17815_vm1 = vcmp.lt.s32.totalorder %v7429_v44, 256 }
0x150c   : > { %v17775_v49 = vmax.f32 %v17761_v7, %v17767_v35  ;;  %v17778_v33 = vmax.f32 %v17764_v36, %v17769_v22 }
0x150d   : > { %v17776_v1 = vmax.f32 %v17762_v58, %v17770_v62  ;;  %v17789_v50 = vrot.slane %v17777_v5, 2 }
0x150e   : > { %v17781_v37 = vrot.slane %v17775_v49, 5  ;;  %v17790_v42 = vrot.slane %v17778_v33, 2 }
0x150f   : > { %v17782_v30 = vrot.slane %v17776_v1, 5 }
0x1510   : > { %v17785_v15 = vmax.f32 %v17775_v49, %v17781_v37 }
0x1511   : > { %v17786_v31 = vmax.f32 %v17776_v1, %v17782_v30 }
0x1512   : > { %v17793_v6 = vmax.f32 %v17785_v15, %v17789_v50 }
0x1513   : > { %v17794_v18 = vmax.f32 %v17786_v31, %v17790_v42 }
0x1515   : > { %v17797_v52 = vcombine.low %v17793_v6, %v17794_v18 }
0x1517   : > { %v17804_v39 = vrot.slane %v17797_v52, %v17803_v57 }
0x1519   : > { %v17811_v16 = vrot.slane %v17804_v39, %v17803_v57 }
0x151b   : > { %17817 = vst.msk [vmem:[%s494_s25] sm:$0x3] %vm17815_vm1, %v17811_v16 }
0x151c PF: > { %s27_s18 = sadd.s32 1, %s24516_s18  }
0x151d   : > { %p24_p4 = scmp.ge.s32.totalorder %s27_s18, 4  }
0x151f   :  { %26 = sbr.rel (!%p24_p4) target bundleno = 1 (0x1), region = 158 }

</bundles_post_ra>
